<compile_context>
chip_gen: v7x
topology: tpu7x:2x2x1
jax: 0.10.0
libtpu: 0.0.40
codegen_flags: <defaults>
</compile_context>

<pallas_src>
import jax
import jax.numpy as jnp
from jax.experimental import pallas as pl
from jax.experimental.pallas import tpu as pltpu

_MIB = 1024 * 1024
_TINY_BYTES = 256 * 1024  # below this, plain XLA dot beats the pallas round-trip


def _round_up(x: int, m: int) -> int:
    return (x + m - 1) // m * m


def _physical_vmem_bytes() -> int:
    try:
        info = pltpu.get_tpu_info()
        v = getattr(info, "vmem_capacity_bytes", None)
        if v:
            return int(v)
    except Exception:
        pass
    return 64 * _MIB  # conservative (v7x per-TensorCore)


def _pad_cast(a: jax.Array, shape, dtype) -> jax.Array:
    """Cast to compute dtype, then zero-pad to `shape` (single pad per operand)."""
    if a.dtype != dtype:
        a = a.astype(dtype)
    pads = tuple((0, t - s) for s, t in zip(a.shape, shape))
    if any(p[1] for p in pads):
        a = jnp.pad(a, pads)
    return a


# ---------------------------------------------------------------------------
# Kernels
# ---------------------------------------------------------------------------
def _fc_full_kernel(x_ref, w_ref, o_ref):
    """Whole-contraction block: one MXU matmul, output written once."""
    o_ref[...] = jnp.dot(
        x_ref[...], w_ref[...], preferred_element_type=jnp.float32
    ).astype(o_ref.dtype)


def _fc_kacc_out_kernel(x_ref, w_ref, o_ref):
    """k-reduction, f32 output: accumulate directly into the resident output block."""
    @pl.when(pl.program_id(2) == 0)
    def _():
        o_ref[...] = jnp.zeros_like(o_ref)

    o_ref[...] += jnp.dot(x_ref[...], w_ref[...], preferred_element_type=jnp.float32)


def _fc_kacc_scratch_kernel(x_ref, w_ref, o_ref, acc_ref):
    """k-reduction, non-f32 output: f32 scratch accumulator + final cast."""
    @pl.when(pl.program_id(2) == 0)
    def _():
        acc_ref[...] = jnp.zeros_like(acc_ref)

    acc_ref[...] += jnp.dot(x_ref[...], w_ref[...], preferred_element_type=jnp.float32)

    @pl.when(pl.program_id(2) == pl.num_programs(2) - 1)
    def _():
        o_ref[...] = acc_ref[...].astype(o_ref.dtype)


# ---------------------------------------------------------------------------
# Wrapper
# ---------------------------------------------------------------------------
def classify_topic_fc(contextV: jax.Array, w: jax.Array, *,
                      compute_dtype=jnp.bfloat16,
                      tm: int | None = None,
                      tn: int | None = None,
                      tk: int | None = None) -> jax.Array:
    """log_probs = contextV @ w via a Pallas TPU kernel (f32 accumulation)."""
    B, D = contextV.shape
    D2, T = w.shape
    assert D == D2, f"dim mismatch: {D} vs {D2}"
    out_dtype = contextV.dtype

    # Tiny problems: the pad + kernel-launch + slice overhead dominates.
    total_bytes = (contextV.size * contextV.dtype.itemsize
                   + w.size * w.dtype.itemsize
                   + B * T * jnp.dtype(out_dtype).itemsize)
    if total_bytes <= _TINY_BYTES:
        return jnp.dot(contextV, w)  # exact (matches torch.mm semantics)

    compute_dtype = jnp.dtype(compute_dtype)
    in_bytes = compute_dtype.itemsize
    out_bytes = max(jnp.dtype(out_dtype).itemsize, 4)
    sub_align = 16 if in_bytes < 4 else 8

    # Generation-aware VMEM budget.
    phys = _physical_vmem_bytes()
    vmem_limit = max(32 * _MIB, min(phys - 16 * _MIB, 100 * _MIB))
    tile_budget = (vmem_limit * 3) // 4  # headroom for compiler internal scratch

    # Minimal TPU-friendly padding (lanes x128, sublanes x8/x16 for bf16 pack).
    Bp0 = _round_up(B, sub_align)
    Dp0 = _round_up(D, 128)
    Tp0 = _round_up(T, 128)

    resident = Bp0 * Dp0 * in_bytes + Dp0 * Tp0 * in_bytes + Bp0 * Tp0 * out_bytes

    # -------------------------------------------------------------------
    # Small path: whole problem VMEM-resident, no grid, single MXU matmul.
    # -------------------------------------------------------------------
    if resident <= vmem_limit // 2:
        Bp, Dp, Tp = Bp0, Dp0, Tp0
        x = _pad_cast(contextV, (Bp, Dp), compute_dtype)
        wp = _pad_cast(w, (Dp, Tp), compute_dtype)
        cost = pl.CostEstimate(
            flops=2 * Bp * Dp * Tp,
            transcendentals=0,
            bytes_accessed=Bp * Dp * in_bytes + Dp * Tp * in_bytes + Bp * Tp * out_bytes,
        )
        out_p = pl.pallas_call(
            _fc_full_kernel,
            out_shape=jax.ShapeDtypeStruct((Bp, Tp), out_dtype),
            in_specs=[
                pl.BlockSpec(memory_space=pltpu.MemorySpace.VMEM),
                pl.BlockSpec(memory_space=pltpu.MemorySpace.VMEM),
            ],
            out_specs=pl.BlockSpec(memory_space=pltpu.MemorySpace.VMEM),
            compiler_params=pltpu.CompilerParams(vmem_limit_bytes=vmem_limit),
            cost_estimate=cost,
        )(x, wp)
        if (Bp, Tp) != (B, T):
            out_p = out_p[:B, :T]
        return out_p

    # -------------------------------------------------------------------
    # Tiled path.
    # -------------------------------------------------------------------
    # Defaults: i-grid = 1 (w streamed from HBM exactly once) and k collapsed.
    tm_ = tm if tm is not None else (Bp0 if Bp0 <= 1024 else 512)
    tn_ = tn if tn is not None else min(512, Tp0)
    tk_ = tk if tk is not None else Dp0

    def _fp(m, n, k):
        # double-buffered input tiles + double-buffered output tile
        return 2 * (m * k + k * n) * in_bytes + 2 * m * n * out_bytes

    if tm is None and tn is None and tk is None:
        # Shrink order: tn (w still streamed once), then tk (reintroduces the
        # cheap VMEM k-reduction), then tm (re-streams w) as a last resort.
        while _fp(tm_, tn_, tk_) > tile_budget and tn_ > 256:
            tn_ = max(256, _round_up(tn_ // 2, 128))
        while _fp(tm_, tn_, tk_) > tile_budget and tk_ > 1024:
            tk_ = max(1024, _round_up(tk_ // 2, 128))
        while _fp(tm_, tn_, tk_) > tile_budget and tm_ > 256:
            tm_ = max(256, _round_up(tm_ // 2, sub_align))
        while _fp(tm_, tn_, tk_) > tile_budget and tk_ > 128:
            tk_ = max(128, _round_up(tk_ // 2, 128))
        while _fp(tm_, tn_, tk_) > tile_budget and tn_ > 128:
            tn_ = 128
        while _fp(tm_, tn_, tk_) > tile_budget and tm_ > sub_align:
            tm_ = max(sub_align, _round_up(tm_ // 2, sub_align))

        # Keep >=2 parallel blocks for megacore / v7x dual-TC sharding.
        if pl.cdiv(Bp0, tm_) * pl.cdiv(Tp0, tn_) == 1 and Tp0 >= 256:
            tn_ = max(128, _round_up(pl.cdiv(Tp0, 2), 128))

    # Final tile-multiple dims -> single padding stage per operand.
    Bp = _round_up(Bp0, tm_)
    Dp = _round_up(Dp0, tk_)
    Tp = _round_up(Tp0, tn_)
    x = _pad_cast(contextV, (Bp, Dp), compute_dtype)
    wp = _pad_cast(w, (Dp, Tp), compute_dtype)

    cost = pl.CostEstimate(
        flops=2 * Bp * Dp * Tp,
        transcendentals=0,
        bytes_accessed=((Bp // tm_) * Dp * Tp * in_bytes   # w streamed per i block
                        + Bp * Dp * in_bytes
                        + Bp * Tp * out_bytes),
    )

    k_steps = Dp // tk_
    if k_steps == 1:
        # k collapsed: no accumulator, output written exactly once.
        grid = (Bp // tm_, Tp // tn_)
        out_p = pl.pallas_call(
            _fc_full_kernel,
            out_shape=jax.ShapeDtypeStruct((Bp, Tp), out_dtype),
            grid_spec=pltpu.PrefetchScalarGridSpec(
                num_scalar_prefetch=0,
                grid=grid,
                in_specs=[
                    pl.BlockSpec((tm_, Dp), lambda i, j: (i, 0)),
                    pl.BlockSpec((Dp, tn_), lambda i, j: (0, j)),
                ],
                out_specs=pl.BlockSpec((tm_, tn_), lambda i, j: (i, j)),
            ),
            compiler_params=pltpu.CompilerParams(
                dimension_semantics=("parallel", "parallel"),
                vmem_limit_bytes=vmem_limit,
            ),
            cost_estimate=cost,
        )(x, wp)
    else:
        if out_dtype == jnp.float32:
            kernel = _fc_kacc_out_kernel
            scratch = []
        else:
            kernel = _fc_kacc_scratch_kernel
            scratch = [pltpu.VMEM((tm_, tn_), jnp.float32)]
        grid = (Bp // tm_, Tp // tn_, k_steps)
        out_p = pl.pallas_call(
            kernel,
            out_shape=jax.ShapeDtypeStruct((Bp, Tp), out_dtype),
            grid_spec=pltpu.PrefetchScalarGridSpec(
                num_scalar_prefetch=0,
                grid=grid,
                in_specs=[
                    pl.BlockSpec((tm_, tk_), lambda i, j, k: (i, k)),
                    pl.BlockSpec((tk_, tn_), lambda i, j, k: (k, j)),
                ],
                out_specs=pl.BlockSpec((tm_, tn_), lambda i, j, k: (i, j)),
                scratch_shapes=scratch,
            ),
            compiler_params=pltpu.CompilerParams(
                dimension_semantics=("parallel", "parallel", "arbitrary"),
                vmem_limit_bytes=vmem_limit,
            ),
            cost_estimate=cost,
        )(x, wp)

    if (Bp, Tp) != (B, T):
        out_p = out_p[:B, :T]
    return out_p


def make_weight(dim_emb: int, num_topic: int, key) -> jax.Array:
    """Deterministic analogue of torch.randn(...).fill_diagonal_(1)."""
    w = jax.random.normal(key, (dim_emb, num_topic), dtype=jnp.float32)
    n = min(dim_emb, num_topic)
    idx = jnp.arange(n)
    return w.at[idx, idx].set(1.0)


if __name__ == "__main__":
    key = jax.random.PRNGKey(0)
    k_x, k_w, k_x2, k_w2, k_x3, k_w3 = jax.random.split(key, 6)

    # 1) The module's natural small shapes -> exact tiny fast path.
    batch, dim_emb, num_topic = 8, 32, 16
    contextV = jax.random.normal(k_x, (batch, dim_emb), dtype=jnp.float32)
    w = make_weight(dim_emb, num_topic, k_w)
    log_probs = classify_topic_fc(contextV, w)
    jax.block_until_ready(log_probs)
    assert log_probs.shape == (batch, num_topic)
    assert jnp.allclose(log_probs, contextV @ w, atol=1e-5, rtol=1e-5)

    # 2) Moderate shapes -> single-block Pallas path (no grid, bf16 compute).
    B2, D2, T2 = 256, 1024, 2048
    x2 = jax.random.normal(k_x2, (B2, D2), dtype=jnp.float32)
    w2 = make_weight(D2, T2, k_w2)
    out2 = classify_topic_fc(x2, w2)
    jax.block_until_ready(out2)
    ref2 = jnp.dot(x2.astype(jnp.bfloat16), w2.astype(jnp.bfloat16),
                   preferred_element_type=jnp.float32)
    assert out2.shape == (B2, T2)
    assert jnp.allclose(out2, ref2, atol=5e-2, rtol=1e-2)
    assert jnp.allclose(out2, x2 @ w2, atol=2.0, rtol=5e-2)  # bf16-vs-f32 sanity

    # 3) Larger shapes -> tiled Pallas path (grid over topics, k collapsed).
    B3, D3, T3 = 512, 4096, 8192
    x3 = jax.random.normal(k_x3, (B3, D3), dtype=jnp.float32)
    w3 = make_weight(D3, T3, k_w3)
    out3 = classify_topic_fc(x3, w3)
    jax.block_until_ready(out3)
    ref3 = jnp.dot(x3.astype(jnp.bfloat16), w3.astype(jnp.bfloat16),
                   preferred_element_type=jnp.float32)
    assert out3.shape == (B3, T3)
    assert jnp.allclose(out3, ref3, atol=5e-2, rtol=1e-2)

    print("KERNEL_OK")
</pallas_src>

<mosaic_0001>
module attributes {stable_mosaic.version = 11 : i64} {
  func.func @_fc_full_kernel(%arg0: memref<256x1024xbf16, #tpu.memory_space<vmem>>, %arg1: memref<1024x2048xbf16, #tpu.memory_space<vmem>>, %arg2: memref<256x2048xf32, #tpu.memory_space<vmem>>) attributes {dimension_semantics = [], scalar_prefetch = 0 : i64, scratch_operands = 0 : i64, tpu.core_type = #tpu.core_type<tc>} {
    %c0 = arith.constant 0 : index
    %c0_0 = arith.constant 0 : index
    %0 = vector.load %arg0[%c0, %c0_0] : memref<256x1024xbf16, #tpu.memory_space<vmem>>, vector<256x1024xbf16>
    %c0_1 = arith.constant 0 : index
    %c0_2 = arith.constant 0 : index
    %1 = vector.load %arg1[%c0_1, %c0_2] : memref<1024x2048xbf16, #tpu.memory_space<vmem>>, vector<1024x2048xbf16>
    %cst = arith.constant dense<0.000000e+00> : vector<256x2048xf32>
    %2 = tpu.matmul %0, %1, %cst {dimension_numbers = #tpu.dot_dimension_numbers<[1], [0], [0], [1], [0, 0, 1, 1], [], []>} : vector<256x1024xbf16>, vector<1024x2048xbf16>, vector<256x2048xf32> -> vector<256x2048xf32>
    %c0_3 = arith.constant 0 : index
    %c0_4 = arith.constant 0 : index
    %3 = vector.load %arg2[%c0_3, %c0_4] : memref<256x2048xf32, #tpu.memory_space<vmem>>, vector<256x2048xf32>
    tpu.vector_store %arg2[%c0_3, %c0_4], %2 {strides = array<i32>} : memref<256x2048xf32, #tpu.memory_space<vmem>>, vector<256x2048xf32>,
    return
  }
}

</mosaic_0001>

<bundles_post_ra>
// kernel: tpu_custom_call.1
= control target key start
LH: loop header
LB: loop body
LE: loop exit
PB: predicated region body
PF: predicated region fallthrough
CT: control target
= control target key end

     0   :  { %7 = vsyncpa [#allocation3], 0  ;;  %s18083_s0 = inlined_call_operand.hbm [shape: bf16[256,1024], index: 0, kind: input, shape index: {}]   ;;  %s18084_s1 = inlined_call_operand.hbm [shape: bf16[1024,2048], index: 1, kind: input, shape index: {}]   ;;  %s18085_s2 = inlined_call_operand.hbm [shape: f32[256,2048], index: 2, kind: output, shape index: {}]  }
   0x1   :  { %8 = vsyncpa [#allocation6], 0 }
   0x2   :  { %9 = vsyncpa [#allocation4], 0  ;;  %s16427_s9 = smov [#allocation2]   ;;  %s16355_s13 = scalar_lea.hbm %s18083_s0, 16384 }
   0x3   :  { %s15_s10 = sshll.u32 %s16427_s9, 4  ;;  %p16356_p0 = scmp.ne.s32.totalorder %s18083_s0, %s16355_s13  ;;  %s16_s10 = int_to_ptr.vmem [resolvable:$true] %s15_s10 }
   0x4   :  { %p16359_p1 = scmp.lt.u32.totalorder %s16355_s13, %s18083_s0 }
   0x6   :  { %p16361_p2 = pnand %p16359_p1, %p16356_p0 }
   0x8   :  { %16364 = shalt.err (!%p16361_p2)
}
   0x9   :  { %s16365_s18 = scalar_lea.vmem %s16_s10, 16384  ;;  %p16370_p4 = scmp.lt.s32.totalorder %s16_s10, %s16_s10 }
   0xa   :  { %p16366_p3 = scmp.ne.s32.totalorder %s16_s10, %s16365_s18  ;;  %p16371_p5 = scmp.lt.s32.totalorder %s16365_s18, %s16365_s18 }
   0xc   :  { %p16372_p6 = por %p16371_p5, %p16370_p4 }
   0xe   :  { %p16373_p7 = pnand %p16372_p6, %p16366_p3 }
  0x10   :  { %16376 = shalt.err (!%p16373_p7)
}
  0x11   :  { %s16428_s19 = smov 512   ;;  %s16429_s20 = smov 32  }
  0x12   :  { %21 = dma.hbm_to_vmem [thread:$0]  %s18083_s0, 16384, %s16_s10, [#allocation3], %s16428_s19, %s16428_s19, %s16429_s20  }
  0x13   :  { %s16430_s23 = smov [#allocation5]   ;;  %s16377_s27 = scalar_lea.hbm %s18084_s1, 131072 }
  0x14   :  { %s27_s24 = sshll.u32 %s16430_s23, 4  ;;  %p16378_p8 = scmp.ne.s32.totalorder %s18084_s1, %s16377_s27  ;;  %s28_s24 = int_to_ptr.vmem [resolvable:$true] %s27_s24 }
  0x15   :  { %p16381_p9 = scmp.lt.u32.totalorder %s16377_s27, %s18084_s1 }
  0x17   :  { %p16383_p10 = pnand %p16381_p9, %p16378_p8 }
  0x19   :  { %16386 = shalt.err (!%p16383_p10)
}
  0x1a   :  { %s16387_s4 = scalar_lea.vmem %s28_s24, 131072  ;;  %p16392_p12 = scmp.lt.s32.totalorder %s28_s24, %s28_s24 }
  0x1b   :  { %p16388_p11 = scmp.ne.s32.totalorder %s28_s24, %s16387_s4  ;;  %p16393_p13 = scmp.lt.s32.totalorder %s16387_s4, %s16387_s4 }
  0x1d   :  { %p16394_p0 = por %p16393_p13, %p16392_p12 }
  0x1f   :  { %p16395_p1 = pnand %p16394_p0, %p16388_p11 }
  0x21   :  { %16398 = shalt.err (!%p16395_p1)
}
  0x22   :  { %s16431_s0 = smov 1024   ;;  %s16432_s5 = smov 64  }
  0x23   :  { %33 = dma.hbm_to_vmem [thread:$0]  %s18084_s1, 131072, %s28_s24, [#allocation6], %s16431_s0, %s16431_s0, %s16432_s5  }
  0x24   :  { %16421 = dma.done.wait [#allocation3], 16384  }
  0x25   :  { %16422 = vsyncadd [#allocation3], 4294950912 }
  0x26   :  { %16423 = dma.done.wait [#allocation6], 131072  }
  0x27   :  { %16424 = vsyncadd [#allocation6], 4294836224  ;;  %v168_v0 = vld [vmem:[#allocation5] sm:$0xff]  ;;  %v169_v2 = vld [vmem:[#allocation5 + $0x8] sm:$0xff]  ;;  %s16433_s1 = smov [#allocation7]  }
  0x28   :  { %v176_v1 = vld [vmem:[#allocation5 + $0x40] sm:$0xff]  ;;  %v177_v4 = vld [vmem:[#allocation5 + $0x48] sm:$0xff]  ;;  %s13645_s8 = sshll.u32 %s16433_s1, 4  ;;  %s13646_s8 = int_to_ptr.vmem [resolvable:$true] %s13645_s8 }
  0x29   :  { %v13787_v3 = vcombine.high %v168_v0, %v176_v1  ;;  %v13786_v5 = vcombine.low %v168_v0, %v176_v1  ;;  %v184_v6 = vld [vmem:[#allocation5 + $0x80] sm:$0xff]  ;;  %v13789_v8 = vcombine.high %v169_v2, %v177_v4  ;;  %v13788_v9 = vcombine.low %v169_v2, %v177_v4  ;;  %v185_v11 = vld [vmem:[#allocation5 + $0x88] sm:$0xff]  ;;  %s16399_s9 = scalar_lea.vmem %s13646_s8, 65536  ;;  %p16404_p3 = scmp.lt.s32.totalorder %s13646_s8, %s13646_s8 }
  0x2a   :  { %v192_v7 = vld [vmem:[#allocation5 + $0xc0] sm:$0xff]  ;;  %v193_v12 = vld [vmem:[#allocation5 + $0xc8] sm:$0xff]  ;;  %p16400_p2 = scmp.ne.s32.totalorder %s13646_s8, %s16399_s9  ;;  %p16405_p4 = scmp.lt.s32.totalorder %s16399_s9, %s16399_s9 }
  0x2b   :  { %v13803_v10 = vcombine.high %v184_v6, %v192_v7  ;;  %v200_v13 = vld [vmem:[#allocation5 + $0x100] sm:$0xff]  ;;  %6952 = vmatprep.subr.bf16.mxu0 %v13787_v3  ;;  %v13805_v14 = vcombine.high %v185_v11, %v193_v12  ;;  %v201_v16 = vld [vmem:[#allocation5 + $0x108] sm:$0xff]  ;;  %7724 = vmatprep.subr.bf16.mxu1 %v13789_v8  ;;  %v13802_v18 = vcombine.low %v184_v6, %v192_v7 }
  0x2c   :  { %v208_v15 = vld [vmem:[#allocation5 + $0x140] sm:$0xff]  ;;  %v209_v17 = vld [vmem:[#allocation5 + $0x148] sm:$0xff]  ;;  %6953 = vmatpush1.bf16.msra.mxu0 %v13786_v5  ;;  %7725 = vmatpush1.bf16.msra.mxu1 %v13788_v9  ;;  %v13804_v19 = vcombine.low %v185_v11, %v193_v12  ;;  %p16406_p5 = por %p16405_p4, %p16404_p3 }
  0x2d   :  { %6954 = vmatprep.subr.bf16.mxu0 %v13803_v10  ;;  %v13819_v20 = vcombine.high %v200_v13, %v208_v15  ;;  %7726 = vmatprep.subr.bf16.mxu1 %v13805_v14  ;;  %v13821_v21 = vcombine.high %v201_v16, %v209_v17  ;;  %v216_v22 = vld [vmem:[#allocation5 + $0x180] sm:$0xff]  ;;  %v217_v24 = vld [vmem:[#allocation5 + $0x188] sm:$0xff]  ;;  %v13818_v26 = vcombine.low %v200_v13, %v208_v15 }
  0x2e   :  { %v224_v23 = vld [vmem:[#allocation5 + $0x1c0] sm:$0xff]  ;;  %v225_v25 = vld [vmem:[#allocation5 + $0x1c8] sm:$0xff]  ;;  %v13820_v27 = vcombine.low %v201_v16, %v209_v17  ;;  %p16407_p6 = pnand %p16406_p5, %p16400_p2 }
  0x2f   :  { %v13835_v28 = vcombine.high %v216_v22, %v224_v23  ;;  %v13837_v29 = vcombine.high %v217_v24, %v225_v25  ;;  %v232_v30 = vld [vmem:[#allocation5 + $0x200] sm:$0xff]  ;;  %v233_v32 = vld [vmem:[#allocation5 + $0x208] sm:$0xff]  ;;  %v13834_v34 = vcombine.low %v216_v22, %v224_v23  ;;  %v13836_v35 = vcombine.low %v217_v24, %v225_v25 }
  0x30   :  { %6955 = vmatpush1.bf16.msra.mxu0 %v13802_v18  ;;  %7727 = vmatpush1.bf16.msra.mxu1 %v13804_v19  ;;  %v240_v31 = vld [vmem:[#allocation5 + $0x240] sm:$0xff]  ;;  %v241_v33 = vld [vmem:[#allocation5 + $0x248] sm:$0xff] }
  0x31   :  { %6956 = vmatprep.subr.bf16.mxu0 %v13819_v20  ;;  %7728 = vmatprep.subr.bf16.mxu1 %v13821_v21  ;;  %v13851_v36 = vcombine.high %v232_v30, %v240_v31  ;;  %v13853_v37 = vcombine.high %v233_v32, %v241_v33  ;;  %v248_v38 = vld [vmem:[#allocation5 + $0x280] sm:$0xff]  ;;  %v249_v40 = vld [vmem:[#allocation5 + $0x288] sm:$0xff]  ;;  %v13850_v42 = vcombine.low %v232_v30, %v240_v31 }
  0x32   :  { %v256_v39 = vld [vmem:[#allocation5 + $0x2c0] sm:$0xff]  ;;  %v257_v41 = vld [vmem:[#allocation5 + $0x2c8] sm:$0xff]  ;;  %v13852_v43 = vcombine.low %v233_v32, %v241_v33 }
  0x33   :  { %v13867_v44 = vcombine.high %v248_v38, %v256_v39  ;;  %v13869_v45 = vcombine.high %v249_v40, %v257_v41  ;;  %v264_v46 = vld [vmem:[#allocation5 + $0x300] sm:$0xff]  ;;  %v265_v48 = vld [vmem:[#allocation5 + $0x308] sm:$0xff]  ;;  %v13866_v50 = vcombine.low %v248_v38, %v256_v39  ;;  %v13868_v51 = vcombine.low %v249_v40, %v257_v41 }
  0x34   :  { %6957 = vmatpush1.bf16.msra.mxu0 %v13818_v26  ;;  %7729 = vmatpush1.bf16.msra.mxu1 %v13820_v27  ;;  %v272_v47 = vld [vmem:[#allocation5 + $0x340] sm:$0xff]  ;;  %v273_v49 = vld [vmem:[#allocation5 + $0x348] sm:$0xff] }
  0x35   :  { %6958 = vmatprep.subr.bf16.mxu0 %v13835_v28  ;;  %7730 = vmatprep.subr.bf16.mxu1 %v13837_v29  ;;  %v13883_v52 = vcombine.high %v264_v46, %v272_v47  ;;  %v16475_v53 = vld [vmem:[#allocation2] sm:$0xff]  ;;  %v13885_v55 = vcombine.high %v265_v48, %v273_v49  ;;  %v281_v59 = vld [vmem:[#allocation5 + $0x388] sm:$0xff]  ;;  %v13882_v61 = vcombine.low %v264_v46, %v272_v47 }
  0x36   :  { %v16477_v54 = vld [vmem:[#allocation2 + $0x20] sm:$0xff]  ;;  %v289_v60 = vld [vmem:[#allocation5 + $0x3c8] sm:$0xff]  ;;  %v13884_v62 = vcombine.low %v265_v48, %v273_v49 }
  0x37   :  { %v280_v56 = vld [vmem:[#allocation5 + $0x380] sm:$0xff]  ;;  %v16481_v58 = vcombine.high %v16475_v53, %v16477_v54  ;;  %v13901_v0 = vcombine.high %v281_v59, %v289_v60  ;;  %v297_v3 = vld [vmem:[#allocation5 + $0x408] sm:$0xff]  ;;  %v13900_v6 = vcombine.low %v281_v59, %v289_v60 }
  0x38   :  { %6959 = vmatpush1.bf16.msra.mxu0 %v13834_v34  ;;  %7731 = vmatpush1.bf16.msra.mxu1 %v13836_v35  ;;  %v288_v57 = vld [vmem:[#allocation5 + $0x3c0] sm:$0xff]  ;;  %v305_v4 = vld [vmem:[#allocation5 + $0x448] sm:$0xff] }
  0x39   :  { %6960 = vmatprep.subr.bf16.mxu0 %v13851_v36  ;;  %7732 = vmatprep.subr.bf16.mxu1 %v13853_v37  ;;  %18450 = vst [vmem:[#allocation11_spill] sm:$0xff] %v16481_v58  ;;  %v13899_v63 = vcombine.high %v280_v56, %v288_v57  ;;  %v296_v1 = vld [vmem:[#allocation5 + $0x400] sm:$0xff]  ;;  %v13898_v5 = vcombine.low %v280_v56, %v288_v57  ;;  %v313_v11 = vld [vmem:[#allocation5 + $0x488] sm:$0xff] }
  0x3a   :  { %6984 = vmatprep.mubr.bf16.mxu0 %v16481_v58  ;;  %v304_v2 = vld [vmem:[#allocation5 + $0x440] sm:$0xff]  ;;  %7756 = vmatprep.mubr.bf16.mxu1 %v16481_v58  ;;  %v13917_v8 = vcombine.high %v297_v3, %v305_v4  ;;  %v321_v12 = vld [vmem:[#allocation5 + $0x4c8] sm:$0xff]  ;;  %v13916_v14 = vcombine.low %v297_v3, %v305_v4 }
  0x3b   :  { %v13915_v7 = vcombine.high %v296_v1, %v304_v2  ;;  %v312_v9 = vld [vmem:[#allocation5 + $0x480] sm:$0xff]  ;;  %v13914_v13 = vcombine.low %v296_v1, %v304_v2  ;;  %v13933_v16 = vcombine.high %v313_v11, %v321_v12  ;;  %v329_v19 = vld [vmem:[#allocation5 + $0x508] sm:$0xff]  ;;  %v13932_v22 = vcombine.low %v313_v11, %v321_v12 }
  0x3c   :  { %6961 = vmatpush1.bf16.msra.mxu0 %v13850_v42  ;;  %7733 = vmatpush1.bf16.msra.mxu1 %v13852_v43  ;;  %v320_v10 = vld [vmem:[#allocation5 + $0x4c0] sm:$0xff]  ;;  %v337_v20 = vld [vmem:[#allocation5 + $0x548] sm:$0xff] }
  0x3d   :  { %6962 = vmatprep.subr.bf16.mxu0 %v13867_v44  ;;  %7734 = vmatprep.subr.bf16.mxu1 %v13869_v45  ;;  %v13931_v15 = vcombine.high %v312_v9, %v320_v10  ;;  %v328_v17 = vld [vmem:[#allocation5 + $0x500] sm:$0xff]  ;;  %v13930_v21 = vcombine.low %v312_v9, %v320_v10  ;;  %v13949_v24 = vcombine.high %v329_v19, %v337_v20  ;;  %v345_v27 = vld [vmem:[#allocation5 + $0x588] sm:$0xff] }
  0x3e   :  { %v336_v18 = vld [vmem:[#allocation5 + $0x540] sm:$0xff]  ;;  %v353_v28 = vld [vmem:[#allocation5 + $0x5c8] sm:$0xff]  ;;  %v13948_v30 = vcombine.low %v329_v19, %v337_v20 }
  0x3f   :  { %v13947_v23 = vcombine.high %v328_v17, %v336_v18  ;;  %v344_v25 = vld [vmem:[#allocation5 + $0x580] sm:$0xff]  ;;  %v13946_v29 = vcombine.low %v328_v17, %v336_v18  ;;  %v13965_v32 = vcombine.high %v345_v27, %v353_v28  ;;  %v361_v35 = vld [vmem:[#allocation5 + $0x608] sm:$0xff]  ;;  %v13964_v38 = vcombine.low %v345_v27, %v353_v28 }
  0x40   :  { %6963 = vmatpush1.bf16.msra.mxu0 %v13866_v50  ;;  %7735 = vmatpush1.bf16.msra.mxu1 %v13868_v51  ;;  %v352_v26 = vld [vmem:[#allocation5 + $0x5c0] sm:$0xff]  ;;  %v369_v36 = vld [vmem:[#allocation5 + $0x648] sm:$0xff] }
  0x41   :  { %6964 = vmatprep.subr.bf16.mxu0 %v13883_v52  ;;  %7736 = vmatprep.subr.bf16.mxu1 %v13885_v55  ;;  %v13963_v31 = vcombine.high %v344_v25, %v352_v26  ;;  %v360_v33 = vld [vmem:[#allocation5 + $0x600] sm:$0xff]  ;;  %v13962_v37 = vcombine.low %v344_v25, %v352_v26  ;;  %v13981_v40 = vcombine.high %v361_v35, %v369_v36  ;;  %v377_v43 = vld [vmem:[#allocation5 + $0x688] sm:$0xff] }
  0x42   :  { %v368_v34 = vld [vmem:[#allocation5 + $0x640] sm:$0xff]  ;;  %v385_v44 = vld [vmem:[#allocation5 + $0x6c8] sm:$0xff]  ;;  %v13980_v46 = vcombine.low %v361_v35, %v369_v36 }
  0x43   :  { %v13979_v39 = vcombine.high %v360_v33, %v368_v34  ;;  %v376_v41 = vld [vmem:[#allocation5 + $0x680] sm:$0xff]  ;;  %v13978_v45 = vcombine.low %v360_v33, %v368_v34  ;;  %v13997_v48 = vcombine.high %v377_v43, %v385_v44  ;;  %v393_v51 = vld [vmem:[#allocation5 + $0x708] sm:$0xff]  ;;  %v13996_v56 = vcombine.low %v377_v43, %v385_v44 }
  0x44   :  { %6965 = vmatpush1.bf16.msra.mxu0 %v13882_v61  ;;  %7737 = vmatpush1.bf16.msra.mxu1 %v13884_v62  ;;  %v384_v42 = vld [vmem:[#allocation5 + $0x6c0] sm:$0xff]  ;;  %v401_v52 = vld [vmem:[#allocation5 + $0x748] sm:$0xff] }
  0x45   :  { %6966 = vmatprep.subr.bf16.mxu0 %v13899_v63  ;;  %7738 = vmatprep.subr.bf16.mxu1 %v13901_v0  ;;  %v13995_v47 = vcombine.high %v376_v41, %v384_v42  ;;  %v392_v49 = vld [vmem:[#allocation5 + $0x700] sm:$0xff]  ;;  %v13994_v55 = vcombine.low %v376_v41, %v384_v42  ;;  %v14013_v59 = vcombine.high %v393_v51, %v401_v52  ;;  %v409_v62 = vld [vmem:[#allocation5 + $0x788] sm:$0xff] }
  0x46   :  { %v400_v50 = vld [vmem:[#allocation5 + $0x740] sm:$0xff]  ;;  %v417_v63 = vld [vmem:[#allocation5 + $0x7c8] sm:$0xff]  ;;  %v14012_v1 = vcombine.low %v393_v51, %v401_v52 }
  0x47   :  { %v14011_v57 = vcombine.high %v392_v49, %v400_v50  ;;  %v408_v60 = vld [vmem:[#allocation5 + $0x780] sm:$0xff]  ;;  %v14010_v0 = vcombine.low %v392_v49, %v400_v50  ;;  %v14029_v3 = vcombine.high %v409_v62, %v417_v63  ;;  %v14028_v9 = vcombine.low %v409_v62, %v417_v63  ;;  %v441_v18 = vld [vmem:[#allocation5 + $0x888] sm:$0xff] }
  0x48   :  { %6967 = vmatpush1.bf16.msra.mxu0 %v13898_v5  ;;  %7739 = vmatpush1.bf16.msra.mxu1 %v13900_v6  ;;  %v416_v61 = vld [vmem:[#allocation5 + $0x7c0] sm:$0xff]  ;;  %v425_v6 = vld [vmem:[#allocation5 + $0x808] sm:$0xff] }
  0x49   :  { %6968 = vmatprep.subr.bf16.mxu0 %v13915_v7  ;;  %7740 = vmatprep.subr.bf16.mxu1 %v13917_v8  ;;  %v14027_v2 = vcombine.high %v408_v60, %v416_v61  ;;  %v424_v4 = vld [vmem:[#allocation5 + $0x800] sm:$0xff]  ;;  %v433_v7 = vld [vmem:[#allocation5 + $0x848] sm:$0xff]  ;;  %v14026_v8 = vcombine.low %v408_v60, %v416_v61 }
  0x4a   :  { %v432_v5 = vld [vmem:[#allocation5 + $0x840] sm:$0xff]  ;;  %v14045_v11 = vcombine.high %v425_v6, %v433_v7  ;;  %v449_v19 = vld [vmem:[#allocation5 + $0x8c8] sm:$0xff]  ;;  %v14044_v20 = vcombine.low %v425_v6, %v433_v7 }
  0x4b   :  { %v14043_v10 = vcombine.high %v424_v4, %v432_v5  ;;  %v48_v12 = vld [vmem:[#allocation2 + $0x40] sm:$0xff]  ;;  %v14042_v17 = vcombine.low %v424_v4, %v432_v5  ;;  %v457_v25 = vld [vmem:[#allocation5 + $0x908] sm:$0xff] }
  0x4c   :  { %6969 = vmatpush1.bf16.msra.mxu0 %v13914_v13  ;;  %7741 = vmatpush1.bf16.msra.mxu1 %v13916_v14  ;;  %v52_v13 = vld [vmem:[#allocation2 + $0x60] sm:$0xff]  ;;  %v16487_v14 = vcombine.low %v16475_v53, %v16477_v54  ;;  %v14061_v53 = vcombine.high %v441_v18, %v449_v19  ;;  %v465_v54 = vld [vmem:[#allocation5 + $0x948] sm:$0xff] }
  0x4d   :  { %6970 = vmatprep.subr.bf16.mxu0 %v13931_v15  ;;  %7742 = vmatprep.subr.bf16.mxu1 %v13933_v16  ;;  %v440_v15 = vld [vmem:[#allocation5 + $0x880] sm:$0xff]  ;;  %v473_v42 = vld [vmem:[#allocation5 + $0x988] sm:$0xff] }
  0x4e   :  { %18451 = vst [vmem:[#allocation12_spill] sm:$0xff] %v16487_v14  ;;  %v448_v16 = vld [vmem:[#allocation5 + $0x8c0] sm:$0xff]  ;;  %v481_v43 = vld [vmem:[#allocation5 + $0x9c8] sm:$0xff] }
  0x4f   :  { %v16492_v26 = vld [vmem:[#allocation5 + $0x1000] sm:$0xff]  ;;  %v14058_v28 = vcombine.low %v440_v15, %v448_v16  ;;  %v489_v50 = vld [vmem:[#allocation5 + $0xa08] sm:$0xff] }
  0x50   :  { %6971 = vmatpush1.bf16.msra.mxu0 %v13930_v21  ;;  %7743 = vmatpush1.bf16.msra.mxu1 %v13932_v22  ;;  %v16489_v21 = vcombine.high %v48_v12, %v52_v13  ;;  %v14059_v22 = vcombine.high %v440_v15, %v448_v16  ;;  %v16494_v27 = vld [vmem:[#allocation5 + $0x1040] sm:$0xff]  ;;  %v497_v51 = vld [vmem:[#allocation5 + $0xa48] sm:$0xff] }
  0x51   :  { %6972 = vmatprep.subr.bf16.mxu0 %v13947_v23  ;;  %7744 = vmatprep.subr.bf16.mxu1 %v13949_v24  ;;  %v456_v23 = vld [vmem:[#allocation5 + $0x900] sm:$0xff]  ;;  %v14109_v61 = vcombine.high %v489_v50, %v497_v51  ;;  %v14108_v4 = vcombine.low %v489_v50, %v497_v51  ;;  %v577_v50 = vld [vmem:[#allocation5 + $0xcc8] sm:$0xff] }
  0x52   :  { %18452 = vst [vmem:[#allocation13_spill] sm:$0xff] %v16489_v21  ;;  %v464_v24 = vld [vmem:[#allocation5 + $0x940] sm:$0xff] }
  0x53   :  { %v56_v33 = vld [vmem:[#allocation2 + $0x80] sm:$0xff]  ;;  %v14075_v35 = vcombine.high %v456_v23, %v464_v24  ;;  %v14074_v44 = vcombine.low %v456_v23, %v464_v24  ;;  %v537_v23 = vld [vmem:[#allocation5 + $0xb88] sm:$0xff] }
  0x54   :  { %6973 = vmatpush1.bf16.msra.mxu0 %v13946_v29  ;;  %7745 = vmatpush1.bf16.msra.mxu1 %v13948_v30  ;;  %v14298_v29 = vcombine.low %v16492_v26, %v16494_v27  ;;  %v16499_v30 = vld [vmem:[#allocation5 + $0x1008] sm:$0xff]  ;;  %v60_v34 = vld [vmem:[#allocation2 + $0xa0] sm:$0xff] }
  0x55   :  { %6974 = vmatprep.subr.bf16.mxu0 %v13963_v31  ;;  %7746 = vmatprep.subr.bf16.mxu1 %v13965_v32  ;;  %v16501_v31 = vld [vmem:[#allocation5 + $0x1048] sm:$0xff]  ;;  %v14060_v32 = vcombine.low %v441_v18, %v449_v19  ;;  %v16509_v41 = vcombine.high %v56_v33, %v60_v34  ;;  %v496_v49 = vld [vmem:[#allocation5 + $0xa40] sm:$0xff]  ;;  %v16515_v60 = vcombine.low %v56_v33, %v60_v34 }
  0x56   :  { %v14300_v36 = vcombine.low %v16499_v30, %v16501_v31  ;;  %v64_v52 = vld [vmem:[#allocation2 + $0xc0] sm:$0xff]  ;;  %v545_v24 = vld [vmem:[#allocation5 + $0xbc8] sm:$0xff] }
  0x57   :  { %v504_v62 = vld [vmem:[#allocation5 + $0xa80] sm:$0xff]  ;;  %v553_v34 = vld [vmem:[#allocation5 + $0xc08] sm:$0xff] }
  0x58   :  { %6975 = vmatpush1.bf16.msra.mxu0 %v13962_v37  ;;  %7747 = vmatpush1.bf16.msra.mxu1 %v13964_v38  ;;  %v14077_v37 = vcombine.high %v457_v25, %v465_v54  ;;  %v16507_v38 = vcombine.low %v48_v12, %v52_v13  ;;  %v512_v63 = vld [vmem:[#allocation5 + $0xac0] sm:$0xff] }
  0x59   :  { %6976 = vmatprep.subr.bf16.mxu0 %v13979_v39  ;;  %7748 = vmatprep.subr.bf16.mxu1 %v13981_v40  ;;  %v472_v39 = vld [vmem:[#allocation5 + $0x980] sm:$0xff]  ;;  %v14123_v5 = vcombine.high %v504_v62, %v512_v63  ;;  %v14122_v13 = vcombine.low %v504_v62, %v512_v63  ;;  %v593_v62 = vld [vmem:[#allocation5 + $0xd48] sm:$0xff] }
  0x5a   :  { %18453 = vst [vmem:[#allocation14_spill] sm:$0xff] %v16507_v38  ;;  %v480_v40 = vld [vmem:[#allocation5 + $0x9c0] sm:$0xff] }
  0x5b   :  { %v520_v7 = vld [vmem:[#allocation5 + $0xb00] sm:$0xff] }
  0x5c   :  { %6977 = vmatpush1.bf16.msra.mxu0 %v13978_v45  ;;  %7749 = vmatpush1.bf16.msra.mxu1 %v13980_v46  ;;  %v14076_v45 = vcombine.low %v457_v25, %v465_v54  ;;  %v14091_v46 = vcombine.high %v472_v39, %v480_v40  ;;  %v76_v12 = vld [vmem:[#allocation2 + $0x120] sm:$0xff] }
  0x5d   :  { %6978 = vmatprep.subr.bf16.mxu0 %v13995_v47  ;;  %7750 = vmatprep.subr.bf16.mxu1 %v13997_v48  ;;  %v14093_v47 = vcombine.high %v473_v42, %v481_v43  ;;  %v488_v48 = vld [vmem:[#allocation5 + $0xa00] sm:$0xff] }
  0x5e   :  { %v536_v19 = vld [vmem:[#allocation5 + $0xb80] sm:$0xff] }
  0x5f   :  { %v560_v33 = vld [vmem:[#allocation5 + $0xc40] sm:$0xff] }
  0x60   :  { %6979 = vmatpush1.bf16.msra.mxu0 %v13994_v55  ;;  %7751 = vmatpush1.bf16.msra.mxu1 %v13996_v56  ;;  %v68_v55 = vld [vmem:[#allocation2 + $0xe0] sm:$0xff]  ;;  %v14090_v56 = vcombine.low %v472_v39, %v480_v40 }
  0x61   :  { %6980 = vmatprep.subr.bf16.mxu0 %v14011_v57  ;;  %7752 = vmatprep.subr.bf16.mxu1 %v14013_v59  ;;  %v14092_v57 = vcombine.low %v473_v42, %v481_v43  ;;  %v14107_v59 = vcombine.high %v488_v48, %v496_v49  ;;  %v84_v39 = vld [vmem:[#allocation2 + $0x160] sm:$0xff]  ;;  %v14156_v42 = vcombine.low %v537_v23, %v545_v24 }
  0x62   :  { %v88_v63 = vld [vmem:[#allocation2 + $0x180] sm:$0xff] }
  0x64   :  { %6981 = vmatpush1.bf16.msra.mxu0 %v14010_v0  ;;  %7753 = vmatpush1.bf16.msra.mxu1 %v14012_v1  ;;  %v16517_v0 = vcombine.high %v64_v52, %v68_v55  ;;  %v505_v1 = vld [vmem:[#allocation5 + $0xa88] sm:$0xff] }
  0x65   :  { %6982 = vmatprep.subr.bf16.mxu0 %v14027_v2  ;;  %7754 = vmatprep.subr.bf16.mxu1 %v14029_v3  ;;  %v513_v2 = vld [vmem:[#allocation5 + $0xac8] sm:$0xff]  ;;  %v14106_v3 = vcombine.low %v488_v48, %v496_v49 }
  0x66   :  { %v14125_v6 = vcombine.high %v505_v1, %v513_v2  ;;  %v14124_v15 = vcombine.low %v505_v1, %v513_v2  ;;  %v569_v49 = vld [vmem:[#allocation5 + $0xc88] sm:$0xff]  ;;  %v92_v1 = vld [vmem:[#allocation2 + $0x1a0] sm:$0xff] }
  0x68   :  { %6983 = vmatpush1.bf16.msra.mxu0 %v14026_v8  ;;  %7755 = vmatpush1.bf16.msra.mxu1 %v14028_v9  ;;  %v528_v8 = vld [vmem:[#allocation5 + $0xb40] sm:$0xff]  ;;  %v521_v9 = vld [vmem:[#allocation5 + $0xb08] sm:$0xff] }
  0x69   :  { %7145 = vmatprep.subr.bf16.mxu0 %v14043_v10  ;;  %7917 = vmatprep.subr.bf16.mxu1 %v14045_v11  ;;  %v529_v10 = vld [vmem:[#allocation5 + $0xb48] sm:$0xff]  ;;  %v72_v11 = vld [vmem:[#allocation2 + $0x100] sm:$0xff]  ;;  %v14139_v16 = vcombine.high %v520_v7, %v528_v8  ;;  %v14138_v25 = vcombine.low %v520_v7, %v528_v8 }
  0x6a   :  { %v14141_v18 = vcombine.high %v521_v9, %v529_v10  ;;  %v600_v7 = vld [vmem:[#allocation5 + $0xd80] sm:$0xff] }
  0x6b   :  { %6985 = vmatmul.mubr.bf16.vlgmr.msra.gmra.mrb[0].mxu0 %v16487_v14  ;;  %7757 = vmatmul.mubr.bf16.vlgmr.msra.gmra.mrb[0].mxu1 %v16487_v14  ;;  %v608_v8 = vld [vmem:[#allocation5 + $0xdc0] sm:$0xff] }
  0x6c   :  { %7146 = vmatpush1.bf16.msra.mxu0 %v14042_v17  ;;  %7918 = vmatpush1.bf16.msra.mxu1 %v14044_v20  ;;  %v16523_v17 = vcombine.low %v64_v52, %v68_v55  ;;  %v544_v20 = vld [vmem:[#allocation5 + $0xbc0] sm:$0xff] }
  0x6d   :  { %6994 = vmatprep.mubr.bf16.mxu0 %v16489_v21  ;;  %7766 = vmatprep.mubr.bf16.mxu1 %v16489_v21  ;;  %v14155_v54 = vcombine.high %v536_v19, %v544_v20  ;;  %v14154_v40 = vcombine.low %v536_v19, %v544_v20  ;;  %v624_v19 = vld [vmem:[#allocation5 + $0xe40] sm:$0xff]  ;;  %v617_v20 = vld [vmem:[#allocation5 + $0xe08] sm:$0xff] }
  0x6e   :  { %7147 = vmatprep.subr.bf16.mxu0 %v14059_v22  ;;  %7919 = vmatprep.subr.bf16.mxu1 %v14061_v53  ;;  %v16525_v22 = vcombine.high %v72_v11, %v76_v12  ;;  %v14140_v53 = vcombine.low %v521_v9, %v529_v10  ;;  %v16541_v9 = vcombine.high %v88_v63, %v92_v1  ;;  %v601_v10 = vld [vmem:[#allocation5 + $0xd88] sm:$0xff] }
  0x70   :  { %7148 = vmatpush1.bf16.msra.mxu0 %v14058_v28  ;;  %7920 = vmatpush1.bf16.msra.mxu1 %v14060_v32  ;;  %v14157_v28 = vcombine.high %v537_v23, %v545_v24  ;;  %v552_v32 = vld [vmem:[#allocation5 + $0xc00] sm:$0xff]  ;;  %v625_v23 = vld [vmem:[#allocation5 + $0xe48] sm:$0xff] }
  0x71   :  { %7149 = vmatprep.subr.bf16.mxu0 %v14075_v35  ;;  %7921 = vmatprep.subr.bf16.mxu1 %v14077_v37  ;;  %v561_v35 = vld [vmem:[#allocation5 + $0xc48] sm:$0xff]  ;;  %v80_v37 = vld [vmem:[#allocation2 + $0x140] sm:$0xff]  ;;  %v14171_v43 = vcombine.high %v552_v32, %v560_v33  ;;  %v14170_v51 = vcombine.low %v552_v32, %v560_v33  ;;  %v16547_v32 = vcombine.low %v88_v63, %v92_v1 }
  0x72   :  { %v16533_v48 = vcombine.high %v80_v37, %v84_v39  ;;  %v14172_v52 = vcombine.low %v553_v34, %v561_v35  ;;  %v96_v24 = vld [vmem:[#allocation2 + $0x1c0] sm:$0xff]  ;;  %v14237_v33 = vcombine.high %v617_v20, %v625_v23 }
  0x73   :  { %6995 = vmatmul.mubr.bf16.gmra.mrb[4].mxu0 %v16507_v38  ;;  %7767 = vmatmul.mubr.bf16.gmra.mrb[4].mxu1 %v16507_v38  ;;  %v664_v63 = vld [vmem:[#allocation5 + $0xf80] sm:$0xff] }
  0x74   :  { %7004 = vmatprep.mubr.bf16.mxu0 %v16509_v41  ;;  %7776 = vmatprep.mubr.bf16.mxu1 %v16509_v41  ;;  %v672_v1 = vld [vmem:[#allocation5 + $0xfc0] sm:$0xff] }
  0x75   :  { %7150 = vmatpush1.bf16.msra.mxu0 %v14074_v44  ;;  %7922 = vmatpush1.bf16.msra.mxu1 %v14076_v45  ;;  %v16531_v44 = vcombine.low %v72_v11, %v76_v12  ;;  %v14173_v45 = vcombine.high %v553_v34, %v561_v35  ;;  %v609_v11 = vld [vmem:[#allocation5 + $0xdc8] sm:$0xff]  ;;  %v632_v34 = vld [vmem:[#allocation5 + $0xe80] sm:$0xff] }
  0x76   :  { %7151 = vmatprep.subr.bf16.mxu0 %v14091_v46  ;;  %7923 = vmatprep.subr.bf16.mxu1 %v14093_v47  ;;  %v568_v46 = vld [vmem:[#allocation5 + $0xc80] sm:$0xff] }
  0x77   :  { %v576_v47 = vld [vmem:[#allocation5 + $0xcc0] sm:$0xff] }
  0x78   :  { %v14187_v55 = vcombine.high %v568_v46, %v576_v47  ;;  %v14186_v2 = vcombine.low %v568_v46, %v576_v47  ;;  %v640_v35 = vld [vmem:[#allocation5 + $0xec0] sm:$0xff] }
  0x79   :  { %7152 = vmatpush1.bf16.msra.mxu0 %v14090_v56  ;;  %7924 = vmatpush1.bf16.msra.mxu1 %v14092_v57  ;;  %v14189_v56 = vcombine.high %v569_v49, %v577_v50  ;;  %v584_v57 = vld [vmem:[#allocation5 + $0xd00] sm:$0xff] }
  0x7a   :  { %7153 = vmatprep.subr.bf16.mxu0 %v14107_v59  ;;  %7925 = vmatprep.subr.bf16.mxu1 %v14109_v61  ;;  %v592_v59 = vld [vmem:[#allocation5 + $0xd40] sm:$0xff]  ;;  %v585_v61 = vld [vmem:[#allocation5 + $0xd08] sm:$0xff] }
  0x7b   :  { %7005 = vmatmul.mubr.bf16.gmra.mrb[8].mxu0 %v16515_v60  ;;  %7777 = vmatmul.mubr.bf16.gmra.mrb[8].mxu1 %v16515_v60  ;;  %v14202_v12 = vcombine.low %v584_v57, %v592_v59  ;;  %v648_v47 = vld [vmem:[#allocation5 + $0xf00] sm:$0xff] }
  0x7c   :  { %7014 = vmatprep.mubr.bf16.mxu0 %v16517_v0  ;;  %7786 = vmatprep.mubr.bf16.mxu1 %v16517_v0 }
  0x7d   :  { %7154 = vmatpush1.bf16.msra.mxu0 %v14106_v3  ;;  %7926 = vmatpush1.bf16.msra.mxu1 %v14108_v4  ;;  %v14188_v3 = vcombine.low %v569_v49, %v577_v50  ;;  %v14203_v4 = vcombine.high %v584_v57, %v592_v59  ;;  %v656_v49 = vld [vmem:[#allocation5 + $0xf40] sm:$0xff]  ;;  %v649_v50 = vld [vmem:[#allocation5 + $0xf08] sm:$0xff] }
  0x7e   :  { %7155 = vmatprep.subr.bf16.mxu0 %v14123_v5  ;;  %7927 = vmatprep.subr.bf16.mxu1 %v14125_v6  ;;  %v16539_v5 = vcombine.low %v80_v37, %v84_v39  ;;  %v14205_v6 = vcombine.high %v585_v61, %v593_v62  ;;  %v633_v39 = vld [vmem:[#allocation5 + $0xe88] sm:$0xff]  ;;  %v14267_v59 = vcombine.high %v648_v47, %v656_v49 }
  0x81   :  { %7156 = vmatpush1.bf16.msra.mxu0 %v14122_v13  ;;  %7928 = vmatpush1.bf16.msra.mxu1 %v14124_v15  ;;  %v14204_v13 = vcombine.low %v585_v61, %v593_v62  ;;  %v14219_v15 = vcombine.high %v600_v7, %v608_v8 }
  0x82   :  { %7157 = vmatprep.subr.bf16.mxu0 %v14139_v16  ;;  %7929 = vmatprep.subr.bf16.mxu1 %v14141_v18  ;;  %v14221_v16 = vcombine.high %v601_v10, %v609_v11  ;;  %v616_v18 = vld [vmem:[#allocation5 + $0xe00] sm:$0xff] }
  0x83   :  { %7015 = vmatmul.mubr.bf16.gmra.mrb[12].mxu0 %v16523_v17  ;;  %7787 = vmatmul.mubr.bf16.gmra.mrb[12].mxu1 %v16523_v17 }
  0x84   :  { %7024 = vmatprep.mubr.bf16.mxu0 %v16525_v22  ;;  %7796 = vmatprep.mubr.bf16.mxu1 %v16525_v22 }
  0x85   :  { %7158 = vmatpush1.bf16.msra.mxu0 %v14138_v25  ;;  %7930 = vmatpush1.bf16.msra.mxu1 %v14140_v53  ;;  %v100_v25 = vld [vmem:[#allocation2 + $0x1e0] sm:$0xff]  ;;  %v14218_v53 = vcombine.low %v600_v7, %v608_v8  ;;  %v14283_v8 = vcombine.high %v664_v63, %v672_v1 }
  0x86   :  { %7159 = vmatprep.subr.bf16.mxu0 %v14155_v54  ;;  %7931 = vmatprep.subr.bf16.mxu1 %v14157_v28  ;;  %v14220_v54 = vcombine.low %v601_v10, %v609_v11  ;;  %v14235_v28 = vcombine.high %v616_v18, %v624_v19  ;;  %v16549_v37 = vcombine.high %v96_v24, %v100_v25  ;;  %v112_v11 = vld [vmem:[#allocation2 + $0x240] sm:$0xff] }
  0x87   :  { %v16555_v61 = vcombine.low %v96_v24, %v100_v25  ;;  %v124_v24 = vld [vmem:[#allocation2 + $0x2a0] sm:$0xff] }
  0x89   :  { %7160 = vmatpush1.bf16.msra.mxu0 %v14154_v40  ;;  %7932 = vmatpush1.bf16.msra.mxu1 %v14156_v42  ;;  %v641_v40 = vld [vmem:[#allocation5 + $0xec8] sm:$0xff]  ;;  %v14234_v42 = vcombine.low %v616_v18, %v624_v19  ;;  %v14301_v19 = vcombine.high %v16499_v30, %v16501_v31 }
  0x8a   :  { %7161 = vmatprep.subr.bf16.mxu0 %v14171_v43  ;;  %7933 = vmatprep.subr.bf16.mxu1 %v14173_v45  ;;  %v14236_v43 = vcombine.low %v617_v20, %v625_v23  ;;  %v14251_v45 = vcombine.high %v632_v34, %v640_v35  ;;  %v14253_v46 = vcombine.high %v633_v39, %v641_v40  ;;  %v120_v23 = vld [vmem:[#allocation2 + $0x280] sm:$0xff]  ;;  %v729_v31 = vld [vmem:[#allocation5 + $0x1188] sm:$0xff] }
  0x8b   :  { %7025 = vmatmul.mubr.bf16.gmra.mrb[16].mxu0 %v16531_v44  ;;  %7797 = vmatmul.mubr.bf16.gmra.mrb[16].mxu1 %v16531_v44  ;;  %v14252_v57 = vcombine.low %v633_v39, %v641_v40  ;;  %v140_v39 = vld [vmem:[#allocation2 + $0x320] sm:$0xff] }
  0x8c   :  { %7034 = vmatprep.mubr.bf16.mxu0 %v16533_v48  ;;  %7806 = vmatprep.mubr.bf16.mxu1 %v16533_v48 }
  0x8d   :  { %7162 = vmatpush1.bf16.msra.mxu0 %v14170_v51  ;;  %7934 = vmatpush1.bf16.msra.mxu1 %v14172_v52  ;;  %v657_v51 = vld [vmem:[#allocation5 + $0xf48] sm:$0xff]  ;;  %v104_v52 = vld [vmem:[#allocation2 + $0x200] sm:$0xff] }
  0x8e   :  { %7163 = vmatprep.subr.bf16.mxu0 %v14187_v55  ;;  %7935 = vmatprep.subr.bf16.mxu1 %v14189_v56  ;;  %v108_v55 = vld [vmem:[#allocation2 + $0x220] sm:$0xff]  ;;  %v14250_v56 = vcombine.low %v632_v34, %v640_v35  ;;  %v14269_v62 = vcombine.high %v649_v50, %v657_v51  ;;  %v14268_v7 = vcombine.low %v649_v50, %v657_v51 }
  0x8f   :  { %v16565_v18 = vcombine.low %v104_v52, %v108_v55  ;;  %v136_v35 = vld [vmem:[#allocation2 + $0x300] sm:$0xff] }
  0x90   :  { %v156_v50 = vld [vmem:[#allocation2 + $0x3a0] sm:$0xff] }
  0x91   :  { %7164 = vmatpush1.bf16.msra.mxu0 %v14186_v2  ;;  %7936 = vmatpush1.bf16.msra.mxu1 %v14188_v3  ;;  %v16557_v2 = vcombine.high %v104_v52, %v108_v55  ;;  %v665_v3 = vld [vmem:[#allocation5 + $0xf88] sm:$0xff]  ;;  %v160_v55 = vld [vmem:[#allocation2 + $0x3c0] sm:$0xff] }
  0x92   :  { %7165 = vmatprep.subr.bf16.mxu0 %v14203_v4  ;;  %7937 = vmatprep.subr.bf16.mxu1 %v14205_v6  ;;  %v673_v4 = vld [vmem:[#allocation5 + $0xfc8] sm:$0xff]  ;;  %v14266_v6 = vcombine.low %v648_v47, %v656_v49  ;;  %v152_v49 = vld [vmem:[#allocation2 + $0x380] sm:$0xff] }
  0x93   :  { %7035 = vmatmul.mubr.bf16.gmra.mrb[20].mxu0 %v16539_v5  ;;  %7807 = vmatmul.mubr.bf16.gmra.mrb[20].mxu1 %v16539_v5  ;;  %v14285_v10 = vcombine.high %v665_v3, %v673_v4  ;;  %v16609_v52 = vcombine.high %v152_v49, %v156_v50 }
  0x94   :  { %7044 = vmatprep.mubr.bf16.mxu0 %v16541_v9  ;;  %7816 = vmatprep.mubr.bf16.mxu1 %v16541_v9 }
  0x95   :  { %7166 = vmatpush1.bf16.msra.mxu0 %v14202_v12  ;;  %7938 = vmatpush1.bf16.msra.mxu1 %v14204_v13  ;;  %v116_v12 = vld [vmem:[#allocation2 + $0x260] sm:$0xff]  ;;  %v14282_v13 = vcombine.low %v664_v63, %v672_v1  ;;  %v45_v63 = vld [vmem:[#allocation2 + $0x28] sm:$0xff] }
  0x96   :  { %7167 = vmatprep.subr.bf16.mxu0 %v14219_v15  ;;  %7939 = vmatprep.subr.bf16.mxu1 %v14221_v16  ;;  %v14284_v15 = vcombine.low %v665_v3, %v673_v4  ;;  %v14299_v16 = vcombine.high %v16492_v26, %v16494_v27  ;;  %v16569_v20 = vcombine.high %v112_v11, %v116_v12  ;;  %v49_v4 = vld [vmem:[#allocation2 + $0x48] sm:$0xff]  ;;  %v744_v26 = vld [vmem:[#allocation5 + $0x1200] sm:$0xff] }
  0x97   :  { %v16575_v25 = vcombine.low %v112_v11, %v116_v12  ;;  %v697_v11 = vld [vmem:[#allocation5 + $0x1088] sm:$0xff] }
  0x98   :  { %v705_v12 = vld [vmem:[#allocation5 + $0x10c8] sm:$0xff] }
  0x99   :  { %7168 = vmatpush1.bf16.msra.mxu0 %v14218_v53  ;;  %7940 = vmatpush1.bf16.msra.mxu1 %v14220_v54  ;;  %v16577_v53 = vcombine.high %v120_v23, %v124_v24  ;;  %v128_v54 = vld [vmem:[#allocation2 + $0x2c0] sm:$0xff] }
  0x9a   :  { %7169 = vmatprep.subr.bf16.mxu0 %v14235_v28  ;;  %7941 = vmatprep.subr.bf16.mxu1 %v14237_v33  ;;  %v132_v28 = vld [vmem:[#allocation2 + $0x2e0] sm:$0xff]  ;;  %v16583_v33 = vcombine.low %v120_v23, %v124_v24  ;;  %v713_v23 = vld [vmem:[#allocation5 + $0x1108] sm:$0xff]  ;;  %v14317_v24 = vcombine.high %v697_v11, %v705_v12 }
  0x9b   :  { %7045 = vmatmul.mubr.bf16.gmra.mrb[24].mxu0 %v16547_v32  ;;  %7817 = vmatmul.mubr.bf16.gmra.mrb[24].mxu1 %v16547_v32  ;;  %v16585_v34 = vcombine.high %v128_v54, %v132_v28  ;;  %v16591_v40 = vcombine.low %v128_v54, %v132_v28  ;;  %v721_v54 = vld [vmem:[#allocation5 + $0x1148] sm:$0xff]  ;;  %v16636_v28 = vld [vmem:[#allocation5 + $0x1800] sm:$0xff] }
  0x9c   :  { %7054 = vmatprep.mubr.bf16.mxu0 %v16549_v37  ;;  %7826 = vmatprep.mubr.bf16.mxu1 %v16549_v37  ;;  %v14333_v27 = vcombine.high %v713_v23, %v721_v54 }
  0x9d   :  { %7170 = vmatpush1.bf16.msra.mxu0 %v14234_v42  ;;  %7942 = vmatpush1.bf16.msra.mxu1 %v14236_v43  ;;  %v16593_v42 = vcombine.high %v136_v35, %v140_v39  ;;  %v144_v43 = vld [vmem:[#allocation2 + $0x340] sm:$0xff] }
  0x9e   :  { %7171 = vmatprep.subr.bf16.mxu0 %v14251_v45  ;;  %7943 = vmatprep.subr.bf16.mxu1 %v14253_v46  ;;  %v148_v45 = vld [vmem:[#allocation2 + $0x360] sm:$0xff]  ;;  %v16599_v46 = vcombine.low %v136_v35, %v140_v39 }
  0x9f   :  { %v16601_v47 = vcombine.high %v144_v43, %v148_v45  ;;  %v16607_v51 = vcombine.low %v144_v43, %v148_v45  ;;  %v16638_v35 = vld [vmem:[#allocation5 + $0x1840] sm:$0xff]  ;;  %v16646_v45 = vld [vmem:[#allocation5 + $0x1808] sm:$0xff] }
  0xa0   :  { %v768_v43 = vld [vmem:[#allocation5 + $0x12c0] sm:$0xff] }
  0xa1   :  { %7172 = vmatpush1.bf16.msra.mxu0 %v14250_v56  ;;  %7944 = vmatpush1.bf16.msra.mxu1 %v14252_v57  ;;  %v164_v56 = vld [vmem:[#allocation2 + $0x3e0] sm:$0xff]  ;;  %v16615_v57 = vcombine.low %v152_v49, %v156_v50  ;;  %v16648_v49 = vld [vmem:[#allocation5 + $0x1848] sm:$0xff]  ;;  %v14316_v50 = vcombine.low %v697_v11, %v705_v12  ;;  %v14332_v11 = vcombine.low %v713_v23, %v721_v54 }
  0xa2   :  { %7173 = vmatprep.subr.bf16.mxu0 %v14267_v59  ;;  %7945 = vmatprep.subr.bf16.mxu1 %v14269_v62  ;;  %v16617_v59 = vcombine.high %v160_v55, %v164_v56  ;;  %v41_v62 = vld [vmem:[#allocation2 + $0x8] sm:$0xff]  ;;  %v16623_v1 = vcombine.low %v160_v55, %v164_v56 }
  0xa3   :  { %7055 = vmatmul.mubr.bf16.gmra.mrb[28].mxu0 %v16555_v61  ;;  %7827 = vmatmul.mubr.bf16.gmra.mrb[28].mxu1 %v16555_v61  ;;  %18454 = vst [vmem:[#allocation15_spill] sm:$0xff] %v16615_v57  ;;  %v16625_v3 = vcombine.high %v41_v62, %v45_v63  ;;  %v57_v55 = vld [vmem:[#allocation2 + $0x88] sm:$0xff] }
  0xa4   :  { %7064 = vmatprep.mubr.bf16.mxu0 %v16557_v2  ;;  %7836 = vmatprep.mubr.bf16.mxu1 %v16557_v2  ;;  %18455 = vst [vmem:[#allocation16_spill] sm:$0xff] %v16617_v59  ;;  %18456 = vst [vmem:[#allocation17_spill] sm:$0xff] %v16623_v1  ;;  %v61_v56 = vld [vmem:[#allocation2 + $0xa8] sm:$0xff] }
  0xa5   :  { %7174 = vmatpush1.bf16.msra.mxu0 %v14266_v6  ;;  %7946 = vmatpush1.bf16.msra.mxu1 %v14268_v7  ;;  %18457 = vst [vmem:[#allocation18_spill] sm:$0xff] %v16625_v3  ;;  %v53_v6 = vld [vmem:[#allocation2 + $0x68] sm:$0xff]  ;;  %v16631_v7 = vcombine.low %v41_v62, %v45_v63  ;;  %v728_v63 = vld [vmem:[#allocation5 + $0x1180] sm:$0xff]  ;;  %v16659_v30 = vcombine.high %v57_v55, %v61_v56 }
  0xa6   :  { %7175 = vmatprep.subr.bf16.mxu0 %v14283_v8  ;;  %7947 = vmatprep.subr.bf16.mxu1 %v14285_v10  ;;  %v696_v8 = vld [vmem:[#allocation5 + $0x1080] sm:$0xff] }
  0xa7   :  { %18458 = vst [vmem:[#allocation19_spill] sm:$0xff] %v16631_v7  ;;  %v704_v10 = vld [vmem:[#allocation5 + $0x10c0] sm:$0xff]  ;;  %18461 = vst [vmem:[#allocation22_spill] sm:$0xff] %v16659_v30 }
  0xa8   :  { %v14314_v39 = vcombine.low %v696_v8, %v704_v10 }
  0xa9   :  { %7176 = vmatpush1.bf16.msra.mxu0 %v14282_v13  ;;  %7948 = vmatpush1.bf16.msra.mxu1 %v14284_v15  ;;  %v16633_v13 = vcombine.high %v49_v4, %v53_v6  ;;  %v14315_v15 = vcombine.high %v696_v8, %v704_v10  ;;  %v736_v8 = vld [vmem:[#allocation5 + $0x11c0] sm:$0xff] }
  0xaa   :  { %7338 = vmatprep.subr.bf16.mxu0 %v14299_v16  ;;  %8110 = vmatprep.subr.bf16.mxu1 %v14301_v19  ;;  %v712_v16 = vld [vmem:[#allocation5 + $0x1100] sm:$0xff]  ;;  %v14347_v12 = vcombine.high %v728_v63, %v736_v8 }
  0xab   :  { %7065 = vmatmul.mubr.bf16.gmra.mrb[32].mxu0 %v16565_v18  ;;  %7837 = vmatmul.mubr.bf16.gmra.mrb[32].mxu1 %v16565_v18  ;;  %18459 = vst [vmem:[#allocation20_spill] sm:$0xff] %v16633_v13  ;;  %v720_v19 = vld [vmem:[#allocation5 + $0x1140] sm:$0xff] }
  0xac   :  { %7074 = vmatprep.mubr.bf16.mxu0 %v16569_v20  ;;  %7846 = vmatprep.mubr.bf16.mxu1 %v16569_v20  ;;  %v14331_v62 = vcombine.high %v712_v16, %v720_v19  ;;  %v14330_v10 = vcombine.low %v712_v16, %v720_v19  ;;  %v69_v16 = vld [vmem:[#allocation2 + $0xe8] sm:$0xff]  ;;  %v14346_v19 = vcombine.low %v728_v63, %v736_v8 }
  0xb3   :  { %7075 = vmatmul.mubr.bf16.gmra.mrb[36].mxu0 %v16575_v25  ;;  %7847 = vmatmul.mubr.bf16.gmra.mrb[36].mxu1 %v16575_v25 }
  0xb4   :  { %7084 = vmatprep.mubr.bf16.mxu0 %v16577_v53  ;;  %7856 = vmatprep.mubr.bf16.mxu1 %v16577_v53 }
  0xbb   :  { %7085 = vmatmul.mubr.bf16.gmra.mrb[40].mxu0 %v16583_v33  ;;  %7857 = vmatmul.mubr.bf16.gmra.mrb[40].mxu1 %v16583_v33 }
  0xbc   :  { %7094 = vmatprep.mubr.bf16.mxu0 %v16585_v34  ;;  %7866 = vmatprep.mubr.bf16.mxu1 %v16585_v34 }
  0xc3   :  { %7095 = vmatmul.mubr.bf16.gmra.mrb[44].mxu0 %v16591_v40  ;;  %7867 = vmatmul.mubr.bf16.gmra.mrb[44].mxu1 %v16591_v40 }
  0xc4   :  { %7104 = vmatprep.mubr.bf16.mxu0 %v16593_v42  ;;  %7876 = vmatprep.mubr.bf16.mxu1 %v16593_v42 }
  0xcb   :  { %7105 = vmatmul.mubr.bf16.gmra.mrb[48].mxu0 %v16599_v46  ;;  %7877 = vmatmul.mubr.bf16.gmra.mrb[48].mxu1 %v16599_v46 }
  0xcc   :  { %7114 = vmatprep.mubr.bf16.mxu0 %v16601_v47  ;;  %7886 = vmatprep.mubr.bf16.mxu1 %v16601_v47 }
  0xd3   :  { %7115 = vmatmul.mubr.bf16.gmra.mrb[52].mxu0 %v16607_v51  ;;  %7887 = vmatmul.mubr.bf16.gmra.mrb[52].mxu1 %v16607_v51 }
  0xd4   :  { %7124 = vmatprep.mubr.bf16.mxu0 %v16609_v52  ;;  %7896 = vmatprep.mubr.bf16.mxu1 %v16609_v52 }
  0xdb   :  { %7125 = vmatmul.mubr.bf16.gmra.mrb[56].mxu0 %v16615_v57  ;;  %7897 = vmatmul.mubr.bf16.gmra.mrb[56].mxu1 %v16615_v57 }
  0xdc   :  { %7134 = vmatprep.mubr.bf16.mxu0 %v16617_v59  ;;  %7906 = vmatprep.mubr.bf16.mxu1 %v16617_v59 }
  0xe3   :  { %7135 = vmatmul.mubr.bf16.gmra.mrb[60].mxu0 %v16623_v1  ;;  %7907 = vmatmul.mubr.bf16.gmra.mrb[60].mxu1 %v16623_v1 }
  0xe4   :  { %7177 = vmatprep.mubr.bf16.mxu0 %v16625_v3  ;;  %7949 = vmatprep.mubr.bf16.mxu1 %v16625_v3 }
  0xeb   :  { %7178 = vmatmul.mubr.bf16.vlgmr.msra.gmra.mrb[0].mxu0 %v16631_v7  ;;  %7950 = vmatmul.mubr.bf16.vlgmr.msra.gmra.mrb[0].mxu1 %v16631_v7  ;;  %v769_v7 = vld [vmem:[#allocation5 + $0x12c8] sm:$0xff] }
  0xec   :  { %7339 = vmatpush1.bf16.msra.mxu0 %v14298_v29  ;;  %8111 = vmatpush1.bf16.msra.mxu1 %v14300_v36  ;;  %v16657_v29 = vcombine.low %v49_v4, %v53_v6  ;;  %v737_v36 = vld [vmem:[#allocation5 + $0x11c8] sm:$0xff]  ;;  %v752_v4 = vld [vmem:[#allocation5 + $0x1240] sm:$0xff] }
  0xed   :  { %7187 = vmatprep.mubr.bf16.mxu0 %v16633_v13  ;;  %7959 = vmatprep.mubr.bf16.mxu1 %v16633_v13  ;;  %v745_v6 = vld [vmem:[#allocation5 + $0x1208] sm:$0xff]  ;;  %v14348_v23 = vcombine.low %v729_v31, %v737_v36  ;;  %v14363_v54 = vcombine.high %v744_v26, %v752_v4 }
  0xee   :  { %7340 = vmatprep.subr.bf16.mxu0 %v14315_v15  ;;  %18460 = vst [vmem:[#allocation21_spill] sm:$0xff] %v16657_v29  ;;  %8112 = vmatprep.subr.bf16.mxu1 %v14317_v24  ;;  %v14349_v15 = vcombine.high %v729_v31, %v737_v36  ;;  %v753_v24 = vld [vmem:[#allocation5 + $0x1248] sm:$0xff] }
  0xef   :  { %v761_v13 = vld [vmem:[#allocation5 + $0x1288] sm:$0xff] }
  0xf0   :  { %7341 = vmatpush1.bf16.msra.mxu0 %v14314_v39  ;;  %8113 = vmatpush1.bf16.msra.mxu1 %v14316_v50  ;;  %v65_v39 = vld [vmem:[#allocation2 + $0xc8] sm:$0xff]  ;;  %v16665_v50 = vcombine.low %v57_v55, %v61_v56  ;;  %v14381_v8 = vcombine.high %v761_v13, %v769_v7  ;;  %v776_v55 = vld [vmem:[#allocation5 + $0x1300] sm:$0xff] }
  0xf1   :  { %7342 = vmatprep.subr.bf16.mxu0 %v14331_v62  ;;  %8114 = vmatprep.subr.bf16.mxu1 %v14333_v27  ;;  %v14365_v62 = vcombine.high %v745_v6, %v753_v24  ;;  %v760_v27 = vld [vmem:[#allocation5 + $0x1280] sm:$0xff]  ;;  %v777_v31 = vld [vmem:[#allocation5 + $0x1308] sm:$0xff] }
  0xf2   :  { %18462 = vst [vmem:[#allocation23_spill] sm:$0xff] %v16665_v50  ;;  %v14379_v63 = vcombine.high %v760_v27, %v768_v43  ;;  %v784_v56 = vld [vmem:[#allocation5 + $0x1340] sm:$0xff]  ;;  %v785_v36 = vld [vmem:[#allocation5 + $0x1348] sm:$0xff] }
  0xf3   :  { %7188 = vmatmul.mubr.bf16.gmra.mrb[4].mxu0 %v16657_v29  ;;  %7960 = vmatmul.mubr.bf16.gmra.mrb[4].mxu1 %v16657_v29  ;;  %v16667_v29 = vcombine.high %v65_v39, %v69_v16 }
  0xf4   :  { %7197 = vmatprep.mubr.bf16.mxu0 %v16659_v30  ;;  %7969 = vmatprep.mubr.bf16.mxu1 %v16659_v30  ;;  %v14362_v30 = vcombine.low %v744_v26, %v752_v4  ;;  %v77_v26 = vld [vmem:[#allocation2 + $0x128] sm:$0xff]  ;;  %v14395_v4 = vcombine.high %v776_v55, %v784_v56 }
  0xf5   :  { %7343 = vmatpush1.bf16.msra.mxu0 %v14330_v10  ;;  %8115 = vmatpush1.bf16.msra.mxu1 %v14332_v11  ;;  %18463 = vst [vmem:[#allocation24_spill] sm:$0xff] %v16667_v29  ;;  %v14364_v10 = vcombine.low %v745_v6, %v753_v24  ;;  %v73_v11 = vld [vmem:[#allocation2 + $0x108] sm:$0xff]  ;;  %v16673_v6 = vcombine.low %v65_v39, %v69_v16  ;;  %v816_v39 = vld [vmem:[#allocation5 + $0x1440] sm:$0xff] }
  0xf6   :  { %7344 = vmatprep.subr.bf16.mxu0 %v14347_v12  ;;  %8116 = vmatprep.subr.bf16.mxu1 %v14349_v15  ;;  %v14378_v12 = vcombine.low %v760_v27, %v768_v43  ;;  %v14380_v15 = vcombine.low %v761_v13, %v769_v7  ;;  %v14397_v24 = vcombine.high %v777_v31, %v785_v36  ;;  %v808_v13 = vld [vmem:[#allocation5 + $0x1400] sm:$0xff]  ;;  %v809_v16 = vld [vmem:[#allocation5 + $0x1408] sm:$0xff] }
  0xf7   :  { %18464 = vst [vmem:[#allocation25_spill] sm:$0xff] %v16673_v6  ;;  %v817_v27 = vld [vmem:[#allocation5 + $0x1448] sm:$0xff] }
  0xf9   :  { %7345 = vmatpush1.bf16.msra.mxu0 %v14346_v19  ;;  %8117 = vmatpush1.bf16.msra.mxu1 %v14348_v23  ;;  %v792_v19 = vld [vmem:[#allocation5 + $0x1380] sm:$0xff] }
  0xfa   :  { %7346 = vmatprep.subr.bf16.mxu0 %v14363_v54  ;;  %8118 = vmatprep.subr.bf16.mxu1 %v14365_v62  ;;  %v800_v23 = vld [vmem:[#allocation5 + $0x13c0] sm:$0xff]  ;;  %v16675_v54 = vcombine.high %v73_v11, %v77_v26  ;;  %v793_v62 = vld [vmem:[#allocation5 + $0x1388] sm:$0xff] }
  0xfb   :  { %7198 = vmatmul.mubr.bf16.gmra.mrb[8].mxu0 %v16665_v50  ;;  %7970 = vmatmul.mubr.bf16.gmra.mrb[8].mxu1 %v16665_v50  ;;  %v801_v50 = vld [vmem:[#allocation5 + $0x13c8] sm:$0xff]  ;;  %v14411_v43 = vcombine.high %v792_v19, %v800_v23 }
  0xfc   :  { %7207 = vmatprep.mubr.bf16.mxu0 %v16667_v29  ;;  %7979 = vmatprep.mubr.bf16.mxu1 %v16667_v29  ;;  %18465 = vst [vmem:[#allocation26_spill] sm:$0xff] %v16675_v54  ;;  %v14394_v29 = vcombine.low %v776_v55, %v784_v56  ;;  %v14413_v7 = vcombine.high %v793_v62, %v801_v50 }
  0xfd   :  { %7347 = vmatpush1.bf16.msra.mxu0 %v14362_v30  ;;  %8119 = vmatpush1.bf16.msra.mxu1 %v14364_v10  ;;  %v14396_v30 = vcombine.low %v777_v31, %v785_v36  ;;  %v81_v10 = vld [vmem:[#allocation2 + $0x148] sm:$0xff]  ;;  %v14412_v55 = vcombine.low %v793_v62, %v801_v50  ;;  %v14427_v56 = vcombine.high %v808_v13, %v816_v39 }
  0xfe   :  { %7348 = vmatprep.subr.bf16.mxu0 %v14379_v63  ;;  %8120 = vmatprep.subr.bf16.mxu1 %v14381_v8  ;;  %v85_v63 = vld [vmem:[#allocation2 + $0x168] sm:$0xff]  ;;  %v14410_v8 = vcombine.low %v792_v19, %v800_v23  ;;  %v16681_v31 = vcombine.low %v73_v11, %v77_v26  ;;  %v14429_v36 = vcombine.high %v809_v16, %v817_v27  ;;  %v840_v11 = vld [vmem:[#allocation5 + $0x1500] sm:$0xff] }
  0xff   :  { %v848_v26 = vld [vmem:[#allocation5 + $0x1540] sm:$0xff]  ;;  %v841_v23 = vld [vmem:[#allocation5 + $0x1508] sm:$0xff] }
 0x100   :  { %18466 = vst [vmem:[#allocation27_spill] sm:$0xff] %v16681_v31  ;;  %v849_v62 = vld [vmem:[#allocation5 + $0x1548] sm:$0xff] }
 0x101   :  { %7349 = vmatpush1.bf16.msra.mxu0 %v14378_v12  ;;  %8121 = vmatpush1.bf16.msra.mxu1 %v14380_v15  ;;  %v824_v12 = vld [vmem:[#allocation5 + $0x1480] sm:$0xff] }
 0x102   :  { %7350 = vmatprep.subr.bf16.mxu0 %v14395_v4  ;;  %8122 = vmatprep.subr.bf16.mxu1 %v14397_v24  ;;  %v832_v15 = vld [vmem:[#allocation5 + $0x14c0] sm:$0xff]  ;;  %v16683_v4 = vcombine.high %v81_v10, %v85_v63  ;;  %v825_v24 = vld [vmem:[#allocation5 + $0x1488] sm:$0xff] }
 0x103   :  { %7208 = vmatmul.mubr.bf16.gmra.mrb[12].mxu0 %v16673_v6  ;;  %7980 = vmatmul.mubr.bf16.gmra.mrb[12].mxu1 %v16673_v6  ;;  %v833_v6 = vld [vmem:[#allocation5 + $0x14c8] sm:$0xff]  ;;  %v14443_v19 = vcombine.high %v824_v12, %v832_v15 }
 0x104   :  { %7217 = vmatprep.mubr.bf16.mxu0 %v16675_v54  ;;  %7989 = vmatprep.mubr.bf16.mxu1 %v16675_v54  ;;  %18467 = vst [vmem:[#allocation28_spill] sm:$0xff] %v16683_v4  ;;  %v14426_v54 = vcombine.low %v808_v13, %v816_v39  ;;  %v14445_v50 = vcombine.high %v825_v24, %v833_v6 }
 0x105   :  { %7351 = vmatpush1.bf16.msra.mxu0 %v14394_v29  ;;  %8123 = vmatpush1.bf16.msra.mxu1 %v14396_v30  ;;  %v14428_v29 = vcombine.low %v809_v16, %v817_v27  ;;  %v89_v30 = vld [vmem:[#allocation2 + $0x188] sm:$0xff]  ;;  %v14444_v13 = vcombine.low %v825_v24, %v833_v6  ;;  %v14459_v39 = vcombine.high %v840_v11, %v848_v26 }
 0x106   :  { %7352 = vmatprep.subr.bf16.mxu0 %v14411_v43  ;;  %8124 = vmatprep.subr.bf16.mxu1 %v14413_v7  ;;  %v93_v43 = vld [vmem:[#allocation2 + $0x1a8] sm:$0xff]  ;;  %v14442_v7 = vcombine.low %v824_v12, %v832_v15  ;;  %v16689_v16 = vcombine.low %v81_v10, %v85_v63  ;;  %v14461_v27 = vcombine.high %v841_v23, %v849_v62  ;;  %v872_v10 = vld [vmem:[#allocation5 + $0x1600] sm:$0xff] }
 0x107   :  { %v880_v63 = vld [vmem:[#allocation5 + $0x1640] sm:$0xff]  ;;  %v873_v15 = vld [vmem:[#allocation5 + $0x1608] sm:$0xff] }
 0x108   :  { %18468 = vst [vmem:[#allocation29_spill] sm:$0xff] %v16689_v16  ;;  %v881_v24 = vld [vmem:[#allocation5 + $0x1648] sm:$0xff] }
 0x109   :  { %7353 = vmatpush1.bf16.msra.mxu0 %v14410_v8  ;;  %8125 = vmatpush1.bf16.msra.mxu1 %v14412_v55  ;;  %v856_v8 = vld [vmem:[#allocation5 + $0x1580] sm:$0xff] }
 0x10a   :  { %7354 = vmatprep.subr.bf16.mxu0 %v14427_v56  ;;  %8126 = vmatprep.subr.bf16.mxu1 %v14429_v36  ;;  %v864_v55 = vld [vmem:[#allocation5 + $0x15c0] sm:$0xff]  ;;  %v16691_v56 = vcombine.high %v89_v30, %v93_v43  ;;  %v857_v36 = vld [vmem:[#allocation5 + $0x1588] sm:$0xff] }
 0x10b   :  { %7218 = vmatmul.mubr.bf16.gmra.mrb[16].mxu0 %v16681_v31  ;;  %7990 = vmatmul.mubr.bf16.gmra.mrb[16].mxu1 %v16681_v31  ;;  %v865_v31 = vld [vmem:[#allocation5 + $0x15c8] sm:$0xff]  ;;  %v14475_v12 = vcombine.high %v856_v8, %v864_v55 }
 0x10c   :  { %7227 = vmatprep.mubr.bf16.mxu0 %v16683_v4  ;;  %7999 = vmatprep.mubr.bf16.mxu1 %v16683_v4  ;;  %18469 = vst [vmem:[#allocation30_spill] sm:$0xff] %v16691_v56  ;;  %v14458_v4 = vcombine.low %v840_v11, %v848_v26  ;;  %v14477_v6 = vcombine.high %v857_v36, %v865_v31 }
 0x10d   :  { %7355 = vmatpush1.bf16.msra.mxu0 %v14426_v54  ;;  %8127 = vmatpush1.bf16.msra.mxu1 %v14428_v29  ;;  %v14460_v54 = vcombine.low %v841_v23, %v849_v62  ;;  %v97_v29 = vld [vmem:[#allocation2 + $0x1c8] sm:$0xff]  ;;  %v14476_v11 = vcombine.low %v857_v36, %v865_v31  ;;  %v14491_v26 = vcombine.high %v872_v10, %v880_v63 }
 0x10e   :  { %7356 = vmatprep.subr.bf16.mxu0 %v14443_v19  ;;  %8128 = vmatprep.subr.bf16.mxu1 %v14445_v50  ;;  %v101_v19 = vld [vmem:[#allocation2 + $0x1e8] sm:$0xff]  ;;  %v14474_v50 = vcombine.low %v856_v8, %v864_v55  ;;  %v16697_v23 = vcombine.low %v89_v30, %v93_v43  ;;  %v14493_v62 = vcombine.high %v873_v15, %v881_v24  ;;  %v904_v30 = vld [vmem:[#allocation5 + $0x1700] sm:$0xff] }
 0x10f   :  { %v912_v43 = vld [vmem:[#allocation5 + $0x1740] sm:$0xff]  ;;  %v905_v55 = vld [vmem:[#allocation5 + $0x1708] sm:$0xff] }
 0x110   :  { %18470 = vst [vmem:[#allocation31_spill] sm:$0xff] %v16697_v23  ;;  %v913_v36 = vld [vmem:[#allocation5 + $0x1748] sm:$0xff] }
 0x111   :  { %7357 = vmatpush1.bf16.msra.mxu0 %v14442_v7  ;;  %8129 = vmatpush1.bf16.msra.mxu1 %v14444_v13  ;;  %v888_v7 = vld [vmem:[#allocation5 + $0x1680] sm:$0xff] }
 0x112   :  { %7358 = vmatprep.subr.bf16.mxu0 %v14459_v39  ;;  %8130 = vmatprep.subr.bf16.mxu1 %v14461_v27  ;;  %v896_v13 = vld [vmem:[#allocation5 + $0x16c0] sm:$0xff]  ;;  %v16699_v39 = vcombine.high %v97_v29, %v101_v19  ;;  %v889_v27 = vld [vmem:[#allocation5 + $0x1688] sm:$0xff] }
 0x113   :  { %7228 = vmatmul.mubr.bf16.gmra.mrb[20].mxu0 %v16689_v16  ;;  %8000 = vmatmul.mubr.bf16.gmra.mrb[20].mxu1 %v16689_v16  ;;  %v897_v16 = vld [vmem:[#allocation5 + $0x16c8] sm:$0xff]  ;;  %v14507_v8 = vcombine.high %v888_v7, %v896_v13 }
 0x114   :  { %7237 = vmatprep.mubr.bf16.mxu0 %v16691_v56  ;;  %8009 = vmatprep.mubr.bf16.mxu1 %v16691_v56  ;;  %18471 = vst [vmem:[#allocation32_spill] sm:$0xff] %v16699_v39  ;;  %v14490_v56 = vcombine.low %v872_v10, %v880_v63  ;;  %v14509_v31 = vcombine.high %v889_v27, %v897_v16 }
 0x115   :  { %7359 = vmatpush1.bf16.msra.mxu0 %v14458_v4  ;;  %8131 = vmatpush1.bf16.msra.mxu1 %v14460_v54  ;;  %v14492_v4 = vcombine.low %v873_v15, %v881_v24  ;;  %v105_v54 = vld [vmem:[#allocation2 + $0x208] sm:$0xff]  ;;  %v14508_v10 = vcombine.low %v889_v27, %v897_v16  ;;  %v14523_v63 = vcombine.high %v904_v30, %v912_v43 }
 0x116   :  { %7360 = vmatprep.subr.bf16.mxu0 %v14475_v12  ;;  %8132 = vmatprep.subr.bf16.mxu1 %v14477_v6  ;;  %v109_v12 = vld [vmem:[#allocation2 + $0x228] sm:$0xff]  ;;  %v14506_v6 = vcombine.low %v888_v7, %v896_v13  ;;  %v16705_v15 = vcombine.low %v97_v29, %v101_v19  ;;  %v14525_v24 = vcombine.high %v905_v55, %v913_v36 }
 0x117   :  { %v113_v29 = vld [vmem:[#allocation2 + $0x248] sm:$0xff] }
 0x118   :  { %18472 = vst [vmem:[#allocation33_spill] sm:$0xff] %v16705_v15  ;;  %v117_v19 = vld [vmem:[#allocation2 + $0x268] sm:$0xff] }
 0x119   :  { %7361 = vmatpush1.bf16.msra.mxu0 %v14474_v50  ;;  %8133 = vmatpush1.bf16.msra.mxu1 %v14476_v11  ;;  %v920_v50 = vld [vmem:[#allocation5 + $0x1780] sm:$0xff] }
 0x11a   :  { %7362 = vmatprep.subr.bf16.mxu0 %v14491_v26  ;;  %8134 = vmatprep.subr.bf16.mxu1 %v14493_v62  ;;  %v928_v11 = vld [vmem:[#allocation5 + $0x17c0] sm:$0xff]  ;;  %v16707_v26 = vcombine.high %v105_v54, %v109_v12  ;;  %v921_v62 = vld [vmem:[#allocation5 + $0x1788] sm:$0xff] }
 0x11b   :  { %7238 = vmatmul.mubr.bf16.gmra.mrb[24].mxu0 %v16697_v23  ;;  %8010 = vmatmul.mubr.bf16.gmra.mrb[24].mxu1 %v16697_v23  ;;  %v929_v23 = vld [vmem:[#allocation5 + $0x17c8] sm:$0xff]  ;;  %v14539_v7 = vcombine.high %v920_v50, %v928_v11  ;;  %v14538_v13 = vcombine.low %v920_v50, %v928_v11 }
 0x11c   :  { %7247 = vmatprep.mubr.bf16.mxu0 %v16699_v39  ;;  %8019 = vmatprep.mubr.bf16.mxu1 %v16699_v39  ;;  %18473 = vst [vmem:[#allocation34_spill] sm:$0xff] %v16707_v26  ;;  %v14522_v39 = vcombine.low %v904_v30, %v912_v43  ;;  %v14541_v16 = vcombine.high %v921_v62, %v929_v23  ;;  %v145_v11 = vld [vmem:[#allocation2 + $0x348] sm:$0xff] }
 0x11d   :  { %7363 = vmatpush1.bf16.msra.mxu0 %v14490_v56  ;;  %8135 = vmatpush1.bf16.msra.mxu1 %v14492_v4  ;;  %v14524_v56 = vcombine.low %v905_v55, %v913_v36  ;;  %v14540_v27 = vcombine.low %v921_v62, %v929_v23  ;;  %v14555_v4 = vcombine.high %v16636_v28, %v16638_v35  ;;  %v121_v23 = vld [vmem:[#allocation2 + $0x288] sm:$0xff] }
 0x11e   :  { %7364 = vmatprep.subr.bf16.mxu0 %v14507_v8  ;;  %8136 = vmatprep.subr.bf16.mxu1 %v14509_v31  ;;  %v16715_v8 = vcombine.low %v105_v54, %v109_v12  ;;  %v14557_v31 = vcombine.high %v16646_v45, %v16648_v49  ;;  %v16719_v30 = vcombine.high %v113_v29, %v117_v19  ;;  %v129_v36 = vld [vmem:[#allocation2 + $0x2c8] sm:$0xff] }
 0x11f   :  { %v16725_v43 = vcombine.low %v113_v29, %v117_v19  ;;  %v133_v54 = vld [vmem:[#allocation2 + $0x2e8] sm:$0xff] }
 0x120   :  { %18474 = vst [vmem:[#allocation35_spill] sm:$0xff] %v16715_v8  ;;  %18475 = vst [vmem:[#allocation36_spill] sm:$0xff] %v16719_v30  ;;  %v149_v62 = vld [vmem:[#allocation2 + $0x368] sm:$0xff] }
 0x121   :  { %7365 = vmatpush1.bf16.msra.mxu0 %v14506_v6  ;;  %8137 = vmatpush1.bf16.msra.mxu1 %v14508_v10  ;;  %18476 = vst [vmem:[#allocation37_spill] sm:$0xff] %v16725_v43  ;;  %v16735_v6 = vcombine.high %v129_v36, %v133_v54  ;;  %v137_v10 = vld [vmem:[#allocation2 + $0x308] sm:$0xff]  ;;  %v16757_v19 = vcombine.low %v145_v11, %v149_v62 }
 0x122   :  { %7366 = vmatprep.subr.bf16.mxu0 %v14523_v63  ;;  %8138 = vmatprep.subr.bf16.mxu1 %v14525_v24  ;;  %v141_v63 = vld [vmem:[#allocation2 + $0x328] sm:$0xff]  ;;  %v16741_v24 = vcombine.low %v129_v36, %v133_v54  ;;  %v46_v36 = vld [vmem:[#allocation2 + $0x30] sm:$0xff] }
 0x123   :  { %7248 = vmatmul.mubr.bf16.gmra.mrb[28].mxu0 %v16705_v15  ;;  %8020 = vmatmul.mubr.bf16.gmra.mrb[28].mxu1 %v16705_v15  ;;  %18479 = vst [vmem:[#allocation40_spill] sm:$0xff] %v16735_v6  ;;  %v16743_v50 = vcombine.high %v137_v10, %v141_v63  ;;  %v157_v29 = vld [vmem:[#allocation2 + $0x3a8] sm:$0xff]  ;;  %18484 = vst [vmem:[#allocation45_spill] sm:$0xff] %v16757_v19 }
 0x124   :  { %7257 = vmatprep.mubr.bf16.mxu0 %v16707_v26  ;;  %8029 = vmatprep.mubr.bf16.mxu1 %v16707_v26  ;;  %18480 = vst [vmem:[#allocation41_spill] sm:$0xff] %v16741_v24  ;;  %v1017_v26 = vld [vmem:[#allocation5 + $0x1a88] sm:$0xff] }
 0x125   :  { %7367 = vmatpush1.bf16.msra.mxu0 %v14522_v39  ;;  %8139 = vmatpush1.bf16.msra.mxu1 %v14524_v56  ;;  %v125_v39 = vld [vmem:[#allocation2 + $0x2a8] sm:$0xff]  ;;  %18481 = vst [vmem:[#allocation42_spill] sm:$0xff] %v16743_v50  ;;  %v16749_v56 = vcombine.low %v137_v10, %v141_v63  ;;  %v50_v63 = vld [vmem:[#allocation2 + $0x50] sm:$0xff] }
 0x126   :  { %7368 = vmatprep.subr.bf16.mxu0 %v14539_v7  ;;  %8140 = vmatprep.subr.bf16.mxu1 %v14541_v16  ;;  %v16727_v55 = vcombine.high %v121_v23, %v125_v39  ;;  %v16733_v12 = vcombine.low %v121_v23, %v125_v39  ;;  %v16751_v7 = vcombine.high %v145_v11, %v149_v62  ;;  %v153_v16 = vld [vmem:[#allocation2 + $0x388] sm:$0xff]  ;;  %v42_v39 = vld [vmem:[#allocation2 + $0x10] sm:$0xff] }
 0x127   :  { %18482 = vst [vmem:[#allocation43_spill] sm:$0xff] %v16749_v56  ;;  %v16775_v10 = vcombine.high %v42_v39, %v46_v36  ;;  %v54_v11 = vld [vmem:[#allocation2 + $0x70] sm:$0xff]  ;;  %v16781_v62 = vcombine.low %v42_v39, %v46_v36  ;;  %v18492_v39 = vcombine.low %v16636_v28, %v16638_v35  ;;  %v16802_v35 = vld [vmem:[#allocation5 + $0x58] sm:$0xff]  ;;  %v1025_v15 = vld [vmem:[#allocation5 + $0x1ac8] sm:$0xff] }
 0x128   :  { %18477 = vst [vmem:[#allocation38_spill] sm:$0xff] %v16727_v55  ;;  %18478 = vst [vmem:[#allocation39_spill] sm:$0xff] %v16733_v12 }
 0x129   :  { %7369 = vmatpush1.bf16.msra.mxu0 %v14538_v13  ;;  %8141 = vmatpush1.bf16.msra.mxu1 %v14540_v27  ;;  %18483 = vst [vmem:[#allocation44_spill] sm:$0xff] %v16751_v7  ;;  %v16759_v13 = vcombine.high %v153_v16, %v157_v29  ;;  %v161_v27 = vld [vmem:[#allocation2 + $0x3c8] sm:$0xff]  ;;  %18489 = vst [vmem:[#allocation50_spill] sm:$0xff] %v16775_v10 }
 0x12a   :  { %7531 = vmatprep.subr.bf16.mxu0 %v14555_v4  ;;  %8303 = vmatprep.subr.bf16.mxu1 %v14557_v31  ;;  %v165_v4 = vld [vmem:[#allocation2 + $0x3e8] sm:$0xff]  ;;  %v16765_v31 = vcombine.low %v153_v16, %v157_v29  ;;  %18490 = vst [vmem:[#allocation51_spill] sm:$0xff] %v16781_v62  ;;  %v952_v16 = vld [vmem:[#allocation5 + $0x1880] sm:$0xff] }
 0x12b   :  { %7258 = vmatmul.mubr.bf16.gmra.mrb[32].mxu0 %v16715_v8  ;;  %8030 = vmatmul.mubr.bf16.gmra.mrb[32].mxu1 %v16715_v8  ;;  %18485 = vst [vmem:[#allocation46_spill] sm:$0xff] %v16759_v13  ;;  %v16767_v23 = vcombine.high %v161_v27, %v165_v4  ;;  %v16773_v54 = vcombine.low %v161_v27, %v165_v4  ;;  %v960_v29 = vld [vmem:[#allocation5 + $0x18c0] sm:$0xff] }
 0x12c   :  { %7267 = vmatprep.mubr.bf16.mxu0 %v16719_v30  ;;  %8039 = vmatprep.mubr.bf16.mxu1 %v16719_v30  ;;  %18486 = vst [vmem:[#allocation47_spill] sm:$0xff] %v16765_v31  ;;  %v16783_v27 = vcombine.high %v50_v63, %v54_v11  ;;  %v14571_v4 = vcombine.high %v952_v16, %v960_v29 }
 0x12d   :  { %18487 = vst [vmem:[#allocation48_spill] sm:$0xff] %v16767_v23  ;;  %18488 = vst [vmem:[#allocation49_spill] sm:$0xff] %v16773_v54  ;;  %v14570_v36 = vcombine.low %v952_v16, %v960_v29  ;;  %v1000_v29 = vld [vmem:[#allocation5 + $0x1a00] sm:$0xff] }
 0x12e   :  { %18491 = vst [vmem:[#allocation52_spill] sm:$0xff] %v16783_v27 }
 0x133   :  { %7268 = vmatmul.mubr.bf16.gmra.mrb[36].mxu0 %v16725_v43  ;;  %8040 = vmatmul.mubr.bf16.gmra.mrb[36].mxu1 %v16725_v43 }
 0x134   :  { %7277 = vmatprep.mubr.bf16.mxu0 %v16727_v55  ;;  %8049 = vmatprep.mubr.bf16.mxu1 %v16727_v55  ;;  %v58_v55 = vld [vmem:[#allocation2 + $0x90] sm:$0xff] }
 0x13b   :  { %7278 = vmatmul.mubr.bf16.gmra.mrb[40].mxu0 %v16733_v12  ;;  %8050 = vmatmul.mubr.bf16.gmra.mrb[40].mxu1 %v16733_v12 }
 0x13c   :  { %7287 = vmatprep.mubr.bf16.mxu0 %v16735_v6  ;;  %8059 = vmatprep.mubr.bf16.mxu1 %v16735_v6  ;;  %v18493_v6 = vcombine.low %v16646_v45, %v16648_v49  ;;  %v16807_v45 = vcombine.low %v50_v63, %v54_v11  ;;  %v984_v49 = vld [vmem:[#allocation5 + $0x1980] sm:$0xff]  ;;  %v1009_v11 = vld [vmem:[#allocation5 + $0x1a48] sm:$0xff] }
 0x13d   :  { %v1008_v63 = vld [vmem:[#allocation5 + $0x1a40] sm:$0xff] }
 0x13e   :  { %18494 = vst [vmem:[#allocation53_spill] sm:$0xff] %v16807_v45 }
 0x143   :  { %7288 = vmatmul.mubr.bf16.gmra.mrb[44].mxu0 %v16741_v24  ;;  %8060 = vmatmul.mubr.bf16.gmra.mrb[44].mxu1 %v16741_v24  ;;  %v16794_v24 = vld [vmem:[#allocation5 + $0x18] sm:$0xff] }
 0x144   :  { %7297 = vmatprep.mubr.bf16.mxu0 %v16743_v50  ;;  %8069 = vmatprep.mubr.bf16.mxu1 %v16743_v50  ;;  %v16792_v50 = vld [vmem:[#allocation5 + $0x50] sm:$0xff] }
 0x14b   :  { %7298 = vmatmul.mubr.bf16.gmra.mrb[48].mxu0 %v16749_v56  ;;  %8070 = vmatmul.mubr.bf16.gmra.mrb[48].mxu1 %v16749_v56  ;;  %v977_v56 = vld [vmem:[#allocation5 + $0x1948] sm:$0xff] }
 0x14c   :  { %7307 = vmatprep.mubr.bf16.mxu0 %v16751_v7  ;;  %8079 = vmatprep.mubr.bf16.mxu1 %v16751_v7  ;;  %v969_v7 = vld [vmem:[#allocation5 + $0x1908] sm:$0xff] }
 0x14d   :  { %v14589_v16 = vcombine.high %v969_v7, %v977_v56  ;;  %v14588_v30 = vcombine.low %v969_v7, %v977_v56  ;;  %v14619_v7 = vcombine.high %v1000_v29, %v1008_v63 }
 0x153   :  { %7308 = vmatmul.mubr.bf16.gmra.mrb[52].mxu0 %v16757_v19  ;;  %8080 = vmatmul.mubr.bf16.gmra.mrb[52].mxu1 %v16757_v19  ;;  %v976_v19 = vld [vmem:[#allocation5 + $0x1940] sm:$0xff] }
 0x154   :  { %7317 = vmatprep.mubr.bf16.mxu0 %v16759_v13  ;;  %8089 = vmatprep.mubr.bf16.mxu1 %v16759_v13  ;;  %v968_v13 = vld [vmem:[#allocation5 + $0x1900] sm:$0xff] }
 0x155   :  { %v14587_v43 = vcombine.high %v968_v13, %v976_v19  ;;  %v14586_v28 = vcombine.low %v968_v13, %v976_v19  ;;  %v70_v19 = vld [vmem:[#allocation2 + $0xf0] sm:$0xff] }
 0x15b   :  { %7318 = vmatmul.mubr.bf16.gmra.mrb[56].mxu0 %v16765_v31  ;;  %8090 = vmatmul.mubr.bf16.gmra.mrb[56].mxu1 %v16765_v31  ;;  %v961_v31 = vld [vmem:[#allocation5 + $0x18c8] sm:$0xff] }
 0x15c   :  { %7327 = vmatprep.mubr.bf16.mxu0 %v16767_v23  ;;  %8099 = vmatprep.mubr.bf16.mxu1 %v16767_v23  ;;  %v953_v23 = vld [vmem:[#allocation5 + $0x1888] sm:$0xff] }
 0x15d   :  { %v14572_v12 = vcombine.low %v953_v23, %v961_v31 }
 0x163   :  { %7328 = vmatmul.mubr.bf16.gmra.mrb[60].mxu0 %v16773_v54  ;;  %8100 = vmatmul.mubr.bf16.gmra.mrb[60].mxu1 %v16773_v54  ;;  %v14573_v54 = vcombine.high %v953_v23, %v961_v31  ;;  %v985_v23 = vld [vmem:[#allocation5 + $0x1988] sm:$0xff] }
 0x164   :  { %7370 = vmatprep.mubr.bf16.mxu0 %v16775_v10  ;;  %8142 = vmatprep.mubr.bf16.mxu1 %v16775_v10  ;;  %v16790_v10 = vld [vmem:[#allocation5 + $0x10] sm:$0xff] }
 0x16b   :  { %7371 = vmatmul.mubr.bf16.vlgmr.msra.gmra.mrb[0].mxu0 %v16781_v62  ;;  %8143 = vmatmul.mubr.bf16.vlgmr.msra.gmra.mrb[0].mxu1 %v16781_v62  ;;  %v62_v62 = vld [vmem:[#allocation2 + $0xb0] sm:$0xff] }
 0x16c   :  { %7532 = vmatpush1.bf16.msra.mxu0 %v18492_v39  ;;  %8304 = vmatpush1.bf16.msra.mxu1 %v18493_v6  ;;  %v992_v6 = vld [vmem:[#allocation5 + $0x19c0] sm:$0xff]  ;;  %v16809_v31 = vcombine.high %v58_v55, %v62_v62  ;;  %v993_v39 = vld [vmem:[#allocation5 + $0x19c8] sm:$0xff]  ;;  %v16815_v13 = vcombine.low %v58_v55, %v62_v62 }
 0x16d   :  { %7380 = vmatprep.mubr.bf16.mxu0 %v16783_v27  ;;  %8152 = vmatprep.mubr.bf16.mxu1 %v16783_v27  ;;  %v14605_v27 = vcombine.high %v985_v23, %v993_v39  ;;  %v14604_v56 = vcombine.low %v985_v23, %v993_v39  ;;  %v1032_v55 = vld [vmem:[#allocation5 + $0x1b00] sm:$0xff]  ;;  %v74_v23 = vld [vmem:[#allocation2 + $0x110] sm:$0xff] }
 0x16e   :  { %7533 = vmatprep.subr.bf16.mxu0 %v14571_v4  ;;  %8305 = vmatprep.subr.bf16.mxu1 %v14573_v54  ;;  %18495 = vst [vmem:[#allocation54_spill] sm:$0xff] %v16809_v31  ;;  %v14603_v4 = vcombine.high %v984_v49, %v992_v6  ;;  %v1001_v54 = vld [vmem:[#allocation5 + $0x1a08] sm:$0xff]  ;;  %18496 = vst [vmem:[#allocation55_spill] sm:$0xff] %v16815_v13  ;;  %v1040_v62 = vld [vmem:[#allocation5 + $0x1b40] sm:$0xff] }
 0x170   :  { %7534 = vmatpush1.bf16.msra.mxu0 %v14570_v36  ;;  %8306 = vmatpush1.bf16.msra.mxu1 %v14572_v12  ;;  %v66_v12 = vld [vmem:[#allocation2 + $0xd0] sm:$0xff]  ;;  %v14621_v36 = vcombine.high %v1001_v54, %v1009_v11 }
 0x171   :  { %7535 = vmatprep.subr.bf16.mxu0 %v14587_v43  ;;  %8307 = vmatprep.subr.bf16.mxu1 %v14589_v16  ;;  %v14602_v43 = vcombine.low %v984_v49, %v992_v6  ;;  %v1016_v16 = vld [vmem:[#allocation5 + $0x1a80] sm:$0xff]  ;;  %v16817_v8 = vcombine.high %v66_v12, %v70_v19  ;;  %v1041_v6 = vld [vmem:[#allocation5 + $0x1b48] sm:$0xff] }
 0x173   :  { %7381 = vmatmul.mubr.bf16.gmra.mrb[4].mxu0 %v16807_v45  ;;  %8153 = vmatmul.mubr.bf16.gmra.mrb[4].mxu1 %v16807_v45  ;;  %v1024_v45 = vld [vmem:[#allocation5 + $0x1ac0] sm:$0xff]  ;;  %18497 = vst [vmem:[#allocation56_spill] sm:$0xff] %v16817_v8 }
 0x174   :  { %7390 = vmatprep.mubr.bf16.mxu0 %v16809_v31  ;;  %8162 = vmatprep.mubr.bf16.mxu1 %v16809_v31  ;;  %v14618_v31 = vcombine.low %v1000_v29, %v1008_v63  ;;  %v14635_v49 = vcombine.high %v1016_v16, %v1024_v45  ;;  %v78_v29 = vld [vmem:[#allocation2 + $0x130] sm:$0xff]  ;;  %v14634_v39 = vcombine.low %v1016_v16, %v1024_v45  ;;  %v1073_v16 = vld [vmem:[#allocation5 + $0x1c48] sm:$0xff] }
 0x175   :  { %7536 = vmatpush1.bf16.msra.mxu0 %v14586_v28  ;;  %8308 = vmatpush1.bf16.msra.mxu1 %v14588_v30  ;;  %v14620_v28 = vcombine.low %v1001_v54, %v1009_v11  ;;  %v14637_v30 = vcombine.high %v1017_v26, %v1025_v15  ;;  %v14651_v63 = vcombine.high %v1032_v55, %v1040_v62 }
 0x176   :  { %7537 = vmatprep.subr.bf16.mxu0 %v14603_v4  ;;  %8309 = vmatprep.subr.bf16.mxu1 %v14605_v27  ;;  %v1033_v27 = vld [vmem:[#allocation5 + $0x1b08] sm:$0xff]  ;;  %v14636_v4 = vcombine.low %v1017_v26, %v1025_v15  ;;  %v16823_v54 = vcombine.low %v66_v12, %v70_v19  ;;  %v1064_v26 = vld [vmem:[#allocation5 + $0x1c00] sm:$0xff] }
 0x177   :  { %v14653_v11 = vcombine.high %v1033_v27, %v1041_v6  ;;  %v1072_v12 = vld [vmem:[#allocation5 + $0x1c40] sm:$0xff]  ;;  %v1065_v19 = vld [vmem:[#allocation5 + $0x1c08] sm:$0xff] }
 0x178   :  { %18498 = vst [vmem:[#allocation57_spill] sm:$0xff] %v16823_v54 }
 0x179   :  { %7538 = vmatpush1.bf16.msra.mxu0 %v14602_v43  ;;  %8310 = vmatpush1.bf16.msra.mxu1 %v14604_v56  ;;  %v1048_v43 = vld [vmem:[#allocation5 + $0x1b80] sm:$0xff] }
 0x17a   :  { %7539 = vmatprep.subr.bf16.mxu0 %v14619_v7  ;;  %8311 = vmatprep.subr.bf16.mxu1 %v14621_v36  ;;  %v1056_v56 = vld [vmem:[#allocation5 + $0x1bc0] sm:$0xff]  ;;  %v16825_v7 = vcombine.high %v74_v23, %v78_v29  ;;  %v1049_v36 = vld [vmem:[#allocation5 + $0x1b88] sm:$0xff] }
 0x17b   :  { %7391 = vmatmul.mubr.bf16.gmra.mrb[8].mxu0 %v16815_v13  ;;  %8163 = vmatmul.mubr.bf16.gmra.mrb[8].mxu1 %v16815_v13  ;;  %v1057_v13 = vld [vmem:[#allocation5 + $0x1bc8] sm:$0xff]  ;;  %v14667_v45 = vcombine.high %v1048_v43, %v1056_v56 }
 0x17c   :  { %7400 = vmatprep.mubr.bf16.mxu0 %v16817_v8  ;;  %8172 = vmatprep.mubr.bf16.mxu1 %v16817_v8  ;;  %18499 = vst [vmem:[#allocation58_spill] sm:$0xff] %v16825_v7  ;;  %v14650_v8 = vcombine.low %v1032_v55, %v1040_v62  ;;  %v14669_v15 = vcombine.high %v1049_v36, %v1057_v13 }
 0x17d   :  { %7540 = vmatpush1.bf16.msra.mxu0 %v14618_v31  ;;  %8312 = vmatpush1.bf16.msra.mxu1 %v14620_v28  ;;  %v14652_v31 = vcombine.low %v1033_v27, %v1041_v6  ;;  %v82_v28 = vld [vmem:[#allocation2 + $0x150] sm:$0xff]  ;;  %v14668_v55 = vcombine.low %v1049_v36, %v1057_v13  ;;  %v14683_v62 = vcombine.high %v1064_v26, %v1072_v12  ;;  %v1105_v36 = vld [vmem:[#allocation5 + $0x1d48] sm:$0xff] }
 0x17e   :  { %7541 = vmatprep.subr.bf16.mxu0 %v14635_v49  ;;  %8313 = vmatprep.subr.bf16.mxu1 %v14637_v30  ;;  %v86_v49 = vld [vmem:[#allocation2 + $0x170] sm:$0xff]  ;;  %v14666_v30 = vcombine.low %v1048_v43, %v1056_v56  ;;  %v16831_v27 = vcombine.low %v74_v23, %v78_v29  ;;  %v14685_v6 = vcombine.high %v1065_v19, %v1073_v16  ;;  %v1096_v23 = vld [vmem:[#allocation5 + $0x1d00] sm:$0xff]  ;;  %v1097_v56 = vld [vmem:[#allocation5 + $0x1d08] sm:$0xff] }
 0x17f   :  { %v1104_v29 = vld [vmem:[#allocation5 + $0x1d40] sm:$0xff] }
 0x180   :  { %18500 = vst [vmem:[#allocation59_spill] sm:$0xff] %v16831_v27 }
 0x181   :  { %7542 = vmatpush1.bf16.msra.mxu0 %v14634_v39  ;;  %8314 = vmatpush1.bf16.msra.mxu1 %v14636_v4  ;;  %v1080_v39 = vld [vmem:[#allocation5 + $0x1c80] sm:$0xff] }
 0x182   :  { %7543 = vmatprep.subr.bf16.mxu0 %v14651_v63  ;;  %8315 = vmatprep.subr.bf16.mxu1 %v14653_v11  ;;  %v1088_v4 = vld [vmem:[#allocation5 + $0x1cc0] sm:$0xff]  ;;  %v16833_v63 = vcombine.high %v82_v28, %v86_v49  ;;  %v1081_v11 = vld [vmem:[#allocation5 + $0x1c88] sm:$0xff] }
 0x183   :  { %7401 = vmatmul.mubr.bf16.gmra.mrb[12].mxu0 %v16823_v54  ;;  %8173 = vmatmul.mubr.bf16.gmra.mrb[12].mxu1 %v16823_v54  ;;  %v1089_v54 = vld [vmem:[#allocation5 + $0x1cc8] sm:$0xff]  ;;  %v14699_v43 = vcombine.high %v1080_v39, %v1088_v4 }
 0x184   :  { %7410 = vmatprep.mubr.bf16.mxu0 %v16825_v7  ;;  %8182 = vmatprep.mubr.bf16.mxu1 %v16825_v7  ;;  %18501 = vst [vmem:[#allocation60_spill] sm:$0xff] %v16833_v63  ;;  %v14682_v7 = vcombine.low %v1064_v26, %v1072_v12  ;;  %v14701_v13 = vcombine.high %v1081_v11, %v1089_v54 }
 0x185   :  { %7544 = vmatpush1.bf16.msra.mxu0 %v14650_v8  ;;  %8316 = vmatpush1.bf16.msra.mxu1 %v14652_v31  ;;  %v14684_v8 = vcombine.low %v1065_v19, %v1073_v16  ;;  %v90_v31 = vld [vmem:[#allocation2 + $0x190] sm:$0xff]  ;;  %v14700_v26 = vcombine.low %v1081_v11, %v1089_v54  ;;  %v14715_v12 = vcombine.high %v1096_v23, %v1104_v29  ;;  %v1137_v11 = vld [vmem:[#allocation5 + $0x1e48] sm:$0xff] }
 0x186   :  { %7545 = vmatprep.subr.bf16.mxu0 %v14667_v45  ;;  %8317 = vmatprep.subr.bf16.mxu1 %v14669_v15  ;;  %v94_v45 = vld [vmem:[#allocation2 + $0x1b0] sm:$0xff]  ;;  %v14698_v15 = vcombine.low %v1080_v39, %v1088_v4  ;;  %v16839_v19 = vcombine.low %v82_v28, %v86_v49  ;;  %v14717_v16 = vcombine.high %v1097_v56, %v1105_v36  ;;  %v1128_v28 = vld [vmem:[#allocation5 + $0x1e00] sm:$0xff]  ;;  %v1129_v4 = vld [vmem:[#allocation5 + $0x1e08] sm:$0xff] }
 0x187   :  { %v1136_v49 = vld [vmem:[#allocation5 + $0x1e40] sm:$0xff] }
 0x188   :  { %18502 = vst [vmem:[#allocation61_spill] sm:$0xff] %v16839_v19 }
 0x189   :  { %7546 = vmatpush1.bf16.msra.mxu0 %v14666_v30  ;;  %8318 = vmatpush1.bf16.msra.mxu1 %v14668_v55  ;;  %v1112_v30 = vld [vmem:[#allocation5 + $0x1d80] sm:$0xff] }
 0x18a   :  { %7547 = vmatprep.subr.bf16.mxu0 %v14683_v62  ;;  %8319 = vmatprep.subr.bf16.mxu1 %v14685_v6  ;;  %v1120_v55 = vld [vmem:[#allocation5 + $0x1dc0] sm:$0xff]  ;;  %v16841_v62 = vcombine.high %v90_v31, %v94_v45  ;;  %v1113_v6 = vld [vmem:[#allocation5 + $0x1d88] sm:$0xff] }
 0x18b   :  { %7411 = vmatmul.mubr.bf16.gmra.mrb[16].mxu0 %v16831_v27  ;;  %8183 = vmatmul.mubr.bf16.gmra.mrb[16].mxu1 %v16831_v27  ;;  %v1121_v27 = vld [vmem:[#allocation5 + $0x1dc8] sm:$0xff]  ;;  %v14731_v39 = vcombine.high %v1112_v30, %v1120_v55 }
 0x18c   :  { %7420 = vmatprep.mubr.bf16.mxu0 %v16833_v63  ;;  %8192 = vmatprep.mubr.bf16.mxu1 %v16833_v63  ;;  %18503 = vst [vmem:[#allocation62_spill] sm:$0xff] %v16841_v62  ;;  %v14714_v63 = vcombine.low %v1096_v23, %v1104_v29  ;;  %v14733_v54 = vcombine.high %v1113_v6, %v1121_v27 }
 0x18d   :  { %7548 = vmatpush1.bf16.msra.mxu0 %v14682_v7  ;;  %8320 = vmatpush1.bf16.msra.mxu1 %v14684_v8  ;;  %v14716_v7 = vcombine.low %v1097_v56, %v1105_v36  ;;  %v98_v8 = vld [vmem:[#allocation2 + $0x1d0] sm:$0xff]  ;;  %v14732_v23 = vcombine.low %v1113_v6, %v1121_v27  ;;  %v14747_v29 = vcombine.high %v1128_v28, %v1136_v49  ;;  %v1169_v6 = vld [vmem:[#allocation5 + $0x1f48] sm:$0xff] }
 0x18e   :  { %7549 = vmatprep.subr.bf16.mxu0 %v14699_v43  ;;  %8321 = vmatprep.subr.bf16.mxu1 %v14701_v13  ;;  %v102_v43 = vld [vmem:[#allocation2 + $0x1f0] sm:$0xff]  ;;  %v14730_v13 = vcombine.low %v1112_v30, %v1120_v55  ;;  %v16847_v56 = vcombine.low %v90_v31, %v94_v45  ;;  %v14749_v36 = vcombine.high %v1129_v4, %v1137_v11  ;;  %v1160_v31 = vld [vmem:[#allocation5 + $0x1f00] sm:$0xff]  ;;  %v1161_v55 = vld [vmem:[#allocation5 + $0x1f08] sm:$0xff] }
 0x18f   :  { %v1168_v45 = vld [vmem:[#allocation5 + $0x1f40] sm:$0xff] }
 0x190   :  { %18504 = vst [vmem:[#allocation63_spill] sm:$0xff] %v16847_v56 }
 0x191   :  { %7550 = vmatpush1.bf16.msra.mxu0 %v14698_v15  ;;  %8322 = vmatpush1.bf16.msra.mxu1 %v14700_v26  ;;  %v1144_v15 = vld [vmem:[#allocation5 + $0x1e80] sm:$0xff] }
 0x192   :  { %7551 = vmatprep.subr.bf16.mxu0 %v14715_v12  ;;  %8323 = vmatprep.subr.bf16.mxu1 %v14717_v16  ;;  %v1152_v26 = vld [vmem:[#allocation5 + $0x1ec0] sm:$0xff]  ;;  %v16849_v12 = vcombine.high %v98_v8, %v102_v43  ;;  %v1145_v16 = vld [vmem:[#allocation5 + $0x1e88] sm:$0xff] }
 0x193   :  { %7421 = vmatmul.mubr.bf16.gmra.mrb[20].mxu0 %v16839_v19  ;;  %8193 = vmatmul.mubr.bf16.gmra.mrb[20].mxu1 %v16839_v19  ;;  %v1153_v19 = vld [vmem:[#allocation5 + $0x1ec8] sm:$0xff]  ;;  %v14763_v30 = vcombine.high %v1144_v15, %v1152_v26 }
 0x194   :  { %7430 = vmatprep.mubr.bf16.mxu0 %v16841_v62  ;;  %8202 = vmatprep.mubr.bf16.mxu1 %v16841_v62  ;;  %18505 = vst [vmem:[#allocation64_spill] sm:$0xff] %v16849_v12  ;;  %v14746_v62 = vcombine.low %v1128_v28, %v1136_v49  ;;  %v14765_v27 = vcombine.high %v1145_v16, %v1153_v19 }
 0x195   :  { %7552 = vmatpush1.bf16.msra.mxu0 %v14714_v63  ;;  %8324 = vmatpush1.bf16.msra.mxu1 %v14716_v7  ;;  %v14748_v63 = vcombine.low %v1129_v4, %v1137_v11  ;;  %v106_v7 = vld [vmem:[#allocation2 + $0x210] sm:$0xff]  ;;  %v14764_v28 = vcombine.low %v1145_v16, %v1153_v19  ;;  %v14779_v49 = vcombine.high %v1160_v31, %v1168_v45 }
 0x196   :  { %7553 = vmatprep.subr.bf16.mxu0 %v14731_v39  ;;  %8325 = vmatprep.subr.bf16.mxu1 %v14733_v54  ;;  %v110_v39 = vld [vmem:[#allocation2 + $0x230] sm:$0xff]  ;;  %v14762_v54 = vcombine.low %v1144_v15, %v1152_v26  ;;  %v16855_v4 = vcombine.low %v98_v8, %v102_v43  ;;  %v14781_v11 = vcombine.high %v1161_v55, %v1169_v6 }
 0x197   :  { %v114_v8 = vld [vmem:[#allocation2 + $0x250] sm:$0xff] }
 0x198   :  { %18506 = vst [vmem:[#allocation65_spill] sm:$0xff] %v16855_v4  ;;  %v118_v43 = vld [vmem:[#allocation2 + $0x270] sm:$0xff] }
 0x199   :  { %7554 = vmatpush1.bf16.msra.mxu0 %v14730_v13  ;;  %8326 = vmatpush1.bf16.msra.mxu1 %v14732_v23  ;;  %v1176_v13 = vld [vmem:[#allocation5 + $0x1f80] sm:$0xff] }
 0x19a   :  { %7555 = vmatprep.subr.bf16.mxu0 %v14747_v29  ;;  %8327 = vmatprep.subr.bf16.mxu1 %v14749_v36  ;;  %v1184_v23 = vld [vmem:[#allocation5 + $0x1fc0] sm:$0xff]  ;;  %v16857_v29 = vcombine.high %v106_v7, %v110_v39  ;;  %v1177_v36 = vld [vmem:[#allocation5 + $0x1f88] sm:$0xff] }
 0x19b   :  { %7431 = vmatmul.mubr.bf16.gmra.mrb[24].mxu0 %v16847_v56  ;;  %8203 = vmatmul.mubr.bf16.gmra.mrb[24].mxu1 %v16847_v56  ;;  %v1185_v56 = vld [vmem:[#allocation5 + $0x1fc8] sm:$0xff]  ;;  %v14795_v15 = vcombine.high %v1176_v13, %v1184_v23  ;;  %v14794_v26 = vcombine.low %v1176_v13, %v1184_v23  ;;  %v146_v23 = vld [vmem:[#allocation2 + $0x350] sm:$0xff] }
 0x19c   :  { %7440 = vmatprep.mubr.bf16.mxu0 %v16849_v12  ;;  %8212 = vmatprep.mubr.bf16.mxu1 %v16849_v12  ;;  %18507 = vst [vmem:[#allocation66_spill] sm:$0xff] %v16857_v29  ;;  %v14778_v12 = vcombine.low %v1160_v31, %v1168_v45  ;;  %v14797_v19 = vcombine.high %v1177_v36, %v1185_v56 }
 0x19d   :  { %7556 = vmatpush1.bf16.msra.mxu0 %v14746_v62  ;;  %8328 = vmatpush1.bf16.msra.mxu1 %v14748_v63  ;;  %v14780_v62 = vcombine.low %v1161_v55, %v1169_v6  ;;  %v14796_v16 = vcombine.low %v1177_v36, %v1185_v56  ;;  %v13791_v63 = vcombine.high %v16790_v10, %v16792_v50  ;;  %v122_v56 = vld [vmem:[#allocation2 + $0x290] sm:$0xff] }
 0x19e   :  { %7557 = vmatprep.subr.bf16.mxu0 %v14763_v30  ;;  %8329 = vmatprep.subr.bf16.mxu1 %v14765_v27  ;;  %v16865_v30 = vcombine.low %v106_v7, %v110_v39  ;;  %v13793_v27 = vcombine.high %v16794_v24, %v16802_v35  ;;  %v16869_v31 = vcombine.high %v114_v8, %v118_v43  ;;  %v130_v6 = vld [vmem:[#allocation2 + $0x2d0] sm:$0xff] }
 0x19f   :  { %v16875_v45 = vcombine.low %v114_v8, %v118_v43  ;;  %v134_v7 = vld [vmem:[#allocation2 + $0x2f0] sm:$0xff] }
 0x1a0   :  { %18508 = vst [vmem:[#allocation67_spill] sm:$0xff] %v16865_v30  ;;  %18509 = vst [vmem:[#allocation68_spill] sm:$0xff] %v16869_v31  ;;  %v150_v36 = vld [vmem:[#allocation2 + $0x370] sm:$0xff] }
 0x1a1   :  { %7558 = vmatpush1.bf16.msra.mxu0 %v14762_v54  ;;  %8330 = vmatpush1.bf16.msra.mxu1 %v14764_v28  ;;  %18510 = vst [vmem:[#allocation69_spill] sm:$0xff] %v16875_v45  ;;  %v16885_v54 = vcombine.high %v130_v6, %v134_v7  ;;  %v138_v28 = vld [vmem:[#allocation2 + $0x310] sm:$0xff]  ;;  %v16907_v43 = vcombine.low %v146_v23, %v150_v36 }
 0x1a2   :  { %7559 = vmatprep.subr.bf16.mxu0 %v14779_v49  ;;  %8331 = vmatprep.subr.bf16.mxu1 %v14781_v11  ;;  %v142_v49 = vld [vmem:[#allocation2 + $0x330] sm:$0xff]  ;;  %v16891_v11 = vcombine.low %v130_v6, %v134_v7  ;;  %v47_v6 = vld [vmem:[#allocation2 + $0x38] sm:$0xff] }
 0x1a3   :  { %7441 = vmatmul.mubr.bf16.gmra.mrb[28].mxu0 %v16855_v4  ;;  %8213 = vmatmul.mubr.bf16.gmra.mrb[28].mxu1 %v16855_v4  ;;  %18513 = vst [vmem:[#allocation72_spill] sm:$0xff] %v16885_v54  ;;  %v16893_v13 = vcombine.high %v138_v28, %v142_v49  ;;  %v158_v8 = vld [vmem:[#allocation2 + $0x3b0] sm:$0xff]  ;;  %18518 = vst [vmem:[#allocation77_spill] sm:$0xff] %v16907_v43  ;;  %v259_v4 = vld [vmem:[#allocation5 + $0x2d8] sm:$0xff] }
 0x1a4   :  { %7450 = vmatprep.mubr.bf16.mxu0 %v16857_v29  ;;  %8222 = vmatprep.mubr.bf16.mxu1 %v16857_v29  ;;  %18514 = vst [vmem:[#allocation73_spill] sm:$0xff] %v16891_v11  ;;  %v251_v29 = vld [vmem:[#allocation5 + $0x298] sm:$0xff] }
 0x1a5   :  { %7560 = vmatpush1.bf16.msra.mxu0 %v14778_v12  ;;  %8332 = vmatpush1.bf16.msra.mxu1 %v14780_v62  ;;  %v126_v12 = vld [vmem:[#allocation2 + $0x2b0] sm:$0xff]  ;;  %18515 = vst [vmem:[#allocation74_spill] sm:$0xff] %v16893_v13  ;;  %v16899_v62 = vcombine.low %v138_v28, %v142_v49  ;;  %v51_v49 = vld [vmem:[#allocation2 + $0x58] sm:$0xff] }
 0x1a6   :  { %7561 = vmatprep.subr.bf16.mxu0 %v14795_v15  ;;  %8333 = vmatprep.subr.bf16.mxu1 %v14797_v19  ;;  %v16877_v55 = vcombine.high %v122_v56, %v126_v12  ;;  %v16883_v39 = vcombine.low %v122_v56, %v126_v12  ;;  %v16901_v15 = vcombine.high %v146_v23, %v150_v36  ;;  %v154_v19 = vld [vmem:[#allocation2 + $0x390] sm:$0xff]  ;;  %v43_v12 = vld [vmem:[#allocation2 + $0x18] sm:$0xff] }
 0x1a7   :  { %18516 = vst [vmem:[#allocation75_spill] sm:$0xff] %v16899_v62  ;;  %v16925_v28 = vcombine.high %v43_v12, %v47_v6  ;;  %v55_v23 = vld [vmem:[#allocation2 + $0x78] sm:$0xff]  ;;  %v16931_v36 = vcombine.low %v43_v12, %v47_v6  ;;  %v18526_v12 = vcombine.low %v16790_v10, %v16792_v50 }
 0x1a8   :  { %18511 = vst [vmem:[#allocation70_spill] sm:$0xff] %v16877_v55  ;;  %18512 = vst [vmem:[#allocation71_spill] sm:$0xff] %v16883_v39 }
 0x1a9   :  { %7562 = vmatpush1.bf16.msra.mxu0 %v14794_v26  ;;  %8334 = vmatpush1.bf16.msra.mxu1 %v14796_v16  ;;  %18517 = vst [vmem:[#allocation76_spill] sm:$0xff] %v16901_v15  ;;  %v16909_v26 = vcombine.high %v154_v19, %v158_v8  ;;  %v162_v16 = vld [vmem:[#allocation2 + $0x3d0] sm:$0xff]  ;;  %18523 = vst [vmem:[#allocation82_spill] sm:$0xff] %v16925_v28 }
 0x1aa   :  { %8496 = vmatprep.subr.bf16.mxu0 %v13791_v63  ;;  %9268 = vmatprep.subr.bf16.mxu1 %v13793_v27  ;;  %v166_v63 = vld [vmem:[#allocation2 + $0x3f0] sm:$0xff]  ;;  %v16915_v27 = vcombine.low %v154_v19, %v158_v8  ;;  %18524 = vst [vmem:[#allocation83_spill] sm:$0xff] %v16931_v36 }
 0x1ab   :  { %7451 = vmatmul.mubr.bf16.gmra.mrb[32].mxu0 %v16865_v30  ;;  %8223 = vmatmul.mubr.bf16.gmra.mrb[32].mxu1 %v16865_v30  ;;  %18519 = vst [vmem:[#allocation78_spill] sm:$0xff] %v16909_v26  ;;  %v16917_v56 = vcombine.high %v162_v16, %v166_v63  ;;  %v16923_v7 = vcombine.low %v162_v16, %v166_v63  ;;  %v186_v19 = vld [vmem:[#allocation5 + $0x90] sm:$0xff] }
 0x1ac   :  { %7460 = vmatprep.mubr.bf16.mxu0 %v16869_v31  ;;  %8232 = vmatprep.mubr.bf16.mxu1 %v16869_v31  ;;  %18520 = vst [vmem:[#allocation79_spill] sm:$0xff] %v16915_v27  ;;  %v194_v8 = vld [vmem:[#allocation5 + $0xd0] sm:$0xff]  ;;  %v16933_v16 = vcombine.high %v51_v49, %v55_v23  ;;  %v63_v31 = vld [vmem:[#allocation2 + $0xb8] sm:$0xff] }
 0x1ad   :  { %18521 = vst [vmem:[#allocation80_spill] sm:$0xff] %v16917_v56  ;;  %18522 = vst [vmem:[#allocation81_spill] sm:$0xff] %v16923_v7  ;;  %v13807_v63 = vcombine.high %v186_v19, %v194_v8  ;;  %v13806_v6 = vcombine.low %v186_v19, %v194_v8  ;;  %v16957_v19 = vcombine.low %v51_v49, %v55_v23  ;;  %v218_v8 = vld [vmem:[#allocation5 + $0x190] sm:$0xff]  ;;  %v243_v23 = vld [vmem:[#allocation5 + $0x258] sm:$0xff] }
 0x1ae   :  { %18525 = vst [vmem:[#allocation84_spill] sm:$0xff] %v16933_v16  ;;  %v242_v49 = vld [vmem:[#allocation5 + $0x250] sm:$0xff] }
 0x1af   :  { %18528 = vst [vmem:[#allocation85_spill] sm:$0xff] %v16957_v19 }
 0x1b3   :  { %7461 = vmatmul.mubr.bf16.gmra.mrb[36].mxu0 %v16875_v45  ;;  %8233 = vmatmul.mubr.bf16.gmra.mrb[36].mxu1 %v16875_v45 }
 0x1b4   :  { %7470 = vmatprep.mubr.bf16.mxu0 %v16877_v55  ;;  %8242 = vmatprep.mubr.bf16.mxu1 %v16877_v55  ;;  %v18527_v55 = vcombine.low %v16794_v24, %v16802_v35  ;;  %v219_v35 = vld [vmem:[#allocation5 + $0x198] sm:$0xff] }
 0x1bb   :  { %7471 = vmatmul.mubr.bf16.gmra.mrb[40].mxu0 %v16883_v39  ;;  %8243 = vmatmul.mubr.bf16.gmra.mrb[40].mxu1 %v16883_v39  ;;  %v16948_v39 = vld [vmem:[#allocation5 + $0x858] sm:$0xff] }
 0x1bc   :  { %7480 = vmatprep.mubr.bf16.mxu0 %v16885_v54  ;;  %8252 = vmatprep.mubr.bf16.mxu1 %v16885_v54  ;;  %v16946_v54 = vld [vmem:[#allocation5 + $0x818] sm:$0xff] }
 0x1c3   :  { %7481 = vmatmul.mubr.bf16.gmra.mrb[44].mxu0 %v16891_v11  ;;  %8253 = vmatmul.mubr.bf16.gmra.mrb[44].mxu1 %v16891_v11  ;;  %v234_v11 = vld [vmem:[#allocation5 + $0x210] sm:$0xff] }
 0x1c4   :  { %7490 = vmatprep.mubr.bf16.mxu0 %v16893_v13  ;;  %8262 = vmatprep.mubr.bf16.mxu1 %v16893_v13  ;;  %v16936_v13 = vld [vmem:[#allocation5 + $0x810] sm:$0xff] }
 0x1cb   :  { %7491 = vmatmul.mubr.bf16.gmra.mrb[48].mxu0 %v16899_v62  ;;  %8263 = vmatmul.mubr.bf16.gmra.mrb[48].mxu1 %v16899_v62  ;;  %v211_v62 = vld [vmem:[#allocation5 + $0x158] sm:$0xff] }
 0x1cc   :  { %7500 = vmatprep.mubr.bf16.mxu0 %v16901_v15  ;;  %8272 = vmatprep.mubr.bf16.mxu1 %v16901_v15  ;;  %v203_v15 = vld [vmem:[#allocation5 + $0x118] sm:$0xff] }
 0x1cd   :  { %v13825_v10 = vcombine.high %v203_v15, %v211_v62 }
 0x1d3   :  { %7501 = vmatmul.mubr.bf16.gmra.mrb[52].mxu0 %v16907_v43  ;;  %8273 = vmatmul.mubr.bf16.gmra.mrb[52].mxu1 %v16907_v43  ;;  %v210_v43 = vld [vmem:[#allocation5 + $0x150] sm:$0xff] }
 0x1d4   :  { %7510 = vmatprep.mubr.bf16.mxu0 %v16909_v26  ;;  %8282 = vmatprep.mubr.bf16.mxu1 %v16909_v26  ;;  %v202_v26 = vld [vmem:[#allocation5 + $0x110] sm:$0xff] }
 0x1d5   :  { %v13823_v30 = vcombine.high %v202_v26, %v210_v43 }
 0x1db   :  { %7511 = vmatmul.mubr.bf16.gmra.mrb[56].mxu0 %v16915_v27  ;;  %8283 = vmatmul.mubr.bf16.gmra.mrb[56].mxu1 %v16915_v27  ;;  %v195_v27 = vld [vmem:[#allocation5 + $0xd8] sm:$0xff] }
 0x1dc   :  { %7520 = vmatprep.mubr.bf16.mxu0 %v16917_v56  ;;  %8292 = vmatprep.mubr.bf16.mxu1 %v16917_v56  ;;  %v187_v56 = vld [vmem:[#allocation5 + $0x98] sm:$0xff] }
 0x1dd   :  { %v13808_v45 = vcombine.low %v187_v56, %v195_v27 }
 0x1e3   :  { %7521 = vmatmul.mubr.bf16.gmra.mrb[60].mxu0 %v16923_v7  ;;  %8293 = vmatmul.mubr.bf16.gmra.mrb[60].mxu1 %v16923_v7  ;;  %v13809_v7 = vcombine.high %v187_v56, %v195_v27  ;;  %v13822_v27 = vcombine.low %v202_v26, %v210_v43  ;;  %v13824_v56 = vcombine.low %v203_v15, %v211_v62  ;;  %v71_v43 = vld [vmem:[#allocation2 + $0xf8] sm:$0xff] }
 0x1e4   :  { %7563 = vmatprep.mubr.bf16.mxu0 %v16925_v28  ;;  %8335 = vmatprep.mubr.bf16.mxu1 %v16925_v28  ;;  %v16938_v28 = vld [vmem:[#allocation5 + $0x850] sm:$0xff]  ;;  %v13855_v15 = vcombine.high %v234_v11, %v242_v49 }
 0x1eb   :  { %7564 = vmatmul.mubr.bf16.vlgmr.msra.gmra.mrb[0].mxu0 %v16931_v36  ;;  %8336 = vmatmul.mubr.bf16.vlgmr.msra.gmra.mrb[0].mxu1 %v16931_v36  ;;  %v59_v36 = vld [vmem:[#allocation2 + $0x98] sm:$0xff] }
 0x1ec   :  { %8497 = vmatpush1.bf16.msra.mxu0 %v18526_v12  ;;  %9269 = vmatpush1.bf16.msra.mxu1 %v18527_v55  ;;  %v226_v12 = vld [vmem:[#allocation5 + $0x1d0] sm:$0xff]  ;;  %v16959_v24 = vcombine.high %v59_v36, %v63_v31  ;;  %v227_v55 = vld [vmem:[#allocation5 + $0x1d8] sm:$0xff]  ;;  %v16965_v26 = vcombine.low %v59_v36, %v63_v31 }
 0x1ed   :  { %7573 = vmatprep.mubr.bf16.mxu0 %v16933_v16  ;;  %8345 = vmatprep.mubr.bf16.mxu1 %v16933_v16  ;;  %v13839_v50 = vcombine.high %v218_v8, %v226_v12  ;;  %v13840_v62 = vcombine.low %v219_v35, %v227_v55  ;;  %v266_v31 = vld [vmem:[#allocation5 + $0x310] sm:$0xff] }
 0x1ee   :  { %8498 = vmatprep.subr.bf16.mxu0 %v13807_v63  ;;  %9270 = vmatprep.subr.bf16.mxu1 %v13809_v7  ;;  %18529 = vst [vmem:[#allocation86_spill] sm:$0xff] %v16959_v24  ;;  %v13841_v63 = vcombine.high %v219_v35, %v227_v55  ;;  %v235_v7 = vld [vmem:[#allocation5 + $0x218] sm:$0xff]  ;;  %18530 = vst [vmem:[#allocation87_spill] sm:$0xff] %v16965_v26  ;;  %v274_v36 = vld [vmem:[#allocation5 + $0x350] sm:$0xff] }
 0x1ef   :  { %v275_v35 = vld [vmem:[#allocation5 + $0x358] sm:$0xff] }
 0x1f0   :  { %8499 = vmatpush1.bf16.msra.mxu0 %v13806_v6  ;;  %9271 = vmatpush1.bf16.msra.mxu1 %v13808_v45  ;;  %v67_v45 = vld [vmem:[#allocation2 + $0xd8] sm:$0xff]  ;;  %v13857_v6 = vcombine.high %v235_v7, %v243_v23 }
 0x1f1   :  { %8500 = vmatprep.subr.bf16.mxu0 %v13823_v30  ;;  %9272 = vmatprep.subr.bf16.mxu1 %v13825_v10  ;;  %v13838_v30 = vcombine.low %v218_v8, %v226_v12  ;;  %v250_v10 = vld [vmem:[#allocation5 + $0x290] sm:$0xff]  ;;  %v16967_v16 = vcombine.high %v67_v45, %v71_v43  ;;  %v267_v12 = vld [vmem:[#allocation5 + $0x318] sm:$0xff] }
 0x1f2   :  { %v75_v55 = vld [vmem:[#allocation2 + $0x118] sm:$0xff] }
 0x1f3   :  { %7574 = vmatmul.mubr.bf16.gmra.mrb[4].mxu0 %v16957_v19  ;;  %8346 = vmatmul.mubr.bf16.gmra.mrb[4].mxu1 %v16957_v19  ;;  %v258_v19 = vld [vmem:[#allocation5 + $0x2d0] sm:$0xff]  ;;  %18531 = vst [vmem:[#allocation88_spill] sm:$0xff] %v16967_v16 }
 0x1f4   :  { %7583 = vmatprep.mubr.bf16.mxu0 %v16959_v24  ;;  %8355 = vmatprep.mubr.bf16.mxu1 %v16959_v24  ;;  %v13854_v24 = vcombine.low %v234_v11, %v242_v49  ;;  %v13871_v8 = vcombine.high %v250_v10, %v258_v19  ;;  %v79_v11 = vld [vmem:[#allocation2 + $0x138] sm:$0xff]  ;;  %v13887_v49 = vcombine.high %v266_v31, %v274_v36 }
 0x1f5   :  { %8501 = vmatpush1.bf16.msra.mxu0 %v13822_v27  ;;  %9273 = vmatpush1.bf16.msra.mxu1 %v13824_v56  ;;  %v13856_v27 = vcombine.low %v235_v7, %v243_v23  ;;  %v13870_v56 = vcombine.low %v250_v10, %v258_v19  ;;  %v16973_v7 = vcombine.low %v67_v45, %v71_v43  ;;  %v306_v45 = vld [vmem:[#allocation5 + $0x450] sm:$0xff]  ;;  %v299_v43 = vld [vmem:[#allocation5 + $0x418] sm:$0xff] }
 0x1f6   :  { %8502 = vmatprep.subr.bf16.mxu0 %v13839_v50  ;;  %9274 = vmatprep.subr.bf16.mxu1 %v13841_v63  ;;  %v13873_v50 = vcombine.high %v251_v29, %v259_v4  ;;  %v13872_v63 = vcombine.low %v251_v29, %v259_v4  ;;  %v13889_v23 = vcombine.high %v267_v12, %v275_v35  ;;  %v298_v29 = vld [vmem:[#allocation5 + $0x410] sm:$0xff]  ;;  %v307_v10 = vld [vmem:[#allocation5 + $0x458] sm:$0xff] }
 0x1f7   :  { %18532 = vst [vmem:[#allocation89_spill] sm:$0xff] %v16973_v7 }
 0x1f9   :  { %8503 = vmatpush1.bf16.msra.mxu0 %v13838_v30  ;;  %9275 = vmatpush1.bf16.msra.mxu1 %v13840_v62  ;;  %v282_v30 = vld [vmem:[#allocation5 + $0x390] sm:$0xff] }
 0x1fa   :  { %8504 = vmatprep.subr.bf16.mxu0 %v13855_v15  ;;  %9276 = vmatprep.subr.bf16.mxu1 %v13857_v6  ;;  %v290_v62 = vld [vmem:[#allocation5 + $0x3d0] sm:$0xff]  ;;  %v16975_v15 = vcombine.high %v75_v55, %v79_v11  ;;  %v283_v6 = vld [vmem:[#allocation5 + $0x398] sm:$0xff] }
 0x1fb   :  { %7584 = vmatmul.mubr.bf16.gmra.mrb[8].mxu0 %v16965_v26  ;;  %8356 = vmatmul.mubr.bf16.gmra.mrb[8].mxu1 %v16965_v26  ;;  %v291_v26 = vld [vmem:[#allocation5 + $0x3d8] sm:$0xff]  ;;  %v13903_v19 = vcombine.high %v282_v30, %v290_v62 }
 0x1fc   :  { %7593 = vmatprep.mubr.bf16.mxu0 %v16967_v16  ;;  %8365 = vmatprep.mubr.bf16.mxu1 %v16967_v16  ;;  %18533 = vst [vmem:[#allocation90_spill] sm:$0xff] %v16975_v15  ;;  %v13886_v16 = vcombine.low %v266_v31, %v274_v36  ;;  %v13905_v4 = vcombine.high %v283_v6, %v291_v26 }
 0x1fd   :  { %8505 = vmatpush1.bf16.msra.mxu0 %v13854_v24  ;;  %9277 = vmatpush1.bf16.msra.mxu1 %v13856_v27  ;;  %v13888_v24 = vcombine.low %v267_v12, %v275_v35  ;;  %v83_v27 = vld [vmem:[#allocation2 + $0x158] sm:$0xff]  ;;  %v13904_v31 = vcombine.low %v283_v6, %v291_v26  ;;  %v13919_v36 = vcombine.high %v298_v29, %v306_v45 }
 0x1fe   :  { %8506 = vmatprep.subr.bf16.mxu0 %v13871_v8  ;;  %9278 = vmatprep.subr.bf16.mxu1 %v13873_v50  ;;  %v87_v8 = vld [vmem:[#allocation2 + $0x178] sm:$0xff]  ;;  %v13902_v50 = vcombine.low %v282_v30, %v290_v62  ;;  %v16981_v12 = vcombine.low %v75_v55, %v79_v11  ;;  %v13921_v35 = vcombine.high %v299_v43, %v307_v10  ;;  %v330_v55 = vld [vmem:[#allocation5 + $0x510] sm:$0xff] }
 0x1ff   :  { %v338_v11 = vld [vmem:[#allocation5 + $0x550] sm:$0xff]  ;;  %v331_v62 = vld [vmem:[#allocation5 + $0x518] sm:$0xff] }
 0x200   :  { %18534 = vst [vmem:[#allocation91_spill] sm:$0xff] %v16981_v12  ;;  %v339_v6 = vld [vmem:[#allocation5 + $0x558] sm:$0xff] }
 0x201   :  { %8507 = vmatpush1.bf16.msra.mxu0 %v13870_v56  ;;  %9279 = vmatpush1.bf16.msra.mxu1 %v13872_v63  ;;  %v314_v56 = vld [vmem:[#allocation5 + $0x490] sm:$0xff] }
 0x202   :  { %8508 = vmatprep.subr.bf16.mxu0 %v13887_v49  ;;  %9280 = vmatprep.subr.bf16.mxu1 %v13889_v23  ;;  %v322_v63 = vld [vmem:[#allocation5 + $0x4d0] sm:$0xff]  ;;  %v16983_v49 = vcombine.high %v83_v27, %v87_v8  ;;  %v315_v23 = vld [vmem:[#allocation5 + $0x498] sm:$0xff] }
 0x203   :  { %7594 = vmatmul.mubr.bf16.gmra.mrb[12].mxu0 %v16973_v7  ;;  %8366 = vmatmul.mubr.bf16.gmra.mrb[12].mxu1 %v16973_v7  ;;  %v323_v7 = vld [vmem:[#allocation5 + $0x4d8] sm:$0xff]  ;;  %v13935_v30 = vcombine.high %v314_v56, %v322_v63 }
 0x204   :  { %7603 = vmatprep.mubr.bf16.mxu0 %v16975_v15  ;;  %8375 = vmatprep.mubr.bf16.mxu1 %v16975_v15  ;;  %18535 = vst [vmem:[#allocation92_spill] sm:$0xff] %v16983_v49  ;;  %v13918_v15 = vcombine.low %v298_v29, %v306_v45  ;;  %v13937_v26 = vcombine.high %v315_v23, %v323_v7 }
 0x205   :  { %8509 = vmatpush1.bf16.msra.mxu0 %v13886_v16  ;;  %9281 = vmatpush1.bf16.msra.mxu1 %v13888_v24  ;;  %v13920_v16 = vcombine.low %v299_v43, %v307_v10  ;;  %v91_v24 = vld [vmem:[#allocation2 + $0x198] sm:$0xff]  ;;  %v13936_v29 = vcombine.low %v315_v23, %v323_v7  ;;  %v13951_v45 = vcombine.high %v330_v55, %v338_v11 }
 0x206   :  { %8510 = vmatprep.subr.bf16.mxu0 %v13903_v19  ;;  %9282 = vmatprep.subr.bf16.mxu1 %v13905_v4  ;;  %v95_v19 = vld [vmem:[#allocation2 + $0x1b8] sm:$0xff]  ;;  %v13934_v4 = vcombine.low %v314_v56, %v322_v63  ;;  %v16989_v43 = vcombine.low %v83_v27, %v87_v8  ;;  %v13953_v10 = vcombine.high %v331_v62, %v339_v6  ;;  %v362_v27 = vld [vmem:[#allocation5 + $0x610] sm:$0xff] }
 0x207   :  { %v370_v8 = vld [vmem:[#allocation5 + $0x650] sm:$0xff]  ;;  %v363_v63 = vld [vmem:[#allocation5 + $0x618] sm:$0xff] }
 0x208   :  { %18536 = vst [vmem:[#allocation93_spill] sm:$0xff] %v16989_v43  ;;  %v371_v23 = vld [vmem:[#allocation5 + $0x658] sm:$0xff] }
 0x209   :  { %8511 = vmatpush1.bf16.msra.mxu0 %v13902_v50  ;;  %9283 = vmatpush1.bf16.msra.mxu1 %v13904_v31  ;;  %v346_v50 = vld [vmem:[#allocation5 + $0x590] sm:$0xff] }
 0x20a   :  { %8512 = vmatprep.subr.bf16.mxu0 %v13919_v36  ;;  %9284 = vmatprep.subr.bf16.mxu1 %v13921_v35  ;;  %v354_v31 = vld [vmem:[#allocation5 + $0x5d0] sm:$0xff]  ;;  %v16991_v36 = vcombine.high %v91_v24, %v95_v19  ;;  %v347_v35 = vld [vmem:[#allocation5 + $0x598] sm:$0xff] }
 0x20b   :  { %7604 = vmatmul.mubr.bf16.gmra.mrb[16].mxu0 %v16981_v12  ;;  %8376 = vmatmul.mubr.bf16.gmra.mrb[16].mxu1 %v16981_v12  ;;  %v355_v12 = vld [vmem:[#allocation5 + $0x5d8] sm:$0xff]  ;;  %v13967_v56 = vcombine.high %v346_v50, %v354_v31 }
 0x20c   :  { %7613 = vmatprep.mubr.bf16.mxu0 %v16983_v49  ;;  %8385 = vmatprep.mubr.bf16.mxu1 %v16983_v49  ;;  %18537 = vst [vmem:[#allocation94_spill] sm:$0xff] %v16991_v36  ;;  %v13950_v49 = vcombine.low %v330_v55, %v338_v11  ;;  %v13969_v7 = vcombine.high %v347_v35, %v355_v12 }
 0x20d   :  { %8513 = vmatpush1.bf16.msra.mxu0 %v13918_v15  ;;  %9285 = vmatpush1.bf16.msra.mxu1 %v13920_v16  ;;  %v13952_v15 = vcombine.low %v331_v62, %v339_v6  ;;  %v99_v16 = vld [vmem:[#allocation2 + $0x1d8] sm:$0xff]  ;;  %v13968_v55 = vcombine.low %v347_v35, %v355_v12  ;;  %v13983_v11 = vcombine.high %v362_v27, %v370_v8 }
 0x20e   :  { %8514 = vmatprep.subr.bf16.mxu0 %v13935_v30  ;;  %9286 = vmatprep.subr.bf16.mxu1 %v13937_v26  ;;  %v103_v30 = vld [vmem:[#allocation2 + $0x1f8] sm:$0xff]  ;;  %v13966_v26 = vcombine.low %v346_v50, %v354_v31  ;;  %v16997_v62 = vcombine.low %v91_v24, %v95_v19  ;;  %v13985_v6 = vcombine.high %v363_v63, %v371_v23  ;;  %v394_v24 = vld [vmem:[#allocation5 + $0x710] sm:$0xff] }
 0x20f   :  { %v402_v19 = vld [vmem:[#allocation5 + $0x750] sm:$0xff]  ;;  %v395_v31 = vld [vmem:[#allocation5 + $0x718] sm:$0xff] }
 0x210   :  { %18538 = vst [vmem:[#allocation95_spill] sm:$0xff] %v16997_v62  ;;  %v403_v35 = vld [vmem:[#allocation5 + $0x758] sm:$0xff] }
 0x211   :  { %8515 = vmatpush1.bf16.msra.mxu0 %v13934_v4  ;;  %9287 = vmatpush1.bf16.msra.mxu1 %v13936_v29  ;;  %v378_v4 = vld [vmem:[#allocation5 + $0x690] sm:$0xff] }
 0x212   :  { %8516 = vmatprep.subr.bf16.mxu0 %v13951_v45  ;;  %9288 = vmatprep.subr.bf16.mxu1 %v13953_v10  ;;  %v386_v29 = vld [vmem:[#allocation5 + $0x6d0] sm:$0xff]  ;;  %v16999_v45 = vcombine.high %v99_v16, %v103_v30  ;;  %v379_v10 = vld [vmem:[#allocation5 + $0x698] sm:$0xff] }
 0x213   :  { %7614 = vmatmul.mubr.bf16.gmra.mrb[20].mxu0 %v16989_v43  ;;  %8386 = vmatmul.mubr.bf16.gmra.mrb[20].mxu1 %v16989_v43  ;;  %v387_v43 = vld [vmem:[#allocation5 + $0x6d8] sm:$0xff]  ;;  %v13999_v50 = vcombine.high %v378_v4, %v386_v29 }
 0x214   :  { %7623 = vmatprep.mubr.bf16.mxu0 %v16991_v36  ;;  %8395 = vmatprep.mubr.bf16.mxu1 %v16991_v36  ;;  %18539 = vst [vmem:[#allocation96_spill] sm:$0xff] %v16999_v45  ;;  %v13982_v36 = vcombine.low %v362_v27, %v370_v8  ;;  %v14001_v12 = vcombine.high %v379_v10, %v387_v43 }
 0x215   :  { %8517 = vmatpush1.bf16.msra.mxu0 %v13950_v49  ;;  %9289 = vmatpush1.bf16.msra.mxu1 %v13952_v15  ;;  %v13984_v49 = vcombine.low %v363_v63, %v371_v23  ;;  %v107_v15 = vld [vmem:[#allocation2 + $0x218] sm:$0xff]  ;;  %v14000_v27 = vcombine.low %v379_v10, %v387_v43  ;;  %v14015_v8 = vcombine.high %v394_v24, %v402_v19 }
 0x216   :  { %8518 = vmatprep.subr.bf16.mxu0 %v13967_v56  ;;  %9290 = vmatprep.subr.bf16.mxu1 %v13969_v7  ;;  %v111_v56 = vld [vmem:[#allocation2 + $0x238] sm:$0xff]  ;;  %v13998_v7 = vcombine.low %v378_v4, %v386_v29  ;;  %v17005_v63 = vcombine.low %v99_v16, %v103_v30  ;;  %v14017_v23 = vcombine.high %v395_v31, %v403_v35 }
 0x217   :  { %v115_v16 = vld [vmem:[#allocation2 + $0x258] sm:$0xff] }
 0x218   :  { %v119_v30 = vld [vmem:[#allocation2 + $0x278] sm:$0xff] }
 0x219   :  { %8519 = vmatpush1.bf16.msra.mxu0 %v13966_v26  ;;  %9291 = vmatpush1.bf16.msra.mxu1 %v13968_v55  ;;  %v410_v26 = vld [vmem:[#allocation5 + $0x790] sm:$0xff] }
 0x21a   :  { %8520 = vmatprep.subr.bf16.mxu0 %v13983_v11  ;;  %9292 = vmatprep.subr.bf16.mxu1 %v13985_v6  ;;  %v418_v55 = vld [vmem:[#allocation5 + $0x7d0] sm:$0xff]  ;;  %v17007_v11 = vcombine.high %v107_v15, %v111_v56  ;;  %v411_v6 = vld [vmem:[#allocation5 + $0x798] sm:$0xff] }
 0x21b   :  { %7624 = vmatmul.mubr.bf16.gmra.mrb[24].mxu0 %v16997_v62  ;;  %8396 = vmatmul.mubr.bf16.gmra.mrb[24].mxu1 %v16997_v62  ;;  %v419_v62 = vld [vmem:[#allocation5 + $0x7d8] sm:$0xff]  ;;  %v14031_v4 = vcombine.high %v410_v26, %v418_v55  ;;  %v14030_v29 = vcombine.low %v410_v26, %v418_v55 }
 0x21c   :  { %7633 = vmatprep.mubr.bf16.mxu0 %v16999_v45  ;;  %8405 = vmatprep.mubr.bf16.mxu1 %v16999_v45  ;;  %v14014_v45 = vcombine.low %v394_v24, %v402_v19  ;;  %v14033_v43 = vcombine.high %v411_v6, %v419_v62  ;;  %v14032_v10 = vcombine.low %v411_v6, %v419_v62  ;;  %v123_v62 = vld [vmem:[#allocation2 + $0x298] sm:$0xff] }
 0x21d   :  { %8521 = vmatpush1.bf16.msra.mxu0 %v13982_v36  ;;  %9293 = vmatpush1.bf16.msra.mxu1 %v13984_v49  ;;  %v14016_v36 = vcombine.low %v395_v31, %v403_v35  ;;  %v14047_v49 = vcombine.high %v16936_v13, %v16938_v28  ;;  %v17019_v24 = vcombine.high %v115_v16, %v119_v30  ;;  %v131_v35 = vld [vmem:[#allocation2 + $0x2d8] sm:$0xff] }
 0x21e   :  { %8522 = vmatprep.subr.bf16.mxu0 %v13999_v50  ;;  %9294 = vmatprep.subr.bf16.mxu1 %v14001_v12  ;;  %v17015_v50 = vcombine.low %v107_v15, %v111_v56  ;;  %v14049_v12 = vcombine.high %v16946_v54, %v16948_v39  ;;  %v17025_v19 = vcombine.low %v115_v16, %v119_v30  ;;  %v135_v15 = vld [vmem:[#allocation2 + $0x2f8] sm:$0xff] }
 0x21f   :  { %v147_v55 = vld [vmem:[#allocation2 + $0x358] sm:$0xff] }
 0x220   :  { %v151_v6 = vld [vmem:[#allocation2 + $0x378] sm:$0xff] }
 0x221   :  { %8523 = vmatpush1.bf16.msra.mxu0 %v13998_v7  ;;  %9295 = vmatpush1.bf16.msra.mxu1 %v14000_v27  ;;  %v17035_v7 = vcombine.high %v131_v35, %v135_v15  ;;  %v139_v27 = vld [vmem:[#allocation2 + $0x318] sm:$0xff]  ;;  %v17057_v30 = vcombine.low %v147_v55, %v151_v6 }
 0x222   :  { %8524 = vmatprep.subr.bf16.mxu0 %v14015_v8  ;;  %9296 = vmatprep.subr.bf16.mxu1 %v14017_v23  ;;  %v143_v8 = vld [vmem:[#allocation2 + $0x338] sm:$0xff]  ;;  %v17041_v23 = vcombine.low %v131_v35, %v135_v15  ;;  %v442_v35 = vld [vmem:[#allocation5 + $0x890] sm:$0xff] }
 0x223   :  { %7634 = vmatmul.mubr.bf16.gmra.mrb[28].mxu0 %v17005_v63  ;;  %8406 = vmatmul.mubr.bf16.gmra.mrb[28].mxu1 %v17005_v63  ;;  %v17043_v26 = vcombine.high %v139_v27, %v143_v8  ;;  %v159_v16 = vld [vmem:[#allocation2 + $0x3b8] sm:$0xff]  ;;  %18544 = vst [vmem:[#allocation101_spill] sm:$0xff] %v17057_v30  ;;  %v450_v15 = vld [vmem:[#allocation5 + $0x8d0] sm:$0xff] }
 0x224   :  { %7643 = vmatprep.mubr.bf16.mxu0 %v17007_v11  ;;  %8415 = vmatprep.mubr.bf16.mxu1 %v17007_v11  ;;  %18540 = vst [vmem:[#allocation97_spill] sm:$0xff] %v17041_v23 }
 0x225   :  { %8525 = vmatpush1.bf16.msra.mxu0 %v14014_v45  ;;  %9297 = vmatpush1.bf16.msra.mxu1 %v14016_v36  ;;  %v127_v45 = vld [vmem:[#allocation2 + $0x2b8] sm:$0xff]  ;;  %18541 = vst [vmem:[#allocation98_spill] sm:$0xff] %v17043_v26  ;;  %v17049_v36 = vcombine.low %v139_v27, %v143_v8 }
 0x226   :  { %8526 = vmatprep.subr.bf16.mxu0 %v14031_v4  ;;  %9298 = vmatprep.subr.bf16.mxu1 %v14033_v43  ;;  %v17027_v31 = vcombine.high %v123_v62, %v127_v45  ;;  %v17033_v56 = vcombine.low %v123_v62, %v127_v45  ;;  %v17051_v4 = vcombine.high %v147_v55, %v151_v6  ;;  %v155_v43 = vld [vmem:[#allocation2 + $0x398] sm:$0xff]  ;;  %v458_v6 = vld [vmem:[#allocation5 + $0x910] sm:$0xff] }
 0x227   :  { %18542 = vst [vmem:[#allocation99_spill] sm:$0xff] %v17049_v36  ;;  %v443_v27 = vld [vmem:[#allocation5 + $0x898] sm:$0xff]  ;;  %v14063_v55 = vcombine.high %v442_v35, %v450_v15 }
 0x228   :  { %18543 = vst [vmem:[#allocation100_spill] sm:$0xff] %v17051_v4  ;;  %v451_v8 = vld [vmem:[#allocation5 + $0x8d8] sm:$0xff] }
 0x229   :  { %8527 = vmatpush1.bf16.msra.mxu0 %v14030_v29  ;;  %9299 = vmatpush1.bf16.msra.mxu1 %v14032_v10  ;;  %v17059_v29 = vcombine.high %v155_v43, %v159_v16  ;;  %v163_v10 = vld [vmem:[#allocation2 + $0x3d8] sm:$0xff] }
 0x22a   :  { %8689 = vmatprep.subr.bf16.mxu0 %v14047_v49  ;;  %9461 = vmatprep.subr.bf16.mxu1 %v14049_v12  ;;  %v167_v49 = vld [vmem:[#allocation2 + $0x3f8] sm:$0xff]  ;;  %v17065_v12 = vcombine.low %v155_v43, %v159_v16  ;;  %v466_v43 = vld [vmem:[#allocation5 + $0x950] sm:$0xff] }
 0x22b   :  { %7644 = vmatmul.mubr.bf16.gmra.mrb[32].mxu0 %v17015_v50  ;;  %8416 = vmatmul.mubr.bf16.gmra.mrb[32].mxu1 %v17015_v50  ;;  %18545 = vst [vmem:[#allocation102_spill] sm:$0xff] %v17059_v29  ;;  %v17067_v62 = vcombine.high %v163_v10, %v167_v49  ;;  %v17073_v45 = vcombine.low %v163_v10, %v167_v49  ;;  %v459_v16 = vld [vmem:[#allocation5 + $0x918] sm:$0xff] }
 0x22c   :  { %7653 = vmatprep.mubr.bf16.mxu0 %v17019_v24  ;;  %8425 = vmatprep.mubr.bf16.mxu1 %v17019_v24  ;;  %18546 = vst [vmem:[#allocation103_spill] sm:$0xff] %v17065_v12  ;;  %v14065_v10 = vcombine.high %v443_v27, %v451_v8  ;;  %v467_v49 = vld [vmem:[#allocation5 + $0x958] sm:$0xff] }
 0x22d   :  { %18547 = vst [vmem:[#allocation104_spill] sm:$0xff] %v17067_v62  ;;  %18548 = vst [vmem:[#allocation105_spill] sm:$0xff] %v17073_v45 }
 0x233   :  { %7654 = vmatmul.mubr.bf16.gmra.mrb[36].mxu0 %v17025_v19  ;;  %8426 = vmatmul.mubr.bf16.gmra.mrb[36].mxu1 %v17025_v19 }
 0x234   :  { %7663 = vmatprep.mubr.bf16.mxu0 %v17027_v31  ;;  %8435 = vmatprep.mubr.bf16.mxu1 %v17027_v31 }
 0x23b   :  { %7664 = vmatmul.mubr.bf16.gmra.mrb[40].mxu0 %v17033_v56  ;;  %8436 = vmatmul.mubr.bf16.gmra.mrb[40].mxu1 %v17033_v56 }
 0x23c   :  { %7673 = vmatprep.mubr.bf16.mxu0 %v17035_v7  ;;  %8445 = vmatprep.mubr.bf16.mxu1 %v17035_v7 }
 0x243   :  { %7674 = vmatmul.mubr.bf16.gmra.mrb[44].mxu0 %v17041_v23  ;;  %8446 = vmatmul.mubr.bf16.gmra.mrb[44].mxu1 %v17041_v23 }
 0x244   :  { %7683 = vmatprep.mubr.bf16.mxu0 %v17043_v26  ;;  %8455 = vmatprep.mubr.bf16.mxu1 %v17043_v26  ;;  %v14064_v26 = vcombine.low %v443_v27, %v451_v8  ;;  %v490_v8 = vld [vmem:[#allocation5 + $0xa10] sm:$0xff] }
 0x24b   :  { %7684 = vmatmul.mubr.bf16.gmra.mrb[48].mxu0 %v17049_v36  ;;  %8456 = vmatmul.mubr.bf16.gmra.mrb[48].mxu1 %v17049_v36  ;;  %v18550_v36 = vcombine.low %v16946_v54, %v16948_v39  ;;  %v14078_v39 = vcombine.low %v458_v6, %v466_v43  ;;  %v14080_v54 = vcombine.low %v459_v16, %v467_v49 }
 0x24c   :  { %7693 = vmatprep.mubr.bf16.mxu0 %v17051_v4  ;;  %8465 = vmatprep.mubr.bf16.mxu1 %v17051_v4  ;;  %v17092_v4 = vld [vmem:[#allocation5 + $0x1058] sm:$0xff] }
 0x253   :  { %7694 = vmatmul.mubr.bf16.gmra.mrb[52].mxu0 %v17057_v30  ;;  %8466 = vmatmul.mubr.bf16.gmra.mrb[52].mxu1 %v17057_v30  ;;  %v17090_v30 = vld [vmem:[#allocation5 + $0x1018] sm:$0xff] }
 0x254   :  { %7703 = vmatprep.mubr.bf16.mxu0 %v17059_v29  ;;  %8475 = vmatprep.mubr.bf16.mxu1 %v17059_v29  ;;  %v483_v29 = vld [vmem:[#allocation5 + $0x9d8] sm:$0xff] }
 0x25b   :  { %7704 = vmatmul.mubr.bf16.gmra.mrb[56].mxu0 %v17065_v12  ;;  %8476 = vmatmul.mubr.bf16.gmra.mrb[56].mxu1 %v17065_v12  ;;  %v17082_v12 = vld [vmem:[#allocation5 + $0x1050] sm:$0xff] }
 0x25c   :  { %7713 = vmatprep.mubr.bf16.mxu0 %v17067_v62  ;;  %8485 = vmatprep.mubr.bf16.mxu1 %v17067_v62  ;;  %v17080_v62 = vld [vmem:[#allocation5 + $0x1010] sm:$0xff] }
 0x263   :  { %7714 = vmatmul.mubr.bf16.gmra.mrb[60].mxu0 %v17073_v45  ;;  %8486 = vmatmul.mubr.bf16.gmra.mrb[60].mxu1 %v17073_v45  ;;  %v14062_v45 = vcombine.low %v442_v35, %v450_v15  ;;  %v482_v35 = vld [vmem:[#allocation5 + $0x9d0] sm:$0xff]  ;;  %v475_v15 = vld [vmem:[#allocation5 + $0x998] sm:$0xff] }
 0x264   :  { %8528 = vmatprep.mubr.bf16.mxu0 %v16481_v58  ;;  %9300 = vmatprep.mubr.bf16.mxu1 %v16481_v58  ;;  %v18549_v58 = vcombine.low %v16936_v13, %v16938_v28  ;;  %v474_v28 = vld [vmem:[#allocation5 + $0x990] sm:$0xff]  ;;  %v14097_v27 = vcombine.high %v475_v15, %v483_v29 }
 0x265   :  { %v498_v13 = vld [vmem:[#allocation5 + $0xa50] sm:$0xff] }
 0x26b   :  { %8529 = vmatmul.mubr.bf16.vlgmr.msra.gmra.mrb[64].mxu0 %v16487_v14  ;;  %9301 = vmatmul.mubr.bf16.vlgmr.msra.gmra.mrb[64].mxu1 %v16487_v14  ;;  %v14079_v14 = vcombine.high %v458_v6, %v466_v43  ;;  %v506_v43 = vld [vmem:[#allocation5 + $0xa90] sm:$0xff] }
 0x26c   :  { %8690 = vmatpush1.bf16.msra.mxu0 %v18549_v58  ;;  %9462 = vmatpush1.bf16.msra.mxu1 %v18550_v36  ;;  %v14081_v58 = vcombine.high %v459_v16, %v467_v49  ;;  %v14095_v36 = vcombine.high %v474_v28, %v482_v35  ;;  %v514_v16 = vld [vmem:[#allocation5 + $0xad0] sm:$0xff]  ;;  %v507_v49 = vld [vmem:[#allocation5 + $0xa98] sm:$0xff] }
 0x26d   :  { %8538 = vmatprep.mubr.bf16.mxu0 %v16489_v21  ;;  %9310 = vmatprep.mubr.bf16.mxu1 %v16489_v21  ;;  %v14127_v23 = vcombine.high %v506_v43, %v514_v16 }
 0x26e   :  { %8691 = vmatprep.subr.bf16.mxu0 %v14063_v55  ;;  %9463 = vmatprep.subr.bf16.mxu1 %v14065_v10  ;;  %v491_v55 = vld [vmem:[#allocation5 + $0xa18] sm:$0xff] }
 0x26f   :  { %v499_v10 = vld [vmem:[#allocation5 + $0xa58] sm:$0xff] }
 0x270   :  { %8692 = vmatpush1.bf16.msra.mxu0 %v14062_v45  ;;  %9464 = vmatpush1.bf16.msra.mxu1 %v14064_v26  ;;  %v14094_v26 = vcombine.low %v474_v28, %v482_v35  ;;  %v14111_v45 = vcombine.high %v490_v8, %v498_v13  ;;  %v14113_v6 = vcombine.high %v491_v55, %v499_v10  ;;  %v522_v35 = vld [vmem:[#allocation5 + $0xb10] sm:$0xff] }
 0x271   :  { %8693 = vmatprep.subr.bf16.mxu0 %v14079_v14  ;;  %9465 = vmatprep.subr.bf16.mxu1 %v14081_v58  ;;  %v14096_v14 = vcombine.low %v475_v15, %v483_v29  ;;  %v515_v58 = vld [vmem:[#allocation5 + $0xad8] sm:$0xff]  ;;  %v14112_v21 = vcombine.low %v491_v55, %v499_v10  ;;  %v546_v55 = vld [vmem:[#allocation5 + $0xbd0] sm:$0xff] }
 0x272   :  { %v14129_v28 = vcombine.high %v507_v49, %v515_v58  ;;  %v523_v29 = vld [vmem:[#allocation5 + $0xb18] sm:$0xff] }
 0x273   :  { %8539 = vmatmul.mubr.bf16.gmra.mrb[68].mxu0 %v16507_v38  ;;  %9311 = vmatmul.mubr.bf16.gmra.mrb[68].mxu1 %v16507_v38  ;;  %v14110_v38 = vcombine.low %v490_v8, %v498_v13  ;;  %v531_v15 = vld [vmem:[#allocation5 + $0xb58] sm:$0xff]  ;;  %v14126_v13 = vcombine.low %v506_v43, %v514_v16  ;;  %v538_v8 = vld [vmem:[#allocation5 + $0xb90] sm:$0xff] }
 0x274   :  { %8548 = vmatprep.mubr.bf16.mxu0 %v16509_v41  ;;  %9320 = vmatprep.mubr.bf16.mxu1 %v16509_v41  ;;  %v539_v10 = vld [vmem:[#allocation5 + $0xb98] sm:$0xff] }
 0x275   :  { %8694 = vmatpush1.bf16.msra.mxu0 %v14078_v39  ;;  %9466 = vmatpush1.bf16.msra.mxu1 %v14080_v54  ;;  %v530_v39 = vld [vmem:[#allocation5 + $0xb50] sm:$0xff]  ;;  %v14128_v54 = vcombine.low %v507_v49, %v515_v58  ;;  %v555_v43 = vld [vmem:[#allocation5 + $0xc18] sm:$0xff]  ;;  %v14158_v49 = vcombine.low %v538_v8, %v546_v55 }
 0x276   :  { %8695 = vmatprep.subr.bf16.mxu0 %v14095_v36  ;;  %9467 = vmatprep.subr.bf16.mxu1 %v14097_v27  ;;  %v14143_v36 = vcombine.high %v522_v35, %v530_v39  ;;  %v14145_v27 = vcombine.high %v523_v29, %v531_v15  ;;  %v563_v16 = vld [vmem:[#allocation5 + $0xc58] sm:$0xff] }
 0x279   :  { %8696 = vmatpush1.bf16.msra.mxu0 %v14094_v26  ;;  %9468 = vmatpush1.bf16.msra.mxu1 %v14096_v14  ;;  %v547_v26 = vld [vmem:[#allocation5 + $0xbd8] sm:$0xff]  ;;  %v14142_v14 = vcombine.low %v522_v35, %v530_v39  ;;  %v14177_v35 = vcombine.high %v555_v43, %v563_v16  ;;  %v570_v39 = vld [vmem:[#allocation5 + $0xc90] sm:$0xff] }
 0x27a   :  { %8697 = vmatprep.subr.bf16.mxu0 %v14111_v45  ;;  %9469 = vmatprep.subr.bf16.mxu1 %v14113_v6  ;;  %v14144_v45 = vcombine.low %v523_v29, %v531_v15  ;;  %v14159_v6 = vcombine.high %v538_v8, %v546_v55  ;;  %v14160_v58 = vcombine.low %v539_v10, %v547_v26  ;;  %v578_v29 = vld [vmem:[#allocation5 + $0xcd0] sm:$0xff]  ;;  %v571_v15 = vld [vmem:[#allocation5 + $0xc98] sm:$0xff] }
 0x27b   :  { %8549 = vmatmul.mubr.bf16.gmra.mrb[72].mxu0 %v16515_v60  ;;  %9321 = vmatmul.mubr.bf16.gmra.mrb[72].mxu1 %v16515_v60  ;;  %v586_v55 = vld [vmem:[#allocation5 + $0xd10] sm:$0xff] }
 0x27c   :  { %8558 = vmatprep.mubr.bf16.mxu0 %v16517_v0  ;;  %9330 = vmatprep.mubr.bf16.mxu1 %v16517_v0 }
 0x27d   :  { %8698 = vmatpush1.bf16.msra.mxu0 %v14110_v38  ;;  %9470 = vmatpush1.bf16.msra.mxu1 %v14112_v21  ;;  %v14161_v38 = vcombine.high %v539_v10, %v547_v26  ;;  %v554_v21 = vld [vmem:[#allocation5 + $0xc10] sm:$0xff]  ;;  %v587_v10 = vld [vmem:[#allocation5 + $0xd18] sm:$0xff] }
 0x27e   :  { %8699 = vmatprep.subr.bf16.mxu0 %v14127_v23  ;;  %9471 = vmatprep.subr.bf16.mxu1 %v14129_v28  ;;  %v562_v23 = vld [vmem:[#allocation5 + $0xc50] sm:$0xff]  ;;  %v595_v26 = vld [vmem:[#allocation5 + $0xd58] sm:$0xff] }
 0x27f   :  { %v14175_v28 = vcombine.high %v554_v21, %v562_v23 }
 0x281   :  { %8700 = vmatpush1.bf16.msra.mxu0 %v14126_v13  ;;  %9472 = vmatpush1.bf16.msra.mxu1 %v14128_v54  ;;  %v579_v13 = vld [vmem:[#allocation5 + $0xcd8] sm:$0xff]  ;;  %v14174_v54 = vcombine.low %v554_v21, %v562_v23  ;;  %v14209_v21 = vcombine.high %v587_v10, %v595_v26  ;;  %v602_v23 = vld [vmem:[#allocation5 + $0xd90] sm:$0xff] }
 0x282   :  { %8701 = vmatprep.subr.bf16.mxu0 %v14143_v36  ;;  %9473 = vmatprep.subr.bf16.mxu1 %v14145_v27  ;;  %v14176_v36 = vcombine.low %v555_v43, %v563_v16  ;;  %v14191_v27 = vcombine.high %v570_v39, %v578_v29  ;;  %v14193_v8 = vcombine.high %v571_v15, %v579_v13  ;;  %v610_v43 = vld [vmem:[#allocation5 + $0xdd0] sm:$0xff]  ;;  %v603_v16 = vld [vmem:[#allocation5 + $0xd98] sm:$0xff] }
 0x283   :  { %8559 = vmatmul.mubr.bf16.gmra.mrb[76].mxu0 %v16523_v17  ;;  %9331 = vmatmul.mubr.bf16.gmra.mrb[76].mxu1 %v16523_v17 }
 0x284   :  { %8568 = vmatprep.mubr.bf16.mxu0 %v16525_v22  ;;  %9340 = vmatprep.mubr.bf16.mxu1 %v16525_v22 }
 0x285   :  { %8702 = vmatpush1.bf16.msra.mxu0 %v14142_v14  ;;  %9474 = vmatpush1.bf16.msra.mxu1 %v14144_v45  ;;  %v594_v14 = vld [vmem:[#allocation5 + $0xd50] sm:$0xff]  ;;  %v14190_v45 = vcombine.low %v570_v39, %v578_v29 }
 0x286   :  { %8703 = vmatprep.subr.bf16.mxu0 %v14159_v6  ;;  %9475 = vmatprep.subr.bf16.mxu1 %v14161_v38  ;;  %v14192_v6 = vcombine.low %v571_v15, %v579_v13  ;;  %v14207_v38 = vcombine.high %v586_v55, %v594_v14  ;;  %v618_v29 = vld [vmem:[#allocation5 + $0xe10] sm:$0xff]  ;;  %v619_v15 = vld [vmem:[#allocation5 + $0xe18] sm:$0xff] }
 0x287   :  { %v627_v13 = vld [vmem:[#allocation5 + $0xe58] sm:$0xff] }
 0x289   :  { %8704 = vmatpush1.bf16.msra.mxu0 %v14158_v49  ;;  %9476 = vmatpush1.bf16.msra.mxu1 %v14160_v58  ;;  %v611_v49 = vld [vmem:[#allocation5 + $0xdd8] sm:$0xff]  ;;  %v14206_v58 = vcombine.low %v586_v55, %v594_v14  ;;  %v14241_v55 = vcombine.high %v619_v15, %v627_v13  ;;  %v634_v14 = vld [vmem:[#allocation5 + $0xe90] sm:$0xff] }
 0x28a   :  { %8705 = vmatprep.subr.bf16.mxu0 %v14175_v28  ;;  %9477 = vmatprep.subr.bf16.mxu1 %v14177_v35  ;;  %v14208_v28 = vcombine.low %v587_v10, %v595_v26  ;;  %v14223_v35 = vcombine.high %v602_v23, %v610_v43  ;;  %v14225_v39 = vcombine.high %v603_v16, %v611_v49  ;;  %v642_v10 = vld [vmem:[#allocation5 + $0xed0] sm:$0xff]  ;;  %v635_v26 = vld [vmem:[#allocation5 + $0xe98] sm:$0xff] }
 0x28b   :  { %8569 = vmatmul.mubr.bf16.gmra.mrb[80].mxu0 %v16531_v44  ;;  %9341 = vmatmul.mubr.bf16.gmra.mrb[80].mxu1 %v16531_v44 }
 0x28c   :  { %8578 = vmatprep.mubr.bf16.mxu0 %v16533_v48  ;;  %9350 = vmatprep.mubr.bf16.mxu1 %v16533_v48 }
 0x28d   :  { %8706 = vmatpush1.bf16.msra.mxu0 %v14174_v54  ;;  %9478 = vmatpush1.bf16.msra.mxu1 %v14176_v36  ;;  %v626_v54 = vld [vmem:[#allocation5 + $0xe50] sm:$0xff]  ;;  %v14222_v36 = vcombine.low %v602_v23, %v610_v43 }
 0x28e   :  { %8707 = vmatprep.subr.bf16.mxu0 %v14191_v27  ;;  %9479 = vmatprep.subr.bf16.mxu1 %v14193_v8  ;;  %v14224_v27 = vcombine.low %v603_v16, %v611_v49  ;;  %v14239_v8 = vcombine.high %v618_v29, %v626_v54  ;;  %v650_v43 = vld [vmem:[#allocation5 + $0xf10] sm:$0xff]  ;;  %v651_v16 = vld [vmem:[#allocation5 + $0xf18] sm:$0xff] }
 0x28f   :  { %v659_v49 = vld [vmem:[#allocation5 + $0xf58] sm:$0xff] }
 0x291   :  { %8708 = vmatpush1.bf16.msra.mxu0 %v14190_v45  ;;  %9480 = vmatpush1.bf16.msra.mxu1 %v14192_v6  ;;  %v643_v45 = vld [vmem:[#allocation5 + $0xed8] sm:$0xff]  ;;  %v14238_v6 = vcombine.low %v618_v29, %v626_v54  ;;  %v14273_v29 = vcombine.high %v651_v16, %v659_v49  ;;  %v666_v54 = vld [vmem:[#allocation5 + $0xf90] sm:$0xff] }
 0x292   :  { %8709 = vmatprep.subr.bf16.mxu0 %v14207_v38  ;;  %9481 = vmatprep.subr.bf16.mxu1 %v14209_v21  ;;  %v14240_v38 = vcombine.low %v619_v15, %v627_v13  ;;  %v14255_v21 = vcombine.high %v634_v14, %v642_v10  ;;  %v14257_v23 = vcombine.high %v635_v26, %v643_v45  ;;  %v674_v15 = vld [vmem:[#allocation5 + $0xfd0] sm:$0xff]  ;;  %v667_v13 = vld [vmem:[#allocation5 + $0xf98] sm:$0xff] }
 0x293   :  { %8579 = vmatmul.mubr.bf16.gmra.mrb[84].mxu0 %v16539_v5  ;;  %9351 = vmatmul.mubr.bf16.gmra.mrb[84].mxu1 %v16539_v5 }
 0x294   :  { %8588 = vmatprep.mubr.bf16.mxu0 %v16541_v9  ;;  %9360 = vmatprep.mubr.bf16.mxu1 %v16541_v9 }
 0x295   :  { %8710 = vmatpush1.bf16.msra.mxu0 %v14206_v58  ;;  %9482 = vmatpush1.bf16.msra.mxu1 %v14208_v28  ;;  %v658_v58 = vld [vmem:[#allocation5 + $0xf50] sm:$0xff]  ;;  %v14254_v28 = vcombine.low %v634_v14, %v642_v10  ;;  %v14286_v10 = vcombine.low %v666_v54, %v674_v15 }
 0x296   :  { %8711 = vmatprep.subr.bf16.mxu0 %v14223_v35  ;;  %9483 = vmatprep.subr.bf16.mxu1 %v14225_v39  ;;  %v14256_v35 = vcombine.low %v635_v26, %v643_v45  ;;  %v14271_v39 = vcombine.high %v650_v43, %v658_v58  ;;  %v14303_v45 = vcombine.high %v17080_v62, %v17082_v12 }
 0x299   :  { %8712 = vmatpush1.bf16.msra.mxu0 %v14222_v36  ;;  %9484 = vmatpush1.bf16.msra.mxu1 %v14224_v27  ;;  %v675_v36 = vld [vmem:[#allocation5 + $0xfd8] sm:$0xff]  ;;  %v14270_v27 = vcombine.low %v650_v43, %v658_v58 }
 0x29a   :  { %8713 = vmatprep.subr.bf16.mxu0 %v14239_v8  ;;  %9485 = vmatprep.subr.bf16.mxu1 %v14241_v55  ;;  %v14272_v8 = vcombine.low %v651_v16, %v659_v49  ;;  %v14287_v55 = vcombine.high %v666_v54, %v674_v15  ;;  %v14289_v14 = vcombine.high %v667_v13, %v675_v36 }
 0x29b   :  { %8589 = vmatmul.mubr.bf16.gmra.mrb[88].mxu0 %v16547_v32  ;;  %9361 = vmatmul.mubr.bf16.gmra.mrb[88].mxu1 %v16547_v32  ;;  %v14288_v26 = vcombine.low %v667_v13, %v675_v36 }
 0x29c   :  { %8598 = vmatprep.mubr.bf16.mxu0 %v16549_v37  ;;  %9370 = vmatprep.mubr.bf16.mxu1 %v16549_v37 }
 0x29d   :  { %8714 = vmatpush1.bf16.msra.mxu0 %v14238_v6  ;;  %9486 = vmatpush1.bf16.msra.mxu1 %v14240_v38  ;;  %v14305_v6 = vcombine.high %v17090_v30, %v17092_v4 }
 0x29e   :  { %8715 = vmatprep.subr.bf16.mxu0 %v14255_v21  ;;  %9487 = vmatprep.subr.bf16.mxu1 %v14257_v23 }
 0x2a1   :  { %8716 = vmatpush1.bf16.msra.mxu0 %v14254_v28  ;;  %9488 = vmatpush1.bf16.msra.mxu1 %v14256_v35 }
 0x2a2   :  { %8717 = vmatprep.subr.bf16.mxu0 %v14271_v39  ;;  %9489 = vmatprep.subr.bf16.mxu1 %v14273_v29 }
 0x2a3   :  { %8599 = vmatmul.mubr.bf16.gmra.mrb[92].mxu0 %v16555_v61  ;;  %9371 = vmatmul.mubr.bf16.gmra.mrb[92].mxu1 %v16555_v61 }
 0x2a4   :  { %8608 = vmatprep.mubr.bf16.mxu0 %v16557_v2  ;;  %9380 = vmatprep.mubr.bf16.mxu1 %v16557_v2 }
 0x2a5   :  { %8718 = vmatpush1.bf16.msra.mxu0 %v14270_v27  ;;  %9490 = vmatpush1.bf16.msra.mxu1 %v14272_v8 }
 0x2a6   :  { %8719 = vmatprep.subr.bf16.mxu0 %v14287_v55  ;;  %9491 = vmatprep.subr.bf16.mxu1 %v14289_v14 }
 0x2a9   :  { %8720 = vmatpush1.bf16.msra.mxu0 %v14286_v10  ;;  %9492 = vmatpush1.bf16.msra.mxu1 %v14288_v26 }
 0x2aa   :  { %8882 = vmatprep.subr.bf16.mxu0 %v14303_v45  ;;  %9654 = vmatprep.subr.bf16.mxu1 %v14305_v6 }
 0x2ab   :  { %8609 = vmatmul.mubr.bf16.gmra.mrb[96].mxu0 %v16565_v18  ;;  %9381 = vmatmul.mubr.bf16.gmra.mrb[96].mxu1 %v16565_v18 }
 0x2ac   :  { %8618 = vmatprep.mubr.bf16.mxu0 %v16569_v20  ;;  %9390 = vmatprep.mubr.bf16.mxu1 %v16569_v20 }
 0x2b3   :  { %8619 = vmatmul.mubr.bf16.gmra.mrb[100].mxu0 %v16575_v25  ;;  %9391 = vmatmul.mubr.bf16.gmra.mrb[100].mxu1 %v16575_v25 }
 0x2b4   :  { %8628 = vmatprep.mubr.bf16.mxu0 %v16577_v53  ;;  %9400 = vmatprep.mubr.bf16.mxu1 %v16577_v53 }
 0x2bb   :  { %8629 = vmatmul.mubr.bf16.gmra.mrb[104].mxu0 %v16583_v33  ;;  %9401 = vmatmul.mubr.bf16.gmra.mrb[104].mxu1 %v16583_v33 }
 0x2bc   :  { %8638 = vmatprep.mubr.bf16.mxu0 %v16585_v34  ;;  %9410 = vmatprep.mubr.bf16.mxu1 %v16585_v34 }
 0x2be   :  { %v7565_v38 = vpop.f32.mrb[0].mxu0  ;;  %v8337_v21 = vpop.f32.mrb[0].mxu1 }
 0x2bf   :  { %13128 = vst [vmem:[#allocation7] sm:$0xff] %v7565_v38  ;;  %v7567_v23 = vpop.f32.mrb[1].mxu0  ;;  %13130 = vst [vmem:[#allocation7 + $0x10] sm:$0xff] %v8337_v21  ;;  %v8339_v43 = vpop.f32.mrb[1].mxu1 }
 0x2c0   :  { %13129 = vst [vmem:[#allocation7 + $0x8] sm:$0xff] %v7567_v23  ;;  %v7569_v58 = vpop.f32.mrb[2].mxu0  ;;  %13131 = vst [vmem:[#allocation7 + $0x18] sm:$0xff] %v8339_v43  ;;  %v8341_v16 = vpop.f32.mrb[2].mxu1 }
 0x2c1   :  { %13144 = vst [vmem:[#allocation7 + $0x80] sm:$0xff] %v7569_v58  ;;  %v7571_v49 = vpop.f32.mrb[3].mxu0  ;;  %13146 = vst [vmem:[#allocation7 + $0x90] sm:$0xff] %v8341_v16  ;;  %v8343_v28 = vpop.f32.mrb[3].mxu1 }
 0x2c2   :  { %13145 = vst [vmem:[#allocation7 + $0x88] sm:$0xff] %v7571_v49  ;;  %13147 = vst [vmem:[#allocation7 + $0x98] sm:$0xff] %v8343_v28 }
 0x2c3   :  { %8639 = vmatmul.mubr.bf16.gmra.mrb[108].mxu0 %v16591_v40  ;;  %9411 = vmatmul.mubr.bf16.gmra.mrb[108].mxu1 %v16591_v40 }
 0x2c4   :  { %8648 = vmatprep.mubr.bf16.mxu0 %v16593_v42  ;;  %9420 = vmatprep.mubr.bf16.mxu1 %v16593_v42 }
 0x2c6   :  { %v7575_v35 = vpop.f32.mrb[4].mxu0  ;;  %v8347_v39 = vpop.f32.mrb[4].mxu1 }
 0x2c7   :  { %13160 = vst [vmem:[#allocation7 + $0x100] sm:$0xff] %v7575_v35  ;;  %v7577_v29 = vpop.f32.mrb[5].mxu0  ;;  %13162 = vst [vmem:[#allocation7 + $0x110] sm:$0xff] %v8347_v39  ;;  %v8349_v54 = vpop.f32.mrb[5].mxu1 }
 0x2c8   :  { %13161 = vst [vmem:[#allocation7 + $0x108] sm:$0xff] %v7577_v29  ;;  %v7579_v15 = vpop.f32.mrb[6].mxu0  ;;  %13163 = vst [vmem:[#allocation7 + $0x118] sm:$0xff] %v8349_v54  ;;  %v8351_v13 = vpop.f32.mrb[6].mxu1 }
 0x2c9   :  { %13176 = vst [vmem:[#allocation7 + $0x180] sm:$0xff] %v7579_v15  ;;  %v7581_v36 = vpop.f32.mrb[7].mxu0  ;;  %13178 = vst [vmem:[#allocation7 + $0x190] sm:$0xff] %v8351_v13  ;;  %v8353_v27 = vpop.f32.mrb[7].mxu1 }
 0x2ca   :  { %13177 = vst [vmem:[#allocation7 + $0x188] sm:$0xff] %v7581_v36  ;;  %13179 = vst [vmem:[#allocation7 + $0x198] sm:$0xff] %v8353_v27 }
 0x2cb   :  { %8649 = vmatmul.mubr.bf16.gmra.mrb[112].mxu0 %v16599_v46  ;;  %9421 = vmatmul.mubr.bf16.gmra.mrb[112].mxu1 %v16599_v46 }
 0x2cc   :  { %8658 = vmatprep.mubr.bf16.mxu0 %v16601_v47  ;;  %9430 = vmatprep.mubr.bf16.mxu1 %v16601_v47 }
 0x2ce   :  { %v7585_v8 = vpop.f32.mrb[8].mxu0  ;;  %v8357_v55 = vpop.f32.mrb[8].mxu1 }
 0x2cf   :  { %13192 = vst [vmem:[#allocation7 + $0x200] sm:$0xff] %v7585_v8  ;;  %v7587_v14 = vpop.f32.mrb[9].mxu0  ;;  %13194 = vst [vmem:[#allocation7 + $0x210] sm:$0xff] %v8357_v55  ;;  %v8359_v10 = vpop.f32.mrb[9].mxu1 }
 0x2d0   :  { %13193 = vst [vmem:[#allocation7 + $0x208] sm:$0xff] %v7587_v14  ;;  %v7589_v26 = vpop.f32.mrb[10].mxu0  ;;  %13195 = vst [vmem:[#allocation7 + $0x218] sm:$0xff] %v8359_v10  ;;  %v8361_v45 = vpop.f32.mrb[10].mxu1 }
 0x2d1   :  { %13208 = vst [vmem:[#allocation7 + $0x280] sm:$0xff] %v7589_v26  ;;  %v7591_v6 = vpop.f32.mrb[11].mxu0  ;;  %13210 = vst [vmem:[#allocation7 + $0x290] sm:$0xff] %v8361_v45  ;;  %v8363_v38 = vpop.f32.mrb[11].mxu1  ;;  %v698_v26 = vld [vmem:[#allocation5 + $0x1090] sm:$0xff] }
 0x2d2   :  { %13209 = vst [vmem:[#allocation7 + $0x288] sm:$0xff] %v7591_v6  ;;  %13211 = vst [vmem:[#allocation7 + $0x298] sm:$0xff] %v8363_v38  ;;  %v706_v45 = vld [vmem:[#allocation5 + $0x10d0] sm:$0xff] }
 0x2d3   :  { %8659 = vmatmul.mubr.bf16.gmra.mrb[116].mxu0 %v16607_v51  ;;  %9431 = vmatmul.mubr.bf16.gmra.mrb[116].mxu1 %v16607_v51 }
 0x2d4   :  { %8668 = vmatprep.mubr.bf16.mxu0 %v16609_v52  ;;  %9440 = vmatprep.mubr.bf16.mxu1 %v16609_v52 }
 0x2d6   :  { %v7595_v21 = vpop.f32.mrb[12].mxu0  ;;  %v8367_v23 = vpop.f32.mrb[12].mxu1 }
 0x2d7   :  { %13224 = vst [vmem:[#allocation7 + $0x300] sm:$0xff] %v7595_v21  ;;  %v7597_v43 = vpop.f32.mrb[13].mxu0  ;;  %13226 = vst [vmem:[#allocation7 + $0x310] sm:$0xff] %v8367_v23  ;;  %v8369_v58 = vpop.f32.mrb[13].mxu1  ;;  %v699_v21 = vld [vmem:[#allocation5 + $0x1098] sm:$0xff] }
 0x2d8   :  { %13225 = vst [vmem:[#allocation7 + $0x308] sm:$0xff] %v7597_v43  ;;  %v7599_v16 = vpop.f32.mrb[14].mxu0  ;;  %13227 = vst [vmem:[#allocation7 + $0x318] sm:$0xff] %v8369_v58  ;;  %v8371_v49 = vpop.f32.mrb[14].mxu1  ;;  %v707_v23 = vld [vmem:[#allocation5 + $0x10d8] sm:$0xff] }
 0x2d9   :  { %13240 = vst [vmem:[#allocation7 + $0x380] sm:$0xff] %v7599_v16  ;;  %v7601_v28 = vpop.f32.mrb[15].mxu0  ;;  %13242 = vst [vmem:[#allocation7 + $0x390] sm:$0xff] %v8371_v49  ;;  %v8373_v35 = vpop.f32.mrb[15].mxu1  ;;  %v14319_v49 = vcombine.high %v698_v26, %v706_v45 }
 0x2da   :  { %13241 = vst [vmem:[#allocation7 + $0x388] sm:$0xff] %v7601_v28  ;;  %13243 = vst [vmem:[#allocation7 + $0x398] sm:$0xff] %v8373_v35  ;;  %v714_v28 = vld [vmem:[#allocation5 + $0x1110] sm:$0xff] }
 0x2db   :  { %8669 = vmatmul.mubr.bf16.gmra.mrb[120].mxu0 %v16615_v57  ;;  %9441 = vmatmul.mubr.bf16.gmra.mrb[120].mxu1 %v16615_v57  ;;  %v722_v35 = vld [vmem:[#allocation5 + $0x1150] sm:$0xff] }
 0x2dc   :  { %8678 = vmatprep.mubr.bf16.mxu0 %v16617_v59  ;;  %9450 = vmatprep.mubr.bf16.mxu1 %v16617_v59 }
 0x2de   :  { %v7605_v39 = vpop.f32.mrb[16].mxu0  ;;  %v8377_v29 = vpop.f32.mrb[16].mxu1 }
 0x2df   :  { %13256 = vst [vmem:[#allocation7 + $0x400] sm:$0xff] %v7605_v39  ;;  %v7607_v54 = vpop.f32.mrb[17].mxu0  ;;  %13258 = vst [vmem:[#allocation7 + $0x410] sm:$0xff] %v8377_v29  ;;  %v8379_v15 = vpop.f32.mrb[17].mxu1  ;;  %v715_v39 = vld [vmem:[#allocation5 + $0x1118] sm:$0xff]  ;;  %v18551_v29 = vld [vmem:[#allocation19_spill] sm:$0xff] }
 0x2e0   :  { %13257 = vst [vmem:[#allocation7 + $0x408] sm:$0xff] %v7607_v54  ;;  %v7609_v13 = vpop.f32.mrb[18].mxu0  ;;  %13259 = vst [vmem:[#allocation7 + $0x418] sm:$0xff] %v8379_v15  ;;  %v8381_v36 = vpop.f32.mrb[18].mxu1  ;;  %v14321_v54 = vcombine.high %v699_v21, %v707_v23  ;;  %v723_v15 = vld [vmem:[#allocation5 + $0x1158] sm:$0xff] }
 0x2e1   :  { %13272 = vst [vmem:[#allocation7 + $0x480] sm:$0xff] %v7609_v13  ;;  %v7611_v27 = vpop.f32.mrb[19].mxu0  ;;  %13274 = vst [vmem:[#allocation7 + $0x490] sm:$0xff] %v8381_v36  ;;  %v8383_v8 = vpop.f32.mrb[19].mxu1  ;;  %v17166_v13 = vld [vmem:[#allocation5 + $0x1810] sm:$0xff] }
 0x2e2   :  { %13273 = vst [vmem:[#allocation7 + $0x488] sm:$0xff] %v7611_v27  ;;  %13275 = vst [vmem:[#allocation7 + $0x498] sm:$0xff] %v8383_v8  ;;  %v17168_v36 = vld [vmem:[#allocation5 + $0x1850] sm:$0xff]  ;;  %v18552_v27 = vcombine.low %v17080_v62, %v17082_v12  ;;  %v14318_v8 = vcombine.low %v698_v26, %v706_v45  ;;  %v14337_v26 = vcombine.high %v715_v39, %v723_v15 }
 0x2e3   :  { %8679 = vmatmul.mubr.bf16.gmra.mrb[124].mxu0 %v16623_v1  ;;  %9451 = vmatmul.mubr.bf16.gmra.mrb[124].mxu1 %v16623_v1  ;;  %v763_v1 = vld [vmem:[#allocation5 + $0x1298] sm:$0xff] }
 0x2e4   :  { %8721 = vmatprep.mubr.bf16.mxu0 %v16625_v3  ;;  %9493 = vmatprep.mubr.bf16.mxu1 %v16625_v3 }
 0x2e6   :  { %v7615_v55 = vpop.f32.mrb[20].mxu0  ;;  %v8387_v14 = vpop.f32.mrb[20].mxu1 }
 0x2e7   :  { %13288 = vst [vmem:[#allocation7 + $0x500] sm:$0xff] %v7615_v55  ;;  %v7617_v10 = vpop.f32.mrb[21].mxu0  ;;  %13290 = vst [vmem:[#allocation7 + $0x510] sm:$0xff] %v8387_v14  ;;  %v8389_v6 = vpop.f32.mrb[21].mxu1  ;;  %v17176_v14 = vld [vmem:[#allocation5 + $0x1818] sm:$0xff]  ;;  %v738_v55 = vld [vmem:[#allocation5 + $0x11d0] sm:$0xff] }
 0x2e8   :  { %13289 = vst [vmem:[#allocation7 + $0x508] sm:$0xff] %v7617_v10  ;;  %v7619_v38 = vpop.f32.mrb[22].mxu0  ;;  %13291 = vst [vmem:[#allocation7 + $0x518] sm:$0xff] %v8389_v6  ;;  %v8391_v43 = vpop.f32.mrb[22].mxu1  ;;  %v17178_v10 = vld [vmem:[#allocation5 + $0x1858] sm:$0xff]  ;;  %v18553_v6 = vcombine.low %v17090_v30, %v17092_v4 }
 0x2e9   :  { %13304 = vst [vmem:[#allocation7 + $0x580] sm:$0xff] %v7619_v38  ;;  %v7621_v58 = vpop.f32.mrb[23].mxu0  ;;  %13306 = vst [vmem:[#allocation7 + $0x590] sm:$0xff] %v8391_v43  ;;  %v8393_v16 = vpop.f32.mrb[23].mxu1  ;;  %v18554_v38 = vld [vmem:[#allocation20_spill] sm:$0xff]  ;;  %v14320_v43 = vcombine.low %v699_v21, %v707_v23  ;;  %v731_v21 = vld [vmem:[#allocation5 + $0x1198] sm:$0xff] }
 0x2ea   :  { %13305 = vst [vmem:[#allocation7 + $0x588] sm:$0xff] %v7621_v58  ;;  %13307 = vst [vmem:[#allocation7 + $0x598] sm:$0xff] %v8393_v16  ;;  %v14335_v58 = vcombine.high %v714_v28, %v722_v35  ;;  %v739_v23 = vld [vmem:[#allocation5 + $0x11d8] sm:$0xff] }
 0x2eb   :  { %8722 = vmatmul.mubr.bf16.vlgmr.msra.gmra.mrb[64].mxu0 %v18551_v29  ;;  %9494 = vmatmul.mubr.bf16.vlgmr.msra.gmra.mrb[64].mxu1 %v18551_v29  ;;  %v754_v29 = vld [vmem:[#allocation5 + $0x1250] sm:$0xff] }
 0x2ec   :  { %8883 = vmatpush1.bf16.msra.mxu0 %v18552_v27  ;;  %9655 = vmatpush1.bf16.msra.mxu1 %v18553_v6  ;;  %v730_v27 = vld [vmem:[#allocation5 + $0x1190] sm:$0xff] }
 0x2ed   :  { %8731 = vmatprep.mubr.bf16.mxu0 %v18554_v38  ;;  %9503 = vmatprep.mubr.bf16.mxu1 %v18554_v38  ;;  %v14351_v38 = vcombine.high %v730_v27, %v738_v55 }
 0x2ee   :  { %v7625_v62 = vpop.f32.mrb[24].mxu0  ;;  %8884 = vmatprep.subr.bf16.mxu0 %v14319_v49  ;;  %v8397_v45 = vpop.f32.mrb[24].mxu1  ;;  %9656 = vmatprep.subr.bf16.mxu1 %v14321_v54  ;;  %v14334_v49 = vcombine.low %v714_v28, %v722_v35  ;;  %v14336_v54 = vcombine.low %v715_v39, %v723_v15  ;;  %v14350_v28 = vcombine.low %v730_v27, %v738_v55 }
 0x2ef   :  { %13320 = vst [vmem:[#allocation7 + $0x600] sm:$0xff] %v7625_v62  ;;  %v7627_v16 = vpop.f32.mrb[25].mxu0  ;;  %13322 = vst [vmem:[#allocation7 + $0x610] sm:$0xff] %v8397_v45  ;;  %v8399_v4 = vpop.f32.mrb[25].mxu1  ;;  %v18555_v45 = vld [vmem:[#allocation21_spill] sm:$0xff]  ;;  %v14352_v39 = vcombine.low %v731_v21, %v739_v23 }
 0x2f0   :  { %13321 = vst [vmem:[#allocation7 + $0x608] sm:$0xff] %v7627_v16  ;;  %v7629_v30 = vpop.f32.mrb[26].mxu0  ;;  %8885 = vmatpush1.bf16.msra.mxu0 %v14318_v8  ;;  %13323 = vst [vmem:[#allocation7 + $0x618] sm:$0xff] %v8399_v4  ;;  %v8401_v6 = vpop.f32.mrb[26].mxu1  ;;  %9657 = vmatpush1.bf16.msra.mxu1 %v14320_v43  ;;  %v14353_v16 = vcombine.high %v731_v21, %v739_v23  ;;  %v746_v8 = vld [vmem:[#allocation5 + $0x1210] sm:$0xff]  ;;  %v18556_v4 = vld [vmem:[#allocation22_spill] sm:$0xff] }
 0x2f1   :  { %13336 = vst [vmem:[#allocation7 + $0x680] sm:$0xff] %v7629_v30  ;;  %v7631_v12 = vpop.f32.mrb[27].mxu0  ;;  %8886 = vmatprep.subr.bf16.mxu0 %v14335_v58  ;;  %13338 = vst [vmem:[#allocation7 + $0x690] sm:$0xff] %v8401_v6  ;;  %v8403_v62 = vpop.f32.mrb[27].mxu1  ;;  %9658 = vmatprep.subr.bf16.mxu1 %v14337_v26  ;;  %v747_v30 = vld [vmem:[#allocation5 + $0x1218] sm:$0xff]  ;;  %v14367_v15 = vcombine.high %v746_v8, %v754_v29  ;;  %v762_v6 = vld [vmem:[#allocation5 + $0x1290] sm:$0xff] }
 0x2f2   :  { %13337 = vst [vmem:[#allocation7 + $0x688] sm:$0xff] %v7631_v12  ;;  %13339 = vst [vmem:[#allocation7 + $0x698] sm:$0xff] %v8403_v62  ;;  %v755_v43 = vld [vmem:[#allocation5 + $0x1258] sm:$0xff]  ;;  %v770_v62 = vld [vmem:[#allocation5 + $0x12d0] sm:$0xff] }
 0x2f3   :  { %8732 = vmatmul.mubr.bf16.gmra.mrb[68].mxu0 %v18555_v45  ;;  %9504 = vmatmul.mubr.bf16.gmra.mrb[68].mxu1 %v18555_v45  ;;  %v14369_v26 = vcombine.high %v747_v30, %v755_v43  ;;  %v14368_v23 = vcombine.low %v747_v30, %v755_v43 }
 0x2f4   :  { %8741 = vmatprep.mubr.bf16.mxu0 %v18556_v4  ;;  %9513 = vmatprep.mubr.bf16.mxu1 %v18556_v4  ;;  %v771_v4 = vld [vmem:[#allocation5 + $0x12d8] sm:$0xff] }
 0x2f5   :  { %8887 = vmatpush1.bf16.msra.mxu0 %v14334_v49  ;;  %9659 = vmatpush1.bf16.msra.mxu1 %v14336_v54  ;;  %v14383_v49 = vcombine.high %v762_v6, %v770_v62  ;;  %v18557_v54 = vld [vmem:[#allocation23_spill] sm:$0xff]  ;;  %v14384_v30 = vcombine.low %v763_v1, %v771_v4 }
 0x2f6   :  { %v7635_v35 = vpop.f32.mrb[28].mxu0  ;;  %8888 = vmatprep.subr.bf16.mxu0 %v14351_v38  ;;  %v8407_v58 = vpop.f32.mrb[28].mxu1  ;;  %9660 = vmatprep.subr.bf16.mxu1 %v14353_v16  ;;  %v14366_v38 = vcombine.low %v746_v8, %v754_v29  ;;  %v14385_v16 = vcombine.high %v763_v1, %v771_v4  ;;  %v787_v29 = vld [vmem:[#allocation5 + $0x1358] sm:$0xff]  ;;  %v14382_v8 = vcombine.low %v762_v6, %v770_v62 }
 0x2f7   :  { %13352 = vst [vmem:[#allocation7 + $0x700] sm:$0xff] %v7635_v35  ;;  %v7637_v12 = vpop.f32.mrb[29].mxu0  ;;  %13354 = vst [vmem:[#allocation7 + $0x710] sm:$0xff] %v8407_v58  ;;  %v8409_v45 = vpop.f32.mrb[29].mxu1  ;;  %v778_v35 = vld [vmem:[#allocation5 + $0x1310] sm:$0xff] }
 0x2f8   :  { %13353 = vst [vmem:[#allocation7 + $0x708] sm:$0xff] %v7637_v12  ;;  %v7639_v3 = vpop.f32.mrb[30].mxu0  ;;  %13355 = vst [vmem:[#allocation7 + $0x718] sm:$0xff] %v8409_v45  ;;  %v8411_v55 = vpop.f32.mrb[30].mxu1  ;;  %v786_v58 = vld [vmem:[#allocation5 + $0x1350] sm:$0xff]  ;;  %v779_v45 = vld [vmem:[#allocation5 + $0x1318] sm:$0xff] }
 0x2f9   :  { %13368 = vst [vmem:[#allocation7 + $0x780] sm:$0xff] %v7639_v3  ;;  %v7641_v27 = vpop.f32.mrb[31].mxu0  ;;  %8889 = vmatpush1.bf16.msra.mxu0 %v14350_v28  ;;  %13370 = vst [vmem:[#allocation7 + $0x790] sm:$0xff] %v8411_v55  ;;  %v8413_v21 = vpop.f32.mrb[31].mxu1  ;;  %9661 = vmatpush1.bf16.msra.mxu1 %v14352_v39  ;;  %v18558_v3 = vld [vmem:[#allocation24_spill] sm:$0xff]  ;;  %v14399_v43 = vcombine.high %v778_v35, %v786_v58  ;;  %v14401_v12 = vcombine.high %v779_v45, %v787_v29  ;;  %v802_v55 = vld [vmem:[#allocation5 + $0x13d0] sm:$0xff] }
 0x2fa   :  { %13369 = vst [vmem:[#allocation7 + $0x788] sm:$0xff] %v7641_v27  ;;  %8890 = vmatprep.subr.bf16.mxu0 %v14367_v15  ;;  %13371 = vst [vmem:[#allocation7 + $0x798] sm:$0xff] %v8413_v21  ;;  %9662 = vmatprep.subr.bf16.mxu1 %v14369_v26  ;;  %v794_v26 = vld [vmem:[#allocation5 + $0x1390] sm:$0xff]  ;;  %v14398_v1 = vcombine.low %v778_v35, %v786_v58  ;;  %v819_v35 = vld [vmem:[#allocation5 + $0x1458] sm:$0xff] }
 0x2fb   :  { %8742 = vmatmul.mubr.bf16.gmra.mrb[72].mxu0 %v18557_v54  ;;  %9514 = vmatmul.mubr.bf16.gmra.mrb[72].mxu1 %v18557_v54  ;;  %v795_v54 = vld [vmem:[#allocation5 + $0x1398] sm:$0xff]  ;;  %v14414_v58 = vcombine.low %v794_v26, %v802_v55 }
 0x2fc   :  { %8751 = vmatprep.mubr.bf16.mxu0 %v18558_v3  ;;  %9523 = vmatprep.mubr.bf16.mxu1 %v18558_v3  ;;  %v803_v3 = vld [vmem:[#allocation5 + $0x13d8] sm:$0xff] }
 0x2fd   :  { %8891 = vmatpush1.bf16.msra.mxu0 %v14366_v38  ;;  %9663 = vmatpush1.bf16.msra.mxu1 %v14368_v23  ;;  %v14400_v38 = vcombine.low %v779_v45, %v787_v29  ;;  %v14415_v23 = vcombine.high %v794_v26, %v802_v55  ;;  %v14416_v45 = vcombine.low %v795_v54, %v803_v3 }
 0x2fe   :  { %v7645_v28 = vpop.f32.mrb[32].mxu0  ;;  %8892 = vmatprep.subr.bf16.mxu0 %v14383_v49  ;;  %v8417_v39 = vpop.f32.mrb[32].mxu1  ;;  %9664 = vmatprep.subr.bf16.mxu1 %v14385_v16  ;;  %v18559_v49 = vld [vmem:[#allocation25_spill] sm:$0xff]  ;;  %v14417_v16 = vcombine.high %v795_v54, %v803_v3 }
 0x2ff   :  { %13384 = vst [vmem:[#allocation7 + $0x800] sm:$0xff] %v7645_v28  ;;  %v7647_v15 = vpop.f32.mrb[33].mxu0  ;;  %13386 = vst [vmem:[#allocation7 + $0x810] sm:$0xff] %v8417_v39  ;;  %v8419_v27 = vpop.f32.mrb[33].mxu1  ;;  %v810_v28 = vld [vmem:[#allocation5 + $0x1410] sm:$0xff] }
 0x300   :  { %13385 = vst [vmem:[#allocation7 + $0x808] sm:$0xff] %v7647_v15  ;;  %v7649_v21 = vpop.f32.mrb[34].mxu0  ;;  %13387 = vst [vmem:[#allocation7 + $0x818] sm:$0xff] %v8419_v27  ;;  %v8421_v6 = vpop.f32.mrb[34].mxu1  ;;  %v818_v39 = vld [vmem:[#allocation5 + $0x1450] sm:$0xff]  ;;  %v18560_v15 = vld [vmem:[#allocation26_spill] sm:$0xff] }
 0x301   :  { %13400 = vst [vmem:[#allocation7 + $0x880] sm:$0xff] %v7649_v21  ;;  %v7651_v62 = vpop.f32.mrb[35].mxu0  ;;  %8893 = vmatpush1.bf16.msra.mxu0 %v14382_v8  ;;  %13402 = vst [vmem:[#allocation7 + $0x890] sm:$0xff] %v8421_v6  ;;  %v8423_v4 = vpop.f32.mrb[35].mxu1  ;;  %9665 = vmatpush1.bf16.msra.mxu1 %v14384_v30  ;;  %v811_v8 = vld [vmem:[#allocation5 + $0x1418] sm:$0xff]  ;;  %v14431_v29 = vcombine.high %v810_v28, %v818_v39  ;;  %v826_v21 = vld [vmem:[#allocation5 + $0x1490] sm:$0xff]  ;;  %v14430_v54 = vcombine.low %v810_v28, %v818_v39 }
 0x302   :  { %13401 = vst [vmem:[#allocation7 + $0x888] sm:$0xff] %v7651_v62  ;;  %8894 = vmatprep.subr.bf16.mxu0 %v14399_v43  ;;  %13403 = vst [vmem:[#allocation7 + $0x898] sm:$0xff] %v8423_v4  ;;  %9666 = vmatprep.subr.bf16.mxu1 %v14401_v12  ;;  %v14433_v27 = vcombine.high %v811_v8, %v819_v35  ;;  %v834_v6 = vld [vmem:[#allocation5 + $0x14d0] sm:$0xff]  ;;  %v851_v28 = vld [vmem:[#allocation5 + $0x1558] sm:$0xff] }
 0x303   :  { %8752 = vmatmul.mubr.bf16.gmra.mrb[76].mxu0 %v18559_v49  ;;  %9524 = vmatmul.mubr.bf16.gmra.mrb[76].mxu1 %v18559_v49  ;;  %v827_v49 = vld [vmem:[#allocation5 + $0x1498] sm:$0xff]  ;;  %v14446_v39 = vcombine.low %v826_v21, %v834_v6 }
 0x304   :  { %8761 = vmatprep.mubr.bf16.mxu0 %v18560_v15  ;;  %9533 = vmatprep.mubr.bf16.mxu1 %v18560_v15  ;;  %v835_v15 = vld [vmem:[#allocation5 + $0x14d8] sm:$0xff] }
 0x305   :  { %8895 = vmatpush1.bf16.msra.mxu0 %v14398_v1  ;;  %9667 = vmatpush1.bf16.msra.mxu1 %v14400_v38  ;;  %v14432_v1 = vcombine.low %v811_v8, %v819_v35  ;;  %v14447_v38 = vcombine.high %v826_v21, %v834_v6  ;;  %v14448_v8 = vcombine.low %v827_v49, %v835_v15 }
 0x306   :  { %v7655_v30 = vpop.f32.mrb[36].mxu0  ;;  %8896 = vmatprep.subr.bf16.mxu0 %v14415_v23  ;;  %v8427_v43 = vpop.f32.mrb[36].mxu1  ;;  %9668 = vmatprep.subr.bf16.mxu1 %v14417_v16  ;;  %v18561_v23 = vld [vmem:[#allocation27_spill] sm:$0xff]  ;;  %v14449_v16 = vcombine.high %v827_v49, %v835_v15 }
 0x307   :  { %13416 = vst [vmem:[#allocation7 + $0x900] sm:$0xff] %v7655_v30  ;;  %v7657_v12 = vpop.f32.mrb[37].mxu0  ;;  %13418 = vst [vmem:[#allocation7 + $0x910] sm:$0xff] %v8427_v43  ;;  %v8429_v62 = vpop.f32.mrb[37].mxu1  ;;  %v842_v30 = vld [vmem:[#allocation5 + $0x1510] sm:$0xff] }
 0x308   :  { %13417 = vst [vmem:[#allocation7 + $0x908] sm:$0xff] %v7657_v12  ;;  %v7659_v4 = vpop.f32.mrb[38].mxu0  ;;  %13419 = vst [vmem:[#allocation7 + $0x918] sm:$0xff] %v8429_v62  ;;  %v8431_v26 = vpop.f32.mrb[38].mxu1  ;;  %v850_v43 = vld [vmem:[#allocation5 + $0x1550] sm:$0xff]  ;;  %v18562_v12 = vld [vmem:[#allocation28_spill] sm:$0xff] }
 0x309   :  { %13432 = vst [vmem:[#allocation7 + $0x980] sm:$0xff] %v7659_v4  ;;  %v7661_v55 = vpop.f32.mrb[39].mxu0  ;;  %8897 = vmatpush1.bf16.msra.mxu0 %v14414_v58  ;;  %13434 = vst [vmem:[#allocation7 + $0x990] sm:$0xff] %v8431_v26  ;;  %v8433_v3 = vpop.f32.mrb[39].mxu1  ;;  %9669 = vmatpush1.bf16.msra.mxu1 %v14416_v45  ;;  %v843_v58 = vld [vmem:[#allocation5 + $0x1518] sm:$0xff]  ;;  %v14463_v35 = vcombine.high %v842_v30, %v850_v43  ;;  %v858_v4 = vld [vmem:[#allocation5 + $0x1590] sm:$0xff]  ;;  %v14462_v49 = vcombine.low %v842_v30, %v850_v43 }
 0x30a   :  { %13433 = vst [vmem:[#allocation7 + $0x988] sm:$0xff] %v7661_v55  ;;  %8898 = vmatprep.subr.bf16.mxu0 %v14431_v29  ;;  %13435 = vst [vmem:[#allocation7 + $0x998] sm:$0xff] %v8433_v3  ;;  %9670 = vmatprep.subr.bf16.mxu1 %v14433_v27  ;;  %v14465_v62 = vcombine.high %v843_v58, %v851_v28  ;;  %v866_v26 = vld [vmem:[#allocation5 + $0x15d0] sm:$0xff]  ;;  %v883_v30 = vld [vmem:[#allocation5 + $0x1658] sm:$0xff] }
 0x30b   :  { %8762 = vmatmul.mubr.bf16.gmra.mrb[80].mxu0 %v18561_v23  ;;  %9534 = vmatmul.mubr.bf16.gmra.mrb[80].mxu1 %v18561_v23  ;;  %v859_v23 = vld [vmem:[#allocation5 + $0x1598] sm:$0xff]  ;;  %v14478_v43 = vcombine.low %v858_v4, %v866_v26 }
 0x30c   :  { %8771 = vmatprep.mubr.bf16.mxu0 %v18562_v12  ;;  %9543 = vmatprep.mubr.bf16.mxu1 %v18562_v12  ;;  %v867_v12 = vld [vmem:[#allocation5 + $0x15d8] sm:$0xff] }
 0x30d   :  { %8899 = vmatpush1.bf16.msra.mxu0 %v14430_v54  ;;  %9671 = vmatpush1.bf16.msra.mxu1 %v14432_v1  ;;  %v14464_v54 = vcombine.low %v843_v58, %v851_v28  ;;  %v14479_v1 = vcombine.high %v858_v4, %v866_v26  ;;  %v14480_v58 = vcombine.low %v859_v23, %v867_v12 }
 0x30e   :  { %v7665_v45 = vpop.f32.mrb[40].mxu0  ;;  %8900 = vmatprep.subr.bf16.mxu0 %v14447_v38  ;;  %v8437_v29 = vpop.f32.mrb[40].mxu1  ;;  %9672 = vmatprep.subr.bf16.mxu1 %v14449_v16  ;;  %v18563_v38 = vld [vmem:[#allocation29_spill] sm:$0xff]  ;;  %v14481_v16 = vcombine.high %v859_v23, %v867_v12 }
 0x30f   :  { %13448 = vst [vmem:[#allocation7 + $0xa00] sm:$0xff] %v7665_v45  ;;  %v7667_v27 = vpop.f32.mrb[41].mxu0  ;;  %13450 = vst [vmem:[#allocation7 + $0xa10] sm:$0xff] %v8437_v29  ;;  %v8439_v55 = vpop.f32.mrb[41].mxu1  ;;  %v874_v45 = vld [vmem:[#allocation5 + $0x1610] sm:$0xff] }
 0x310   :  { %13449 = vst [vmem:[#allocation7 + $0xa08] sm:$0xff] %v7667_v27  ;;  %v7669_v3 = vpop.f32.mrb[42].mxu0  ;;  %13451 = vst [vmem:[#allocation7 + $0xa18] sm:$0xff] %v8439_v55  ;;  %v8441_v21 = vpop.f32.mrb[42].mxu1  ;;  %v882_v29 = vld [vmem:[#allocation5 + $0x1650] sm:$0xff]  ;;  %v18564_v27 = vld [vmem:[#allocation30_spill] sm:$0xff] }
 0x311   :  { %13464 = vst [vmem:[#allocation7 + $0xa80] sm:$0xff] %v7669_v3  ;;  %v7671_v6 = vpop.f32.mrb[43].mxu0  ;;  %8901 = vmatpush1.bf16.msra.mxu0 %v14446_v39  ;;  %13466 = vst [vmem:[#allocation7 + $0xa90] sm:$0xff] %v8441_v21  ;;  %v8443_v15 = vpop.f32.mrb[43].mxu1  ;;  %9673 = vmatpush1.bf16.msra.mxu1 %v14448_v8  ;;  %v875_v39 = vld [vmem:[#allocation5 + $0x1618] sm:$0xff]  ;;  %v14495_v28 = vcombine.high %v874_v45, %v882_v29  ;;  %v890_v3 = vld [vmem:[#allocation5 + $0x1690] sm:$0xff]  ;;  %v14494_v23 = vcombine.low %v874_v45, %v882_v29 }
 0x312   :  { %13465 = vst [vmem:[#allocation7 + $0xa88] sm:$0xff] %v7671_v6  ;;  %8902 = vmatprep.subr.bf16.mxu0 %v14463_v35  ;;  %13467 = vst [vmem:[#allocation7 + $0xa98] sm:$0xff] %v8443_v15  ;;  %9674 = vmatprep.subr.bf16.mxu1 %v14465_v62  ;;  %v14497_v55 = vcombine.high %v875_v39, %v883_v30  ;;  %v898_v21 = vld [vmem:[#allocation5 + $0x16d0] sm:$0xff]  ;;  %v915_v45 = vld [vmem:[#allocation5 + $0x1758] sm:$0xff] }
 0x313   :  { %8772 = vmatmul.mubr.bf16.gmra.mrb[84].mxu0 %v18563_v38  ;;  %9544 = vmatmul.mubr.bf16.gmra.mrb[84].mxu1 %v18563_v38  ;;  %v891_v38 = vld [vmem:[#allocation5 + $0x1698] sm:$0xff]  ;;  %v14510_v29 = vcombine.low %v890_v3, %v898_v21 }
 0x314   :  { %8781 = vmatprep.mubr.bf16.mxu0 %v18564_v27  ;;  %9553 = vmatprep.mubr.bf16.mxu1 %v18564_v27  ;;  %v899_v27 = vld [vmem:[#allocation5 + $0x16d8] sm:$0xff] }
 0x315   :  { %8903 = vmatpush1.bf16.msra.mxu0 %v14462_v49  ;;  %9675 = vmatpush1.bf16.msra.mxu1 %v14464_v54  ;;  %v14496_v49 = vcombine.low %v875_v39, %v883_v30  ;;  %v14511_v54 = vcombine.high %v890_v3, %v898_v21  ;;  %v14512_v39 = vcombine.low %v891_v38, %v899_v27 }
 0x316   :  { %v7675_v8 = vpop.f32.mrb[44].mxu0  ;;  %8904 = vmatprep.subr.bf16.mxu0 %v14479_v1  ;;  %v8447_v35 = vpop.f32.mrb[44].mxu1  ;;  %9676 = vmatprep.subr.bf16.mxu1 %v14481_v16  ;;  %v18565_v1 = vld [vmem:[#allocation31_spill] sm:$0xff]  ;;  %v14513_v16 = vcombine.high %v891_v38, %v899_v27 }
 0x317   :  { %13480 = vst [vmem:[#allocation7 + $0xb00] sm:$0xff] %v7675_v8  ;;  %v7677_v62 = vpop.f32.mrb[45].mxu0  ;;  %13482 = vst [vmem:[#allocation7 + $0xb10] sm:$0xff] %v8447_v35  ;;  %v8449_v6 = vpop.f32.mrb[45].mxu1  ;;  %v906_v8 = vld [vmem:[#allocation5 + $0x1710] sm:$0xff] }
 0x318   :  { %13481 = vst [vmem:[#allocation7 + $0xb08] sm:$0xff] %v7677_v62  ;;  %v7679_v15 = vpop.f32.mrb[46].mxu0  ;;  %13483 = vst [vmem:[#allocation7 + $0xb18] sm:$0xff] %v8449_v6  ;;  %v8451_v4 = vpop.f32.mrb[46].mxu1  ;;  %v914_v35 = vld [vmem:[#allocation5 + $0x1750] sm:$0xff]  ;;  %v18566_v62 = vld [vmem:[#allocation32_spill] sm:$0xff] }
 0x319   :  { %13496 = vst [vmem:[#allocation7 + $0xb80] sm:$0xff] %v7679_v15  ;;  %v7681_v26 = vpop.f32.mrb[47].mxu0  ;;  %8905 = vmatpush1.bf16.msra.mxu0 %v14478_v43  ;;  %13498 = vst [vmem:[#allocation7 + $0xb90] sm:$0xff] %v8451_v4  ;;  %v8453_v12 = vpop.f32.mrb[47].mxu1  ;;  %9677 = vmatpush1.bf16.msra.mxu1 %v14480_v58  ;;  %v907_v43 = vld [vmem:[#allocation5 + $0x1718] sm:$0xff]  ;;  %v14527_v30 = vcombine.high %v906_v8, %v914_v35  ;;  %v922_v15 = vld [vmem:[#allocation5 + $0x1790] sm:$0xff]  ;;  %v14526_v38 = vcombine.low %v906_v8, %v914_v35 }
 0x31a   :  { %13497 = vst [vmem:[#allocation7 + $0xb88] sm:$0xff] %v7681_v26  ;;  %8906 = vmatprep.subr.bf16.mxu0 %v14495_v28  ;;  %13499 = vst [vmem:[#allocation7 + $0xb98] sm:$0xff] %v8453_v12  ;;  %9678 = vmatprep.subr.bf16.mxu1 %v14497_v55  ;;  %v14529_v6 = vcombine.high %v907_v43, %v915_v45  ;;  %v930_v4 = vld [vmem:[#allocation5 + $0x17d0] sm:$0xff] }
 0x31b   :  { %8782 = vmatmul.mubr.bf16.gmra.mrb[88].mxu0 %v18565_v1  ;;  %9554 = vmatmul.mubr.bf16.gmra.mrb[88].mxu1 %v18565_v1  ;;  %v923_v1 = vld [vmem:[#allocation5 + $0x1798] sm:$0xff]  ;;  %v14542_v8 = vcombine.low %v922_v15, %v930_v4 }
 0x31c   :  { %8791 = vmatprep.mubr.bf16.mxu0 %v18566_v62  ;;  %9563 = vmatprep.mubr.bf16.mxu1 %v18566_v62  ;;  %v931_v62 = vld [vmem:[#allocation5 + $0x17d8] sm:$0xff] }
 0x31d   :  { %8907 = vmatpush1.bf16.msra.mxu0 %v14494_v23  ;;  %9679 = vmatpush1.bf16.msra.mxu1 %v14496_v49  ;;  %v14528_v23 = vcombine.low %v907_v43, %v915_v45  ;;  %v14543_v49 = vcombine.high %v922_v15, %v930_v4  ;;  %v14559_v43 = vcombine.high %v17166_v13, %v17168_v36  ;;  %v18570_v4 = vld [vmem:[#allocation36_spill] sm:$0xff] }
 0x31e   :  { %v7685_v58 = vpop.f32.mrb[48].mxu0  ;;  %8908 = vmatprep.subr.bf16.mxu0 %v14511_v54  ;;  %v8457_v28 = vpop.f32.mrb[48].mxu1  ;;  %9680 = vmatprep.subr.bf16.mxu1 %v14513_v16  ;;  %v18567_v54 = vld [vmem:[#allocation33_spill] sm:$0xff]  ;;  %v14545_v16 = vcombine.high %v923_v1, %v931_v62 }
 0x31f   :  { %13512 = vst [vmem:[#allocation7 + $0xc00] sm:$0xff] %v7685_v58  ;;  %v7687_v55 = vpop.f32.mrb[49].mxu0  ;;  %13514 = vst [vmem:[#allocation7 + $0xc10] sm:$0xff] %v8457_v28  ;;  %v8459_v26 = vpop.f32.mrb[49].mxu1  ;;  %v18568_v58 = vld [vmem:[#allocation34_spill] sm:$0xff] }
 0x320   :  { %13513 = vst [vmem:[#allocation7 + $0xc08] sm:$0xff] %v7687_v55  ;;  %v7689_v12 = vpop.f32.mrb[50].mxu0  ;;  %13515 = vst [vmem:[#allocation7 + $0xc18] sm:$0xff] %v8459_v26  ;;  %v8461_v3 = vpop.f32.mrb[50].mxu1 }
 0x321   :  { %13528 = vst [vmem:[#allocation7 + $0xc80] sm:$0xff] %v7689_v12  ;;  %v7691_v21 = vpop.f32.mrb[51].mxu0  ;;  %8909 = vmatpush1.bf16.msra.mxu0 %v14510_v29  ;;  %13530 = vst [vmem:[#allocation7 + $0xc90] sm:$0xff] %v8461_v3  ;;  %v8463_v27 = vpop.f32.mrb[51].mxu1  ;;  %9681 = vmatpush1.bf16.msra.mxu1 %v14512_v39  ;;  %v14544_v29 = vcombine.low %v923_v1, %v931_v62  ;;  %v18569_v62 = vld [vmem:[#allocation35_spill] sm:$0xff] }
 0x322   :  { %13529 = vst [vmem:[#allocation7 + $0xc88] sm:$0xff] %v7691_v21  ;;  %8910 = vmatprep.subr.bf16.mxu0 %v14527_v30  ;;  %13531 = vst [vmem:[#allocation7 + $0xc98] sm:$0xff] %v8463_v27  ;;  %9682 = vmatprep.subr.bf16.mxu1 %v14529_v6  ;;  %v14561_v30 = vcombine.high %v17176_v14, %v17178_v10 }
 0x323   :  { %8792 = vmatmul.mubr.bf16.gmra.mrb[92].mxu0 %v18567_v54  ;;  %9564 = vmatmul.mubr.bf16.gmra.mrb[92].mxu1 %v18567_v54  ;;  %v18591_v54 = vld [vmem:[#allocation55_spill] sm:$0xff] }
 0x324   :  { %8801 = vmatprep.mubr.bf16.mxu0 %v18568_v58  ;;  %9573 = vmatprep.mubr.bf16.mxu1 %v18568_v58 }
 0x325   :  { %8911 = vmatpush1.bf16.msra.mxu0 %v14526_v38  ;;  %9683 = vmatpush1.bf16.msra.mxu1 %v14528_v23 }
 0x326   :  { %v7695_v35 = vpop.f32.mrb[52].mxu0  ;;  %8912 = vmatprep.subr.bf16.mxu0 %v14543_v49  ;;  %v8467_v45 = vpop.f32.mrb[52].mxu1  ;;  %9684 = vmatprep.subr.bf16.mxu1 %v14545_v16  ;;  %v18571_v16 = vld [vmem:[#allocation37_spill] sm:$0xff] }
 0x327   :  { %13544 = vst [vmem:[#allocation7 + $0xd00] sm:$0xff] %v7695_v35  ;;  %v7697_v39 = vpop.f32.mrb[53].mxu0  ;;  %13546 = vst [vmem:[#allocation7 + $0xd10] sm:$0xff] %v8467_v45  ;;  %v8469_v28 = vpop.f32.mrb[53].mxu1 }
 0x328   :  { %13545 = vst [vmem:[#allocation7 + $0xd08] sm:$0xff] %v7697_v39  ;;  %v7699_v55 = vpop.f32.mrb[54].mxu0  ;;  %13547 = vst [vmem:[#allocation7 + $0xd18] sm:$0xff] %v8469_v28  ;;  %v8471_v6 = vpop.f32.mrb[54].mxu1 }
 0x329   :  { %13560 = vst [vmem:[#allocation7 + $0xd80] sm:$0xff] %v7699_v55  ;;  %v7701_v15 = vpop.f32.mrb[55].mxu0  ;;  %8913 = vmatpush1.bf16.msra.mxu0 %v14542_v8  ;;  %13562 = vst [vmem:[#allocation7 + $0xd90] sm:$0xff] %v8471_v6  ;;  %v8473_v1 = vpop.f32.mrb[55].mxu1  ;;  %9685 = vmatpush1.bf16.msra.mxu1 %v14544_v29  ;;  %v18572_v8 = vld [vmem:[#allocation38_spill] sm:$0xff]  ;;  %v18573_v6 = vld [vmem:[#allocation39_spill] sm:$0xff] }
 0x32a   :  { %13561 = vst [vmem:[#allocation7 + $0xd88] sm:$0xff] %v7701_v15  ;;  %9075 = vmatprep.subr.bf16.mxu0 %v14559_v43  ;;  %13563 = vst [vmem:[#allocation7 + $0xd98] sm:$0xff] %v8473_v1  ;;  %9847 = vmatprep.subr.bf16.mxu1 %v14561_v30  ;;  %v18574_v15 = vld [vmem:[#allocation40_spill] sm:$0xff]  ;;  %v18575_v1 = vld [vmem:[#allocation41_spill] sm:$0xff] }
 0x32b   :  { %8802 = vmatmul.mubr.bf16.gmra.mrb[96].mxu0 %v18569_v62  ;;  %9574 = vmatmul.mubr.bf16.gmra.mrb[96].mxu1 %v18569_v62 }
 0x32c   :  { %8811 = vmatprep.mubr.bf16.mxu0 %v18570_v4  ;;  %9583 = vmatprep.mubr.bf16.mxu1 %v18570_v4  ;;  %v1011_v4 = vld [vmem:[#allocation5 + $0x1a58] sm:$0xff] }
 0x32e   :  { %v7705_v26 = vpop.f32.mrb[56].mxu0  ;;  %v8477_v12 = vpop.f32.mrb[56].mxu1 }
 0x32f   :  { %13576 = vst [vmem:[#allocation7 + $0xe00] sm:$0xff] %v7705_v26  ;;  %v7707_v3 = vpop.f32.mrb[57].mxu0  ;;  %13578 = vst [vmem:[#allocation7 + $0xe10] sm:$0xff] %v8477_v12  ;;  %v8479_v21 = vpop.f32.mrb[57].mxu1  ;;  %v18576_v26 = vld [vmem:[#allocation42_spill] sm:$0xff]  ;;  %v18577_v12 = vld [vmem:[#allocation43_spill] sm:$0xff] }
 0x330   :  { %13577 = vst [vmem:[#allocation7 + $0xe08] sm:$0xff] %v7707_v3  ;;  %v7709_v38 = vpop.f32.mrb[58].mxu0  ;;  %13579 = vst [vmem:[#allocation7 + $0xe18] sm:$0xff] %v8479_v21  ;;  %v8481_v27 = vpop.f32.mrb[58].mxu1  ;;  %v18578_v3 = vld [vmem:[#allocation44_spill] sm:$0xff]  ;;  %v18579_v21 = vld [vmem:[#allocation45_spill] sm:$0xff] }
 0x331   :  { %13592 = vst [vmem:[#allocation7 + $0xe80] sm:$0xff] %v7709_v38  ;;  %v7711_v23 = vpop.f32.mrb[59].mxu0  ;;  %13594 = vst [vmem:[#allocation7 + $0xe90] sm:$0xff] %v8481_v27  ;;  %v8483_v49 = vpop.f32.mrb[59].mxu1  ;;  %v18580_v38 = vld [vmem:[#allocation46_spill] sm:$0xff]  ;;  %v18581_v27 = vld [vmem:[#allocation47_spill] sm:$0xff] }
 0x332   :  { %13593 = vst [vmem:[#allocation7 + $0xe88] sm:$0xff] %v7711_v23  ;;  %13595 = vst [vmem:[#allocation7 + $0xe98] sm:$0xff] %v8483_v49  ;;  %v18582_v23 = vld [vmem:[#allocation48_spill] sm:$0xff]  ;;  %v18583_v49 = vld [vmem:[#allocation49_spill] sm:$0xff] }
 0x333   :  { %8812 = vmatmul.mubr.bf16.gmra.mrb[100].mxu0 %v18571_v16  ;;  %9584 = vmatmul.mubr.bf16.gmra.mrb[100].mxu1 %v18571_v16  ;;  %v1010_v16 = vld [vmem:[#allocation5 + $0x1a50] sm:$0xff] }
 0x334   :  { %8821 = vmatprep.mubr.bf16.mxu0 %v18572_v8  ;;  %9593 = vmatprep.mubr.bf16.mxu1 %v18572_v8 }
 0x336   :  { %v7715_v35 = vpop.f32.mrb[60].mxu0  ;;  %v8487_v29 = vpop.f32.mrb[60].mxu1 }
 0x337   :  { %13608 = vst [vmem:[#allocation7 + $0xf00] sm:$0xff] %v7715_v35  ;;  %v7717_v43 = vpop.f32.mrb[61].mxu0  ;;  %13610 = vst [vmem:[#allocation7 + $0xf10] sm:$0xff] %v8487_v29  ;;  %v8489_v45 = vpop.f32.mrb[61].mxu1  ;;  %v18584_v35 = vld [vmem:[#allocation50_spill] sm:$0xff]  ;;  %v954_v29 = vld [vmem:[#allocation5 + $0x1890] sm:$0xff] }
 0x338   :  { %13609 = vst [vmem:[#allocation7 + $0xf08] sm:$0xff] %v7717_v43  ;;  %v7719_v39 = vpop.f32.mrb[62].mxu0  ;;  %13611 = vst [vmem:[#allocation7 + $0xf18] sm:$0xff] %v8489_v45  ;;  %v8491_v30 = vpop.f32.mrb[62].mxu1  ;;  %v962_v43 = vld [vmem:[#allocation5 + $0x18d0] sm:$0xff]  ;;  %v955_v45 = vld [vmem:[#allocation5 + $0x1898] sm:$0xff] }
 0x339   :  { %13624 = vst [vmem:[#allocation7 + $0xf80] sm:$0xff] %v7719_v39  ;;  %v7721_v28 = vpop.f32.mrb[63].mxu0  ;;  %13626 = vst [vmem:[#allocation7 + $0xf90] sm:$0xff] %v8491_v30  ;;  %v8493_v55 = vpop.f32.mrb[63].mxu1  ;;  %v963_v39 = vld [vmem:[#allocation5 + $0x18d8] sm:$0xff]  ;;  %v14575_v30 = vcombine.high %v954_v29, %v962_v43 }
 0x33a   :  { %13625 = vst [vmem:[#allocation7 + $0xf88] sm:$0xff] %v7721_v28  ;;  %13627 = vst [vmem:[#allocation7 + $0xf98] sm:$0xff] %v8493_v55  ;;  %v970_v28 = vld [vmem:[#allocation5 + $0x1910] sm:$0xff] }
 0x33b   :  { %8822 = vmatmul.mubr.bf16.gmra.mrb[104].mxu0 %v18573_v6  ;;  %9594 = vmatmul.mubr.bf16.gmra.mrb[104].mxu1 %v18573_v6  ;;  %v978_v55 = vld [vmem:[#allocation5 + $0x1950] sm:$0xff]  ;;  %v14576_v6 = vcombine.low %v955_v45, %v963_v39 }
 0x33c   :  { %8831 = vmatprep.mubr.bf16.mxu0 %v18574_v15  ;;  %9603 = vmatprep.mubr.bf16.mxu1 %v18574_v15  ;;  %v18588_v15 = vld [vmem:[#allocation52_spill] sm:$0xff]  ;;  %v14591_v8 = vcombine.high %v970_v28, %v978_v55 }
 0x343   :  { %8832 = vmatmul.mubr.bf16.gmra.mrb[108].mxu0 %v18575_v1  ;;  %9604 = vmatmul.mubr.bf16.gmra.mrb[108].mxu1 %v18575_v1  ;;  %v18587_v1 = vcombine.low %v17176_v14, %v17178_v10  ;;  %v994_v14 = vld [vmem:[#allocation5 + $0x19d0] sm:$0xff]  ;;  %v987_v10 = vld [vmem:[#allocation5 + $0x1998] sm:$0xff] }
 0x344   :  { %8841 = vmatprep.mubr.bf16.mxu0 %v18576_v26  ;;  %9613 = vmatprep.mubr.bf16.mxu1 %v18576_v26  ;;  %v17260_v26 = vld [vmem:[#allocation5 + $0x28] sm:$0xff] }
 0x34b   :  { %8842 = vmatmul.mubr.bf16.gmra.mrb[112].mxu0 %v18577_v12  ;;  %9614 = vmatmul.mubr.bf16.gmra.mrb[112].mxu1 %v18577_v12  ;;  %v17258_v12 = vld [vmem:[#allocation5 + $0x60] sm:$0xff] }
 0x34c   :  { %8851 = vmatprep.mubr.bf16.mxu0 %v18578_v3  ;;  %9623 = vmatprep.mubr.bf16.mxu1 %v18578_v3  ;;  %v14574_v3 = vcombine.low %v954_v29, %v962_v43  ;;  %v986_v29 = vld [vmem:[#allocation5 + $0x1990] sm:$0xff]  ;;  %v14590_v43 = vcombine.low %v970_v28, %v978_v55  ;;  %v1019_v55 = vld [vmem:[#allocation5 + $0x1a98] sm:$0xff] }
 0x34d   :  { %v1026_v28 = vld [vmem:[#allocation5 + $0x1ad0] sm:$0xff] }
 0x353   :  { %8852 = vmatmul.mubr.bf16.gmra.mrb[116].mxu0 %v18579_v21  ;;  %9624 = vmatmul.mubr.bf16.gmra.mrb[116].mxu1 %v18579_v21  ;;  %v971_v21 = vld [vmem:[#allocation5 + $0x1918] sm:$0xff] }
 0x354   :  { %8861 = vmatprep.mubr.bf16.mxu0 %v18580_v38  ;;  %9633 = vmatprep.mubr.bf16.mxu1 %v18580_v38  ;;  %v14577_v38 = vcombine.high %v955_v45, %v963_v39  ;;  %v14607_v39 = vcombine.high %v986_v29, %v994_v14 }
 0x35b   :  { %8862 = vmatmul.mubr.bf16.gmra.mrb[120].mxu0 %v18581_v27  ;;  %9634 = vmatmul.mubr.bf16.gmra.mrb[120].mxu1 %v18581_v27  ;;  %v18585_v27 = vld [vmem:[#allocation51_spill] sm:$0xff] }
 0x35c   :  { %8871 = vmatprep.mubr.bf16.mxu0 %v18582_v23  ;;  %9643 = vmatprep.mubr.bf16.mxu1 %v18582_v23  ;;  %v979_v23 = vld [vmem:[#allocation5 + $0x1958] sm:$0xff] }
 0x35d   :  { %v14592_v45 = vcombine.low %v971_v21, %v979_v23 }
 0x363   :  { %8872 = vmatmul.mubr.bf16.gmra.mrb[124].mxu0 %v18583_v49  ;;  %9644 = vmatmul.mubr.bf16.gmra.mrb[124].mxu1 %v18583_v49  ;;  %v18586_v49 = vcombine.low %v17166_v13, %v17168_v36  ;;  %v17268_v13 = vld [vmem:[#allocation5 + $0x68] sm:$0xff]  ;;  %v14593_v36 = vcombine.high %v971_v21, %v979_v23  ;;  %v1018_v23 = vld [vmem:[#allocation5 + $0x1a90] sm:$0xff] }
 0x364   :  { %8914 = vmatprep.mubr.bf16.mxu0 %v18584_v35  ;;  %9686 = vmatprep.mubr.bf16.mxu1 %v18584_v35  ;;  %v17256_v35 = vld [vmem:[#allocation5 + $0x20] sm:$0xff]  ;;  %v14639_v58 = vcombine.high %v1018_v23, %v1026_v28 }
 0x36b   :  { %8915 = vmatmul.mubr.bf16.vlgmr.msra.gmra.mrb[64].mxu0 %v18585_v27  ;;  %9687 = vmatmul.mubr.bf16.vlgmr.msra.gmra.mrb[64].mxu1 %v18585_v27  ;;  %v18589_v27 = vld [vmem:[#allocation53_spill] sm:$0xff] }
 0x36c   :  { %9076 = vmatpush1.bf16.msra.mxu0 %v18586_v49  ;;  %9848 = vmatpush1.bf16.msra.mxu1 %v18587_v1  ;;  %v995_v1 = vld [vmem:[#allocation5 + $0x19d8] sm:$0xff] }
 0x36d   :  { %8924 = vmatprep.mubr.bf16.mxu0 %v18588_v15  ;;  %9696 = vmatprep.mubr.bf16.mxu1 %v18588_v15  ;;  %v14609_v15 = vcombine.high %v987_v10, %v995_v1  ;;  %v18590_v49 = vld [vmem:[#allocation54_spill] sm:$0xff] }
 0x36e   :  { %9077 = vmatprep.subr.bf16.mxu0 %v14575_v30  ;;  %9849 = vmatprep.subr.bf16.mxu1 %v14577_v38  ;;  %v1002_v30 = vld [vmem:[#allocation5 + $0x1a10] sm:$0xff]  ;;  %v1003_v38 = vld [vmem:[#allocation5 + $0x1a18] sm:$0xff] }
 0x36f   :  { %v14625_v21 = vcombine.high %v1003_v38, %v1011_v4  ;;  %v14624_v62 = vcombine.low %v1003_v38, %v1011_v4  ;;  %v1058_v38 = vld [vmem:[#allocation5 + $0x1bd0] sm:$0xff] }
 0x370   :  { %9078 = vmatpush1.bf16.msra.mxu0 %v14574_v3  ;;  %9850 = vmatpush1.bf16.msra.mxu1 %v14576_v6  ;;  %v14606_v6 = vcombine.low %v986_v29, %v994_v14  ;;  %v14623_v3 = vcombine.high %v1002_v30, %v1010_v16  ;;  %v1034_v14 = vld [vmem:[#allocation5 + $0x1b10] sm:$0xff] }
 0x371   :  { %9079 = vmatprep.subr.bf16.mxu0 %v14591_v8  ;;  %9851 = vmatprep.subr.bf16.mxu1 %v14593_v36  ;;  %v14608_v8 = vcombine.low %v987_v10, %v995_v1  ;;  %v1027_v36 = vld [vmem:[#allocation5 + $0x1ad8] sm:$0xff] }
 0x372   :  { %v14641_v29 = vcombine.high %v1019_v55, %v1027_v36  ;;  %v1035_v10 = vld [vmem:[#allocation5 + $0x1b18] sm:$0xff]  ;;  %v14640_v4 = vcombine.low %v1019_v55, %v1027_v36 }
 0x373   :  { %8925 = vmatmul.mubr.bf16.gmra.mrb[68].mxu0 %v18589_v27  ;;  %9697 = vmatmul.mubr.bf16.gmra.mrb[68].mxu1 %v18589_v27  ;;  %v14622_v27 = vcombine.low %v1002_v30, %v1010_v16  ;;  %v1043_v1 = vld [vmem:[#allocation5 + $0x1b58] sm:$0xff]  ;;  %v14638_v16 = vcombine.low %v1018_v23, %v1026_v28  ;;  %v1050_v30 = vld [vmem:[#allocation5 + $0x1b90] sm:$0xff] }
 0x374   :  { %8934 = vmatprep.mubr.bf16.mxu0 %v18590_v49  ;;  %9706 = vmatprep.mubr.bf16.mxu1 %v18590_v49  ;;  %v18593_v49 = vld [vmem:[#allocation57_spill] sm:$0xff]  ;;  %v18594_v23 = vld [vmem:[#allocation58_spill] sm:$0xff]  ;;  %v14670_v36 = vcombine.low %v1050_v30, %v1058_v38 }
 0x375   :  { %9080 = vmatpush1.bf16.msra.mxu0 %v14590_v43  ;;  %9852 = vmatpush1.bf16.msra.mxu1 %v14592_v45  ;;  %v1042_v43 = vld [vmem:[#allocation5 + $0x1b50] sm:$0xff]  ;;  %v1067_v28 = vld [vmem:[#allocation5 + $0x1c18] sm:$0xff] }
 0x376   :  { %9081 = vmatprep.subr.bf16.mxu0 %v14607_v39  ;;  %9853 = vmatprep.subr.bf16.mxu1 %v14609_v15  ;;  %v18592_v15 = vld [vmem:[#allocation56_spill] sm:$0xff]  ;;  %v14655_v45 = vcombine.high %v1034_v14, %v1042_v43  ;;  %v14657_v39 = vcombine.high %v1035_v10, %v1043_v1  ;;  %v1075_v55 = vld [vmem:[#allocation5 + $0x1c58] sm:$0xff] }
 0x379   :  { %9082 = vmatpush1.bf16.msra.mxu0 %v14606_v6  ;;  %9854 = vmatpush1.bf16.msra.mxu1 %v14608_v8  ;;  %v1051_v6 = vld [vmem:[#allocation5 + $0x1b98] sm:$0xff] }
 0x37a   :  { %9083 = vmatprep.subr.bf16.mxu0 %v14623_v3  ;;  %9855 = vmatprep.subr.bf16.mxu1 %v14625_v21  ;;  %v1059_v8 = vld [vmem:[#allocation5 + $0x1bd8] sm:$0xff]  ;;  %v14654_v3 = vcombine.low %v1034_v14, %v1042_v43  ;;  %v14656_v21 = vcombine.low %v1035_v10, %v1043_v1  ;;  %v14689_v43 = vcombine.high %v1067_v28, %v1075_v55  ;;  %v1082_v10 = vld [vmem:[#allocation5 + $0x1c90] sm:$0xff] }
 0x37b   :  { %8935 = vmatmul.mubr.bf16.gmra.mrb[72].mxu0 %v18591_v54  ;;  %9707 = vmatmul.mubr.bf16.gmra.mrb[72].mxu1 %v18591_v54  ;;  %v14671_v54 = vcombine.high %v1050_v30, %v1058_v38  ;;  %v1090_v1 = vld [vmem:[#allocation5 + $0x1cd0] sm:$0xff] }
 0x37c   :  { %8944 = vmatprep.mubr.bf16.mxu0 %v18592_v15  ;;  %9716 = vmatprep.mubr.bf16.mxu1 %v18592_v15  ;;  %v18595_v15 = vld [vmem:[#allocation59_spill] sm:$0xff]  ;;  %v1098_v38 = vld [vmem:[#allocation5 + $0x1d10] sm:$0xff] }
 0x37d   :  { %9084 = vmatpush1.bf16.msra.mxu0 %v14622_v27  ;;  %9856 = vmatpush1.bf16.msra.mxu1 %v14624_v62  ;;  %v14673_v27 = vcombine.high %v1051_v6, %v1059_v8  ;;  %v1066_v62 = vld [vmem:[#allocation5 + $0x1c10] sm:$0xff] }
 0x37e   :  { %9085 = vmatprep.subr.bf16.mxu0 %v14639_v58  ;;  %9857 = vmatprep.subr.bf16.mxu1 %v14641_v29  ;;  %v1074_v58 = vld [vmem:[#allocation5 + $0x1c50] sm:$0xff]  ;;  %v14672_v29 = vcombine.low %v1051_v6, %v1059_v8  ;;  %v18596_v6 = vld [vmem:[#allocation60_spill] sm:$0xff]  ;;  %v1099_v8 = vld [vmem:[#allocation5 + $0x1d18] sm:$0xff] }
 0x37f   :  { %v14687_v14 = vcombine.high %v1066_v62, %v1074_v58 }
 0x381   :  { %9086 = vmatpush1.bf16.msra.mxu0 %v14638_v16  ;;  %9858 = vmatpush1.bf16.msra.mxu1 %v14640_v4  ;;  %v1083_v16 = vld [vmem:[#allocation5 + $0x1c98] sm:$0xff] }
 0x382   :  { %9087 = vmatprep.subr.bf16.mxu0 %v14655_v45  ;;  %9859 = vmatprep.subr.bf16.mxu1 %v14657_v39  ;;  %v1091_v4 = vld [vmem:[#allocation5 + $0x1cd8] sm:$0xff]  ;;  %v14686_v45 = vcombine.low %v1066_v62, %v1074_v58  ;;  %v14688_v39 = vcombine.low %v1067_v28, %v1075_v55  ;;  %v1114_v28 = vld [vmem:[#allocation5 + $0x1d90] sm:$0xff] }
 0x383   :  { %8945 = vmatmul.mubr.bf16.gmra.mrb[76].mxu0 %v18593_v49  ;;  %9717 = vmatmul.mubr.bf16.gmra.mrb[76].mxu1 %v18593_v49  ;;  %v14703_v49 = vcombine.high %v1082_v10, %v1090_v1  ;;  %v14705_v30 = vcombine.high %v1083_v16, %v1091_v4  ;;  %v1122_v55 = vld [vmem:[#allocation5 + $0x1dd0] sm:$0xff] }
 0x384   :  { %8954 = vmatprep.mubr.bf16.mxu0 %v18594_v23  ;;  %9726 = vmatprep.mubr.bf16.mxu1 %v18594_v23  ;;  %v18597_v23 = vld [vmem:[#allocation61_spill] sm:$0xff] }
 0x385   :  { %9088 = vmatpush1.bf16.msra.mxu0 %v14654_v3  ;;  %9860 = vmatpush1.bf16.msra.mxu1 %v14656_v21  ;;  %v1107_v3 = vld [vmem:[#allocation5 + $0x1d58] sm:$0xff]  ;;  %v14702_v21 = vcombine.low %v1082_v10, %v1090_v1  ;;  %v1130_v1 = vld [vmem:[#allocation5 + $0x1e10] sm:$0xff] }
 0x386   :  { %9089 = vmatprep.subr.bf16.mxu0 %v14671_v54  ;;  %9861 = vmatprep.subr.bf16.mxu1 %v14673_v27  ;;  %v1106_v54 = vld [vmem:[#allocation5 + $0x1d50] sm:$0xff]  ;;  %v14704_v27 = vcombine.low %v1083_v16, %v1091_v4  ;;  %v14721_v58 = vcombine.high %v1099_v8, %v1107_v3  ;;  %v18598_v16 = vld [vmem:[#allocation62_spill] sm:$0xff] }
 0x387   :  { %v14719_v62 = vcombine.high %v1098_v38, %v1106_v54  ;;  %v1131_v4 = vld [vmem:[#allocation5 + $0x1e18] sm:$0xff] }
 0x389   :  { %9090 = vmatpush1.bf16.msra.mxu0 %v14670_v36  ;;  %9862 = vmatpush1.bf16.msra.mxu1 %v14672_v29  ;;  %v1115_v36 = vld [vmem:[#allocation5 + $0x1d98] sm:$0xff] }
 0x38a   :  { %9091 = vmatprep.subr.bf16.mxu0 %v14687_v14  ;;  %9863 = vmatprep.subr.bf16.mxu1 %v14689_v43  ;;  %v1123_v29 = vld [vmem:[#allocation5 + $0x1dd8] sm:$0xff]  ;;  %v14718_v14 = vcombine.low %v1098_v38, %v1106_v54  ;;  %v14720_v43 = vcombine.low %v1099_v8, %v1107_v3  ;;  %v1146_v8 = vld [vmem:[#allocation5 + $0x1e90] sm:$0xff] }
 0x38b   :  { %8955 = vmatmul.mubr.bf16.gmra.mrb[80].mxu0 %v18595_v15  ;;  %9727 = vmatmul.mubr.bf16.gmra.mrb[80].mxu1 %v18595_v15  ;;  %v14735_v15 = vcombine.high %v1114_v28, %v1122_v55  ;;  %v14737_v10 = vcombine.high %v1115_v36, %v1123_v29  ;;  %v1154_v3 = vld [vmem:[#allocation5 + $0x1ed0] sm:$0xff] }
 0x38c   :  { %8964 = vmatprep.mubr.bf16.mxu0 %v18596_v6  ;;  %9736 = vmatprep.mubr.bf16.mxu1 %v18596_v6  ;;  %v18599_v6 = vld [vmem:[#allocation63_spill] sm:$0xff] }
 0x38d   :  { %9092 = vmatpush1.bf16.msra.mxu0 %v14686_v45  ;;  %9864 = vmatpush1.bf16.msra.mxu1 %v14688_v39  ;;  %v1139_v45 = vld [vmem:[#allocation5 + $0x1e58] sm:$0xff]  ;;  %v14734_v39 = vcombine.low %v1114_v28, %v1122_v55  ;;  %v1162_v55 = vld [vmem:[#allocation5 + $0x1f10] sm:$0xff] }
 0x38e   :  { %9093 = vmatprep.subr.bf16.mxu0 %v14703_v49  ;;  %9865 = vmatprep.subr.bf16.mxu1 %v14705_v30  ;;  %v1138_v49 = vld [vmem:[#allocation5 + $0x1e50] sm:$0xff]  ;;  %v14736_v30 = vcombine.low %v1115_v36, %v1123_v29  ;;  %v14753_v54 = vcombine.high %v1131_v4, %v1139_v45  ;;  %v18600_v36 = vld [vmem:[#allocation64_spill] sm:$0xff]  ;;  %v1163_v29 = vld [vmem:[#allocation5 + $0x1f18] sm:$0xff] }
 0x38f   :  { %v14751_v38 = vcombine.high %v1130_v1, %v1138_v49 }
 0x391   :  { %9094 = vmatpush1.bf16.msra.mxu0 %v14702_v21  ;;  %9866 = vmatpush1.bf16.msra.mxu1 %v14704_v27  ;;  %v1147_v21 = vld [vmem:[#allocation5 + $0x1e98] sm:$0xff] }
 0x392   :  { %9095 = vmatprep.subr.bf16.mxu0 %v14719_v62  ;;  %9867 = vmatprep.subr.bf16.mxu1 %v14721_v58  ;;  %v1155_v27 = vld [vmem:[#allocation5 + $0x1ed8] sm:$0xff]  ;;  %v14750_v62 = vcombine.low %v1130_v1, %v1138_v49  ;;  %v14752_v58 = vcombine.low %v1131_v4, %v1139_v45  ;;  %v1178_v4 = vld [vmem:[#allocation5 + $0x1f90] sm:$0xff] }
 0x393   :  { %8965 = vmatmul.mubr.bf16.gmra.mrb[84].mxu0 %v18597_v23  ;;  %9737 = vmatmul.mubr.bf16.gmra.mrb[84].mxu1 %v18597_v23  ;;  %v14767_v23 = vcombine.high %v1146_v8, %v1154_v3  ;;  %v14769_v28 = vcombine.high %v1147_v21, %v1155_v27  ;;  %v1186_v45 = vld [vmem:[#allocation5 + $0x1fd0] sm:$0xff] }
 0x394   :  { %8974 = vmatprep.mubr.bf16.mxu0 %v18598_v16  ;;  %9746 = vmatprep.mubr.bf16.mxu1 %v18598_v16  ;;  %v18601_v16 = vld [vmem:[#allocation65_spill] sm:$0xff] }
 0x395   :  { %9096 = vmatpush1.bf16.msra.mxu0 %v14718_v14  ;;  %9868 = vmatpush1.bf16.msra.mxu1 %v14720_v43  ;;  %v1171_v14 = vld [vmem:[#allocation5 + $0x1f58] sm:$0xff]  ;;  %v14766_v43 = vcombine.low %v1146_v8, %v1154_v3  ;;  %v14798_v3 = vcombine.low %v1178_v4, %v1186_v45 }
 0x396   :  { %9097 = vmatprep.subr.bf16.mxu0 %v14735_v15  ;;  %9869 = vmatprep.subr.bf16.mxu1 %v14737_v10  ;;  %v1170_v15 = vld [vmem:[#allocation5 + $0x1f50] sm:$0xff]  ;;  %v14768_v10 = vcombine.low %v1147_v21, %v1155_v27  ;;  %v14785_v49 = vcombine.high %v1163_v29, %v1171_v14  ;;  %v13795_v27 = vcombine.high %v17256_v35, %v17258_v12 }
 0x397   :  { %v14783_v1 = vcombine.high %v1162_v55, %v1170_v15 }
 0x399   :  { %9098 = vmatpush1.bf16.msra.mxu0 %v14734_v39  ;;  %9870 = vmatpush1.bf16.msra.mxu1 %v14736_v30  ;;  %v1179_v39 = vld [vmem:[#allocation5 + $0x1f98] sm:$0xff] }
 0x39a   :  { %9099 = vmatprep.subr.bf16.mxu0 %v14751_v38  ;;  %9871 = vmatprep.subr.bf16.mxu1 %v14753_v54  ;;  %v1187_v30 = vld [vmem:[#allocation5 + $0x1fd8] sm:$0xff]  ;;  %v14782_v38 = vcombine.low %v1162_v55, %v1170_v15  ;;  %v14784_v54 = vcombine.low %v1163_v29, %v1171_v14  ;;  %v18607_v15 = vld [vmem:[#allocation71_spill] sm:$0xff]  ;;  %v18608_v29 = vld [vmem:[#allocation72_spill] sm:$0xff] }
 0x39b   :  { %8975 = vmatmul.mubr.bf16.gmra.mrb[88].mxu0 %v18599_v6  ;;  %9747 = vmatmul.mubr.bf16.gmra.mrb[88].mxu1 %v18599_v6  ;;  %v14799_v6 = vcombine.high %v1178_v4, %v1186_v45  ;;  %v14801_v8 = vcombine.high %v1179_v39, %v1187_v30  ;;  %v14800_v21 = vcombine.low %v1179_v39, %v1187_v30  ;;  %v18606_v55 = vld [vmem:[#allocation70_spill] sm:$0xff]  ;;  %v18609_v14 = vld [vmem:[#allocation73_spill] sm:$0xff]  ;;  %v18615_v45 = vld [vmem:[#allocation79_spill] sm:$0xff] }
 0x39c   :  { %8984 = vmatprep.mubr.bf16.mxu0 %v18600_v36  ;;  %9756 = vmatprep.mubr.bf16.mxu1 %v18600_v36  ;;  %v18614_v4 = vld [vmem:[#allocation78_spill] sm:$0xff]  ;;  %v18616_v39 = vld [vmem:[#allocation80_spill] sm:$0xff]  ;;  %v18617_v30 = vld [vmem:[#allocation81_spill] sm:$0xff] }
 0x39d   :  { %9100 = vmatpush1.bf16.msra.mxu0 %v14750_v62  ;;  %9872 = vmatpush1.bf16.msra.mxu1 %v14752_v58  ;;  %v13797_v62 = vcombine.high %v17260_v26, %v17268_v13  ;;  %v18603_v58 = vld [vmem:[#allocation67_spill] sm:$0xff] }
 0x39e   :  { %9101 = vmatprep.subr.bf16.mxu0 %v14767_v23  ;;  %9873 = vmatprep.subr.bf16.mxu1 %v14769_v28  ;;  %v18602_v23 = vld [vmem:[#allocation66_spill] sm:$0xff]  ;;  %v18604_v28 = vld [vmem:[#allocation68_spill] sm:$0xff]  ;;  %v18625_v36 = vld [vmem:[#allocation87_spill] sm:$0xff] }
 0x3a1   :  { %9102 = vmatpush1.bf16.msra.mxu0 %v14766_v43  ;;  %9874 = vmatpush1.bf16.msra.mxu1 %v14768_v10  ;;  %v18610_v43 = vld [vmem:[#allocation74_spill] sm:$0xff]  ;;  %v18611_v10 = vld [vmem:[#allocation75_spill] sm:$0xff] }
 0x3a2   :  { %9103 = vmatprep.subr.bf16.mxu0 %v14783_v1  ;;  %9875 = vmatprep.subr.bf16.mxu1 %v14785_v49  ;;  %v18612_v1 = vld [vmem:[#allocation76_spill] sm:$0xff]  ;;  %v18613_v49 = vld [vmem:[#allocation77_spill] sm:$0xff] }
 0x3a3   :  { %8985 = vmatmul.mubr.bf16.gmra.mrb[92].mxu0 %v18601_v16  ;;  %9757 = vmatmul.mubr.bf16.gmra.mrb[92].mxu1 %v18601_v16 }
 0x3a4   :  { %8994 = vmatprep.mubr.bf16.mxu0 %v18602_v23  ;;  %9766 = vmatprep.mubr.bf16.mxu1 %v18602_v23 }
 0x3a5   :  { %9104 = vmatpush1.bf16.msra.mxu0 %v14782_v38  ;;  %9876 = vmatpush1.bf16.msra.mxu1 %v14784_v54  ;;  %v18618_v38 = vld [vmem:[#allocation82_spill] sm:$0xff]  ;;  %v188_v54 = vld [vmem:[#allocation5 + $0xa0] sm:$0xff] }
 0x3a6   :  { %9105 = vmatprep.subr.bf16.mxu0 %v14799_v6  ;;  %9877 = vmatprep.subr.bf16.mxu1 %v14801_v8  ;;  %v18605_v6 = vld [vmem:[#allocation69_spill] sm:$0xff]  ;;  %v196_v8 = vld [vmem:[#allocation5 + $0xe0] sm:$0xff] }
 0x3a9   :  { %9106 = vmatpush1.bf16.msra.mxu0 %v14798_v3  ;;  %9878 = vmatpush1.bf16.msra.mxu1 %v14800_v21  ;;  %v189_v3 = vld [vmem:[#allocation5 + $0xa8] sm:$0xff] }
 0x3aa   :  { %10040 = vmatprep.subr.bf16.mxu0 %v13795_v27  ;;  %10812 = vmatprep.subr.bf16.mxu1 %v13797_v62  ;;  %v197_v21 = vld [vmem:[#allocation5 + $0xe8] sm:$0xff]  ;;  %v13811_v27 = vcombine.high %v188_v54, %v196_v8  ;;  %v204_v62 = vld [vmem:[#allocation5 + $0x120] sm:$0xff] }
 0x3ab   :  { %8995 = vmatmul.mubr.bf16.gmra.mrb[96].mxu0 %v18603_v58  ;;  %9767 = vmatmul.mubr.bf16.gmra.mrb[96].mxu1 %v18603_v58  ;;  %v244_v58 = vld [vmem:[#allocation5 + $0x260] sm:$0xff] }
 0x3ac   :  { %9004 = vmatprep.mubr.bf16.mxu0 %v18604_v28  ;;  %9776 = vmatprep.mubr.bf16.mxu1 %v18604_v28  ;;  %v13812_v28 = vcombine.low %v189_v3, %v197_v21 }
 0x3b3   :  { %9005 = vmatmul.mubr.bf16.gmra.mrb[100].mxu0 %v18605_v6  ;;  %9777 = vmatmul.mubr.bf16.gmra.mrb[100].mxu1 %v18605_v6  ;;  %v18622_v6 = vld [vmem:[#allocation84_spill] sm:$0xff] }
 0x3b4   :  { %9014 = vmatprep.mubr.bf16.mxu0 %v18606_v55  ;;  %9786 = vmatprep.mubr.bf16.mxu1 %v18606_v55  ;;  %v18621_v55 = vcombine.low %v17260_v26, %v17268_v13 }
 0x3bb   :  { %9015 = vmatmul.mubr.bf16.gmra.mrb[104].mxu0 %v18607_v15  ;;  %9787 = vmatmul.mubr.bf16.gmra.mrb[104].mxu1 %v18607_v15  ;;  %v17350_v15 = vld [vmem:[#allocation5 + $0x868] sm:$0xff] }
 0x3bc   :  { %9024 = vmatprep.mubr.bf16.mxu0 %v18608_v29  ;;  %9796 = vmatprep.mubr.bf16.mxu1 %v18608_v29  ;;  %v17348_v29 = vld [vmem:[#allocation5 + $0x828] sm:$0xff] }
 0x3c3   :  { %9025 = vmatmul.mubr.bf16.gmra.mrb[108].mxu0 %v18609_v14  ;;  %9797 = vmatmul.mubr.bf16.gmra.mrb[108].mxu1 %v18609_v14  ;;  %v229_v14 = vld [vmem:[#allocation5 + $0x1e8] sm:$0xff] }
 0x3c4   :  { %9034 = vmatprep.mubr.bf16.mxu0 %v18610_v43  ;;  %9806 = vmatprep.mubr.bf16.mxu1 %v18610_v43  ;;  %v17340_v43 = vld [vmem:[#allocation5 + $0x860] sm:$0xff] }
 0x3cb   :  { %9035 = vmatmul.mubr.bf16.gmra.mrb[112].mxu0 %v18611_v10  ;;  %9807 = vmatmul.mubr.bf16.gmra.mrb[112].mxu1 %v18611_v10  ;;  %v17338_v10 = vld [vmem:[#allocation5 + $0x820] sm:$0xff] }
 0x3cc   :  { %9044 = vmatprep.mubr.bf16.mxu0 %v18612_v1  ;;  %9816 = vmatprep.mubr.bf16.mxu1 %v18612_v1  ;;  %v13813_v1 = vcombine.high %v189_v3, %v197_v21  ;;  %v18623_v3 = vld [vmem:[#allocation85_spill] sm:$0xff] }
 0x3d3   :  { %9045 = vmatmul.mubr.bf16.gmra.mrb[116].mxu0 %v18613_v49  ;;  %9817 = vmatmul.mubr.bf16.gmra.mrb[116].mxu1 %v18613_v49  ;;  %v18619_v49 = vld [vmem:[#allocation83_spill] sm:$0xff] }
 0x3d4   :  { %9054 = vmatprep.mubr.bf16.mxu0 %v18614_v4  ;;  %9826 = vmatprep.mubr.bf16.mxu1 %v18614_v4  ;;  %v212_v4 = vld [vmem:[#allocation5 + $0x160] sm:$0xff] }
 0x3d5   :  { %v13826_v26 = vcombine.low %v204_v62, %v212_v4 }
 0x3db   :  { %9055 = vmatmul.mubr.bf16.gmra.mrb[120].mxu0 %v18615_v45  ;;  %9827 = vmatmul.mubr.bf16.gmra.mrb[120].mxu1 %v18615_v45  ;;  %v205_v45 = vld [vmem:[#allocation5 + $0x128] sm:$0xff] }
 0x3dc   :  { %9064 = vmatprep.mubr.bf16.mxu0 %v18616_v39  ;;  %9836 = vmatprep.mubr.bf16.mxu1 %v18616_v39  ;;  %v213_v39 = vld [vmem:[#allocation5 + $0x168] sm:$0xff] }
 0x3dd   :  { %v13828_v13 = vcombine.low %v205_v45, %v213_v39 }
 0x3e3   :  { %9065 = vmatmul.mubr.bf16.gmra.mrb[124].mxu0 %v18617_v30  ;;  %9837 = vmatmul.mubr.bf16.gmra.mrb[124].mxu1 %v18617_v30  ;;  %v13810_v30 = vcombine.low %v188_v54, %v196_v8  ;;  %v228_v54 = vld [vmem:[#allocation5 + $0x1e0] sm:$0xff]  ;;  %v221_v8 = vld [vmem:[#allocation5 + $0x1a8] sm:$0xff] }
 0x3e4   :  { %9107 = vmatprep.mubr.bf16.mxu0 %v18618_v38  ;;  %9879 = vmatprep.mubr.bf16.mxu1 %v18618_v38  ;;  %v18620_v38 = vcombine.low %v17256_v35, %v17258_v12  ;;  %v13829_v35 = vcombine.high %v205_v45, %v213_v39  ;;  %v13845_v21 = vcombine.high %v221_v8, %v229_v14  ;;  %v236_v12 = vld [vmem:[#allocation5 + $0x220] sm:$0xff] }
 0x3e5   :  { %v252_v39 = vld [vmem:[#allocation5 + $0x2a0] sm:$0xff] }
 0x3eb   :  { %9108 = vmatmul.mubr.bf16.vlgmr.msra.gmra.mrb[64].mxu0 %v18619_v49  ;;  %9880 = vmatmul.mubr.bf16.vlgmr.msra.gmra.mrb[64].mxu1 %v18619_v49  ;;  %v13827_v49 = vcombine.high %v204_v62, %v212_v4  ;;  %v13859_v4 = vcombine.high %v236_v12, %v244_v58  ;;  %v253_v62 = vld [vmem:[#allocation5 + $0x2a8] sm:$0xff] }
 0x3ec   :  { %10041 = vmatpush1.bf16.msra.mxu0 %v18620_v38  ;;  %10813 = vmatpush1.bf16.msra.mxu1 %v18621_v55  ;;  %v220_v38 = vld [vmem:[#allocation5 + $0x1a0] sm:$0xff] }
 0x3ed   :  { %9117 = vmatprep.mubr.bf16.mxu0 %v18622_v6  ;;  %9889 = vmatprep.mubr.bf16.mxu1 %v18622_v6  ;;  %v13843_v55 = vcombine.high %v220_v38, %v228_v54  ;;  %v245_v6 = vld [vmem:[#allocation5 + $0x268] sm:$0xff] }
 0x3ee   :  { %10042 = vmatprep.subr.bf16.mxu0 %v13811_v27  ;;  %10814 = vmatprep.subr.bf16.mxu1 %v13813_v1  ;;  %v18624_v27 = vld [vmem:[#allocation86_spill] sm:$0xff]  ;;  %v237_v1 = vld [vmem:[#allocation5 + $0x228] sm:$0xff] }
 0x3ef   :  { %v13861_v45 = vcombine.high %v237_v1, %v245_v6  ;;  %v13860_v23 = vcombine.low %v237_v1, %v245_v6  ;;  %v292_v1 = vld [vmem:[#allocation5 + $0x3e0] sm:$0xff] }
 0x3f0   :  { %10043 = vmatpush1.bf16.msra.mxu0 %v13810_v30  ;;  %10815 = vmatpush1.bf16.msra.mxu1 %v13812_v28  ;;  %v13842_v28 = vcombine.low %v220_v38, %v228_v54  ;;  %v260_v30 = vld [vmem:[#allocation5 + $0x2e0] sm:$0xff] }
 0x3f1   :  { %10044 = vmatprep.subr.bf16.mxu0 %v13827_v49  ;;  %10816 = vmatprep.subr.bf16.mxu1 %v13829_v35  ;;  %v13844_v49 = vcombine.low %v221_v8, %v229_v14  ;;  %v261_v35 = vld [vmem:[#allocation5 + $0x2e8] sm:$0xff]  ;;  %v13875_v16 = vcombine.high %v252_v39, %v260_v30  ;;  %v268_v54 = vld [vmem:[#allocation5 + $0x320] sm:$0xff] }
 0x3f2   :  { %v13877_v38 = vcombine.high %v253_v62, %v261_v35  ;;  %v18626_v14 = vld [vmem:[#allocation88_spill] sm:$0xff]  ;;  %v13876_v6 = vcombine.low %v253_v62, %v261_v35 }
 0x3f3   :  { %9118 = vmatmul.mubr.bf16.gmra.mrb[68].mxu0 %v18623_v3  ;;  %9890 = vmatmul.mubr.bf16.gmra.mrb[68].mxu1 %v18623_v3  ;;  %v13858_v3 = vcombine.low %v236_v12, %v244_v58  ;;  %v269_v8 = vld [vmem:[#allocation5 + $0x328] sm:$0xff]  ;;  %v13874_v58 = vcombine.low %v252_v39, %v260_v30  ;;  %v18628_v39 = vld [vmem:[#allocation90_spill] sm:$0xff] }
 0x3f4   :  { %9127 = vmatprep.mubr.bf16.mxu0 %v18624_v27  ;;  %9899 = vmatprep.mubr.bf16.mxu1 %v18624_v27  ;;  %v18627_v27 = vld [vmem:[#allocation89_spill] sm:$0xff]  ;;  %v301_v30 = vld [vmem:[#allocation5 + $0x428] sm:$0xff] }
 0x3f5   :  { %10045 = vmatpush1.bf16.msra.mxu0 %v13826_v26  ;;  %10817 = vmatpush1.bf16.msra.mxu1 %v13828_v13  ;;  %v276_v26 = vld [vmem:[#allocation5 + $0x360] sm:$0xff]  ;;  %v277_v13 = vld [vmem:[#allocation5 + $0x368] sm:$0xff] }
 0x3f6   :  { %10046 = vmatprep.subr.bf16.mxu0 %v13843_v55  ;;  %10818 = vmatprep.subr.bf16.mxu1 %v13845_v21  ;;  %v13891_v12 = vcombine.high %v268_v54, %v276_v26  ;;  %v13893_v55 = vcombine.high %v269_v8, %v277_v13  ;;  %v284_v21 = vld [vmem:[#allocation5 + $0x3a0] sm:$0xff]  ;;  %v309_v62 = vld [vmem:[#allocation5 + $0x468] sm:$0xff] }
 0x3f7   :  { %v13906_v35 = vcombine.low %v284_v21, %v292_v1 }
 0x3f9   :  { %10047 = vmatpush1.bf16.msra.mxu0 %v13842_v28  ;;  %10819 = vmatpush1.bf16.msra.mxu1 %v13844_v49  ;;  %v285_v28 = vld [vmem:[#allocation5 + $0x3a8] sm:$0xff] }
 0x3fa   :  { %10048 = vmatprep.subr.bf16.mxu0 %v13859_v4  ;;  %10820 = vmatprep.subr.bf16.mxu1 %v13861_v45  ;;  %v293_v49 = vld [vmem:[#allocation5 + $0x3e8] sm:$0xff]  ;;  %v13890_v4 = vcombine.low %v268_v54, %v276_v26  ;;  %v13892_v45 = vcombine.low %v269_v8, %v277_v13  ;;  %v13925_v26 = vcombine.high %v301_v30, %v309_v62  ;;  %v316_v8 = vld [vmem:[#allocation5 + $0x4a0] sm:$0xff] }
 0x3fb   :  { %9128 = vmatmul.mubr.bf16.gmra.mrb[72].mxu0 %v18625_v36  ;;  %9900 = vmatmul.mubr.bf16.gmra.mrb[72].mxu1 %v18625_v36  ;;  %v13907_v36 = vcombine.high %v284_v21, %v292_v1  ;;  %v324_v13 = vld [vmem:[#allocation5 + $0x4e0] sm:$0xff] }
 0x3fc   :  { %9137 = vmatprep.mubr.bf16.mxu0 %v18626_v14  ;;  %9909 = vmatprep.mubr.bf16.mxu1 %v18626_v14  ;;  %v18629_v14 = vld [vmem:[#allocation91_spill] sm:$0xff] }
 0x3fd   :  { %10049 = vmatpush1.bf16.msra.mxu0 %v13858_v3  ;;  %10821 = vmatpush1.bf16.msra.mxu1 %v13860_v23  ;;  %v13909_v3 = vcombine.high %v285_v28, %v293_v49  ;;  %v300_v23 = vld [vmem:[#allocation5 + $0x420] sm:$0xff] }
 0x3fe   :  { %10050 = vmatprep.subr.bf16.mxu0 %v13875_v16  ;;  %10822 = vmatprep.subr.bf16.mxu1 %v13877_v38  ;;  %v308_v16 = vld [vmem:[#allocation5 + $0x460] sm:$0xff]  ;;  %v13908_v38 = vcombine.low %v285_v28, %v293_v49  ;;  %v18630_v28 = vld [vmem:[#allocation92_spill] sm:$0xff] }
 0x3ff   :  { %v13923_v54 = vcombine.high %v300_v23, %v308_v16  ;;  %v332_v1 = vld [vmem:[#allocation5 + $0x520] sm:$0xff]  ;;  %v333_v49 = vld [vmem:[#allocation5 + $0x528] sm:$0xff] }
 0x401   :  { %10051 = vmatpush1.bf16.msra.mxu0 %v13874_v58  ;;  %10823 = vmatpush1.bf16.msra.mxu1 %v13876_v6  ;;  %v317_v58 = vld [vmem:[#allocation5 + $0x4a8] sm:$0xff] }
 0x402   :  { %10052 = vmatprep.subr.bf16.mxu0 %v13891_v12  ;;  %10824 = vmatprep.subr.bf16.mxu1 %v13893_v55  ;;  %v325_v6 = vld [vmem:[#allocation5 + $0x4e8] sm:$0xff]  ;;  %v13922_v12 = vcombine.low %v300_v23, %v308_v16  ;;  %v13924_v55 = vcombine.low %v301_v30, %v309_v62  ;;  %v348_v30 = vld [vmem:[#allocation5 + $0x5a0] sm:$0xff] }
 0x403   :  { %9138 = vmatmul.mubr.bf16.gmra.mrb[76].mxu0 %v18627_v27  ;;  %9910 = vmatmul.mubr.bf16.gmra.mrb[76].mxu1 %v18627_v27  ;;  %v13939_v27 = vcombine.high %v316_v8, %v324_v13  ;;  %v13941_v21 = vcombine.high %v317_v58, %v325_v6  ;;  %v356_v62 = vld [vmem:[#allocation5 + $0x5e0] sm:$0xff] }
 0x404   :  { %9147 = vmatprep.mubr.bf16.mxu0 %v18628_v39  ;;  %9919 = vmatprep.mubr.bf16.mxu1 %v18628_v39  ;;  %v18631_v39 = vld [vmem:[#allocation93_spill] sm:$0xff] }
 0x405   :  { %10053 = vmatpush1.bf16.msra.mxu0 %v13890_v4  ;;  %10825 = vmatpush1.bf16.msra.mxu1 %v13892_v45  ;;  %v341_v4 = vld [vmem:[#allocation5 + $0x568] sm:$0xff]  ;;  %v13938_v45 = vcombine.low %v316_v8, %v324_v13  ;;  %v364_v13 = vld [vmem:[#allocation5 + $0x620] sm:$0xff] }
 0x406   :  { %10054 = vmatprep.subr.bf16.mxu0 %v13907_v36  ;;  %10826 = vmatprep.subr.bf16.mxu1 %v13909_v3  ;;  %v340_v36 = vld [vmem:[#allocation5 + $0x560] sm:$0xff]  ;;  %v13940_v3 = vcombine.low %v317_v58, %v325_v6  ;;  %v13957_v16 = vcombine.high %v333_v49, %v341_v4  ;;  %v18632_v58 = vld [vmem:[#allocation94_spill] sm:$0xff]  ;;  %v365_v6 = vld [vmem:[#allocation5 + $0x628] sm:$0xff] }
 0x407   :  { %v13955_v23 = vcombine.high %v332_v1, %v340_v36 }
 0x409   :  { %10055 = vmatpush1.bf16.msra.mxu0 %v13906_v35  ;;  %10827 = vmatpush1.bf16.msra.mxu1 %v13908_v38  ;;  %v349_v35 = vld [vmem:[#allocation5 + $0x5a8] sm:$0xff] }
 0x40a   :  { %10056 = vmatprep.subr.bf16.mxu0 %v13923_v54  ;;  %10828 = vmatprep.subr.bf16.mxu1 %v13925_v26  ;;  %v357_v38 = vld [vmem:[#allocation5 + $0x5e8] sm:$0xff]  ;;  %v13954_v54 = vcombine.low %v332_v1, %v340_v36  ;;  %v13956_v26 = vcombine.low %v333_v49, %v341_v4  ;;  %v380_v49 = vld [vmem:[#allocation5 + $0x6a0] sm:$0xff] }
 0x40b   :  { %9148 = vmatmul.mubr.bf16.gmra.mrb[80].mxu0 %v18629_v14  ;;  %9920 = vmatmul.mubr.bf16.gmra.mrb[80].mxu1 %v18629_v14  ;;  %v13971_v14 = vcombine.high %v348_v30, %v356_v62  ;;  %v13973_v8 = vcombine.high %v349_v35, %v357_v38  ;;  %v388_v4 = vld [vmem:[#allocation5 + $0x6e0] sm:$0xff] }
 0x40c   :  { %9157 = vmatprep.mubr.bf16.mxu0 %v18630_v28  ;;  %9929 = vmatprep.mubr.bf16.mxu1 %v18630_v28  ;;  %v18633_v28 = vld [vmem:[#allocation95_spill] sm:$0xff] }
 0x40d   :  { %10057 = vmatpush1.bf16.msra.mxu0 %v13922_v12  ;;  %10829 = vmatpush1.bf16.msra.mxu1 %v13924_v55  ;;  %v373_v12 = vld [vmem:[#allocation5 + $0x668] sm:$0xff]  ;;  %v13970_v55 = vcombine.low %v348_v30, %v356_v62  ;;  %v396_v62 = vld [vmem:[#allocation5 + $0x720] sm:$0xff] }
 0x40e   :  { %10058 = vmatprep.subr.bf16.mxu0 %v13939_v27  ;;  %10830 = vmatprep.subr.bf16.mxu1 %v13941_v21  ;;  %v372_v27 = vld [vmem:[#allocation5 + $0x660] sm:$0xff]  ;;  %v13972_v21 = vcombine.low %v349_v35, %v357_v38  ;;  %v13989_v36 = vcombine.high %v365_v6, %v373_v12  ;;  %v18634_v35 = vld [vmem:[#allocation96_spill] sm:$0xff] }
 0x40f   :  { %v13987_v1 = vcombine.high %v364_v13, %v372_v27  ;;  %v397_v38 = vld [vmem:[#allocation5 + $0x728] sm:$0xff] }
 0x411   :  { %10059 = vmatpush1.bf16.msra.mxu0 %v13938_v45  ;;  %10831 = vmatpush1.bf16.msra.mxu1 %v13940_v3  ;;  %v381_v45 = vld [vmem:[#allocation5 + $0x6a8] sm:$0xff] }
 0x412   :  { %10060 = vmatprep.subr.bf16.mxu0 %v13955_v23  ;;  %10832 = vmatprep.subr.bf16.mxu1 %v13957_v16  ;;  %v389_v3 = vld [vmem:[#allocation5 + $0x6e8] sm:$0xff]  ;;  %v13986_v23 = vcombine.low %v364_v13, %v372_v27  ;;  %v13988_v16 = vcombine.low %v365_v6, %v373_v12  ;;  %v412_v6 = vld [vmem:[#allocation5 + $0x7a0] sm:$0xff] }
 0x413   :  { %9158 = vmatmul.mubr.bf16.gmra.mrb[84].mxu0 %v18631_v39  ;;  %9930 = vmatmul.mubr.bf16.gmra.mrb[84].mxu1 %v18631_v39  ;;  %v14003_v39 = vcombine.high %v380_v49, %v388_v4  ;;  %v14005_v30 = vcombine.high %v381_v45, %v389_v3  ;;  %v420_v12 = vld [vmem:[#allocation5 + $0x7e0] sm:$0xff] }
 0x414   :  { %9167 = vmatprep.mubr.bf16.mxu0 %v18632_v58  ;;  %9939 = vmatprep.mubr.bf16.mxu1 %v18632_v58 }
 0x415   :  { %10061 = vmatpush1.bf16.msra.mxu0 %v13954_v54  ;;  %10833 = vmatpush1.bf16.msra.mxu1 %v13956_v26  ;;  %v405_v54 = vld [vmem:[#allocation5 + $0x768] sm:$0xff]  ;;  %v14002_v26 = vcombine.low %v380_v49, %v388_v4 }
 0x416   :  { %10062 = vmatprep.subr.bf16.mxu0 %v13971_v14  ;;  %10834 = vmatprep.subr.bf16.mxu1 %v13973_v8  ;;  %v404_v14 = vld [vmem:[#allocation5 + $0x760] sm:$0xff]  ;;  %v14004_v8 = vcombine.low %v381_v45, %v389_v3  ;;  %v14021_v27 = vcombine.high %v397_v38, %v405_v54  ;;  %v14051_v45 = vcombine.high %v17338_v10, %v17340_v43 }
 0x417   :  { %v14019_v13 = vcombine.high %v396_v62, %v404_v14  ;;  %v14053_v3 = vcombine.high %v17348_v29, %v17350_v15 }
 0x419   :  { %10063 = vmatpush1.bf16.msra.mxu0 %v13970_v55  ;;  %10835 = vmatpush1.bf16.msra.mxu1 %v13972_v21  ;;  %v413_v55 = vld [vmem:[#allocation5 + $0x7a8] sm:$0xff] }
 0x41a   :  { %10064 = vmatprep.subr.bf16.mxu0 %v13987_v1  ;;  %10836 = vmatprep.subr.bf16.mxu1 %v13989_v36  ;;  %v421_v21 = vld [vmem:[#allocation5 + $0x7e8] sm:$0xff]  ;;  %v14018_v1 = vcombine.low %v396_v62, %v404_v14  ;;  %v14020_v36 = vcombine.low %v397_v38, %v405_v54  ;;  %v18639_v62 = vld [vmem:[#allocation101_spill] sm:$0xff]  ;;  %v18640_v14 = vld [vmem:[#allocation102_spill] sm:$0xff] }
 0x41b   :  { %9168 = vmatmul.mubr.bf16.gmra.mrb[88].mxu0 %v18633_v28  ;;  %9940 = vmatmul.mubr.bf16.gmra.mrb[88].mxu1 %v18633_v28  ;;  %v14035_v28 = vcombine.high %v412_v6, %v420_v12  ;;  %v14037_v49 = vcombine.high %v413_v55, %v421_v21  ;;  %v14036_v4 = vcombine.low %v413_v55, %v421_v21  ;;  %v18641_v38 = vld [vmem:[#allocation103_spill] sm:$0xff]  ;;  %v18642_v54 = vld [vmem:[#allocation104_spill] sm:$0xff] }
 0x41c   :  { %9177 = vmatprep.mubr.bf16.mxu0 %v18634_v35  ;;  %9949 = vmatprep.mubr.bf16.mxu1 %v18634_v35  ;;  %v460_v21 = vld [vmem:[#allocation5 + $0x920] sm:$0xff] }
 0x41d   :  { %10065 = vmatpush1.bf16.msra.mxu0 %v13986_v23  ;;  %10837 = vmatpush1.bf16.msra.mxu1 %v13988_v16  ;;  %v18636_v23 = vld [vmem:[#allocation98_spill] sm:$0xff]  ;;  %v18637_v16 = vld [vmem:[#allocation99_spill] sm:$0xff] }
 0x41e   :  { %10066 = vmatprep.subr.bf16.mxu0 %v14003_v39  ;;  %10838 = vmatprep.subr.bf16.mxu1 %v14005_v30  ;;  %v14034_v39 = vcombine.low %v412_v6, %v420_v12  ;;  %v18638_v30 = vld [vmem:[#allocation100_spill] sm:$0xff] }
 0x41f   :  { %v445_v6 = vld [vmem:[#allocation5 + $0x8a8] sm:$0xff] }
 0x420   :  { %v453_v12 = vld [vmem:[#allocation5 + $0x8e8] sm:$0xff] }
 0x421   :  { %10067 = vmatpush1.bf16.msra.mxu0 %v14002_v26  ;;  %10839 = vmatpush1.bf16.msra.mxu1 %v14004_v8  ;;  %v18643_v26 = vld [vmem:[#allocation105_spill] sm:$0xff]  ;;  %v18644_v8 = vld [vmem:[#allocation11_spill] sm:$0xff] }
 0x422   :  { %10068 = vmatprep.subr.bf16.mxu0 %v14019_v13  ;;  %10840 = vmatprep.subr.bf16.mxu1 %v14021_v27  ;;  %v444_v13 = vld [vmem:[#allocation5 + $0x8a0] sm:$0xff] }
 0x423   :  { %9178 = vmatmul.mubr.bf16.gmra.mrb[92].mxu0 %v17005_v63  ;;  %9950 = vmatmul.mubr.bf16.gmra.mrb[92].mxu1 %v17005_v63  ;;  %v452_v27 = vld [vmem:[#allocation5 + $0x8e0] sm:$0xff] }
 0x424   :  { %9187 = vmatprep.mubr.bf16.mxu0 %v17007_v11  ;;  %9959 = vmatprep.mubr.bf16.mxu1 %v17007_v11  ;;  %v14067_v55 = vcombine.high %v444_v13, %v452_v27 }
 0x425   :  { %10069 = vmatpush1.bf16.msra.mxu0 %v14018_v1  ;;  %10841 = vmatpush1.bf16.msra.mxu1 %v14020_v36  ;;  %v468_v1 = vld [vmem:[#allocation5 + $0x960] sm:$0xff]  ;;  %v461_v36 = vld [vmem:[#allocation5 + $0x928] sm:$0xff] }
 0x426   :  { %10070 = vmatprep.subr.bf16.mxu0 %v14035_v28  ;;  %10842 = vmatprep.subr.bf16.mxu1 %v14037_v49  ;;  %v18635_v28 = vld [vmem:[#allocation97_spill] sm:$0xff]  ;;  %v18645_v49 = vld [vmem:[#allocation12_spill] sm:$0xff] }
 0x429   :  { %10071 = vmatpush1.bf16.msra.mxu0 %v14034_v39  ;;  %10843 = vmatpush1.bf16.msra.mxu1 %v14036_v4  ;;  %v14069_v39 = vcombine.high %v445_v6, %v453_v12  ;;  %v469_v4 = vld [vmem:[#allocation5 + $0x968] sm:$0xff] }
 0x42a   :  { %10233 = vmatprep.subr.bf16.mxu0 %v14051_v45  ;;  %11005 = vmatprep.subr.bf16.mxu1 %v14053_v3  ;;  %v17424_v45 = vld [vmem:[#allocation5 + $0x1020] sm:$0xff] }
 0x42b   :  { %9188 = vmatmul.mubr.bf16.gmra.mrb[96].mxu0 %v17015_v50  ;;  %9960 = vmatmul.mubr.bf16.gmra.mrb[96].mxu1 %v17015_v50  ;;  %v17426_v3 = vld [vmem:[#allocation5 + $0x1060] sm:$0xff] }
 0x42c   :  { %9197 = vmatprep.mubr.bf16.mxu0 %v17019_v24  ;;  %9969 = vmatprep.mubr.bf16.mxu1 %v17019_v24 }
 0x433   :  { %9198 = vmatmul.mubr.bf16.gmra.mrb[100].mxu0 %v17025_v19  ;;  %9970 = vmatmul.mubr.bf16.gmra.mrb[100].mxu1 %v17025_v19 }
 0x434   :  { %9207 = vmatprep.mubr.bf16.mxu0 %v17027_v31  ;;  %9979 = vmatprep.mubr.bf16.mxu1 %v17027_v31 }
 0x43b   :  { %9208 = vmatmul.mubr.bf16.gmra.mrb[104].mxu0 %v17033_v56  ;;  %9980 = vmatmul.mubr.bf16.gmra.mrb[104].mxu1 %v17033_v56 }
 0x43c   :  { %9217 = vmatprep.mubr.bf16.mxu0 %v17035_v7  ;;  %9989 = vmatprep.mubr.bf16.mxu1 %v17035_v7 }
 0x443   :  { %9218 = vmatmul.mubr.bf16.gmra.mrb[108].mxu0 %v18635_v28  ;;  %9990 = vmatmul.mubr.bf16.gmra.mrb[108].mxu1 %v18635_v28 }
 0x444   :  { %9227 = vmatprep.mubr.bf16.mxu0 %v18636_v23  ;;  %9999 = vmatprep.mubr.bf16.mxu1 %v18636_v23  ;;  %v500_v23 = vld [vmem:[#allocation5 + $0xa60] sm:$0xff] }
 0x44b   :  { %9228 = vmatmul.mubr.bf16.gmra.mrb[112].mxu0 %v18637_v16  ;;  %10000 = vmatmul.mubr.bf16.gmra.mrb[112].mxu1 %v18637_v16  ;;  %v14068_v16 = vcombine.low %v445_v6, %v453_v12  ;;  %v18649_v6 = vld [vmem:[#allocation14_spill] sm:$0xff] }
 0x44c   :  { %9237 = vmatprep.mubr.bf16.mxu0 %v18638_v30  ;;  %10009 = vmatprep.mubr.bf16.mxu1 %v18638_v30  ;;  %v18648_v30 = vld [vmem:[#allocation13_spill] sm:$0xff] }
 0x453   :  { %9238 = vmatmul.mubr.bf16.gmra.mrb[116].mxu0 %v18639_v62  ;;  %10010 = vmatmul.mubr.bf16.gmra.mrb[116].mxu1 %v18639_v62  ;;  %v18647_v62 = vcombine.low %v17348_v29, %v17350_v15  ;;  %v14082_v15 = vcombine.low %v460_v21, %v468_v1  ;;  %v14084_v29 = vcombine.low %v461_v36, %v469_v4 }
 0x454   :  { %9247 = vmatprep.mubr.bf16.mxu0 %v18640_v14  ;;  %10019 = vmatprep.mubr.bf16.mxu1 %v18640_v14  ;;  %v17436_v14 = vld [vmem:[#allocation5 + $0x1068] sm:$0xff] }
 0x45b   :  { %9248 = vmatmul.mubr.bf16.gmra.mrb[120].mxu0 %v18641_v38  ;;  %10020 = vmatmul.mubr.bf16.gmra.mrb[120].mxu1 %v18641_v38  ;;  %v17434_v38 = vld [vmem:[#allocation5 + $0x1028] sm:$0xff] }
 0x45c   :  { %9257 = vmatprep.mubr.bf16.mxu0 %v18642_v54  ;;  %10029 = vmatprep.mubr.bf16.mxu1 %v18642_v54  ;;  %v485_v54 = vld [vmem:[#allocation5 + $0x9e8] sm:$0xff] }
 0x463   :  { %9258 = vmatmul.mubr.bf16.gmra.mrb[124].mxu0 %v18643_v26  ;;  %10030 = vmatmul.mubr.bf16.gmra.mrb[124].mxu1 %v18643_v26  ;;  %v14066_v26 = vcombine.low %v444_v13, %v452_v27  ;;  %v484_v13 = vld [vmem:[#allocation5 + $0x9e0] sm:$0xff]  ;;  %v477_v27 = vld [vmem:[#allocation5 + $0x9a8] sm:$0xff] }
 0x464   :  { %10072 = vmatprep.mubr.bf16.mxu0 %v18644_v8  ;;  %10844 = vmatprep.mubr.bf16.mxu1 %v18644_v8  ;;  %v18646_v8 = vcombine.low %v17338_v10, %v17340_v43  ;;  %v14085_v10 = vcombine.high %v461_v36, %v469_v4  ;;  %v14101_v12 = vcombine.high %v477_v27, %v485_v54  ;;  %v492_v43 = vld [vmem:[#allocation5 + $0xa20] sm:$0xff]  ;;  %v509_v4 = vld [vmem:[#allocation5 + $0xaa8] sm:$0xff] }
 0x465   :  { %v508_v36 = vld [vmem:[#allocation5 + $0xaa0] sm:$0xff] }
 0x46b   :  { %10073 = vmatmul.mubr.bf16.vlgmr.msra.gmra.mrb[128].mxu0 %v18645_v49  ;;  %10845 = vmatmul.mubr.bf16.vlgmr.msra.gmra.mrb[128].mxu1 %v18645_v49  ;;  %v14083_v49 = vcombine.high %v460_v21, %v468_v1  ;;  %v14115_v21 = vcombine.high %v492_v43, %v500_v23 }
 0x46c   :  { %10234 = vmatpush1.bf16.msra.mxu0 %v18646_v8  ;;  %11006 = vmatpush1.bf16.msra.mxu1 %v18647_v62  ;;  %v476_v8 = vld [vmem:[#allocation5 + $0x9a0] sm:$0xff] }
 0x46d   :  { %10082 = vmatprep.mubr.bf16.mxu0 %v18648_v30  ;;  %10854 = vmatprep.mubr.bf16.mxu1 %v18648_v30  ;;  %v14099_v62 = vcombine.high %v476_v8, %v484_v13 }
 0x46e   :  { %10235 = vmatprep.subr.bf16.mxu0 %v14067_v55  ;;  %11007 = vmatprep.subr.bf16.mxu1 %v14069_v39  ;;  %v493_v55 = vld [vmem:[#allocation5 + $0xa28] sm:$0xff] }
 0x46f   :  { %v501_v39 = vld [vmem:[#allocation5 + $0xa68] sm:$0xff] }
 0x470   :  { %10236 = vmatpush1.bf16.msra.mxu0 %v14066_v26  ;;  %11008 = vmatpush1.bf16.msra.mxu1 %v14068_v16  ;;  %v14098_v16 = vcombine.low %v476_v8, %v484_v13  ;;  %v14100_v26 = vcombine.low %v477_v27, %v485_v54  ;;  %v14117_v1 = vcombine.high %v493_v55, %v501_v39  ;;  %v524_v13 = vld [vmem:[#allocation5 + $0xb20] sm:$0xff]  ;;  %v525_v54 = vld [vmem:[#allocation5 + $0xb28] sm:$0xff] }
 0x471   :  { %10237 = vmatprep.subr.bf16.mxu0 %v14083_v49  ;;  %11009 = vmatprep.subr.bf16.mxu1 %v14085_v10  ;;  %v516_v49 = vld [vmem:[#allocation5 + $0xae0] sm:$0xff]  ;;  %v517_v10 = vld [vmem:[#allocation5 + $0xae8] sm:$0xff]  ;;  %v14116_v30 = vcombine.low %v493_v55, %v501_v39 }
 0x472   :  { %v14131_v28 = vcombine.high %v508_v36, %v516_v49  ;;  %v14133_v8 = vcombine.high %v509_v4, %v517_v10  ;;  %v533_v27 = vld [vmem:[#allocation5 + $0xb68] sm:$0xff]  ;;  %v548_v55 = vld [vmem:[#allocation5 + $0xbe0] sm:$0xff] }
 0x473   :  { %10083 = vmatmul.mubr.bf16.gmra.mrb[132].mxu0 %v18649_v6  ;;  %10855 = vmatmul.mubr.bf16.gmra.mrb[132].mxu1 %v18649_v6  ;;  %v14114_v6 = vcombine.low %v492_v43, %v500_v23  ;;  %v14130_v23 = vcombine.low %v508_v36, %v516_v49  ;;  %v14132_v43 = vcombine.low %v509_v4, %v517_v10  ;;  %v541_v39 = vld [vmem:[#allocation5 + $0xba8] sm:$0xff] }
 0x474   :  { %10092 = vmatprep.mubr.bf16.mxu0 %v16509_v41  ;;  %10864 = vmatprep.mubr.bf16.mxu1 %v16509_v41  ;;  %v557_v36 = vld [vmem:[#allocation5 + $0xc28] sm:$0xff] }
 0x475   :  { %10238 = vmatpush1.bf16.msra.mxu0 %v14082_v15  ;;  %11010 = vmatpush1.bf16.msra.mxu1 %v14084_v29  ;;  %v532_v15 = vld [vmem:[#allocation5 + $0xb60] sm:$0xff]  ;;  %v565_v49 = vld [vmem:[#allocation5 + $0xc68] sm:$0xff] }
 0x476   :  { %10239 = vmatprep.subr.bf16.mxu0 %v14099_v62  ;;  %11011 = vmatprep.subr.bf16.mxu1 %v14101_v12  ;;  %v14147_v29 = vcombine.high %v524_v13, %v532_v15  ;;  %v14149_v62 = vcombine.high %v525_v54, %v533_v27  ;;  %v540_v12 = vld [vmem:[#allocation5 + $0xba0] sm:$0xff] }
 0x477   :  { %v14162_v4 = vcombine.low %v540_v12, %v548_v55 }
 0x479   :  { %10240 = vmatpush1.bf16.msra.mxu0 %v14098_v16  ;;  %11012 = vmatpush1.bf16.msra.mxu1 %v14100_v26  ;;  %v549_v16 = vld [vmem:[#allocation5 + $0xbe8] sm:$0xff]  ;;  %v14146_v26 = vcombine.low %v524_v13, %v532_v15  ;;  %v14181_v13 = vcombine.high %v557_v36, %v565_v49  ;;  %v572_v15 = vld [vmem:[#allocation5 + $0xca0] sm:$0xff] }
 0x47a   :  { %10241 = vmatprep.subr.bf16.mxu0 %v14115_v21  ;;  %11013 = vmatprep.subr.bf16.mxu1 %v14117_v1  ;;  %v14148_v21 = vcombine.low %v525_v54, %v533_v27  ;;  %v14163_v1 = vcombine.high %v540_v12, %v548_v55  ;;  %v14164_v10 = vcombine.low %v541_v39, %v549_v16  ;;  %v580_v54 = vld [vmem:[#allocation5 + $0xce0] sm:$0xff]  ;;  %v573_v27 = vld [vmem:[#allocation5 + $0xca8] sm:$0xff] }
 0x47b   :  { %10093 = vmatmul.mubr.bf16.gmra.mrb[136].mxu0 %v16515_v60  ;;  %10865 = vmatmul.mubr.bf16.gmra.mrb[136].mxu1 %v16515_v60  ;;  %v588_v55 = vld [vmem:[#allocation5 + $0xd20] sm:$0xff] }
 0x47c   :  { %10102 = vmatprep.mubr.bf16.mxu0 %v16517_v0  ;;  %10874 = vmatprep.mubr.bf16.mxu1 %v16517_v0 }
 0x47d   :  { %10242 = vmatpush1.bf16.msra.mxu0 %v14114_v6  ;;  %11014 = vmatpush1.bf16.msra.mxu1 %v14116_v30  ;;  %v14165_v6 = vcombine.high %v541_v39, %v549_v16  ;;  %v556_v30 = vld [vmem:[#allocation5 + $0xc20] sm:$0xff]  ;;  %v589_v39 = vld [vmem:[#allocation5 + $0xd28] sm:$0xff] }
 0x47e   :  { %10243 = vmatprep.subr.bf16.mxu0 %v14131_v28  ;;  %11015 = vmatprep.subr.bf16.mxu1 %v14133_v8  ;;  %v564_v28 = vld [vmem:[#allocation5 + $0xc60] sm:$0xff]  ;;  %v597_v16 = vld [vmem:[#allocation5 + $0xd68] sm:$0xff] }
 0x47f   :  { %v14179_v8 = vcombine.high %v556_v30, %v564_v28 }
 0x481   :  { %10244 = vmatpush1.bf16.msra.mxu0 %v14130_v23  ;;  %11016 = vmatpush1.bf16.msra.mxu1 %v14132_v43  ;;  %v581_v23 = vld [vmem:[#allocation5 + $0xce8] sm:$0xff]  ;;  %v14178_v43 = vcombine.low %v556_v30, %v564_v28  ;;  %v14213_v30 = vcombine.high %v589_v39, %v597_v16  ;;  %v604_v28 = vld [vmem:[#allocation5 + $0xda0] sm:$0xff] }
 0x482   :  { %10245 = vmatprep.subr.bf16.mxu0 %v14147_v29  ;;  %11017 = vmatprep.subr.bf16.mxu1 %v14149_v62  ;;  %v14180_v29 = vcombine.low %v557_v36, %v565_v49  ;;  %v14195_v62 = vcombine.high %v572_v15, %v580_v54  ;;  %v14197_v12 = vcombine.high %v573_v27, %v581_v23  ;;  %v612_v36 = vld [vmem:[#allocation5 + $0xde0] sm:$0xff]  ;;  %v605_v49 = vld [vmem:[#allocation5 + $0xda8] sm:$0xff] }
 0x483   :  { %10103 = vmatmul.mubr.bf16.gmra.mrb[140].mxu0 %v16523_v17  ;;  %10875 = vmatmul.mubr.bf16.gmra.mrb[140].mxu1 %v16523_v17 }
 0x484   :  { %10112 = vmatprep.mubr.bf16.mxu0 %v16525_v22  ;;  %10884 = vmatprep.mubr.bf16.mxu1 %v16525_v22 }
 0x485   :  { %10246 = vmatpush1.bf16.msra.mxu0 %v14146_v26  ;;  %11018 = vmatpush1.bf16.msra.mxu1 %v14148_v21  ;;  %v596_v26 = vld [vmem:[#allocation5 + $0xd60] sm:$0xff]  ;;  %v14194_v21 = vcombine.low %v572_v15, %v580_v54 }
 0x486   :  { %10247 = vmatprep.subr.bf16.mxu0 %v14163_v1  ;;  %11019 = vmatprep.subr.bf16.mxu1 %v14165_v6  ;;  %v14196_v1 = vcombine.low %v573_v27, %v581_v23  ;;  %v14211_v6 = vcombine.high %v588_v55, %v596_v26  ;;  %v620_v54 = vld [vmem:[#allocation5 + $0xe20] sm:$0xff]  ;;  %v621_v27 = vld [vmem:[#allocation5 + $0xe28] sm:$0xff] }
 0x487   :  { %v629_v23 = vld [vmem:[#allocation5 + $0xe68] sm:$0xff] }
 0x489   :  { %10248 = vmatpush1.bf16.msra.mxu0 %v14162_v4  ;;  %11020 = vmatpush1.bf16.msra.mxu1 %v14164_v10  ;;  %v613_v4 = vld [vmem:[#allocation5 + $0xde8] sm:$0xff]  ;;  %v14210_v10 = vcombine.low %v588_v55, %v596_v26  ;;  %v14245_v55 = vcombine.high %v621_v27, %v629_v23  ;;  %v636_v26 = vld [vmem:[#allocation5 + $0xea0] sm:$0xff] }
 0x48a   :  { %10249 = vmatprep.subr.bf16.mxu0 %v14179_v8  ;;  %11021 = vmatprep.subr.bf16.mxu1 %v14181_v13  ;;  %v14212_v8 = vcombine.low %v589_v39, %v597_v16  ;;  %v14227_v13 = vcombine.high %v604_v28, %v612_v36  ;;  %v14229_v15 = vcombine.high %v605_v49, %v613_v4  ;;  %v644_v39 = vld [vmem:[#allocation5 + $0xee0] sm:$0xff]  ;;  %v637_v16 = vld [vmem:[#allocation5 + $0xea8] sm:$0xff] }
 0x48b   :  { %10113 = vmatmul.mubr.bf16.gmra.mrb[144].mxu0 %v16531_v44  ;;  %10885 = vmatmul.mubr.bf16.gmra.mrb[144].mxu1 %v16531_v44 }
 0x48c   :  { %10122 = vmatprep.mubr.bf16.mxu0 %v16533_v48  ;;  %10894 = vmatprep.mubr.bf16.mxu1 %v16533_v48 }
 0x48d   :  { %10250 = vmatpush1.bf16.msra.mxu0 %v14178_v43  ;;  %11022 = vmatpush1.bf16.msra.mxu1 %v14180_v29  ;;  %v628_v43 = vld [vmem:[#allocation5 + $0xe60] sm:$0xff]  ;;  %v14226_v29 = vcombine.low %v604_v28, %v612_v36 }
 0x48e   :  { %10251 = vmatprep.subr.bf16.mxu0 %v14195_v62  ;;  %11023 = vmatprep.subr.bf16.mxu1 %v14197_v12  ;;  %v14228_v62 = vcombine.low %v605_v49, %v613_v4  ;;  %v14243_v12 = vcombine.high %v620_v54, %v628_v43  ;;  %v652_v36 = vld [vmem:[#allocation5 + $0xf20] sm:$0xff]  ;;  %v653_v49 = vld [vmem:[#allocation5 + $0xf28] sm:$0xff] }
 0x48f   :  { %v661_v4 = vld [vmem:[#allocation5 + $0xf68] sm:$0xff] }
 0x491   :  { %10252 = vmatpush1.bf16.msra.mxu0 %v14194_v21  ;;  %11024 = vmatpush1.bf16.msra.mxu1 %v14196_v1  ;;  %v645_v21 = vld [vmem:[#allocation5 + $0xee8] sm:$0xff]  ;;  %v14242_v1 = vcombine.low %v620_v54, %v628_v43  ;;  %v14277_v54 = vcombine.high %v653_v49, %v661_v4  ;;  %v668_v43 = vld [vmem:[#allocation5 + $0xfa0] sm:$0xff] }
 0x492   :  { %10253 = vmatprep.subr.bf16.mxu0 %v14211_v6  ;;  %11025 = vmatprep.subr.bf16.mxu1 %v14213_v30  ;;  %v14244_v6 = vcombine.low %v621_v27, %v629_v23  ;;  %v14259_v30 = vcombine.high %v636_v26, %v644_v39  ;;  %v14261_v28 = vcombine.high %v637_v16, %v645_v21  ;;  %v676_v27 = vld [vmem:[#allocation5 + $0xfe0] sm:$0xff]  ;;  %v669_v23 = vld [vmem:[#allocation5 + $0xfa8] sm:$0xff] }
 0x493   :  { %10123 = vmatmul.mubr.bf16.gmra.mrb[148].mxu0 %v16539_v5  ;;  %10895 = vmatmul.mubr.bf16.gmra.mrb[148].mxu1 %v16539_v5 }
 0x494   :  { %10132 = vmatprep.mubr.bf16.mxu0 %v16541_v9  ;;  %10904 = vmatprep.mubr.bf16.mxu1 %v16541_v9 }
 0x495   :  { %10254 = vmatpush1.bf16.msra.mxu0 %v14210_v10  ;;  %11026 = vmatpush1.bf16.msra.mxu1 %v14212_v8  ;;  %v660_v10 = vld [vmem:[#allocation5 + $0xf60] sm:$0xff]  ;;  %v14258_v8 = vcombine.low %v636_v26, %v644_v39  ;;  %v14290_v39 = vcombine.low %v668_v43, %v676_v27 }
 0x496   :  { %10255 = vmatprep.subr.bf16.mxu0 %v14227_v13  ;;  %11027 = vmatprep.subr.bf16.mxu1 %v14229_v15  ;;  %v14260_v13 = vcombine.low %v637_v16, %v645_v21  ;;  %v14275_v15 = vcombine.high %v652_v36, %v660_v10  ;;  %v14307_v21 = vcombine.high %v17424_v45, %v17426_v3 }
 0x499   :  { %10256 = vmatpush1.bf16.msra.mxu0 %v14226_v29  ;;  %11028 = vmatpush1.bf16.msra.mxu1 %v14228_v62  ;;  %v677_v29 = vld [vmem:[#allocation5 + $0xfe8] sm:$0xff]  ;;  %v14274_v62 = vcombine.low %v652_v36, %v660_v10 }
 0x49a   :  { %10257 = vmatprep.subr.bf16.mxu0 %v14243_v12  ;;  %11029 = vmatprep.subr.bf16.mxu1 %v14245_v55  ;;  %v14276_v12 = vcombine.low %v653_v49, %v661_v4  ;;  %v14291_v55 = vcombine.high %v668_v43, %v676_v27  ;;  %v14293_v26 = vcombine.high %v669_v23, %v677_v29 }
 0x49b   :  { %10133 = vmatmul.mubr.bf16.gmra.mrb[152].mxu0 %v16547_v32  ;;  %10905 = vmatmul.mubr.bf16.gmra.mrb[152].mxu1 %v16547_v32  ;;  %v14292_v16 = vcombine.low %v669_v23, %v677_v29 }
 0x49c   :  { %10142 = vmatprep.mubr.bf16.mxu0 %v16549_v37  ;;  %10914 = vmatprep.mubr.bf16.mxu1 %v16549_v37 }
 0x49d   :  { %10258 = vmatpush1.bf16.msra.mxu0 %v14242_v1  ;;  %11030 = vmatpush1.bf16.msra.mxu1 %v14244_v6  ;;  %v14309_v1 = vcombine.high %v17434_v38, %v17436_v14 }
 0x49e   :  { %10259 = vmatprep.subr.bf16.mxu0 %v14259_v30  ;;  %11031 = vmatprep.subr.bf16.mxu1 %v14261_v28 }
 0x4a1   :  { %10260 = vmatpush1.bf16.msra.mxu0 %v14258_v8  ;;  %11032 = vmatpush1.bf16.msra.mxu1 %v14260_v13 }
 0x4a2   :  { %10261 = vmatprep.subr.bf16.mxu0 %v14275_v15  ;;  %11033 = vmatprep.subr.bf16.mxu1 %v14277_v54 }
 0x4a3   :  { %10143 = vmatmul.mubr.bf16.gmra.mrb[156].mxu0 %v16555_v61  ;;  %10915 = vmatmul.mubr.bf16.gmra.mrb[156].mxu1 %v16555_v61 }
 0x4a4   :  { %10152 = vmatprep.mubr.bf16.mxu0 %v16557_v2  ;;  %10924 = vmatprep.mubr.bf16.mxu1 %v16557_v2 }
 0x4a5   :  { %10262 = vmatpush1.bf16.msra.mxu0 %v14274_v62  ;;  %11034 = vmatpush1.bf16.msra.mxu1 %v14276_v12 }
 0x4a6   :  { %10263 = vmatprep.subr.bf16.mxu0 %v14291_v55  ;;  %11035 = vmatprep.subr.bf16.mxu1 %v14293_v26 }
 0x4a9   :  { %10264 = vmatpush1.bf16.msra.mxu0 %v14290_v39  ;;  %11036 = vmatpush1.bf16.msra.mxu1 %v14292_v16 }
 0x4aa   :  { %10426 = vmatprep.subr.bf16.mxu0 %v14307_v21  ;;  %11198 = vmatprep.subr.bf16.mxu1 %v14309_v1 }
 0x4ab   :  { %10153 = vmatmul.mubr.bf16.gmra.mrb[160].mxu0 %v16565_v18  ;;  %10925 = vmatmul.mubr.bf16.gmra.mrb[160].mxu1 %v16565_v18 }
 0x4ac   :  { %10162 = vmatprep.mubr.bf16.mxu0 %v16569_v20  ;;  %10934 = vmatprep.mubr.bf16.mxu1 %v16569_v20 }
 0x4b3   :  { %10163 = vmatmul.mubr.bf16.gmra.mrb[164].mxu0 %v16575_v25  ;;  %10935 = vmatmul.mubr.bf16.gmra.mrb[164].mxu1 %v16575_v25 }
 0x4b4   :  { %10172 = vmatprep.mubr.bf16.mxu0 %v16577_v53  ;;  %10944 = vmatprep.mubr.bf16.mxu1 %v16577_v53 }
 0x4bb   :  { %10173 = vmatmul.mubr.bf16.gmra.mrb[168].mxu0 %v16583_v33  ;;  %10945 = vmatmul.mubr.bf16.gmra.mrb[168].mxu1 %v16583_v33 }
 0x4bc   :  { %10182 = vmatprep.mubr.bf16.mxu0 %v16585_v34  ;;  %10954 = vmatprep.mubr.bf16.mxu1 %v16585_v34 }
 0x4be   :  { %v9109_v6 = vpop.f32.mrb[64].mxu0  ;;  %v9881_v30 = vpop.f32.mrb[64].mxu1 }
 0x4bf   :  { %13132 = vst [vmem:[#allocation7 + $0x20] sm:$0xff] %v9109_v6  ;;  %v9111_v28 = vpop.f32.mrb[65].mxu0  ;;  %13134 = vst [vmem:[#allocation7 + $0x30] sm:$0xff] %v9881_v30  ;;  %v9883_v36 = vpop.f32.mrb[65].mxu1 }
 0x4c0   :  { %13133 = vst [vmem:[#allocation7 + $0x28] sm:$0xff] %v9111_v28  ;;  %v9113_v10 = vpop.f32.mrb[66].mxu0  ;;  %13135 = vst [vmem:[#allocation7 + $0x38] sm:$0xff] %v9883_v36  ;;  %v9885_v49 = vpop.f32.mrb[66].mxu1 }
 0x4c1   :  { %13148 = vst [vmem:[#allocation7 + $0xa0] sm:$0xff] %v9113_v10  ;;  %v9115_v4 = vpop.f32.mrb[67].mxu0  ;;  %13150 = vst [vmem:[#allocation7 + $0xb0] sm:$0xff] %v9885_v49  ;;  %v9887_v8 = vpop.f32.mrb[67].mxu1 }
 0x4c2   :  { %13149 = vst [vmem:[#allocation7 + $0xa8] sm:$0xff] %v9115_v4  ;;  %13151 = vst [vmem:[#allocation7 + $0xb8] sm:$0xff] %v9887_v8 }
 0x4c3   :  { %10183 = vmatmul.mubr.bf16.gmra.mrb[172].mxu0 %v16591_v40  ;;  %10955 = vmatmul.mubr.bf16.gmra.mrb[172].mxu1 %v16591_v40 }
 0x4c4   :  { %10192 = vmatprep.mubr.bf16.mxu0 %v16593_v42  ;;  %10964 = vmatprep.mubr.bf16.mxu1 %v16593_v42 }
 0x4c6   :  { %v9119_v13 = vpop.f32.mrb[68].mxu0  ;;  %v9891_v15 = vpop.f32.mrb[68].mxu1 }
 0x4c7   :  { %13164 = vst [vmem:[#allocation7 + $0x120] sm:$0xff] %v9119_v13  ;;  %v9121_v54 = vpop.f32.mrb[69].mxu0  ;;  %13166 = vst [vmem:[#allocation7 + $0x130] sm:$0xff] %v9891_v15  ;;  %v9893_v43 = vpop.f32.mrb[69].mxu1 }
 0x4c8   :  { %13165 = vst [vmem:[#allocation7 + $0x128] sm:$0xff] %v9121_v54  ;;  %v9123_v27 = vpop.f32.mrb[70].mxu0  ;;  %13167 = vst [vmem:[#allocation7 + $0x138] sm:$0xff] %v9893_v43  ;;  %v9895_v23 = vpop.f32.mrb[70].mxu1 }
 0x4c9   :  { %13180 = vst [vmem:[#allocation7 + $0x1a0] sm:$0xff] %v9123_v27  ;;  %v9125_v29 = vpop.f32.mrb[71].mxu0  ;;  %13182 = vst [vmem:[#allocation7 + $0x1b0] sm:$0xff] %v9895_v23  ;;  %v9897_v62 = vpop.f32.mrb[71].mxu1 }
 0x4ca   :  { %13181 = vst [vmem:[#allocation7 + $0x1a8] sm:$0xff] %v9125_v29  ;;  %13183 = vst [vmem:[#allocation7 + $0x1b8] sm:$0xff] %v9897_v62 }
 0x4cb   :  { %10193 = vmatmul.mubr.bf16.gmra.mrb[176].mxu0 %v16599_v46  ;;  %10965 = vmatmul.mubr.bf16.gmra.mrb[176].mxu1 %v16599_v46 }
 0x4cc   :  { %10202 = vmatprep.mubr.bf16.mxu0 %v16601_v47  ;;  %10974 = vmatprep.mubr.bf16.mxu1 %v16601_v47 }
 0x4ce   :  { %v9129_v12 = vpop.f32.mrb[72].mxu0  ;;  %v9901_v55 = vpop.f32.mrb[72].mxu1 }
 0x4cf   :  { %13196 = vst [vmem:[#allocation7 + $0x220] sm:$0xff] %v9129_v12  ;;  %v9131_v26 = vpop.f32.mrb[73].mxu0  ;;  %13198 = vst [vmem:[#allocation7 + $0x230] sm:$0xff] %v9901_v55  ;;  %v9903_v39 = vpop.f32.mrb[73].mxu1  ;;  %v18650_v55 = vld [vmem:[#allocation17_spill] sm:$0xff] }
 0x4d0   :  { %13197 = vst [vmem:[#allocation7 + $0x228] sm:$0xff] %v9131_v26  ;;  %v9133_v16 = vpop.f32.mrb[74].mxu0  ;;  %13199 = vst [vmem:[#allocation7 + $0x238] sm:$0xff] %v9903_v39  ;;  %v9905_v21 = vpop.f32.mrb[74].mxu1  ;;  %v18651_v26 = vld [vmem:[#allocation18_spill] sm:$0xff] }
 0x4d1   :  { %13212 = vst [vmem:[#allocation7 + $0x2a0] sm:$0xff] %v9133_v16  ;;  %v9135_v1 = vpop.f32.mrb[75].mxu0  ;;  %13214 = vst [vmem:[#allocation7 + $0x2b0] sm:$0xff] %v9905_v21  ;;  %v9907_v6 = vpop.f32.mrb[75].mxu1 }
 0x4d2   :  { %13213 = vst [vmem:[#allocation7 + $0x2a8] sm:$0xff] %v9135_v1  ;;  %13215 = vst [vmem:[#allocation7 + $0x2b8] sm:$0xff] %v9907_v6  ;;  %v700_v1 = vld [vmem:[#allocation5 + $0x10a0] sm:$0xff] }
 0x4d3   :  { %10203 = vmatmul.mubr.bf16.gmra.mrb[180].mxu0 %v16607_v51  ;;  %10975 = vmatmul.mubr.bf16.gmra.mrb[180].mxu1 %v16607_v51  ;;  %v708_v6 = vld [vmem:[#allocation5 + $0x10e0] sm:$0xff] }
 0x4d4   :  { %10212 = vmatprep.mubr.bf16.mxu0 %v16609_v52  ;;  %10984 = vmatprep.mubr.bf16.mxu1 %v16609_v52 }
 0x4d6   :  { %v9139_v30 = vpop.f32.mrb[76].mxu0  ;;  %v9911_v28 = vpop.f32.mrb[76].mxu1 }
 0x4d7   :  { %13228 = vst [vmem:[#allocation7 + $0x320] sm:$0xff] %v9139_v30  ;;  %v9141_v36 = vpop.f32.mrb[77].mxu0  ;;  %13230 = vst [vmem:[#allocation7 + $0x330] sm:$0xff] %v9911_v28  ;;  %v9913_v10 = vpop.f32.mrb[77].mxu1 }
 0x4d8   :  { %13229 = vst [vmem:[#allocation7 + $0x328] sm:$0xff] %v9141_v36  ;;  %v9143_v49 = vpop.f32.mrb[78].mxu0  ;;  %13231 = vst [vmem:[#allocation7 + $0x338] sm:$0xff] %v9913_v10  ;;  %v9915_v4 = vpop.f32.mrb[78].mxu1  ;;  %v701_v36 = vld [vmem:[#allocation5 + $0x10a8] sm:$0xff] }
 0x4d9   :  { %13244 = vst [vmem:[#allocation7 + $0x3a0] sm:$0xff] %v9143_v49  ;;  %v9145_v8 = vpop.f32.mrb[79].mxu0  ;;  %13246 = vst [vmem:[#allocation7 + $0x3b0] sm:$0xff] %v9915_v4  ;;  %v9917_v13 = vpop.f32.mrb[79].mxu1  ;;  %v709_v10 = vld [vmem:[#allocation5 + $0x10e8] sm:$0xff] }
 0x4da   :  { %13245 = vst [vmem:[#allocation7 + $0x3a8] sm:$0xff] %v9145_v8  ;;  %13247 = vst [vmem:[#allocation7 + $0x3b8] sm:$0xff] %v9917_v13  ;;  %v14323_v13 = vcombine.high %v700_v1, %v708_v6 }
 0x4db   :  { %10213 = vmatmul.mubr.bf16.gmra.mrb[184].mxu0 %v16615_v57  ;;  %10985 = vmatmul.mubr.bf16.gmra.mrb[184].mxu1 %v16615_v57  ;;  %v765_v57 = vld [vmem:[#allocation5 + $0x12a8] sm:$0xff] }
 0x4dc   :  { %10222 = vmatprep.mubr.bf16.mxu0 %v16617_v59  ;;  %10994 = vmatprep.mubr.bf16.mxu1 %v16617_v59 }
 0x4de   :  { %v9149_v15 = vpop.f32.mrb[80].mxu0  ;;  %v9921_v54 = vpop.f32.mrb[80].mxu1 }
 0x4df   :  { %13260 = vst [vmem:[#allocation7 + $0x420] sm:$0xff] %v9149_v15  ;;  %v9151_v43 = vpop.f32.mrb[81].mxu0  ;;  %13262 = vst [vmem:[#allocation7 + $0x430] sm:$0xff] %v9921_v54  ;;  %v9923_v27 = vpop.f32.mrb[81].mxu1  ;;  %v716_v15 = vld [vmem:[#allocation5 + $0x1120] sm:$0xff] }
 0x4e0   :  { %13261 = vst [vmem:[#allocation7 + $0x428] sm:$0xff] %v9151_v43  ;;  %v9153_v23 = vpop.f32.mrb[82].mxu0  ;;  %13263 = vst [vmem:[#allocation7 + $0x438] sm:$0xff] %v9923_v27  ;;  %v9925_v29 = vpop.f32.mrb[82].mxu1  ;;  %v724_v54 = vld [vmem:[#allocation5 + $0x1160] sm:$0xff]  ;;  %v717_v43 = vld [vmem:[#allocation5 + $0x1128] sm:$0xff] }
 0x4e1   :  { %13276 = vst [vmem:[#allocation7 + $0x4a0] sm:$0xff] %v9153_v23  ;;  %v9155_v62 = vpop.f32.mrb[83].mxu0  ;;  %13278 = vst [vmem:[#allocation7 + $0x4b0] sm:$0xff] %v9925_v29  ;;  %v9927_v12 = vpop.f32.mrb[83].mxu1  ;;  %v18652_v27 = vld [vmem:[#allocation19_spill] sm:$0xff]  ;;  %v14325_v23 = vcombine.high %v701_v36, %v709_v10  ;;  %v725_v29 = vld [vmem:[#allocation5 + $0x1168] sm:$0xff] }
 0x4e2   :  { %13277 = vst [vmem:[#allocation7 + $0x4a8] sm:$0xff] %v9155_v62  ;;  %13279 = vst [vmem:[#allocation7 + $0x4b8] sm:$0xff] %v9927_v12  ;;  %v17510_v62 = vld [vmem:[#allocation5 + $0x1820] sm:$0xff] }
 0x4e3   :  { %10223 = vmatmul.mubr.bf16.gmra.mrb[188].mxu0 %v18650_v55  ;;  %10995 = vmatmul.mubr.bf16.gmra.mrb[188].mxu1 %v18650_v55  ;;  %v17512_v12 = vld [vmem:[#allocation5 + $0x1860] sm:$0xff] }
 0x4e4   :  { %10265 = vmatprep.mubr.bf16.mxu0 %v18651_v26  ;;  %11037 = vmatprep.mubr.bf16.mxu1 %v18651_v26  ;;  %v740_v26 = vld [vmem:[#allocation5 + $0x11e0] sm:$0xff] }
 0x4e5   :  { %v756_v55 = vld [vmem:[#allocation5 + $0x1260] sm:$0xff] }
 0x4e6   :  { %v9159_v39 = vpop.f32.mrb[84].mxu0  ;;  %v9931_v16 = vpop.f32.mrb[84].mxu1 }
 0x4e7   :  { %13292 = vst [vmem:[#allocation7 + $0x520] sm:$0xff] %v9159_v39  ;;  %v9161_v21 = vpop.f32.mrb[85].mxu0  ;;  %13294 = vst [vmem:[#allocation7 + $0x530] sm:$0xff] %v9931_v16  ;;  %v9933_v30 = vpop.f32.mrb[85].mxu1  ;;  %v18653_v39 = vcombine.low %v17424_v45, %v17426_v3  ;;  %v14322_v16 = vcombine.low %v700_v1, %v708_v6  ;;  %v14341_v1 = vcombine.high %v717_v43, %v725_v29 }
 0x4e8   :  { %13293 = vst [vmem:[#allocation7 + $0x528] sm:$0xff] %v9161_v21  ;;  %v9163_v28 = vpop.f32.mrb[86].mxu0  ;;  %13295 = vst [vmem:[#allocation7 + $0x538] sm:$0xff] %v9933_v30  ;;  %v9935_v49 = vpop.f32.mrb[86].mxu1  ;;  %v17520_v30 = vld [vmem:[#allocation5 + $0x1828] sm:$0xff]  ;;  %v732_v21 = vld [vmem:[#allocation5 + $0x11a0] sm:$0xff] }
 0x4e9   :  { %13308 = vst [vmem:[#allocation7 + $0x5a0] sm:$0xff] %v9163_v28  ;;  %v9165_v4 = vpop.f32.mrb[87].mxu0  ;;  %13310 = vst [vmem:[#allocation7 + $0x5b0] sm:$0xff] %v9935_v49  ;;  %v9937_v8 = vpop.f32.mrb[87].mxu1  ;;  %v17522_v28 = vld [vmem:[#allocation5 + $0x1868] sm:$0xff]  ;;  %v18654_v49 = vcombine.low %v17434_v38, %v17436_v14 }
 0x4ea   :  { %13309 = vst [vmem:[#allocation7 + $0x5a8] sm:$0xff] %v9165_v4  ;;  %13311 = vst [vmem:[#allocation7 + $0x5b8] sm:$0xff] %v9937_v8  ;;  %v18655_v4 = vld [vmem:[#allocation20_spill] sm:$0xff]  ;;  %v14324_v8 = vcombine.low %v701_v36, %v709_v10 }
 0x4eb   :  { %10266 = vmatmul.mubr.bf16.vlgmr.msra.gmra.mrb[128].mxu0 %v18652_v27  ;;  %11038 = vmatmul.mubr.bf16.vlgmr.msra.gmra.mrb[128].mxu1 %v18652_v27  ;;  %v14339_v27 = vcombine.high %v716_v15, %v724_v54  ;;  %v733_v36 = vld [vmem:[#allocation5 + $0x11a8] sm:$0xff] }
 0x4ec   :  { %10427 = vmatpush1.bf16.msra.mxu0 %v18653_v39  ;;  %11199 = vmatpush1.bf16.msra.mxu1 %v18654_v49  ;;  %v741_v10 = vld [vmem:[#allocation5 + $0x11e8] sm:$0xff] }
 0x4ed   :  { %10275 = vmatprep.mubr.bf16.mxu0 %v18655_v4  ;;  %11047 = vmatprep.mubr.bf16.mxu1 %v18655_v4  ;;  %v14355_v4 = vcombine.high %v732_v21, %v740_v26 }
 0x4ee   :  { %v9169_v3 = vpop.f32.mrb[88].mxu0  ;;  %10428 = vmatprep.subr.bf16.mxu0 %v14323_v13  ;;  %v9941_v6 = vpop.f32.mrb[88].mxu1  ;;  %11200 = vmatprep.subr.bf16.mxu1 %v14325_v23  ;;  %v14338_v13 = vcombine.low %v716_v15, %v724_v54  ;;  %v14340_v23 = vcombine.low %v717_v43, %v725_v29  ;;  %v14354_v15 = vcombine.low %v732_v21, %v740_v26 }
 0x4ef   :  { %13324 = vst [vmem:[#allocation7 + $0x620] sm:$0xff] %v9169_v3  ;;  %v9171_v39 = vpop.f32.mrb[89].mxu0  ;;  %13326 = vst [vmem:[#allocation7 + $0x630] sm:$0xff] %v9941_v6  ;;  %v9943_v14 = vpop.f32.mrb[89].mxu1  ;;  %v18656_v6 = vld [vmem:[#allocation21_spill] sm:$0xff]  ;;  %v14356_v43 = vcombine.low %v733_v36, %v741_v10 }
 0x4f0   :  { %13325 = vst [vmem:[#allocation7 + $0x628] sm:$0xff] %v9171_v39  ;;  %v9173_v38 = vpop.f32.mrb[90].mxu0  ;;  %10429 = vmatpush1.bf16.msra.mxu0 %v14322_v16  ;;  %13327 = vst [vmem:[#allocation7 + $0x638] sm:$0xff] %v9943_v14  ;;  %v9945_v49 = vpop.f32.mrb[90].mxu1  ;;  %11201 = vmatpush1.bf16.msra.mxu1 %v14324_v8  ;;  %v14357_v39 = vcombine.high %v733_v36, %v741_v10  ;;  %v748_v16 = vld [vmem:[#allocation5 + $0x1220] sm:$0xff]  ;;  %v18657_v14 = vld [vmem:[#allocation22_spill] sm:$0xff] }
 0x4f1   :  { %13340 = vst [vmem:[#allocation7 + $0x6a0] sm:$0xff] %v9173_v38  ;;  %v9175_v45 = vpop.f32.mrb[91].mxu0  ;;  %10430 = vmatprep.subr.bf16.mxu0 %v14339_v27  ;;  %13342 = vst [vmem:[#allocation7 + $0x6b0] sm:$0xff] %v9945_v49  ;;  %v9947_v3 = vpop.f32.mrb[91].mxu1  ;;  %11202 = vmatprep.subr.bf16.mxu1 %v14341_v1  ;;  %v749_v38 = vld [vmem:[#allocation5 + $0x1228] sm:$0xff]  ;;  %v14371_v27 = vcombine.high %v748_v16, %v756_v55  ;;  %v764_v49 = vld [vmem:[#allocation5 + $0x12a0] sm:$0xff] }
 0x4f2   :  { %13341 = vst [vmem:[#allocation7 + $0x6a8] sm:$0xff] %v9175_v45  ;;  %13343 = vst [vmem:[#allocation7 + $0x6b8] sm:$0xff] %v9947_v3  ;;  %v757_v8 = vld [vmem:[#allocation5 + $0x1268] sm:$0xff]  ;;  %v772_v3 = vld [vmem:[#allocation5 + $0x12e0] sm:$0xff] }
 0x4f3   :  { %10276 = vmatmul.mubr.bf16.gmra.mrb[132].mxu0 %v18656_v6  ;;  %11048 = vmatmul.mubr.bf16.gmra.mrb[132].mxu1 %v18656_v6  ;;  %v14373_v1 = vcombine.high %v749_v38, %v757_v8  ;;  %v14372_v10 = vcombine.low %v749_v38, %v757_v8 }
 0x4f4   :  { %10285 = vmatprep.mubr.bf16.mxu0 %v18657_v14  ;;  %11057 = vmatprep.mubr.bf16.mxu1 %v18657_v14  ;;  %v773_v14 = vld [vmem:[#allocation5 + $0x12e8] sm:$0xff] }
 0x4f5   :  { %10431 = vmatpush1.bf16.msra.mxu0 %v14338_v13  ;;  %11203 = vmatpush1.bf16.msra.mxu1 %v14340_v23  ;;  %v14387_v13 = vcombine.high %v764_v49, %v772_v3  ;;  %v18658_v23 = vld [vmem:[#allocation23_spill] sm:$0xff]  ;;  %v14388_v38 = vcombine.low %v765_v57, %v773_v14 }
 0x4f6   :  { %v9179_v54 = vpop.f32.mrb[92].mxu0  ;;  %10432 = vmatprep.subr.bf16.mxu0 %v14355_v4  ;;  %v9951_v29 = vpop.f32.mrb[92].mxu1  ;;  %11204 = vmatprep.subr.bf16.mxu1 %v14357_v39  ;;  %v14370_v4 = vcombine.low %v748_v16, %v756_v55  ;;  %v14389_v39 = vcombine.high %v765_v57, %v773_v14  ;;  %v789_v55 = vld [vmem:[#allocation5 + $0x1368] sm:$0xff]  ;;  %v14386_v16 = vcombine.low %v764_v49, %v772_v3 }
 0x4f7   :  { %13356 = vst [vmem:[#allocation7 + $0x720] sm:$0xff] %v9179_v54  ;;  %v9181_v45 = vpop.f32.mrb[93].mxu0  ;;  %13358 = vst [vmem:[#allocation7 + $0x730] sm:$0xff] %v9951_v29  ;;  %v9953_v6 = vpop.f32.mrb[93].mxu1  ;;  %v780_v54 = vld [vmem:[#allocation5 + $0x1320] sm:$0xff] }
 0x4f8   :  { %13357 = vst [vmem:[#allocation7 + $0x728] sm:$0xff] %v9181_v45  ;;  %v9183_v59 = vpop.f32.mrb[94].mxu0  ;;  %13359 = vst [vmem:[#allocation7 + $0x738] sm:$0xff] %v9953_v6  ;;  %v9955_v26 = vpop.f32.mrb[94].mxu1  ;;  %v788_v29 = vld [vmem:[#allocation5 + $0x1360] sm:$0xff]  ;;  %v781_v6 = vld [vmem:[#allocation5 + $0x1328] sm:$0xff] }
 0x4f9   :  { %13372 = vst [vmem:[#allocation7 + $0x7a0] sm:$0xff] %v9183_v59  ;;  %v9185_v21 = vpop.f32.mrb[95].mxu0  ;;  %10433 = vmatpush1.bf16.msra.mxu0 %v14354_v15  ;;  %13374 = vst [vmem:[#allocation7 + $0x7b0] sm:$0xff] %v9955_v26  ;;  %v9957_v36 = vpop.f32.mrb[95].mxu1  ;;  %11205 = vmatpush1.bf16.msra.mxu1 %v14356_v43  ;;  %v18659_v59 = vld [vmem:[#allocation24_spill] sm:$0xff]  ;;  %v14403_v8 = vcombine.high %v780_v54, %v788_v29  ;;  %v14405_v45 = vcombine.high %v781_v6, %v789_v55  ;;  %v804_v26 = vld [vmem:[#allocation5 + $0x13e0] sm:$0xff] }
 0x4fa   :  { %13373 = vst [vmem:[#allocation7 + $0x7a8] sm:$0xff] %v9185_v21  ;;  %10434 = vmatprep.subr.bf16.mxu0 %v14371_v27  ;;  %13375 = vst [vmem:[#allocation7 + $0x7b8] sm:$0xff] %v9957_v36  ;;  %11206 = vmatprep.subr.bf16.mxu1 %v14373_v1  ;;  %v796_v1 = vld [vmem:[#allocation5 + $0x13a0] sm:$0xff]  ;;  %v14402_v57 = vcombine.low %v780_v54, %v788_v29  ;;  %v821_v54 = vld [vmem:[#allocation5 + $0x1468] sm:$0xff] }
 0x4fb   :  { %10286 = vmatmul.mubr.bf16.gmra.mrb[136].mxu0 %v18658_v23  ;;  %11058 = vmatmul.mubr.bf16.gmra.mrb[136].mxu1 %v18658_v23  ;;  %v797_v23 = vld [vmem:[#allocation5 + $0x13a8] sm:$0xff]  ;;  %v14418_v29 = vcombine.low %v796_v1, %v804_v26 }
 0x4fc   :  { %10295 = vmatprep.mubr.bf16.mxu0 %v18659_v59  ;;  %11067 = vmatprep.mubr.bf16.mxu1 %v18659_v59  ;;  %v805_v59 = vld [vmem:[#allocation5 + $0x13e8] sm:$0xff] }
 0x4fd   :  { %10435 = vmatpush1.bf16.msra.mxu0 %v14370_v4  ;;  %11207 = vmatpush1.bf16.msra.mxu1 %v14372_v10  ;;  %v14404_v4 = vcombine.low %v781_v6, %v789_v55  ;;  %v14419_v10 = vcombine.high %v796_v1, %v804_v26  ;;  %v14420_v6 = vcombine.low %v797_v23, %v805_v59 }
 0x4fe   :  { %v9189_v15 = vpop.f32.mrb[96].mxu0  ;;  %10436 = vmatprep.subr.bf16.mxu0 %v14387_v13  ;;  %v9961_v43 = vpop.f32.mrb[96].mxu1  ;;  %11208 = vmatprep.subr.bf16.mxu1 %v14389_v39  ;;  %v18660_v13 = vld [vmem:[#allocation25_spill] sm:$0xff]  ;;  %v14421_v39 = vcombine.high %v797_v23, %v805_v59 }
 0x4ff   :  { %13388 = vst [vmem:[#allocation7 + $0x820] sm:$0xff] %v9189_v15  ;;  %v9191_v27 = vpop.f32.mrb[97].mxu0  ;;  %13390 = vst [vmem:[#allocation7 + $0x830] sm:$0xff] %v9961_v43  ;;  %v9963_v21 = vpop.f32.mrb[97].mxu1  ;;  %v812_v15 = vld [vmem:[#allocation5 + $0x1420] sm:$0xff] }
 0x500   :  { %13389 = vst [vmem:[#allocation7 + $0x828] sm:$0xff] %v9191_v27  ;;  %v9193_v36 = vpop.f32.mrb[98].mxu0  ;;  %13391 = vst [vmem:[#allocation7 + $0x838] sm:$0xff] %v9963_v21  ;;  %v9965_v49 = vpop.f32.mrb[98].mxu1  ;;  %v820_v43 = vld [vmem:[#allocation5 + $0x1460] sm:$0xff]  ;;  %v18661_v27 = vld [vmem:[#allocation26_spill] sm:$0xff] }
 0x501   :  { %13404 = vst [vmem:[#allocation7 + $0x8a0] sm:$0xff] %v9193_v36  ;;  %v9195_v3 = vpop.f32.mrb[99].mxu0  ;;  %10437 = vmatpush1.bf16.msra.mxu0 %v14386_v16  ;;  %13406 = vst [vmem:[#allocation7 + $0x8b0] sm:$0xff] %v9965_v49  ;;  %v9967_v14 = vpop.f32.mrb[99].mxu1  ;;  %11209 = vmatpush1.bf16.msra.mxu1 %v14388_v38  ;;  %v813_v16 = vld [vmem:[#allocation5 + $0x1428] sm:$0xff]  ;;  %v14435_v55 = vcombine.high %v812_v15, %v820_v43  ;;  %v828_v36 = vld [vmem:[#allocation5 + $0x14a0] sm:$0xff]  ;;  %v14434_v23 = vcombine.low %v812_v15, %v820_v43 }
 0x502   :  { %13405 = vst [vmem:[#allocation7 + $0x8a8] sm:$0xff] %v9195_v3  ;;  %10438 = vmatprep.subr.bf16.mxu0 %v14403_v8  ;;  %13407 = vst [vmem:[#allocation7 + $0x8b8] sm:$0xff] %v9967_v14  ;;  %11210 = vmatprep.subr.bf16.mxu1 %v14405_v45  ;;  %v14437_v21 = vcombine.high %v813_v16, %v821_v54  ;;  %v836_v49 = vld [vmem:[#allocation5 + $0x14e0] sm:$0xff]  ;;  %v853_v15 = vld [vmem:[#allocation5 + $0x1568] sm:$0xff] }
 0x503   :  { %10296 = vmatmul.mubr.bf16.gmra.mrb[140].mxu0 %v18660_v13  ;;  %11068 = vmatmul.mubr.bf16.gmra.mrb[140].mxu1 %v18660_v13  ;;  %v829_v13 = vld [vmem:[#allocation5 + $0x14a8] sm:$0xff]  ;;  %v14450_v43 = vcombine.low %v828_v36, %v836_v49 }
 0x504   :  { %10305 = vmatprep.mubr.bf16.mxu0 %v18661_v27  ;;  %11077 = vmatprep.mubr.bf16.mxu1 %v18661_v27  ;;  %v837_v27 = vld [vmem:[#allocation5 + $0x14e8] sm:$0xff] }
 0x505   :  { %10439 = vmatpush1.bf16.msra.mxu0 %v14402_v57  ;;  %11211 = vmatpush1.bf16.msra.mxu1 %v14404_v4  ;;  %v14436_v57 = vcombine.low %v813_v16, %v821_v54  ;;  %v14451_v4 = vcombine.high %v828_v36, %v836_v49  ;;  %v14452_v16 = vcombine.low %v829_v13, %v837_v27 }
 0x506   :  { %v9199_v38 = vpop.f32.mrb[100].mxu0  ;;  %10440 = vmatprep.subr.bf16.mxu0 %v14419_v10  ;;  %v9971_v8 = vpop.f32.mrb[100].mxu1  ;;  %11212 = vmatprep.subr.bf16.mxu1 %v14421_v39  ;;  %v18662_v10 = vld [vmem:[#allocation27_spill] sm:$0xff]  ;;  %v14453_v39 = vcombine.high %v829_v13, %v837_v27 }
 0x507   :  { %13420 = vst [vmem:[#allocation7 + $0x920] sm:$0xff] %v9199_v38  ;;  %v9201_v45 = vpop.f32.mrb[101].mxu0  ;;  %13422 = vst [vmem:[#allocation7 + $0x930] sm:$0xff] %v9971_v8  ;;  %v9973_v3 = vpop.f32.mrb[101].mxu1  ;;  %v844_v38 = vld [vmem:[#allocation5 + $0x1520] sm:$0xff] }
 0x508   :  { %13421 = vst [vmem:[#allocation7 + $0x928] sm:$0xff] %v9201_v45  ;;  %v9203_v14 = vpop.f32.mrb[102].mxu0  ;;  %13423 = vst [vmem:[#allocation7 + $0x938] sm:$0xff] %v9973_v3  ;;  %v9975_v1 = vpop.f32.mrb[102].mxu1  ;;  %v852_v8 = vld [vmem:[#allocation5 + $0x1560] sm:$0xff]  ;;  %v18663_v45 = vld [vmem:[#allocation28_spill] sm:$0xff] }
 0x509   :  { %13436 = vst [vmem:[#allocation7 + $0x9a0] sm:$0xff] %v9203_v14  ;;  %v9205_v26 = vpop.f32.mrb[103].mxu0  ;;  %10441 = vmatpush1.bf16.msra.mxu0 %v14418_v29  ;;  %13438 = vst [vmem:[#allocation7 + $0x9b0] sm:$0xff] %v9975_v1  ;;  %v9977_v59 = vpop.f32.mrb[103].mxu1  ;;  %11213 = vmatpush1.bf16.msra.mxu1 %v14420_v6  ;;  %v845_v29 = vld [vmem:[#allocation5 + $0x1528] sm:$0xff]  ;;  %v14467_v54 = vcombine.high %v844_v38, %v852_v8  ;;  %v860_v14 = vld [vmem:[#allocation5 + $0x15a0] sm:$0xff]  ;;  %v14466_v13 = vcombine.low %v844_v38, %v852_v8 }
 0x50a   :  { %13437 = vst [vmem:[#allocation7 + $0x9a8] sm:$0xff] %v9205_v26  ;;  %10442 = vmatprep.subr.bf16.mxu0 %v14435_v55  ;;  %13439 = vst [vmem:[#allocation7 + $0x9b8] sm:$0xff] %v9977_v59  ;;  %11214 = vmatprep.subr.bf16.mxu1 %v14437_v21  ;;  %v14469_v3 = vcombine.high %v845_v29, %v853_v15  ;;  %v868_v1 = vld [vmem:[#allocation5 + $0x15e0] sm:$0xff]  ;;  %v885_v38 = vld [vmem:[#allocation5 + $0x1668] sm:$0xff] }
 0x50b   :  { %10306 = vmatmul.mubr.bf16.gmra.mrb[144].mxu0 %v18662_v10  ;;  %11078 = vmatmul.mubr.bf16.gmra.mrb[144].mxu1 %v18662_v10  ;;  %v861_v10 = vld [vmem:[#allocation5 + $0x15a8] sm:$0xff]  ;;  %v14482_v8 = vcombine.low %v860_v14, %v868_v1 }
 0x50c   :  { %10315 = vmatprep.mubr.bf16.mxu0 %v18663_v45  ;;  %11087 = vmatprep.mubr.bf16.mxu1 %v18663_v45  ;;  %v869_v45 = vld [vmem:[#allocation5 + $0x15e8] sm:$0xff] }
 0x50d   :  { %10443 = vmatpush1.bf16.msra.mxu0 %v14434_v23  ;;  %11215 = vmatpush1.bf16.msra.mxu1 %v14436_v57  ;;  %v14468_v23 = vcombine.low %v845_v29, %v853_v15  ;;  %v14483_v57 = vcombine.high %v860_v14, %v868_v1  ;;  %v14484_v29 = vcombine.low %v861_v10, %v869_v45 }
 0x50e   :  { %v9209_v6 = vpop.f32.mrb[104].mxu0  ;;  %10444 = vmatprep.subr.bf16.mxu0 %v14451_v4  ;;  %v9981_v55 = vpop.f32.mrb[104].mxu1  ;;  %11216 = vmatprep.subr.bf16.mxu1 %v14453_v39  ;;  %v18664_v4 = vld [vmem:[#allocation29_spill] sm:$0xff]  ;;  %v14485_v39 = vcombine.high %v861_v10, %v869_v45 }
 0x50f   :  { %13452 = vst [vmem:[#allocation7 + $0xa20] sm:$0xff] %v9209_v6  ;;  %v9211_v21 = vpop.f32.mrb[105].mxu0  ;;  %13454 = vst [vmem:[#allocation7 + $0xa30] sm:$0xff] %v9981_v55  ;;  %v9983_v26 = vpop.f32.mrb[105].mxu1  ;;  %v876_v6 = vld [vmem:[#allocation5 + $0x1620] sm:$0xff] }
 0x510   :  { %13453 = vst [vmem:[#allocation7 + $0xa28] sm:$0xff] %v9211_v21  ;;  %v9213_v59 = vpop.f32.mrb[106].mxu0  ;;  %13455 = vst [vmem:[#allocation7 + $0xa38] sm:$0xff] %v9983_v26  ;;  %v9985_v36 = vpop.f32.mrb[106].mxu1  ;;  %v884_v55 = vld [vmem:[#allocation5 + $0x1660] sm:$0xff]  ;;  %v18665_v21 = vld [vmem:[#allocation30_spill] sm:$0xff] }
 0x511   :  { %13468 = vst [vmem:[#allocation7 + $0xaa0] sm:$0xff] %v9213_v59  ;;  %v9215_v49 = vpop.f32.mrb[107].mxu0  ;;  %10445 = vmatpush1.bf16.msra.mxu0 %v14450_v43  ;;  %13470 = vst [vmem:[#allocation7 + $0xab0] sm:$0xff] %v9985_v36  ;;  %v9987_v27 = vpop.f32.mrb[107].mxu1  ;;  %11217 = vmatpush1.bf16.msra.mxu1 %v14452_v16  ;;  %v877_v43 = vld [vmem:[#allocation5 + $0x1628] sm:$0xff]  ;;  %v14499_v15 = vcombine.high %v876_v6, %v884_v55  ;;  %v892_v59 = vld [vmem:[#allocation5 + $0x16a0] sm:$0xff]  ;;  %v14498_v10 = vcombine.low %v876_v6, %v884_v55 }
 0x512   :  { %13469 = vst [vmem:[#allocation7 + $0xaa8] sm:$0xff] %v9215_v49  ;;  %10446 = vmatprep.subr.bf16.mxu0 %v14467_v54  ;;  %13471 = vst [vmem:[#allocation7 + $0xab8] sm:$0xff] %v9987_v27  ;;  %11218 = vmatprep.subr.bf16.mxu1 %v14469_v3  ;;  %v14501_v26 = vcombine.high %v877_v43, %v885_v38  ;;  %v900_v36 = vld [vmem:[#allocation5 + $0x16e0] sm:$0xff]  ;;  %v917_v6 = vld [vmem:[#allocation5 + $0x1768] sm:$0xff] }
 0x513   :  { %10316 = vmatmul.mubr.bf16.gmra.mrb[148].mxu0 %v18664_v4  ;;  %11088 = vmatmul.mubr.bf16.gmra.mrb[148].mxu1 %v18664_v4  ;;  %v893_v4 = vld [vmem:[#allocation5 + $0x16a8] sm:$0xff]  ;;  %v14514_v55 = vcombine.low %v892_v59, %v900_v36 }
 0x514   :  { %10325 = vmatprep.mubr.bf16.mxu0 %v18665_v21  ;;  %11097 = vmatprep.mubr.bf16.mxu1 %v18665_v21  ;;  %v901_v21 = vld [vmem:[#allocation5 + $0x16e8] sm:$0xff] }
 0x515   :  { %10447 = vmatpush1.bf16.msra.mxu0 %v14466_v13  ;;  %11219 = vmatpush1.bf16.msra.mxu1 %v14468_v23  ;;  %v14500_v13 = vcombine.low %v877_v43, %v885_v38  ;;  %v14515_v23 = vcombine.high %v892_v59, %v900_v36  ;;  %v14516_v43 = vcombine.low %v893_v4, %v901_v21 }
 0x516   :  { %v9219_v16 = vpop.f32.mrb[108].mxu0  ;;  %10448 = vmatprep.subr.bf16.mxu0 %v14483_v57  ;;  %v9991_v54 = vpop.f32.mrb[108].mxu1  ;;  %11220 = vmatprep.subr.bf16.mxu1 %v14485_v39  ;;  %v18666_v57 = vld [vmem:[#allocation31_spill] sm:$0xff]  ;;  %v14517_v39 = vcombine.high %v893_v4, %v901_v21 }
 0x517   :  { %13484 = vst [vmem:[#allocation7 + $0xb20] sm:$0xff] %v9219_v16  ;;  %v9221_v3 = vpop.f32.mrb[109].mxu0  ;;  %13486 = vst [vmem:[#allocation7 + $0xb30] sm:$0xff] %v9991_v54  ;;  %v9993_v49 = vpop.f32.mrb[109].mxu1  ;;  %v908_v16 = vld [vmem:[#allocation5 + $0x1720] sm:$0xff] }
 0x518   :  { %13485 = vst [vmem:[#allocation7 + $0xb28] sm:$0xff] %v9221_v3  ;;  %v9223_v27 = vpop.f32.mrb[110].mxu0  ;;  %13487 = vst [vmem:[#allocation7 + $0xb38] sm:$0xff] %v9993_v49  ;;  %v9995_v14 = vpop.f32.mrb[110].mxu1  ;;  %v916_v54 = vld [vmem:[#allocation5 + $0x1760] sm:$0xff]  ;;  %v18667_v3 = vld [vmem:[#allocation32_spill] sm:$0xff] }
 0x519   :  { %13500 = vst [vmem:[#allocation7 + $0xba0] sm:$0xff] %v9223_v27  ;;  %v9225_v1 = vpop.f32.mrb[111].mxu0  ;;  %10449 = vmatpush1.bf16.msra.mxu0 %v14482_v8  ;;  %13502 = vst [vmem:[#allocation7 + $0xbb0] sm:$0xff] %v9995_v14  ;;  %v9997_v45 = vpop.f32.mrb[111].mxu1  ;;  %11221 = vmatpush1.bf16.msra.mxu1 %v14484_v29  ;;  %v909_v8 = vld [vmem:[#allocation5 + $0x1728] sm:$0xff]  ;;  %v14531_v38 = vcombine.high %v908_v16, %v916_v54  ;;  %v924_v27 = vld [vmem:[#allocation5 + $0x17a0] sm:$0xff]  ;;  %v14530_v4 = vcombine.low %v908_v16, %v916_v54 }
 0x51a   :  { %13501 = vst [vmem:[#allocation7 + $0xba8] sm:$0xff] %v9225_v1  ;;  %10450 = vmatprep.subr.bf16.mxu0 %v14499_v15  ;;  %13503 = vst [vmem:[#allocation7 + $0xbb8] sm:$0xff] %v9997_v45  ;;  %11222 = vmatprep.subr.bf16.mxu1 %v14501_v26  ;;  %v14533_v49 = vcombine.high %v909_v8, %v917_v6  ;;  %v932_v14 = vld [vmem:[#allocation5 + $0x17e0] sm:$0xff] }
 0x51b   :  { %10326 = vmatmul.mubr.bf16.gmra.mrb[152].mxu0 %v18666_v57  ;;  %11098 = vmatmul.mubr.bf16.gmra.mrb[152].mxu1 %v18666_v57  ;;  %v925_v57 = vld [vmem:[#allocation5 + $0x17a8] sm:$0xff]  ;;  %v14546_v16 = vcombine.low %v924_v27, %v932_v14 }
 0x51c   :  { %10335 = vmatprep.mubr.bf16.mxu0 %v18667_v3  ;;  %11107 = vmatprep.mubr.bf16.mxu1 %v18667_v3  ;;  %v933_v3 = vld [vmem:[#allocation5 + $0x17e8] sm:$0xff] }
 0x51d   :  { %10451 = vmatpush1.bf16.msra.mxu0 %v14498_v10  ;;  %11223 = vmatpush1.bf16.msra.mxu1 %v14500_v13  ;;  %v14532_v10 = vcombine.low %v909_v8, %v917_v6  ;;  %v14547_v13 = vcombine.high %v924_v27, %v932_v14  ;;  %v14563_v8 = vcombine.high %v17510_v62, %v17512_v12  ;;  %v18671_v14 = vld [vmem:[#allocation36_spill] sm:$0xff] }
 0x51e   :  { %v9229_v29 = vpop.f32.mrb[112].mxu0  ;;  %10452 = vmatprep.subr.bf16.mxu0 %v14515_v23  ;;  %v10001_v15 = vpop.f32.mrb[112].mxu1  ;;  %11224 = vmatprep.subr.bf16.mxu1 %v14517_v39  ;;  %v18668_v23 = vld [vmem:[#allocation33_spill] sm:$0xff]  ;;  %v14549_v39 = vcombine.high %v925_v57, %v933_v3 }
 0x51f   :  { %13516 = vst [vmem:[#allocation7 + $0xc20] sm:$0xff] %v9229_v29  ;;  %v9231_v26 = vpop.f32.mrb[113].mxu0  ;;  %13518 = vst [vmem:[#allocation7 + $0xc30] sm:$0xff] %v10001_v15  ;;  %v10003_v1 = vpop.f32.mrb[113].mxu1  ;;  %v18669_v29 = vld [vmem:[#allocation34_spill] sm:$0xff] }
 0x520   :  { %13517 = vst [vmem:[#allocation7 + $0xc28] sm:$0xff] %v9231_v26  ;;  %v9233_v45 = vpop.f32.mrb[114].mxu0  ;;  %13519 = vst [vmem:[#allocation7 + $0xc38] sm:$0xff] %v10003_v1  ;;  %v10005_v59 = vpop.f32.mrb[114].mxu1 }
 0x521   :  { %13532 = vst [vmem:[#allocation7 + $0xca0] sm:$0xff] %v9233_v45  ;;  %v9235_v36 = vpop.f32.mrb[115].mxu0  ;;  %10453 = vmatpush1.bf16.msra.mxu0 %v14514_v55  ;;  %13534 = vst [vmem:[#allocation7 + $0xcb0] sm:$0xff] %v10005_v59  ;;  %v10007_v21 = vpop.f32.mrb[115].mxu1  ;;  %11225 = vmatpush1.bf16.msra.mxu1 %v14516_v43  ;;  %v14548_v55 = vcombine.low %v925_v57, %v933_v3  ;;  %v18670_v3 = vld [vmem:[#allocation35_spill] sm:$0xff] }
 0x522   :  { %13533 = vst [vmem:[#allocation7 + $0xca8] sm:$0xff] %v9235_v36  ;;  %10454 = vmatprep.subr.bf16.mxu0 %v14531_v38  ;;  %13535 = vst [vmem:[#allocation7 + $0xcb8] sm:$0xff] %v10007_v21  ;;  %11226 = vmatprep.subr.bf16.mxu1 %v14533_v49  ;;  %v14565_v38 = vcombine.high %v17520_v30, %v17522_v28 }
 0x523   :  { %10336 = vmatmul.mubr.bf16.gmra.mrb[156].mxu0 %v18668_v23  ;;  %11108 = vmatmul.mubr.bf16.gmra.mrb[156].mxu1 %v18668_v23  ;;  %v18692_v23 = vld [vmem:[#allocation55_spill] sm:$0xff] }
 0x524   :  { %10345 = vmatprep.mubr.bf16.mxu0 %v18669_v29  ;;  %11117 = vmatprep.mubr.bf16.mxu1 %v18669_v29 }
 0x525   :  { %10455 = vmatpush1.bf16.msra.mxu0 %v14530_v4  ;;  %11227 = vmatpush1.bf16.msra.mxu1 %v14532_v10 }
 0x526   :  { %v9239_v54 = vpop.f32.mrb[116].mxu0  ;;  %10456 = vmatprep.subr.bf16.mxu0 %v14547_v13  ;;  %v10011_v6 = vpop.f32.mrb[116].mxu1  ;;  %11228 = vmatprep.subr.bf16.mxu1 %v14549_v39  ;;  %v18672_v39 = vld [vmem:[#allocation37_spill] sm:$0xff] }
 0x527   :  { %13548 = vst [vmem:[#allocation7 + $0xd20] sm:$0xff] %v9239_v54  ;;  %v9241_v43 = vpop.f32.mrb[117].mxu0  ;;  %13550 = vst [vmem:[#allocation7 + $0xd30] sm:$0xff] %v10011_v6  ;;  %v10013_v15 = vpop.f32.mrb[117].mxu1 }
 0x528   :  { %13549 = vst [vmem:[#allocation7 + $0xd28] sm:$0xff] %v9241_v43  ;;  %v9243_v26 = vpop.f32.mrb[118].mxu0  ;;  %13551 = vst [vmem:[#allocation7 + $0xd38] sm:$0xff] %v10013_v15  ;;  %v10015_v49 = vpop.f32.mrb[118].mxu1 }
 0x529   :  { %13564 = vst [vmem:[#allocation7 + $0xda0] sm:$0xff] %v9243_v26  ;;  %v9245_v27 = vpop.f32.mrb[119].mxu0  ;;  %10457 = vmatpush1.bf16.msra.mxu0 %v14546_v16  ;;  %13566 = vst [vmem:[#allocation7 + $0xdb0] sm:$0xff] %v10015_v49  ;;  %v10017_v57 = vpop.f32.mrb[119].mxu1  ;;  %11229 = vmatpush1.bf16.msra.mxu1 %v14548_v55  ;;  %v18673_v16 = vld [vmem:[#allocation38_spill] sm:$0xff]  ;;  %v18674_v49 = vld [vmem:[#allocation39_spill] sm:$0xff] }
 0x52a   :  { %13565 = vst [vmem:[#allocation7 + $0xda8] sm:$0xff] %v9245_v27  ;;  %10619 = vmatprep.subr.bf16.mxu0 %v14563_v8  ;;  %13567 = vst [vmem:[#allocation7 + $0xdb8] sm:$0xff] %v10017_v57  ;;  %11391 = vmatprep.subr.bf16.mxu1 %v14565_v38  ;;  %v18675_v27 = vld [vmem:[#allocation40_spill] sm:$0xff]  ;;  %v18676_v57 = vld [vmem:[#allocation41_spill] sm:$0xff] }
 0x52b   :  { %10346 = vmatmul.mubr.bf16.gmra.mrb[160].mxu0 %v18670_v3  ;;  %11118 = vmatmul.mubr.bf16.gmra.mrb[160].mxu1 %v18670_v3 }
 0x52c   :  { %10355 = vmatprep.mubr.bf16.mxu0 %v18671_v14  ;;  %11127 = vmatprep.mubr.bf16.mxu1 %v18671_v14  ;;  %v1013_v14 = vld [vmem:[#allocation5 + $0x1a68] sm:$0xff] }
 0x52e   :  { %v9249_v1 = vpop.f32.mrb[120].mxu0  ;;  %v10021_v45 = vpop.f32.mrb[120].mxu1 }
 0x52f   :  { %13580 = vst [vmem:[#allocation7 + $0xe20] sm:$0xff] %v9249_v1  ;;  %v9251_v59 = vpop.f32.mrb[121].mxu0  ;;  %13582 = vst [vmem:[#allocation7 + $0xe30] sm:$0xff] %v10021_v45  ;;  %v10023_v36 = vpop.f32.mrb[121].mxu1  ;;  %v18677_v1 = vld [vmem:[#allocation42_spill] sm:$0xff]  ;;  %v18678_v45 = vld [vmem:[#allocation43_spill] sm:$0xff] }
 0x530   :  { %13581 = vst [vmem:[#allocation7 + $0xe28] sm:$0xff] %v9251_v59  ;;  %v9253_v4 = vpop.f32.mrb[122].mxu0  ;;  %13583 = vst [vmem:[#allocation7 + $0xe38] sm:$0xff] %v10023_v36  ;;  %v10025_v21 = vpop.f32.mrb[122].mxu1  ;;  %v18679_v59 = vld [vmem:[#allocation44_spill] sm:$0xff]  ;;  %v18680_v36 = vld [vmem:[#allocation45_spill] sm:$0xff] }
 0x531   :  { %13596 = vst [vmem:[#allocation7 + $0xea0] sm:$0xff] %v9253_v4  ;;  %v9255_v10 = vpop.f32.mrb[123].mxu0  ;;  %13598 = vst [vmem:[#allocation7 + $0xeb0] sm:$0xff] %v10025_v21  ;;  %v10027_v13 = vpop.f32.mrb[123].mxu1  ;;  %v18681_v4 = vld [vmem:[#allocation46_spill] sm:$0xff]  ;;  %v18682_v21 = vld [vmem:[#allocation47_spill] sm:$0xff] }
 0x532   :  { %13597 = vst [vmem:[#allocation7 + $0xea8] sm:$0xff] %v9255_v10  ;;  %13599 = vst [vmem:[#allocation7 + $0xeb8] sm:$0xff] %v10027_v13  ;;  %v18683_v10 = vld [vmem:[#allocation48_spill] sm:$0xff]  ;;  %v18684_v13 = vld [vmem:[#allocation49_spill] sm:$0xff] }
 0x533   :  { %10356 = vmatmul.mubr.bf16.gmra.mrb[164].mxu0 %v18672_v39  ;;  %11128 = vmatmul.mubr.bf16.gmra.mrb[164].mxu1 %v18672_v39  ;;  %v1012_v39 = vld [vmem:[#allocation5 + $0x1a60] sm:$0xff] }
 0x534   :  { %10365 = vmatprep.mubr.bf16.mxu0 %v18673_v16  ;;  %11137 = vmatprep.mubr.bf16.mxu1 %v18673_v16 }
 0x536   :  { %v9259_v54 = vpop.f32.mrb[124].mxu0  ;;  %v10031_v55 = vpop.f32.mrb[124].mxu1 }
 0x537   :  { %13612 = vst [vmem:[#allocation7 + $0xf20] sm:$0xff] %v9259_v54  ;;  %v9261_v8 = vpop.f32.mrb[125].mxu0  ;;  %13614 = vst [vmem:[#allocation7 + $0xf30] sm:$0xff] %v10031_v55  ;;  %v10033_v6 = vpop.f32.mrb[125].mxu1  ;;  %v18685_v54 = vld [vmem:[#allocation50_spill] sm:$0xff]  ;;  %v956_v55 = vld [vmem:[#allocation5 + $0x18a0] sm:$0xff] }
 0x538   :  { %13613 = vst [vmem:[#allocation7 + $0xf28] sm:$0xff] %v9261_v8  ;;  %v9263_v43 = vpop.f32.mrb[126].mxu0  ;;  %13615 = vst [vmem:[#allocation7 + $0xf38] sm:$0xff] %v10033_v6  ;;  %v10035_v38 = vpop.f32.mrb[126].mxu1  ;;  %v964_v8 = vld [vmem:[#allocation5 + $0x18e0] sm:$0xff]  ;;  %v957_v6 = vld [vmem:[#allocation5 + $0x18a8] sm:$0xff] }
 0x539   :  { %13628 = vst [vmem:[#allocation7 + $0xfa0] sm:$0xff] %v9263_v43  ;;  %v9265_v15 = vpop.f32.mrb[127].mxu0  ;;  %13630 = vst [vmem:[#allocation7 + $0xfb0] sm:$0xff] %v10035_v38  ;;  %v10037_v26 = vpop.f32.mrb[127].mxu1  ;;  %v965_v43 = vld [vmem:[#allocation5 + $0x18e8] sm:$0xff]  ;;  %v14579_v38 = vcombine.high %v956_v55, %v964_v8 }
 0x53a   :  { %13629 = vst [vmem:[#allocation7 + $0xfa8] sm:$0xff] %v9265_v15  ;;  %13631 = vst [vmem:[#allocation7 + $0xfb8] sm:$0xff] %v10037_v26  ;;  %v972_v15 = vld [vmem:[#allocation5 + $0x1920] sm:$0xff] }
 0x53b   :  { %10366 = vmatmul.mubr.bf16.gmra.mrb[168].mxu0 %v18674_v49  ;;  %11138 = vmatmul.mubr.bf16.gmra.mrb[168].mxu1 %v18674_v49  ;;  %v980_v26 = vld [vmem:[#allocation5 + $0x1960] sm:$0xff]  ;;  %v14580_v49 = vcombine.low %v957_v6, %v965_v43 }
 0x53c   :  { %10375 = vmatprep.mubr.bf16.mxu0 %v18675_v27  ;;  %11147 = vmatprep.mubr.bf16.mxu1 %v18675_v27  ;;  %v18689_v27 = vld [vmem:[#allocation52_spill] sm:$0xff]  ;;  %v14595_v16 = vcombine.high %v972_v15, %v980_v26 }
 0x543   :  { %10376 = vmatmul.mubr.bf16.gmra.mrb[172].mxu0 %v18676_v57  ;;  %11148 = vmatmul.mubr.bf16.gmra.mrb[172].mxu1 %v18676_v57  ;;  %v18688_v57 = vcombine.low %v17520_v30, %v17522_v28  ;;  %v996_v30 = vld [vmem:[#allocation5 + $0x19e0] sm:$0xff]  ;;  %v989_v28 = vld [vmem:[#allocation5 + $0x19a8] sm:$0xff] }
 0x544   :  { %10385 = vmatprep.mubr.bf16.mxu0 %v18677_v1  ;;  %11157 = vmatprep.mubr.bf16.mxu1 %v18677_v1  ;;  %v17604_v1 = vld [vmem:[#allocation5 + $0x38] sm:$0xff] }
 0x54b   :  { %10386 = vmatmul.mubr.bf16.gmra.mrb[176].mxu0 %v18678_v45  ;;  %11158 = vmatmul.mubr.bf16.gmra.mrb[176].mxu1 %v18678_v45  ;;  %v17602_v45 = vld [vmem:[#allocation5 + $0x70] sm:$0xff] }
 0x54c   :  { %10395 = vmatprep.mubr.bf16.mxu0 %v18679_v59  ;;  %11167 = vmatprep.mubr.bf16.mxu1 %v18679_v59  ;;  %v14578_v59 = vcombine.low %v956_v55, %v964_v8  ;;  %v988_v55 = vld [vmem:[#allocation5 + $0x19a0] sm:$0xff]  ;;  %v14594_v8 = vcombine.low %v972_v15, %v980_v26  ;;  %v1021_v26 = vld [vmem:[#allocation5 + $0x1aa8] sm:$0xff] }
 0x54d   :  { %v1028_v15 = vld [vmem:[#allocation5 + $0x1ae0] sm:$0xff] }
 0x553   :  { %10396 = vmatmul.mubr.bf16.gmra.mrb[180].mxu0 %v18680_v36  ;;  %11168 = vmatmul.mubr.bf16.gmra.mrb[180].mxu1 %v18680_v36  ;;  %v973_v36 = vld [vmem:[#allocation5 + $0x1928] sm:$0xff] }
 0x554   :  { %10405 = vmatprep.mubr.bf16.mxu0 %v18681_v4  ;;  %11177 = vmatprep.mubr.bf16.mxu1 %v18681_v4  ;;  %v14581_v4 = vcombine.high %v957_v6, %v965_v43  ;;  %v14611_v43 = vcombine.high %v988_v55, %v996_v30 }
 0x55b   :  { %10406 = vmatmul.mubr.bf16.gmra.mrb[184].mxu0 %v18682_v21  ;;  %11178 = vmatmul.mubr.bf16.gmra.mrb[184].mxu1 %v18682_v21  ;;  %v18686_v21 = vld [vmem:[#allocation51_spill] sm:$0xff] }
 0x55c   :  { %10415 = vmatprep.mubr.bf16.mxu0 %v18683_v10  ;;  %11187 = vmatprep.mubr.bf16.mxu1 %v18683_v10  ;;  %v981_v10 = vld [vmem:[#allocation5 + $0x1968] sm:$0xff] }
 0x55d   :  { %v14596_v6 = vcombine.low %v973_v36, %v981_v10 }
 0x563   :  { %10416 = vmatmul.mubr.bf16.gmra.mrb[188].mxu0 %v18684_v13  ;;  %11188 = vmatmul.mubr.bf16.gmra.mrb[188].mxu1 %v18684_v13  ;;  %v18687_v13 = vcombine.low %v17510_v62, %v17512_v12  ;;  %v17612_v62 = vld [vmem:[#allocation5 + $0x78] sm:$0xff]  ;;  %v14597_v12 = vcombine.high %v973_v36, %v981_v10  ;;  %v1020_v10 = vld [vmem:[#allocation5 + $0x1aa0] sm:$0xff] }
 0x564   :  { %10458 = vmatprep.mubr.bf16.mxu0 %v18685_v54  ;;  %11230 = vmatprep.mubr.bf16.mxu1 %v18685_v54  ;;  %v17600_v54 = vld [vmem:[#allocation5 + $0x30] sm:$0xff]  ;;  %v14643_v29 = vcombine.high %v1020_v10, %v1028_v15 }
 0x56b   :  { %10459 = vmatmul.mubr.bf16.vlgmr.msra.gmra.mrb[128].mxu0 %v18686_v21  ;;  %11231 = vmatmul.mubr.bf16.vlgmr.msra.gmra.mrb[128].mxu1 %v18686_v21  ;;  %v18690_v21 = vld [vmem:[#allocation53_spill] sm:$0xff] }
 0x56c   :  { %10620 = vmatpush1.bf16.msra.mxu0 %v18687_v13  ;;  %11392 = vmatpush1.bf16.msra.mxu1 %v18688_v57  ;;  %v997_v57 = vld [vmem:[#allocation5 + $0x19e8] sm:$0xff]  ;;  %v18691_v13 = vld [vmem:[#allocation54_spill] sm:$0xff] }
 0x56d   :  { %10468 = vmatprep.mubr.bf16.mxu0 %v18689_v27  ;;  %11240 = vmatprep.mubr.bf16.mxu1 %v18689_v27  ;;  %v14613_v27 = vcombine.high %v989_v28, %v997_v57 }
 0x56e   :  { %10621 = vmatprep.subr.bf16.mxu0 %v14579_v38  ;;  %11393 = vmatprep.subr.bf16.mxu1 %v14581_v4  ;;  %v1004_v38 = vld [vmem:[#allocation5 + $0x1a20] sm:$0xff]  ;;  %v1005_v4 = vld [vmem:[#allocation5 + $0x1a28] sm:$0xff] }
 0x56f   :  { %v14629_v36 = vcombine.high %v1005_v4, %v1013_v14  ;;  %v14628_v3 = vcombine.low %v1005_v4, %v1013_v14  ;;  %v1060_v4 = vld [vmem:[#allocation5 + $0x1be0] sm:$0xff] }
 0x570   :  { %10622 = vmatpush1.bf16.msra.mxu0 %v14578_v59  ;;  %11394 = vmatpush1.bf16.msra.mxu1 %v14580_v49  ;;  %v14610_v49 = vcombine.low %v988_v55, %v996_v30  ;;  %v14627_v59 = vcombine.high %v1004_v38, %v1012_v39  ;;  %v1036_v30 = vld [vmem:[#allocation5 + $0x1b20] sm:$0xff] }
 0x571   :  { %10623 = vmatprep.subr.bf16.mxu0 %v14595_v16  ;;  %11395 = vmatprep.subr.bf16.mxu1 %v14597_v12  ;;  %v14612_v16 = vcombine.low %v989_v28, %v997_v57  ;;  %v1029_v12 = vld [vmem:[#allocation5 + $0x1ae8] sm:$0xff] }
 0x572   :  { %v14645_v55 = vcombine.high %v1021_v26, %v1029_v12  ;;  %v1037_v28 = vld [vmem:[#allocation5 + $0x1b28] sm:$0xff]  ;;  %v14644_v14 = vcombine.low %v1021_v26, %v1029_v12 }
 0x573   :  { %10469 = vmatmul.mubr.bf16.gmra.mrb[132].mxu0 %v18690_v21  ;;  %11241 = vmatmul.mubr.bf16.gmra.mrb[132].mxu1 %v18690_v21  ;;  %v14626_v21 = vcombine.low %v1004_v38, %v1012_v39  ;;  %v1045_v57 = vld [vmem:[#allocation5 + $0x1b68] sm:$0xff]  ;;  %v14642_v39 = vcombine.low %v1020_v10, %v1028_v15  ;;  %v1052_v38 = vld [vmem:[#allocation5 + $0x1ba0] sm:$0xff]  ;;  %v18695_v10 = vld [vmem:[#allocation58_spill] sm:$0xff] }
 0x574   :  { %10478 = vmatprep.mubr.bf16.mxu0 %v18691_v13  ;;  %11250 = vmatprep.mubr.bf16.mxu1 %v18691_v13  ;;  %v18694_v13 = vld [vmem:[#allocation57_spill] sm:$0xff]  ;;  %v1069_v15 = vld [vmem:[#allocation5 + $0x1c28] sm:$0xff]  ;;  %v14674_v12 = vcombine.low %v1052_v38, %v1060_v4 }
 0x575   :  { %10624 = vmatpush1.bf16.msra.mxu0 %v14594_v8  ;;  %11396 = vmatpush1.bf16.msra.mxu1 %v14596_v6  ;;  %v1044_v8 = vld [vmem:[#allocation5 + $0x1b60] sm:$0xff]  ;;  %v1077_v26 = vld [vmem:[#allocation5 + $0x1c68] sm:$0xff] }
 0x576   :  { %10625 = vmatprep.subr.bf16.mxu0 %v14611_v43  ;;  %11397 = vmatprep.subr.bf16.mxu1 %v14613_v27  ;;  %v18693_v27 = vld [vmem:[#allocation56_spill] sm:$0xff]  ;;  %v14659_v6 = vcombine.high %v1036_v30, %v1044_v8  ;;  %v14661_v43 = vcombine.high %v1037_v28, %v1045_v57 }
 0x579   :  { %10626 = vmatpush1.bf16.msra.mxu0 %v14610_v49  ;;  %11398 = vmatpush1.bf16.msra.mxu1 %v14612_v16  ;;  %v1053_v49 = vld [vmem:[#allocation5 + $0x1ba8] sm:$0xff] }
 0x57a   :  { %10627 = vmatprep.subr.bf16.mxu0 %v14627_v59  ;;  %11399 = vmatprep.subr.bf16.mxu1 %v14629_v36  ;;  %v1061_v16 = vld [vmem:[#allocation5 + $0x1be8] sm:$0xff]  ;;  %v14658_v59 = vcombine.low %v1036_v30, %v1044_v8  ;;  %v14660_v36 = vcombine.low %v1037_v28, %v1045_v57  ;;  %v14693_v8 = vcombine.high %v1069_v15, %v1077_v26  ;;  %v1084_v28 = vld [vmem:[#allocation5 + $0x1ca0] sm:$0xff] }
 0x57b   :  { %10479 = vmatmul.mubr.bf16.gmra.mrb[136].mxu0 %v18692_v23  ;;  %11251 = vmatmul.mubr.bf16.gmra.mrb[136].mxu1 %v18692_v23  ;;  %v14675_v23 = vcombine.high %v1052_v38, %v1060_v4  ;;  %v1092_v57 = vld [vmem:[#allocation5 + $0x1ce0] sm:$0xff] }
 0x57c   :  { %10488 = vmatprep.mubr.bf16.mxu0 %v18693_v27  ;;  %11260 = vmatprep.mubr.bf16.mxu1 %v18693_v27  ;;  %v18696_v27 = vld [vmem:[#allocation59_spill] sm:$0xff] }
 0x57d   :  { %10628 = vmatpush1.bf16.msra.mxu0 %v14626_v21  ;;  %11400 = vmatpush1.bf16.msra.mxu1 %v14628_v3  ;;  %v14677_v21 = vcombine.high %v1053_v49, %v1061_v16  ;;  %v1068_v3 = vld [vmem:[#allocation5 + $0x1c20] sm:$0xff] }
 0x57e   :  { %10629 = vmatprep.subr.bf16.mxu0 %v14643_v29  ;;  %11401 = vmatprep.subr.bf16.mxu1 %v14645_v55  ;;  %v1076_v29 = vld [vmem:[#allocation5 + $0x1c60] sm:$0xff]  ;;  %v14676_v55 = vcombine.low %v1053_v49, %v1061_v16  ;;  %v18697_v49 = vld [vmem:[#allocation60_spill] sm:$0xff] }
 0x57f   :  { %v14691_v30 = vcombine.high %v1068_v3, %v1076_v29  ;;  %v1100_v4 = vld [vmem:[#allocation5 + $0x1d20] sm:$0xff]  ;;  %v1101_v16 = vld [vmem:[#allocation5 + $0x1d28] sm:$0xff] }
 0x581   :  { %10630 = vmatpush1.bf16.msra.mxu0 %v14642_v39  ;;  %11402 = vmatpush1.bf16.msra.mxu1 %v14644_v14  ;;  %v1085_v39 = vld [vmem:[#allocation5 + $0x1ca8] sm:$0xff] }
 0x582   :  { %10631 = vmatprep.subr.bf16.mxu0 %v14659_v6  ;;  %11403 = vmatprep.subr.bf16.mxu1 %v14661_v43  ;;  %v1093_v14 = vld [vmem:[#allocation5 + $0x1ce8] sm:$0xff]  ;;  %v14690_v6 = vcombine.low %v1068_v3, %v1076_v29  ;;  %v14692_v43 = vcombine.low %v1069_v15, %v1077_v26  ;;  %v1116_v15 = vld [vmem:[#allocation5 + $0x1da0] sm:$0xff] }
 0x583   :  { %10489 = vmatmul.mubr.bf16.gmra.mrb[140].mxu0 %v18694_v13  ;;  %11261 = vmatmul.mubr.bf16.gmra.mrb[140].mxu1 %v18694_v13  ;;  %v14707_v13 = vcombine.high %v1084_v28, %v1092_v57  ;;  %v14709_v38 = vcombine.high %v1085_v39, %v1093_v14  ;;  %v1124_v26 = vld [vmem:[#allocation5 + $0x1de0] sm:$0xff] }
 0x584   :  { %10498 = vmatprep.mubr.bf16.mxu0 %v18695_v10  ;;  %11270 = vmatprep.mubr.bf16.mxu1 %v18695_v10  ;;  %v18698_v10 = vld [vmem:[#allocation61_spill] sm:$0xff] }
 0x585   :  { %10632 = vmatpush1.bf16.msra.mxu0 %v14658_v59  ;;  %11404 = vmatpush1.bf16.msra.mxu1 %v14660_v36  ;;  %v1109_v59 = vld [vmem:[#allocation5 + $0x1d68] sm:$0xff]  ;;  %v14706_v36 = vcombine.low %v1084_v28, %v1092_v57  ;;  %v1132_v57 = vld [vmem:[#allocation5 + $0x1e20] sm:$0xff] }
 0x586   :  { %10633 = vmatprep.subr.bf16.mxu0 %v14675_v23  ;;  %11405 = vmatprep.subr.bf16.mxu1 %v14677_v21  ;;  %v1108_v23 = vld [vmem:[#allocation5 + $0x1d60] sm:$0xff]  ;;  %v14708_v21 = vcombine.low %v1085_v39, %v1093_v14  ;;  %v14725_v29 = vcombine.high %v1101_v16, %v1109_v59  ;;  %v18699_v39 = vld [vmem:[#allocation62_spill] sm:$0xff]  ;;  %v1133_v14 = vld [vmem:[#allocation5 + $0x1e28] sm:$0xff] }
 0x587   :  { %v14723_v3 = vcombine.high %v1100_v4, %v1108_v23 }
 0x589   :  { %10634 = vmatpush1.bf16.msra.mxu0 %v14674_v12  ;;  %11406 = vmatpush1.bf16.msra.mxu1 %v14676_v55  ;;  %v1117_v12 = vld [vmem:[#allocation5 + $0x1da8] sm:$0xff] }
 0x58a   :  { %10635 = vmatprep.subr.bf16.mxu0 %v14691_v30  ;;  %11407 = vmatprep.subr.bf16.mxu1 %v14693_v8  ;;  %v1125_v55 = vld [vmem:[#allocation5 + $0x1de8] sm:$0xff]  ;;  %v14722_v30 = vcombine.low %v1100_v4, %v1108_v23  ;;  %v14724_v8 = vcombine.low %v1101_v16, %v1109_v59  ;;  %v1148_v16 = vld [vmem:[#allocation5 + $0x1ea0] sm:$0xff] }
 0x58b   :  { %10499 = vmatmul.mubr.bf16.gmra.mrb[144].mxu0 %v18696_v27  ;;  %11271 = vmatmul.mubr.bf16.gmra.mrb[144].mxu1 %v18696_v27  ;;  %v14739_v27 = vcombine.high %v1116_v15, %v1124_v26  ;;  %v14741_v28 = vcombine.high %v1117_v12, %v1125_v55  ;;  %v1156_v59 = vld [vmem:[#allocation5 + $0x1ee0] sm:$0xff] }
 0x58c   :  { %10508 = vmatprep.mubr.bf16.mxu0 %v18697_v49  ;;  %11280 = vmatprep.mubr.bf16.mxu1 %v18697_v49  ;;  %v18700_v49 = vld [vmem:[#allocation63_spill] sm:$0xff] }
 0x58d   :  { %10636 = vmatpush1.bf16.msra.mxu0 %v14690_v6  ;;  %11408 = vmatpush1.bf16.msra.mxu1 %v14692_v43  ;;  %v1141_v6 = vld [vmem:[#allocation5 + $0x1e68] sm:$0xff]  ;;  %v14738_v43 = vcombine.low %v1116_v15, %v1124_v26  ;;  %v1164_v26 = vld [vmem:[#allocation5 + $0x1f20] sm:$0xff] }
 0x58e   :  { %10637 = vmatprep.subr.bf16.mxu0 %v14707_v13  ;;  %11409 = vmatprep.subr.bf16.mxu1 %v14709_v38  ;;  %v1140_v13 = vld [vmem:[#allocation5 + $0x1e60] sm:$0xff]  ;;  %v14740_v38 = vcombine.low %v1117_v12, %v1125_v55  ;;  %v14757_v23 = vcombine.high %v1133_v14, %v1141_v6  ;;  %v18701_v12 = vld [vmem:[#allocation64_spill] sm:$0xff] }
 0x58f   :  { %v14755_v4 = vcombine.high %v1132_v57, %v1140_v13  ;;  %v1165_v55 = vld [vmem:[#allocation5 + $0x1f28] sm:$0xff] }
 0x591   :  { %10638 = vmatpush1.bf16.msra.mxu0 %v14706_v36  ;;  %11410 = vmatpush1.bf16.msra.mxu1 %v14708_v21  ;;  %v1149_v36 = vld [vmem:[#allocation5 + $0x1ea8] sm:$0xff] }
 0x592   :  { %10639 = vmatprep.subr.bf16.mxu0 %v14723_v3  ;;  %11411 = vmatprep.subr.bf16.mxu1 %v14725_v29  ;;  %v1157_v21 = vld [vmem:[#allocation5 + $0x1ee8] sm:$0xff]  ;;  %v14754_v3 = vcombine.low %v1132_v57, %v1140_v13  ;;  %v14756_v29 = vcombine.low %v1133_v14, %v1141_v6  ;;  %v1180_v14 = vld [vmem:[#allocation5 + $0x1fa0] sm:$0xff] }
 0x593   :  { %10509 = vmatmul.mubr.bf16.gmra.mrb[148].mxu0 %v18698_v10  ;;  %11281 = vmatmul.mubr.bf16.gmra.mrb[148].mxu1 %v18698_v10  ;;  %v14771_v10 = vcombine.high %v1148_v16, %v1156_v59  ;;  %v14773_v15 = vcombine.high %v1149_v36, %v1157_v21  ;;  %v1188_v6 = vld [vmem:[#allocation5 + $0x1fe0] sm:$0xff] }
 0x594   :  { %10518 = vmatprep.mubr.bf16.mxu0 %v18699_v39  ;;  %11290 = vmatprep.mubr.bf16.mxu1 %v18699_v39  ;;  %v18702_v39 = vld [vmem:[#allocation65_spill] sm:$0xff] }
 0x595   :  { %10640 = vmatpush1.bf16.msra.mxu0 %v14722_v30  ;;  %11412 = vmatpush1.bf16.msra.mxu1 %v14724_v8  ;;  %v1173_v30 = vld [vmem:[#allocation5 + $0x1f68] sm:$0xff]  ;;  %v14770_v8 = vcombine.low %v1148_v16, %v1156_v59  ;;  %v14802_v59 = vcombine.low %v1180_v14, %v1188_v6 }
 0x596   :  { %10641 = vmatprep.subr.bf16.mxu0 %v14739_v27  ;;  %11413 = vmatprep.subr.bf16.mxu1 %v14741_v28  ;;  %v1172_v27 = vld [vmem:[#allocation5 + $0x1f60] sm:$0xff]  ;;  %v14772_v28 = vcombine.low %v1149_v36, %v1157_v21  ;;  %v14789_v13 = vcombine.high %v1165_v55, %v1173_v30  ;;  %v13799_v21 = vcombine.high %v17600_v54, %v17602_v45 }
 0x597   :  { %v14787_v57 = vcombine.high %v1164_v26, %v1172_v27 }
 0x599   :  { %10642 = vmatpush1.bf16.msra.mxu0 %v14738_v43  ;;  %11414 = vmatpush1.bf16.msra.mxu1 %v14740_v38  ;;  %v1181_v43 = vld [vmem:[#allocation5 + $0x1fa8] sm:$0xff] }
 0x59a   :  { %10643 = vmatprep.subr.bf16.mxu0 %v14755_v4  ;;  %11415 = vmatprep.subr.bf16.mxu1 %v14757_v23  ;;  %v1189_v38 = vld [vmem:[#allocation5 + $0x1fe8] sm:$0xff]  ;;  %v14786_v4 = vcombine.low %v1164_v26, %v1172_v27  ;;  %v14788_v23 = vcombine.low %v1165_v55, %v1173_v30  ;;  %v18707_v26 = vld [vmem:[#allocation70_spill] sm:$0xff]  ;;  %v18708_v27 = vld [vmem:[#allocation71_spill] sm:$0xff] }
 0x59b   :  { %10519 = vmatmul.mubr.bf16.gmra.mrb[152].mxu0 %v18700_v49  ;;  %11291 = vmatmul.mubr.bf16.gmra.mrb[152].mxu1 %v18700_v49  ;;  %v14803_v49 = vcombine.high %v1180_v14, %v1188_v6  ;;  %v14805_v16 = vcombine.high %v1181_v43, %v1189_v38  ;;  %v14804_v36 = vcombine.low %v1181_v43, %v1189_v38  ;;  %v18709_v55 = vld [vmem:[#allocation72_spill] sm:$0xff]  ;;  %v18710_v30 = vld [vmem:[#allocation73_spill] sm:$0xff]  ;;  %v18715_v14 = vld [vmem:[#allocation78_spill] sm:$0xff] }
 0x59c   :  { %10528 = vmatprep.mubr.bf16.mxu0 %v18701_v12  ;;  %11300 = vmatprep.mubr.bf16.mxu1 %v18701_v12  ;;  %v18716_v6 = vld [vmem:[#allocation79_spill] sm:$0xff]  ;;  %v18717_v43 = vld [vmem:[#allocation80_spill] sm:$0xff]  ;;  %v18718_v38 = vld [vmem:[#allocation81_spill] sm:$0xff] }
 0x59d   :  { %10644 = vmatpush1.bf16.msra.mxu0 %v14754_v3  ;;  %11416 = vmatpush1.bf16.msra.mxu1 %v14756_v29  ;;  %v13801_v3 = vcombine.high %v17604_v1, %v17612_v62  ;;  %v18704_v29 = vld [vmem:[#allocation67_spill] sm:$0xff] }
 0x59e   :  { %10645 = vmatprep.subr.bf16.mxu0 %v14771_v10  ;;  %11417 = vmatprep.subr.bf16.mxu1 %v14773_v15  ;;  %v18703_v10 = vld [vmem:[#allocation66_spill] sm:$0xff]  ;;  %v18705_v15 = vld [vmem:[#allocation68_spill] sm:$0xff]  ;;  %v18726_v12 = vld [vmem:[#allocation87_spill] sm:$0xff] }
 0x5a1   :  { %10646 = vmatpush1.bf16.msra.mxu0 %v14770_v8  ;;  %11418 = vmatpush1.bf16.msra.mxu1 %v14772_v28  ;;  %v18711_v8 = vld [vmem:[#allocation74_spill] sm:$0xff]  ;;  %v18712_v28 = vld [vmem:[#allocation75_spill] sm:$0xff] }
 0x5a2   :  { %10647 = vmatprep.subr.bf16.mxu0 %v14787_v57  ;;  %11419 = vmatprep.subr.bf16.mxu1 %v14789_v13  ;;  %v18713_v57 = vld [vmem:[#allocation76_spill] sm:$0xff]  ;;  %v18714_v13 = vld [vmem:[#allocation77_spill] sm:$0xff] }
 0x5a3   :  { %10529 = vmatmul.mubr.bf16.gmra.mrb[156].mxu0 %v18702_v39  ;;  %11301 = vmatmul.mubr.bf16.gmra.mrb[156].mxu1 %v18702_v39 }
 0x5a4   :  { %10538 = vmatprep.mubr.bf16.mxu0 %v18703_v10  ;;  %11310 = vmatprep.mubr.bf16.mxu1 %v18703_v10 }
 0x5a5   :  { %10648 = vmatpush1.bf16.msra.mxu0 %v14786_v4  ;;  %11420 = vmatpush1.bf16.msra.mxu1 %v14788_v23  ;;  %v18719_v4 = vld [vmem:[#allocation82_spill] sm:$0xff]  ;;  %v190_v23 = vld [vmem:[#allocation5 + $0xb0] sm:$0xff] }
 0x5a6   :  { %10649 = vmatprep.subr.bf16.mxu0 %v14803_v49  ;;  %11421 = vmatprep.subr.bf16.mxu1 %v14805_v16  ;;  %v18706_v49 = vld [vmem:[#allocation69_spill] sm:$0xff] }
 0x5a7   :  { %v198_v16 = vld [vmem:[#allocation5 + $0xf0] sm:$0xff] }
 0x5a9   :  { %10650 = vmatpush1.bf16.msra.mxu0 %v14802_v59  ;;  %11422 = vmatpush1.bf16.msra.mxu1 %v14804_v36  ;;  %v191_v59 = vld [vmem:[#allocation5 + $0xb8] sm:$0xff] }
 0x5aa   :  { %11584 = vmatprep.subr.bf16.mxu0 %v13799_v21  ;;  %12356 = vmatprep.subr.bf16.mxu1 %v13801_v3  ;;  %v199_v36 = vld [vmem:[#allocation5 + $0xf8] sm:$0xff]  ;;  %v13815_v21 = vcombine.high %v190_v23, %v198_v16  ;;  %v206_v3 = vld [vmem:[#allocation5 + $0x130] sm:$0xff] }
 0x5ab   :  { %10539 = vmatmul.mubr.bf16.gmra.mrb[160].mxu0 %v18704_v29  ;;  %11311 = vmatmul.mubr.bf16.gmra.mrb[160].mxu1 %v18704_v29  ;;  %v246_v29 = vld [vmem:[#allocation5 + $0x270] sm:$0xff] }
 0x5ac   :  { %10548 = vmatprep.mubr.bf16.mxu0 %v18705_v15  ;;  %11320 = vmatprep.mubr.bf16.mxu1 %v18705_v15  ;;  %v13816_v15 = vcombine.low %v191_v59, %v199_v36 }
 0x5b3   :  { %10549 = vmatmul.mubr.bf16.gmra.mrb[164].mxu0 %v18706_v49  ;;  %11321 = vmatmul.mubr.bf16.gmra.mrb[164].mxu1 %v18706_v49  ;;  %v18723_v49 = vld [vmem:[#allocation84_spill] sm:$0xff] }
 0x5b4   :  { %10558 = vmatprep.mubr.bf16.mxu0 %v18707_v26  ;;  %11330 = vmatprep.mubr.bf16.mxu1 %v18707_v26  ;;  %v18722_v26 = vcombine.low %v17604_v1, %v17612_v62 }
 0x5bb   :  { %10559 = vmatmul.mubr.bf16.gmra.mrb[168].mxu0 %v18708_v27  ;;  %11331 = vmatmul.mubr.bf16.gmra.mrb[168].mxu1 %v18708_v27  ;;  %v17694_v27 = vld [vmem:[#allocation5 + $0x878] sm:$0xff] }
 0x5bc   :  { %10568 = vmatprep.mubr.bf16.mxu0 %v18709_v55  ;;  %11340 = vmatprep.mubr.bf16.mxu1 %v18709_v55  ;;  %v17692_v55 = vld [vmem:[#allocation5 + $0x838] sm:$0xff] }
 0x5c3   :  { %10569 = vmatmul.mubr.bf16.gmra.mrb[172].mxu0 %v18710_v30  ;;  %11341 = vmatmul.mubr.bf16.gmra.mrb[172].mxu1 %v18710_v30  ;;  %v231_v30 = vld [vmem:[#allocation5 + $0x1f8] sm:$0xff] }
 0x5c4   :  { %10578 = vmatprep.mubr.bf16.mxu0 %v18711_v8  ;;  %11350 = vmatprep.mubr.bf16.mxu1 %v18711_v8  ;;  %v17684_v8 = vld [vmem:[#allocation5 + $0x870] sm:$0xff] }
 0x5cb   :  { %10579 = vmatmul.mubr.bf16.gmra.mrb[176].mxu0 %v18712_v28  ;;  %11351 = vmatmul.mubr.bf16.gmra.mrb[176].mxu1 %v18712_v28  ;;  %v17682_v28 = vld [vmem:[#allocation5 + $0x830] sm:$0xff] }
 0x5cc   :  { %10588 = vmatprep.mubr.bf16.mxu0 %v18713_v57  ;;  %11360 = vmatprep.mubr.bf16.mxu1 %v18713_v57  ;;  %v13817_v57 = vcombine.high %v191_v59, %v199_v36  ;;  %v18724_v59 = vld [vmem:[#allocation85_spill] sm:$0xff] }
 0x5d3   :  { %10589 = vmatmul.mubr.bf16.gmra.mrb[180].mxu0 %v18714_v13  ;;  %11361 = vmatmul.mubr.bf16.gmra.mrb[180].mxu1 %v18714_v13  ;;  %v18720_v13 = vld [vmem:[#allocation83_spill] sm:$0xff] }
 0x5d4   :  { %10598 = vmatprep.mubr.bf16.mxu0 %v18715_v14  ;;  %11370 = vmatprep.mubr.bf16.mxu1 %v18715_v14  ;;  %v214_v14 = vld [vmem:[#allocation5 + $0x170] sm:$0xff] }
 0x5d5   :  { %v13830_v1 = vcombine.low %v206_v3, %v214_v14 }
 0x5db   :  { %10599 = vmatmul.mubr.bf16.gmra.mrb[184].mxu0 %v18716_v6  ;;  %11371 = vmatmul.mubr.bf16.gmra.mrb[184].mxu1 %v18716_v6  ;;  %v207_v6 = vld [vmem:[#allocation5 + $0x138] sm:$0xff] }
 0x5dc   :  { %10608 = vmatprep.mubr.bf16.mxu0 %v18717_v43  ;;  %11380 = vmatprep.mubr.bf16.mxu1 %v18717_v43  ;;  %v215_v43 = vld [vmem:[#allocation5 + $0x178] sm:$0xff] }
 0x5dd   :  { %v13832_v62 = vcombine.low %v207_v6, %v215_v43 }
 0x5e3   :  { %10609 = vmatmul.mubr.bf16.gmra.mrb[188].mxu0 %v18718_v38  ;;  %11381 = vmatmul.mubr.bf16.gmra.mrb[188].mxu1 %v18718_v38  ;;  %v13814_v38 = vcombine.low %v190_v23, %v198_v16  ;;  %v230_v23 = vld [vmem:[#allocation5 + $0x1f0] sm:$0xff]  ;;  %v223_v16 = vld [vmem:[#allocation5 + $0x1b8] sm:$0xff] }
 0x5e4   :  { %10651 = vmatprep.mubr.bf16.mxu0 %v18719_v4  ;;  %11423 = vmatprep.mubr.bf16.mxu1 %v18719_v4  ;;  %v18721_v4 = vcombine.low %v17600_v54, %v17602_v45  ;;  %v13833_v54 = vcombine.high %v207_v6, %v215_v43  ;;  %v13849_v36 = vcombine.high %v223_v16, %v231_v30  ;;  %v238_v45 = vld [vmem:[#allocation5 + $0x230] sm:$0xff] }
 0x5e5   :  { %v254_v43 = vld [vmem:[#allocation5 + $0x2b0] sm:$0xff] }
 0x5eb   :  { %10652 = vmatmul.mubr.bf16.vlgmr.msra.gmra.mrb[128].mxu0 %v18720_v13  ;;  %11424 = vmatmul.mubr.bf16.vlgmr.msra.gmra.mrb[128].mxu1 %v18720_v13  ;;  %v13831_v13 = vcombine.high %v206_v3, %v214_v14  ;;  %v13863_v14 = vcombine.high %v238_v45, %v246_v29  ;;  %v255_v3 = vld [vmem:[#allocation5 + $0x2b8] sm:$0xff] }
 0x5ec   :  { %11585 = vmatpush1.bf16.msra.mxu0 %v18721_v4  ;;  %12357 = vmatpush1.bf16.msra.mxu1 %v18722_v26  ;;  %v222_v4 = vld [vmem:[#allocation5 + $0x1b0] sm:$0xff] }
 0x5ed   :  { %10661 = vmatprep.mubr.bf16.mxu0 %v18723_v49  ;;  %11433 = vmatprep.mubr.bf16.mxu1 %v18723_v49  ;;  %v13847_v26 = vcombine.high %v222_v4, %v230_v23  ;;  %v247_v49 = vld [vmem:[#allocation5 + $0x278] sm:$0xff] }
 0x5ee   :  { %11586 = vmatprep.subr.bf16.mxu0 %v13815_v21  ;;  %12358 = vmatprep.subr.bf16.mxu1 %v13817_v57  ;;  %v18725_v21 = vld [vmem:[#allocation86_spill] sm:$0xff] }
 0x5ef   :  { %v239_v57 = vld [vmem:[#allocation5 + $0x238] sm:$0xff] }
 0x5f0   :  { %11587 = vmatpush1.bf16.msra.mxu0 %v13814_v38  ;;  %12359 = vmatpush1.bf16.msra.mxu1 %v13816_v15  ;;  %v13846_v15 = vcombine.low %v222_v4, %v230_v23  ;;  %v13865_v6 = vcombine.high %v239_v57, %v247_v49  ;;  %v262_v38 = vld [vmem:[#allocation5 + $0x2f0] sm:$0xff]  ;;  %v13864_v10 = vcombine.low %v239_v57, %v247_v49 }
 0x5f1   :  { %11588 = vmatprep.subr.bf16.mxu0 %v13831_v13  ;;  %12360 = vmatprep.subr.bf16.mxu1 %v13833_v54  ;;  %v13848_v13 = vcombine.low %v223_v16, %v231_v30  ;;  %v263_v54 = vld [vmem:[#allocation5 + $0x2f8] sm:$0xff]  ;;  %v13879_v39 = vcombine.high %v254_v43, %v262_v38  ;;  %v270_v23 = vld [vmem:[#allocation5 + $0x330] sm:$0xff]  ;;  %v18727_v30 = vld [vmem:[#allocation88_spill] sm:$0xff] }
 0x5f2   :  { %v13881_v4 = vcombine.high %v255_v3, %v263_v54  ;;  %v271_v16 = vld [vmem:[#allocation5 + $0x338] sm:$0xff]  ;;  %v13880_v49 = vcombine.low %v255_v3, %v263_v54  ;;  %v294_v57 = vld [vmem:[#allocation5 + $0x3f0] sm:$0xff] }
 0x5f3   :  { %10662 = vmatmul.mubr.bf16.gmra.mrb[132].mxu0 %v18724_v59  ;;  %11434 = vmatmul.mubr.bf16.gmra.mrb[132].mxu1 %v18724_v59  ;;  %v13862_v59 = vcombine.low %v238_v45, %v246_v29  ;;  %v13878_v29 = vcombine.low %v254_v43, %v262_v38  ;;  %v18729_v43 = vld [vmem:[#allocation90_spill] sm:$0xff] }
 0x5f4   :  { %10671 = vmatprep.mubr.bf16.mxu0 %v18725_v21  ;;  %11443 = vmatprep.mubr.bf16.mxu1 %v18725_v21  ;;  %v18728_v21 = vld [vmem:[#allocation89_spill] sm:$0xff]  ;;  %v303_v38 = vld [vmem:[#allocation5 + $0x438] sm:$0xff] }
 0x5f5   :  { %11589 = vmatpush1.bf16.msra.mxu0 %v13830_v1  ;;  %12361 = vmatpush1.bf16.msra.mxu1 %v13832_v62  ;;  %v278_v1 = vld [vmem:[#allocation5 + $0x370] sm:$0xff]  ;;  %v279_v62 = vld [vmem:[#allocation5 + $0x378] sm:$0xff] }
 0x5f6   :  { %11590 = vmatprep.subr.bf16.mxu0 %v13847_v26  ;;  %12362 = vmatprep.subr.bf16.mxu1 %v13849_v36  ;;  %v13895_v45 = vcombine.high %v270_v23, %v278_v1  ;;  %v13897_v26 = vcombine.high %v271_v16, %v279_v62  ;;  %v286_v36 = vld [vmem:[#allocation5 + $0x3b0] sm:$0xff]  ;;  %v311_v3 = vld [vmem:[#allocation5 + $0x478] sm:$0xff] }
 0x5f7   :  { %v13910_v54 = vcombine.low %v286_v36, %v294_v57 }
 0x5f9   :  { %11591 = vmatpush1.bf16.msra.mxu0 %v13846_v15  ;;  %12363 = vmatpush1.bf16.msra.mxu1 %v13848_v13  ;;  %v287_v15 = vld [vmem:[#allocation5 + $0x3b8] sm:$0xff] }
 0x5fa   :  { %11592 = vmatprep.subr.bf16.mxu0 %v13863_v14  ;;  %12364 = vmatprep.subr.bf16.mxu1 %v13865_v6  ;;  %v295_v13 = vld [vmem:[#allocation5 + $0x3f8] sm:$0xff]  ;;  %v13894_v14 = vcombine.low %v270_v23, %v278_v1  ;;  %v13896_v6 = vcombine.low %v271_v16, %v279_v62  ;;  %v13929_v1 = vcombine.high %v303_v38, %v311_v3  ;;  %v318_v16 = vld [vmem:[#allocation5 + $0x4b0] sm:$0xff] }
 0x5fb   :  { %10672 = vmatmul.mubr.bf16.gmra.mrb[136].mxu0 %v18726_v12  ;;  %11444 = vmatmul.mubr.bf16.gmra.mrb[136].mxu1 %v18726_v12  ;;  %v13911_v12 = vcombine.high %v286_v36, %v294_v57  ;;  %v326_v62 = vld [vmem:[#allocation5 + $0x4f0] sm:$0xff] }
 0x5fc   :  { %10681 = vmatprep.mubr.bf16.mxu0 %v18727_v30  ;;  %11453 = vmatprep.mubr.bf16.mxu1 %v18727_v30  ;;  %v18730_v30 = vld [vmem:[#allocation91_spill] sm:$0xff]  ;;  %v334_v57 = vld [vmem:[#allocation5 + $0x530] sm:$0xff] }
 0x5fd   :  { %11593 = vmatpush1.bf16.msra.mxu0 %v13862_v59  ;;  %12365 = vmatpush1.bf16.msra.mxu1 %v13864_v10  ;;  %v13913_v59 = vcombine.high %v287_v15, %v295_v13  ;;  %v302_v10 = vld [vmem:[#allocation5 + $0x430] sm:$0xff] }
 0x5fe   :  { %11594 = vmatprep.subr.bf16.mxu0 %v13879_v39  ;;  %12366 = vmatprep.subr.bf16.mxu1 %v13881_v4  ;;  %v310_v39 = vld [vmem:[#allocation5 + $0x470] sm:$0xff]  ;;  %v13912_v4 = vcombine.low %v287_v15, %v295_v13  ;;  %v18731_v15 = vld [vmem:[#allocation92_spill] sm:$0xff]  ;;  %v335_v13 = vld [vmem:[#allocation5 + $0x538] sm:$0xff] }
 0x5ff   :  { %v13927_v23 = vcombine.high %v302_v10, %v310_v39 }
 0x601   :  { %11595 = vmatpush1.bf16.msra.mxu0 %v13878_v29  ;;  %12367 = vmatpush1.bf16.msra.mxu1 %v13880_v49  ;;  %v319_v29 = vld [vmem:[#allocation5 + $0x4b8] sm:$0xff] }
 0x602   :  { %11596 = vmatprep.subr.bf16.mxu0 %v13895_v45  ;;  %12368 = vmatprep.subr.bf16.mxu1 %v13897_v26  ;;  %v327_v49 = vld [vmem:[#allocation5 + $0x4f8] sm:$0xff]  ;;  %v13926_v45 = vcombine.low %v302_v10, %v310_v39  ;;  %v13928_v26 = vcombine.low %v303_v38, %v311_v3  ;;  %v350_v38 = vld [vmem:[#allocation5 + $0x5b0] sm:$0xff] }
 0x603   :  { %10682 = vmatmul.mubr.bf16.gmra.mrb[140].mxu0 %v18728_v21  ;;  %11454 = vmatmul.mubr.bf16.gmra.mrb[140].mxu1 %v18728_v21  ;;  %v13943_v21 = vcombine.high %v318_v16, %v326_v62  ;;  %v13945_v36 = vcombine.high %v319_v29, %v327_v49  ;;  %v358_v3 = vld [vmem:[#allocation5 + $0x5f0] sm:$0xff] }
 0x604   :  { %10691 = vmatprep.mubr.bf16.mxu0 %v18729_v43  ;;  %11463 = vmatprep.mubr.bf16.mxu1 %v18729_v43  ;;  %v18732_v43 = vld [vmem:[#allocation93_spill] sm:$0xff] }
 0x605   :  { %11597 = vmatpush1.bf16.msra.mxu0 %v13894_v14  ;;  %12369 = vmatpush1.bf16.msra.mxu1 %v13896_v6  ;;  %v343_v14 = vld [vmem:[#allocation5 + $0x578] sm:$0xff]  ;;  %v13942_v6 = vcombine.low %v318_v16, %v326_v62  ;;  %v366_v62 = vld [vmem:[#allocation5 + $0x630] sm:$0xff] }
 0x606   :  { %11598 = vmatprep.subr.bf16.mxu0 %v13911_v12  ;;  %12370 = vmatprep.subr.bf16.mxu1 %v13913_v59  ;;  %v342_v12 = vld [vmem:[#allocation5 + $0x570] sm:$0xff]  ;;  %v13944_v59 = vcombine.low %v319_v29, %v327_v49  ;;  %v13961_v39 = vcombine.high %v335_v13, %v343_v14  ;;  %v367_v29 = vld [vmem:[#allocation5 + $0x638] sm:$0xff] }
 0x607   :  { %v13959_v10 = vcombine.high %v334_v57, %v342_v12  ;;  %v375_v49 = vld [vmem:[#allocation5 + $0x678] sm:$0xff] }
 0x609   :  { %11599 = vmatpush1.bf16.msra.mxu0 %v13910_v54  ;;  %12371 = vmatpush1.bf16.msra.mxu1 %v13912_v4  ;;  %v351_v54 = vld [vmem:[#allocation5 + $0x5b8] sm:$0xff] }
 0x60a   :  { %11600 = vmatprep.subr.bf16.mxu0 %v13927_v23  ;;  %12372 = vmatprep.subr.bf16.mxu1 %v13929_v1  ;;  %v359_v4 = vld [vmem:[#allocation5 + $0x5f8] sm:$0xff]  ;;  %v13958_v23 = vcombine.low %v334_v57, %v342_v12  ;;  %v13960_v1 = vcombine.low %v335_v13, %v343_v14  ;;  %v13993_v57 = vcombine.high %v367_v29, %v375_v49  ;;  %v382_v12 = vld [vmem:[#allocation5 + $0x6b0] sm:$0xff] }
 0x60b   :  { %10692 = vmatmul.mubr.bf16.gmra.mrb[144].mxu0 %v18730_v30  ;;  %11464 = vmatmul.mubr.bf16.gmra.mrb[144].mxu1 %v18730_v30  ;;  %v13975_v30 = vcombine.high %v350_v38, %v358_v3  ;;  %v13977_v16 = vcombine.high %v351_v54, %v359_v4  ;;  %v390_v13 = vld [vmem:[#allocation5 + $0x6f0] sm:$0xff]  ;;  %v383_v14 = vld [vmem:[#allocation5 + $0x6b8] sm:$0xff] }
 0x60c   :  { %10701 = vmatprep.mubr.bf16.mxu0 %v18731_v15  ;;  %11473 = vmatprep.mubr.bf16.mxu1 %v18731_v15 }
 0x60d   :  { %11601 = vmatpush1.bf16.msra.mxu0 %v13926_v45  ;;  %12373 = vmatpush1.bf16.msra.mxu1 %v13928_v26  ;;  %v13974_v45 = vcombine.low %v350_v38, %v358_v3  ;;  %v13976_v26 = vcombine.low %v351_v54, %v359_v4  ;;  %v398_v3 = vld [vmem:[#allocation5 + $0x730] sm:$0xff]  ;;  %v399_v54 = vld [vmem:[#allocation5 + $0x738] sm:$0xff] }
 0x60e   :  { %11602 = vmatprep.subr.bf16.mxu0 %v13943_v21  ;;  %12374 = vmatprep.subr.bf16.mxu1 %v13945_v36  ;;  %v374_v21 = vld [vmem:[#allocation5 + $0x670] sm:$0xff]  ;;  %v407_v4 = vld [vmem:[#allocation5 + $0x778] sm:$0xff] }
 0x60f   :  { %v13991_v36 = vcombine.high %v366_v62, %v374_v21 }
 0x611   :  { %11603 = vmatpush1.bf16.msra.mxu0 %v13942_v6  ;;  %12375 = vmatpush1.bf16.msra.mxu1 %v13944_v59  ;;  %v391_v6 = vld [vmem:[#allocation5 + $0x6f8] sm:$0xff]  ;;  %v13990_v59 = vcombine.low %v366_v62, %v374_v21  ;;  %v14025_v62 = vcombine.high %v399_v54, %v407_v4  ;;  %v414_v21 = vld [vmem:[#allocation5 + $0x7b0] sm:$0xff] }
 0x612   :  { %11604 = vmatprep.subr.bf16.mxu0 %v13959_v10  ;;  %12376 = vmatprep.subr.bf16.mxu1 %v13961_v39  ;;  %v13992_v10 = vcombine.low %v367_v29, %v375_v49  ;;  %v14007_v39 = vcombine.high %v382_v12, %v390_v13  ;;  %v14009_v38 = vcombine.high %v383_v14, %v391_v6  ;;  %v422_v29 = vld [vmem:[#allocation5 + $0x7f0] sm:$0xff]  ;;  %v415_v49 = vld [vmem:[#allocation5 + $0x7b8] sm:$0xff] }
 0x613   :  { %10702 = vmatmul.mubr.bf16.gmra.mrb[148].mxu0 %v18732_v43  ;;  %11474 = vmatmul.mubr.bf16.gmra.mrb[148].mxu1 %v18732_v43  ;;  %v18733_v43 = vld [vmem:[#allocation95_spill] sm:$0xff] }
 0x614   :  { %10711 = vmatprep.mubr.bf16.mxu0 %v18632_v58  ;;  %11483 = vmatprep.mubr.bf16.mxu1 %v18632_v58 }
 0x615   :  { %11605 = vmatpush1.bf16.msra.mxu0 %v13958_v23  ;;  %12377 = vmatpush1.bf16.msra.mxu1 %v13960_v1  ;;  %v14006_v23 = vcombine.low %v382_v12, %v390_v13  ;;  %v14008_v1 = vcombine.low %v383_v14, %v391_v6  ;;  %v14038_v13 = vcombine.low %v414_v21, %v422_v29 }
 0x616   :  { %11606 = vmatprep.subr.bf16.mxu0 %v13975_v30  ;;  %12378 = vmatprep.subr.bf16.mxu1 %v13977_v16  ;;  %v406_v30 = vld [vmem:[#allocation5 + $0x770] sm:$0xff]  ;;  %v14055_v6 = vcombine.high %v17682_v28, %v17684_v8 }
 0x617   :  { %v14023_v16 = vcombine.high %v398_v3, %v406_v30 }
 0x619   :  { %11607 = vmatpush1.bf16.msra.mxu0 %v13974_v45  ;;  %12379 = vmatpush1.bf16.msra.mxu1 %v13976_v26  ;;  %v423_v45 = vld [vmem:[#allocation5 + $0x7f8] sm:$0xff]  ;;  %v14022_v26 = vcombine.low %v398_v3, %v406_v30  ;;  %v18737_v3 = vld [vmem:[#allocation100_spill] sm:$0xff]  ;;  %v18738_v30 = vld [vmem:[#allocation101_spill] sm:$0xff] }
 0x61a   :  { %11608 = vmatprep.subr.bf16.mxu0 %v13991_v36  ;;  %12380 = vmatprep.subr.bf16.mxu1 %v13993_v57  ;;  %v14024_v36 = vcombine.low %v399_v54, %v407_v4  ;;  %v14039_v57 = vcombine.high %v414_v21, %v422_v29  ;;  %v14041_v12 = vcombine.high %v415_v49, %v423_v45  ;;  %v18739_v54 = vld [vmem:[#allocation102_spill] sm:$0xff]  ;;  %v18740_v4 = vld [vmem:[#allocation103_spill] sm:$0xff]  ;;  %v454_v21 = vld [vmem:[#allocation5 + $0x8f0] sm:$0xff] }
 0x61b   :  { %10712 = vmatmul.mubr.bf16.gmra.mrb[152].mxu0 %v18733_v43  ;;  %11484 = vmatmul.mubr.bf16.gmra.mrb[152].mxu1 %v18733_v43  ;;  %v14040_v14 = vcombine.low %v415_v49, %v423_v45  ;;  %v447_v29 = vld [vmem:[#allocation5 + $0x8b8] sm:$0xff] }
 0x61c   :  { %10721 = vmatprep.mubr.bf16.mxu0 %v18634_v35  ;;  %11493 = vmatprep.mubr.bf16.mxu1 %v18634_v35  ;;  %v455_v49 = vld [vmem:[#allocation5 + $0x8f8] sm:$0xff] }
 0x61d   :  { %11609 = vmatpush1.bf16.msra.mxu0 %v13990_v59  ;;  %12381 = vmatpush1.bf16.msra.mxu1 %v13992_v10  ;;  %v14057_v59 = vcombine.high %v17692_v55, %v17694_v27  ;;  %v18734_v10 = vld [vmem:[#allocation97_spill] sm:$0xff] }
 0x61e   :  { %11610 = vmatprep.subr.bf16.mxu0 %v14007_v39  ;;  %12382 = vmatprep.subr.bf16.mxu1 %v14009_v38  ;;  %v18735_v39 = vld [vmem:[#allocation98_spill] sm:$0xff]  ;;  %v18736_v38 = vld [vmem:[#allocation99_spill] sm:$0xff] }
 0x621   :  { %11611 = vmatpush1.bf16.msra.mxu0 %v14006_v23  ;;  %12383 = vmatpush1.bf16.msra.mxu1 %v14008_v1  ;;  %v18741_v23 = vld [vmem:[#allocation104_spill] sm:$0xff]  ;;  %v18742_v1 = vld [vmem:[#allocation105_spill] sm:$0xff] }
 0x622   :  { %11612 = vmatprep.subr.bf16.mxu0 %v14023_v16  ;;  %12384 = vmatprep.subr.bf16.mxu1 %v14025_v62  ;;  %v18743_v16 = vld [vmem:[#allocation11_spill] sm:$0xff]  ;;  %v446_v62 = vld [vmem:[#allocation5 + $0x8b0] sm:$0xff] }
 0x623   :  { %10722 = vmatmul.mubr.bf16.gmra.mrb[156].mxu0 %v17005_v63  ;;  %11494 = vmatmul.mubr.bf16.gmra.mrb[156].mxu1 %v17005_v63  ;;  %v14071_v45 = vcombine.high %v446_v62, %v454_v21 }
 0x624   :  { %10731 = vmatprep.mubr.bf16.mxu0 %v17007_v11  ;;  %11503 = vmatprep.mubr.bf16.mxu1 %v17007_v11 }
 0x625   :  { %11613 = vmatpush1.bf16.msra.mxu0 %v14022_v26  ;;  %12385 = vmatpush1.bf16.msra.mxu1 %v14024_v36  ;;  %v462_v26 = vld [vmem:[#allocation5 + $0x930] sm:$0xff] }
 0x626   :  { %11614 = vmatprep.subr.bf16.mxu0 %v14039_v57  ;;  %12386 = vmatprep.subr.bf16.mxu1 %v14041_v12  ;;  %v470_v36 = vld [vmem:[#allocation5 + $0x970] sm:$0xff]  ;;  %v463_v57 = vld [vmem:[#allocation5 + $0x938] sm:$0xff]  ;;  %v18744_v12 = vld [vmem:[#allocation12_spill] sm:$0xff] }
 0x629   :  { %11615 = vmatpush1.bf16.msra.mxu0 %v14038_v13  ;;  %12387 = vmatpush1.bf16.msra.mxu1 %v14040_v14  ;;  %v14073_v13 = vcombine.high %v447_v29, %v455_v49  ;;  %v471_v14 = vld [vmem:[#allocation5 + $0x978] sm:$0xff] }
 0x62a   :  { %11777 = vmatprep.subr.bf16.mxu0 %v14055_v6  ;;  %12549 = vmatprep.subr.bf16.mxu1 %v14057_v59  ;;  %v17768_v6 = vld [vmem:[#allocation5 + $0x1030] sm:$0xff] }
 0x62b   :  { %10732 = vmatmul.mubr.bf16.gmra.mrb[160].mxu0 %v17015_v50  ;;  %11504 = vmatmul.mubr.bf16.gmra.mrb[160].mxu1 %v17015_v50  ;;  %v17770_v59 = vld [vmem:[#allocation5 + $0x1070] sm:$0xff] }
 0x62c   :  { %10741 = vmatprep.mubr.bf16.mxu0 %v17019_v24  ;;  %11513 = vmatprep.mubr.bf16.mxu1 %v17019_v24 }
 0x633   :  { %10742 = vmatmul.mubr.bf16.gmra.mrb[164].mxu0 %v17025_v19  ;;  %11514 = vmatmul.mubr.bf16.gmra.mrb[164].mxu1 %v17025_v19 }
 0x634   :  { %10751 = vmatprep.mubr.bf16.mxu0 %v17027_v31  ;;  %11523 = vmatprep.mubr.bf16.mxu1 %v17027_v31 }
 0x63b   :  { %10752 = vmatmul.mubr.bf16.gmra.mrb[168].mxu0 %v17033_v56  ;;  %11524 = vmatmul.mubr.bf16.gmra.mrb[168].mxu1 %v17033_v56 }
 0x63c   :  { %10761 = vmatprep.mubr.bf16.mxu0 %v17035_v7  ;;  %11533 = vmatprep.mubr.bf16.mxu1 %v17035_v7 }
 0x643   :  { %10762 = vmatmul.mubr.bf16.gmra.mrb[172].mxu0 %v18734_v10  ;;  %11534 = vmatmul.mubr.bf16.gmra.mrb[172].mxu1 %v18734_v10 }
 0x644   :  { %10771 = vmatprep.mubr.bf16.mxu0 %v18735_v39  ;;  %11543 = vmatprep.mubr.bf16.mxu1 %v18735_v39  ;;  %v502_v39 = vld [vmem:[#allocation5 + $0xa70] sm:$0xff] }
 0x64b   :  { %10772 = vmatmul.mubr.bf16.gmra.mrb[176].mxu0 %v18736_v38  ;;  %11544 = vmatmul.mubr.bf16.gmra.mrb[176].mxu1 %v18736_v38  ;;  %v14072_v38 = vcombine.low %v447_v29, %v455_v49  ;;  %v18748_v29 = vld [vmem:[#allocation14_spill] sm:$0xff] }
 0x64c   :  { %10781 = vmatprep.mubr.bf16.mxu0 %v18737_v3  ;;  %11553 = vmatprep.mubr.bf16.mxu1 %v18737_v3  ;;  %v18747_v3 = vld [vmem:[#allocation13_spill] sm:$0xff] }
 0x653   :  { %10782 = vmatmul.mubr.bf16.gmra.mrb[180].mxu0 %v18738_v30  ;;  %11554 = vmatmul.mubr.bf16.gmra.mrb[180].mxu1 %v18738_v30  ;;  %v18746_v30 = vcombine.low %v17692_v55, %v17694_v27  ;;  %v14086_v27 = vcombine.low %v462_v26, %v470_v36  ;;  %v14088_v55 = vcombine.low %v463_v57, %v471_v14 }
 0x654   :  { %10791 = vmatprep.mubr.bf16.mxu0 %v18739_v54  ;;  %11563 = vmatprep.mubr.bf16.mxu1 %v18739_v54  ;;  %v17780_v54 = vld [vmem:[#allocation5 + $0x1078] sm:$0xff] }
 0x65b   :  { %10792 = vmatmul.mubr.bf16.gmra.mrb[184].mxu0 %v18740_v4  ;;  %11564 = vmatmul.mubr.bf16.gmra.mrb[184].mxu1 %v18740_v4  ;;  %v17778_v4 = vld [vmem:[#allocation5 + $0x1038] sm:$0xff] }
 0x65c   :  { %10801 = vmatprep.mubr.bf16.mxu0 %v18741_v23  ;;  %11573 = vmatprep.mubr.bf16.mxu1 %v18741_v23  ;;  %v487_v23 = vld [vmem:[#allocation5 + $0x9f8] sm:$0xff] }
 0x663   :  { %10802 = vmatmul.mubr.bf16.gmra.mrb[188].mxu0 %v18742_v1  ;;  %11574 = vmatmul.mubr.bf16.gmra.mrb[188].mxu1 %v18742_v1  ;;  %v14070_v1 = vcombine.low %v446_v62, %v454_v21  ;;  %v478_v62 = vld [vmem:[#allocation5 + $0x9b0] sm:$0xff] }
 0x664   :  { %11616 = vmatprep.mubr.bf16.mxu0 %v18743_v16  ;;  %12388 = vmatprep.mubr.bf16.mxu1 %v18743_v16  ;;  %v18745_v16 = vcombine.low %v17682_v28, %v17684_v8  ;;  %v14089_v28 = vcombine.high %v463_v57, %v471_v14  ;;  %v486_v21 = vld [vmem:[#allocation5 + $0x9f0] sm:$0xff]  ;;  %v511_v14 = vld [vmem:[#allocation5 + $0xab8] sm:$0xff] }
 0x665   :  { %v494_v8 = vld [vmem:[#allocation5 + $0xa30] sm:$0xff] }
 0x666   :  { %v510_v57 = vld [vmem:[#allocation5 + $0xab0] sm:$0xff] }
 0x66b   :  { %11617 = vmatmul.mubr.bf16.vlgmr.msra.gmra.mrb[192].mxu0 %v18744_v12  ;;  %12389 = vmatmul.mubr.bf16.vlgmr.msra.gmra.mrb[192].mxu1 %v18744_v12  ;;  %v14087_v12 = vcombine.high %v462_v26, %v470_v36  ;;  %v14119_v26 = vcombine.high %v494_v8, %v502_v39 }
 0x66c   :  { %11778 = vmatpush1.bf16.msra.mxu0 %v18745_v16  ;;  %12550 = vmatpush1.bf16.msra.mxu1 %v18746_v30  ;;  %v479_v16 = vld [vmem:[#allocation5 + $0x9b8] sm:$0xff]  ;;  %v14103_v30 = vcombine.high %v478_v62, %v486_v21 }
 0x66d   :  { %11626 = vmatprep.mubr.bf16.mxu0 %v18747_v3  ;;  %12398 = vmatprep.mubr.bf16.mxu1 %v18747_v3  ;;  %v14105_v49 = vcombine.high %v479_v16, %v487_v23  ;;  %v495_v3 = vld [vmem:[#allocation5 + $0xa38] sm:$0xff] }
 0x66e   :  { %11779 = vmatprep.subr.bf16.mxu0 %v14071_v45  ;;  %12551 = vmatprep.subr.bf16.mxu1 %v14073_v13  ;;  %v503_v45 = vld [vmem:[#allocation5 + $0xa78] sm:$0xff]  ;;  %v518_v13 = vld [vmem:[#allocation5 + $0xaf0] sm:$0xff] }
 0x66f   :  { %v14121_v36 = vcombine.high %v495_v3, %v503_v45  ;;  %v14135_v10 = vcombine.high %v510_v57, %v518_v13 }
 0x670   :  { %11780 = vmatpush1.bf16.msra.mxu0 %v14070_v1  ;;  %12552 = vmatpush1.bf16.msra.mxu1 %v14072_v38  ;;  %v14102_v38 = vcombine.low %v478_v62, %v486_v21  ;;  %v14104_v1 = vcombine.low %v479_v16, %v487_v23  ;;  %v526_v62 = vld [vmem:[#allocation5 + $0xb30] sm:$0xff]  ;;  %v527_v23 = vld [vmem:[#allocation5 + $0xb38] sm:$0xff] }
 0x671   :  { %11781 = vmatprep.subr.bf16.mxu0 %v14087_v12  ;;  %12553 = vmatprep.subr.bf16.mxu1 %v14089_v28  ;;  %v519_v12 = vld [vmem:[#allocation5 + $0xaf8] sm:$0xff]  ;;  %v14118_v28 = vcombine.low %v494_v8, %v502_v39  ;;  %v534_v21 = vld [vmem:[#allocation5 + $0xb70] sm:$0xff]  ;;  %v14134_v39 = vcombine.low %v510_v57, %v518_v13 }
 0x672   :  { %v535_v16 = vld [vmem:[#allocation5 + $0xb78] sm:$0xff]  ;;  %v14136_v8 = vcombine.low %v511_v14, %v519_v12 }
 0x673   :  { %11627 = vmatmul.mubr.bf16.gmra.mrb[196].mxu0 %v18748_v29  ;;  %12399 = vmatmul.mubr.bf16.gmra.mrb[196].mxu1 %v18748_v29  ;;  %v14120_v29 = vcombine.low %v495_v3, %v503_v45  ;;  %v543_v3 = vld [vmem:[#allocation5 + $0xbb8] sm:$0xff] }
 0x674   :  { %11636 = vmatprep.mubr.bf16.mxu0 %v16509_v41  ;;  %12408 = vmatprep.mubr.bf16.mxu1 %v16509_v41  ;;  %v14137_v41 = vcombine.high %v511_v14, %v519_v12  ;;  %v551_v45 = vld [vmem:[#allocation5 + $0xbf8] sm:$0xff] }
 0x675   :  { %11782 = vmatpush1.bf16.msra.mxu0 %v14086_v27  ;;  %12554 = vmatpush1.bf16.msra.mxu1 %v14088_v55  ;;  %v14151_v27 = vcombine.high %v526_v62, %v534_v21  ;;  %v14153_v55 = vcombine.high %v527_v23, %v535_v16  ;;  %v567_v57 = vld [vmem:[#allocation5 + $0xc78] sm:$0xff]  ;;  %v14168_v14 = vcombine.low %v543_v3, %v551_v45 }
 0x676   :  { %11783 = vmatprep.subr.bf16.mxu0 %v14103_v30  ;;  %12555 = vmatprep.subr.bf16.mxu1 %v14105_v49  ;;  %v542_v30 = vld [vmem:[#allocation5 + $0xbb0] sm:$0xff] }
 0x677   :  { %v550_v49 = vld [vmem:[#allocation5 + $0xbf0] sm:$0xff] }
 0x678   :  { %v14166_v13 = vcombine.low %v542_v30, %v550_v49 }
 0x679   :  { %11784 = vmatpush1.bf16.msra.mxu0 %v14102_v38  ;;  %12556 = vmatpush1.bf16.msra.mxu1 %v14104_v1  ;;  %v14152_v38 = vcombine.low %v527_v23, %v535_v16  ;;  %v14167_v1 = vcombine.high %v542_v30, %v550_v49 }
 0x67a   :  { %11785 = vmatprep.subr.bf16.mxu0 %v14119_v26  ;;  %12557 = vmatprep.subr.bf16.mxu1 %v14121_v36  ;;  %v558_v26 = vld [vmem:[#allocation5 + $0xc30] sm:$0xff]  ;;  %v559_v36 = vld [vmem:[#allocation5 + $0xc38] sm:$0xff] }
 0x67b   :  { %11637 = vmatmul.mubr.bf16.gmra.mrb[200].mxu0 %v16515_v60  ;;  %12409 = vmatmul.mubr.bf16.gmra.mrb[200].mxu1 %v16515_v60  ;;  %v14150_v60 = vcombine.low %v526_v62, %v534_v21  ;;  %v575_v62 = vld [vmem:[#allocation5 + $0xcb8] sm:$0xff]  ;;  %v14184_v23 = vcombine.low %v559_v36, %v567_v57 }
 0x67c   :  { %11646 = vmatprep.mubr.bf16.mxu0 %v16517_v0  ;;  %12418 = vmatprep.mubr.bf16.mxu1 %v16517_v0  ;;  %v14169_v0 = vcombine.high %v543_v3, %v551_v45  ;;  %v583_v21 = vld [vmem:[#allocation5 + $0xcf8] sm:$0xff] }
 0x67d   :  { %11786 = vmatpush1.bf16.msra.mxu0 %v14118_v28  ;;  %12558 = vmatpush1.bf16.msra.mxu1 %v14120_v29  ;;  %v14185_v28 = vcombine.high %v559_v36, %v567_v57  ;;  %v574_v29 = vld [vmem:[#allocation5 + $0xcb0] sm:$0xff]  ;;  %v14200_v49 = vcombine.low %v575_v62, %v583_v21 }
 0x67e   :  { %11787 = vmatprep.subr.bf16.mxu0 %v14135_v10  ;;  %12559 = vmatprep.subr.bf16.mxu1 %v14137_v41  ;;  %v566_v10 = vld [vmem:[#allocation5 + $0xc70] sm:$0xff] }
 0x67f   :  { %v14183_v12 = vcombine.high %v558_v26, %v566_v10  ;;  %v582_v41 = vld [vmem:[#allocation5 + $0xcf0] sm:$0xff] }
 0x680   :  { %v14199_v16 = vcombine.high %v574_v29, %v582_v41  ;;  %v14198_v30 = vcombine.low %v574_v29, %v582_v41  ;;  %v622_v36 = vld [vmem:[#allocation5 + $0xe30] sm:$0xff] }
 0x681   :  { %11788 = vmatpush1.bf16.msra.mxu0 %v14134_v39  ;;  %12560 = vmatpush1.bf16.msra.mxu1 %v14136_v8  ;;  %v590_v39 = vld [vmem:[#allocation5 + $0xd30] sm:$0xff] }
 0x682   :  { %11789 = vmatprep.subr.bf16.mxu0 %v14151_v27  ;;  %12561 = vmatprep.subr.bf16.mxu1 %v14153_v55  ;;  %v598_v8 = vld [vmem:[#allocation5 + $0xd70] sm:$0xff]  ;;  %v591_v27 = vld [vmem:[#allocation5 + $0xd38] sm:$0xff] }
 0x683   :  { %11647 = vmatmul.mubr.bf16.gmra.mrb[204].mxu0 %v16523_v17  ;;  %12419 = vmatmul.mubr.bf16.gmra.mrb[204].mxu1 %v16523_v17  ;;  %v14182_v17 = vcombine.low %v558_v26, %v566_v10  ;;  %v599_v55 = vld [vmem:[#allocation5 + $0xd78] sm:$0xff]  ;;  %v14215_v3 = vcombine.high %v590_v39, %v598_v8  ;;  %v630_v57 = vld [vmem:[#allocation5 + $0xe70] sm:$0xff] }
 0x684   :  { %11656 = vmatprep.mubr.bf16.mxu0 %v16525_v22  ;;  %12428 = vmatprep.mubr.bf16.mxu1 %v16525_v22  ;;  %v14201_v22 = vcombine.high %v575_v62, %v583_v21  ;;  %v14217_v45 = vcombine.high %v591_v27, %v599_v55  ;;  %v14216_v26 = vcombine.low %v591_v27, %v599_v55  ;;  %v638_v62 = vld [vmem:[#allocation5 + $0xeb0] sm:$0xff]  ;;  %v655_v27 = vld [vmem:[#allocation5 + $0xf38] sm:$0xff] }
 0x685   :  { %11790 = vmatpush1.bf16.msra.mxu0 %v14150_v60  ;;  %12562 = vmatpush1.bf16.msra.mxu1 %v14152_v38  ;;  %v606_v60 = vld [vmem:[#allocation5 + $0xdb0] sm:$0xff]  ;;  %v14247_v29 = vcombine.high %v622_v36, %v630_v57  ;;  %v663_v55 = vld [vmem:[#allocation5 + $0xf78] sm:$0xff] }
 0x686   :  { %11791 = vmatprep.subr.bf16.mxu0 %v14167_v1  ;;  %12563 = vmatprep.subr.bf16.mxu1 %v14169_v0  ;;  %v614_v38 = vld [vmem:[#allocation5 + $0xdf0] sm:$0xff]  ;;  %v607_v1 = vld [vmem:[#allocation5 + $0xdb8] sm:$0xff] }
 0x687   :  { %v615_v0 = vld [vmem:[#allocation5 + $0xdf8] sm:$0xff]  ;;  %v14231_v10 = vcombine.high %v606_v60, %v614_v38  ;;  %v646_v21 = vld [vmem:[#allocation5 + $0xef0] sm:$0xff] }
 0x689   :  { %11792 = vmatpush1.bf16.msra.mxu0 %v14166_v13  ;;  %12564 = vmatpush1.bf16.msra.mxu1 %v14168_v14  ;;  %v623_v13 = vld [vmem:[#allocation5 + $0xe38] sm:$0xff] }
 0x68a   :  { %11793 = vmatprep.subr.bf16.mxu0 %v14183_v12  ;;  %12565 = vmatprep.subr.bf16.mxu1 %v14185_v28  ;;  %v631_v14 = vld [vmem:[#allocation5 + $0xe78] sm:$0xff]  ;;  %v14230_v12 = vcombine.low %v606_v60, %v614_v38  ;;  %v14232_v28 = vcombine.low %v607_v1, %v615_v0  ;;  %v670_v60 = vld [vmem:[#allocation5 + $0xfb0] sm:$0xff] }
 0x68b   :  { %11657 = vmatmul.mubr.bf16.gmra.mrb[208].mxu0 %v16531_v44  ;;  %12429 = vmatmul.mubr.bf16.gmra.mrb[208].mxu1 %v16531_v44  ;;  %v14214_v44 = vcombine.low %v590_v39, %v598_v8  ;;  %v14249_v41 = vcombine.high %v623_v13, %v631_v14  ;;  %v654_v39 = vld [vmem:[#allocation5 + $0xf30] sm:$0xff] }
 0x68c   :  { %11666 = vmatprep.mubr.bf16.mxu0 %v16533_v48  ;;  %12438 = vmatprep.mubr.bf16.mxu1 %v16533_v48  ;;  %v14233_v48 = vcombine.high %v607_v1, %v615_v0  ;;  %v662_v8 = vld [vmem:[#allocation5 + $0xf70] sm:$0xff]  ;;  %v671_v1 = vld [vmem:[#allocation5 + $0xfb8] sm:$0xff] }
 0x68d   :  { %11794 = vmatpush1.bf16.msra.mxu0 %v14182_v17  ;;  %12566 = vmatpush1.bf16.msra.mxu1 %v14184_v23  ;;  %v639_v17 = vld [vmem:[#allocation5 + $0xeb8] sm:$0xff]  ;;  %v678_v38 = vld [vmem:[#allocation5 + $0xff0] sm:$0xff] }
 0x68e   :  { %11795 = vmatprep.subr.bf16.mxu0 %v14199_v16  ;;  %12567 = vmatprep.subr.bf16.mxu1 %v14201_v22  ;;  %v647_v23 = vld [vmem:[#allocation5 + $0xef8] sm:$0xff]  ;;  %v14248_v16 = vcombine.low %v623_v13, %v631_v14  ;;  %v14263_v22 = vcombine.high %v638_v62, %v646_v21 }
 0x68f   :  { %v679_v0 = vld [vmem:[#allocation5 + $0xff8] sm:$0xff] }
 0x691   :  { %11796 = vmatpush1.bf16.msra.mxu0 %v14198_v30  ;;  %12568 = vmatpush1.bf16.msra.mxu1 %v14200_v49  ;;  %v14262_v30 = vcombine.low %v638_v62, %v646_v21  ;;  %v14264_v49 = vcombine.low %v639_v17, %v647_v23 }
 0x692   :  { %11797 = vmatprep.subr.bf16.mxu0 %v14215_v3  ;;  %12569 = vmatprep.subr.bf16.mxu1 %v14217_v45  ;;  %v14279_v3 = vcombine.high %v654_v39, %v662_v8  ;;  %v14281_v45 = vcombine.high %v655_v27, %v663_v55 }
 0x693   :  { %11667 = vmatmul.mubr.bf16.gmra.mrb[212].mxu0 %v16539_v5  ;;  %12439 = vmatmul.mubr.bf16.gmra.mrb[212].mxu1 %v16539_v5  ;;  %v14246_v5 = vcombine.low %v622_v36, %v630_v57  ;;  %v14311_v36 = vcombine.high %v17768_v6, %v17770_v59  ;;  %v14313_v57 = vcombine.high %v17778_v4, %v17780_v54 }
 0x694   :  { %11676 = vmatprep.mubr.bf16.mxu0 %v16541_v9  ;;  %12448 = vmatprep.mubr.bf16.mxu1 %v16541_v9  ;;  %v14265_v9 = vcombine.high %v639_v17, %v647_v23 }
 0x695   :  { %11798 = vmatpush1.bf16.msra.mxu0 %v14214_v44  ;;  %12570 = vmatpush1.bf16.msra.mxu1 %v14216_v26  ;;  %v14280_v44 = vcombine.low %v655_v27, %v663_v55  ;;  %v14295_v26 = vcombine.high %v670_v60, %v678_v38 }
 0x696   :  { %11799 = vmatprep.subr.bf16.mxu0 %v14231_v10  ;;  %12571 = vmatprep.subr.bf16.mxu1 %v14233_v48  ;;  %v14294_v10 = vcombine.low %v670_v60, %v678_v38  ;;  %v14296_v48 = vcombine.low %v671_v1, %v679_v0 }
 0x699   :  { %11800 = vmatpush1.bf16.msra.mxu0 %v14230_v12  ;;  %12572 = vmatpush1.bf16.msra.mxu1 %v14232_v28 }
 0x69a   :  { %11801 = vmatprep.subr.bf16.mxu0 %v14247_v29  ;;  %12573 = vmatprep.subr.bf16.mxu1 %v14249_v41 }
 0x69b   :  { %11677 = vmatmul.mubr.bf16.gmra.mrb[216].mxu0 %v16547_v32  ;;  %12449 = vmatmul.mubr.bf16.gmra.mrb[216].mxu1 %v16547_v32  ;;  %v14278_v32 = vcombine.low %v654_v39, %v662_v8 }
 0x69c   :  { %11686 = vmatprep.mubr.bf16.mxu0 %v16549_v37  ;;  %12458 = vmatprep.mubr.bf16.mxu1 %v16549_v37  ;;  %v14297_v37 = vcombine.high %v671_v1, %v679_v0 }
 0x69d   :  { %11802 = vmatpush1.bf16.msra.mxu0 %v14246_v5  ;;  %12574 = vmatpush1.bf16.msra.mxu1 %v14248_v16 }
 0x69e   :  { %11803 = vmatprep.subr.bf16.mxu0 %v14263_v22  ;;  %12575 = vmatprep.subr.bf16.mxu1 %v14265_v9 }
 0x6a1   :  { %11804 = vmatpush1.bf16.msra.mxu0 %v14262_v30  ;;  %12576 = vmatpush1.bf16.msra.mxu1 %v14264_v49 }
 0x6a2   :  { %11805 = vmatprep.subr.bf16.mxu0 %v14279_v3  ;;  %12577 = vmatprep.subr.bf16.mxu1 %v14281_v45 }
 0x6a3   :  { %11687 = vmatmul.mubr.bf16.gmra.mrb[220].mxu0 %v16555_v61  ;;  %12459 = vmatmul.mubr.bf16.gmra.mrb[220].mxu1 %v16555_v61 }
 0x6a4   :  { %11696 = vmatprep.mubr.bf16.mxu0 %v16557_v2  ;;  %12468 = vmatprep.mubr.bf16.mxu1 %v16557_v2 }
 0x6a5   :  { %11806 = vmatpush1.bf16.msra.mxu0 %v14278_v32  ;;  %12578 = vmatpush1.bf16.msra.mxu1 %v14280_v44 }
 0x6a6   :  { %11807 = vmatprep.subr.bf16.mxu0 %v14295_v26  ;;  %12579 = vmatprep.subr.bf16.mxu1 %v14297_v37  ;;  %v18751_v26 = vld [vmem:[#allocation17_spill] sm:$0xff]  ;;  %v18752_v37 = vld [vmem:[#allocation18_spill] sm:$0xff] }
 0x6a9   :  { %11808 = vmatpush1.bf16.msra.mxu0 %v14294_v10  ;;  %12580 = vmatpush1.bf16.msra.mxu1 %v14296_v48 }
 0x6aa   :  { %11970 = vmatprep.subr.bf16.mxu0 %v14311_v36  ;;  %12742 = vmatprep.subr.bf16.mxu1 %v14313_v57  ;;  %v702_v57 = vld [vmem:[#allocation5 + $0x10b0] sm:$0xff] }
 0x6ab   :  { %11697 = vmatmul.mubr.bf16.gmra.mrb[224].mxu0 %v16565_v18  ;;  %12469 = vmatmul.mubr.bf16.gmra.mrb[224].mxu1 %v16565_v18 }
 0x6ac   :  { %11706 = vmatprep.mubr.bf16.mxu0 %v16569_v20  ;;  %12478 = vmatprep.mubr.bf16.mxu1 %v16569_v20 }
 0x6b3   :  { %11707 = vmatmul.mubr.bf16.gmra.mrb[228].mxu0 %v16575_v25  ;;  %12479 = vmatmul.mubr.bf16.gmra.mrb[228].mxu1 %v16575_v25 }
 0x6b4   :  { %11716 = vmatprep.mubr.bf16.mxu0 %v16577_v53  ;;  %12488 = vmatprep.mubr.bf16.mxu1 %v16577_v53 }
 0x6bb   :  { %11717 = vmatmul.mubr.bf16.gmra.mrb[232].mxu0 %v16583_v33  ;;  %12489 = vmatmul.mubr.bf16.gmra.mrb[232].mxu1 %v16583_v33 }
 0x6bc   :  { %11726 = vmatprep.mubr.bf16.mxu0 %v16585_v34  ;;  %12498 = vmatprep.mubr.bf16.mxu1 %v16585_v34 }
 0x6be   :  { %v10653_v61 = vpop.f32.mrb[128].mxu0  ;;  %v11425_v2 = vpop.f32.mrb[128].mxu1 }
 0x6bf   :  { %13136 = vst [vmem:[#allocation7 + $0x40] sm:$0xff] %v10653_v61  ;;  %v10655_v18 = vpop.f32.mrb[129].mxu0  ;;  %13138 = vst [vmem:[#allocation7 + $0x50] sm:$0xff] %v11425_v2  ;;  %v11427_v20 = vpop.f32.mrb[129].mxu1  ;;  %v710_v61 = vld [vmem:[#allocation5 + $0x10f0] sm:$0xff] }
 0x6c0   :  { %13137 = vst [vmem:[#allocation7 + $0x48] sm:$0xff] %v10655_v18  ;;  %v10657_v25 = vpop.f32.mrb[130].mxu0  ;;  %13139 = vst [vmem:[#allocation7 + $0x58] sm:$0xff] %v11427_v20  ;;  %v11429_v13 = vpop.f32.mrb[130].mxu1  ;;  %v703_v20 = vld [vmem:[#allocation5 + $0x10b8] sm:$0xff] }
 0x6c1   :  { %13152 = vst [vmem:[#allocation7 + $0xc0] sm:$0xff] %v10657_v25  ;;  %v10659_v53 = vpop.f32.mrb[131].mxu0  ;;  %13154 = vst [vmem:[#allocation7 + $0xd0] sm:$0xff] %v11429_v13  ;;  %v11431_v14 = vpop.f32.mrb[131].mxu1  ;;  %v711_v25 = vld [vmem:[#allocation5 + $0x10f8] sm:$0xff] }
 0x6c2   :  { %13153 = vst [vmem:[#allocation7 + $0xc8] sm:$0xff] %v10659_v53  ;;  %13155 = vst [vmem:[#allocation7 + $0xd8] sm:$0xff] %v11431_v14 }
 0x6c3   :  { %11727 = vmatmul.mubr.bf16.gmra.mrb[236].mxu0 %v16591_v40  ;;  %12499 = vmatmul.mubr.bf16.gmra.mrb[236].mxu1 %v16591_v40 }
 0x6c4   :  { %11736 = vmatprep.mubr.bf16.mxu0 %v16593_v42  ;;  %12508 = vmatprep.mubr.bf16.mxu1 %v16593_v42 }
 0x6c6   :  { %v10663_v33 = vpop.f32.mrb[132].mxu0  ;;  %v11435_v34 = vpop.f32.mrb[132].mxu1 }
 0x6c7   :  { %13168 = vst [vmem:[#allocation7 + $0x140] sm:$0xff] %v10663_v33  ;;  %v10665_v12 = vpop.f32.mrb[133].mxu0  ;;  %13170 = vst [vmem:[#allocation7 + $0x150] sm:$0xff] %v11435_v34  ;;  %v11437_v28 = vpop.f32.mrb[133].mxu1  ;;  %v14327_v33 = vcombine.high %v702_v57, %v710_v61  ;;  %v718_v34 = vld [vmem:[#allocation5 + $0x1130] sm:$0xff] }
 0x6c8   :  { %13169 = vst [vmem:[#allocation7 + $0x148] sm:$0xff] %v10665_v12  ;;  %v10667_v29 = vpop.f32.mrb[134].mxu0  ;;  %13171 = vst [vmem:[#allocation7 + $0x158] sm:$0xff] %v11437_v28  ;;  %v11439_v41 = vpop.f32.mrb[134].mxu1  ;;  %v726_v12 = vld [vmem:[#allocation5 + $0x1170] sm:$0xff]  ;;  %v719_v28 = vld [vmem:[#allocation5 + $0x1138] sm:$0xff] }
 0x6c9   :  { %13184 = vst [vmem:[#allocation7 + $0x1c0] sm:$0xff] %v10667_v29  ;;  %v10669_v62 = vpop.f32.mrb[135].mxu0  ;;  %13186 = vst [vmem:[#allocation7 + $0x1d0] sm:$0xff] %v11439_v41  ;;  %v11441_v21 = vpop.f32.mrb[135].mxu1  ;;  %v18753_v29 = vld [vmem:[#allocation19_spill] sm:$0xff]  ;;  %v14329_v41 = vcombine.high %v703_v20, %v711_v25 }
 0x6ca   :  { %13185 = vst [vmem:[#allocation7 + $0x1c8] sm:$0xff] %v10669_v62  ;;  %13187 = vst [vmem:[#allocation7 + $0x1d8] sm:$0xff] %v11441_v21  ;;  %v727_v62 = vld [vmem:[#allocation5 + $0x1178] sm:$0xff]  ;;  %v17854_v21 = vld [vmem:[#allocation5 + $0x1830] sm:$0xff] }
 0x6cb   :  { %11737 = vmatmul.mubr.bf16.gmra.mrb[240].mxu0 %v16599_v46  ;;  %12509 = vmatmul.mubr.bf16.gmra.mrb[240].mxu1 %v16599_v46 }
 0x6cc   :  { %11746 = vmatprep.mubr.bf16.mxu0 %v16601_v47  ;;  %12518 = vmatprep.mubr.bf16.mxu1 %v16601_v47 }
 0x6ce   :  { %v10673_v40 = vpop.f32.mrb[136].mxu0  ;;  %v11445_v42 = vpop.f32.mrb[136].mxu1 }
 0x6cf   :  { %13200 = vst [vmem:[#allocation7 + $0x240] sm:$0xff] %v10673_v40  ;;  %v10675_v17 = vpop.f32.mrb[137].mxu0  ;;  %13202 = vst [vmem:[#allocation7 + $0x250] sm:$0xff] %v11445_v42  ;;  %v11447_v23 = vpop.f32.mrb[137].mxu1  ;;  %v17856_v40 = vld [vmem:[#allocation5 + $0x1870] sm:$0xff]  ;;  %v18754_v42 = vcombine.low %v17768_v6, %v17770_v59 }
 0x6d0   :  { %13201 = vst [vmem:[#allocation7 + $0x248] sm:$0xff] %v10675_v17  ;;  %v10677_v5 = vpop.f32.mrb[138].mxu0  ;;  %13203 = vst [vmem:[#allocation7 + $0x258] sm:$0xff] %v11447_v23  ;;  %v11449_v16 = vpop.f32.mrb[138].mxu1  ;;  %v14326_v17 = vcombine.low %v702_v57, %v710_v61  ;;  %v14566_v23 = vcombine.low %v17854_v21, %v17856_v40 }
 0x6d1   :  { %13216 = vst [vmem:[#allocation7 + $0x2c0] sm:$0xff] %v10677_v5  ;;  %v10679_v22 = vpop.f32.mrb[139].mxu0  ;;  %13218 = vst [vmem:[#allocation7 + $0x2d0] sm:$0xff] %v11449_v16  ;;  %v11451_v9 = vpop.f32.mrb[139].mxu1  ;;  %v17864_v5 = vld [vmem:[#allocation5 + $0x1838] sm:$0xff] }
 0x6d2   :  { %13217 = vst [vmem:[#allocation7 + $0x2c8] sm:$0xff] %v10679_v22  ;;  %13219 = vst [vmem:[#allocation7 + $0x2d8] sm:$0xff] %v11451_v9  ;;  %v17866_v16 = vld [vmem:[#allocation5 + $0x1878] sm:$0xff]  ;;  %v18755_v22 = vcombine.low %v17778_v4, %v17780_v54  ;;  %v18756_v9 = vld [vmem:[#allocation20_spill] sm:$0xff] }
 0x6d3   :  { %11747 = vmatmul.mubr.bf16.gmra.mrb[244].mxu0 %v16607_v51  ;;  %12519 = vmatmul.mubr.bf16.gmra.mrb[244].mxu1 %v16607_v51  ;;  %v18749_v51 = vld [vmem:[#allocation15_spill] sm:$0xff]  ;;  %v14568_v6 = vcombine.low %v17864_v5, %v17866_v16 }
 0x6d4   :  { %11756 = vmatprep.mubr.bf16.mxu0 %v16609_v52  ;;  %12528 = vmatprep.mubr.bf16.mxu1 %v16609_v52  ;;  %v18750_v52 = vld [vmem:[#allocation16_spill] sm:$0xff] }
 0x6d6   :  { %v10683_v46 = vpop.f32.mrb[140].mxu0  ;;  %v11455_v47 = vpop.f32.mrb[140].mxu1 }
 0x6d7   :  { %13232 = vst [vmem:[#allocation7 + $0x340] sm:$0xff] %v10683_v46  ;;  %v10685_v39 = vpop.f32.mrb[141].mxu0  ;;  %13234 = vst [vmem:[#allocation7 + $0x350] sm:$0xff] %v11455_v47  ;;  %v11457_v8 = vpop.f32.mrb[141].mxu1  ;;  %v14328_v46 = vcombine.low %v703_v20, %v711_v25  ;;  %v14343_v47 = vcombine.high %v718_v34, %v726_v12 }
 0x6d8   :  { %13233 = vst [vmem:[#allocation7 + $0x348] sm:$0xff] %v10685_v39  ;;  %v10687_v27 = vpop.f32.mrb[142].mxu0  ;;  %13235 = vst [vmem:[#allocation7 + $0x358] sm:$0xff] %v11457_v8  ;;  %v11459_v55 = vpop.f32.mrb[142].mxu1  ;;  %v14345_v39 = vcombine.high %v719_v28, %v727_v62 }
 0x6d9   :  { %13248 = vst [vmem:[#allocation7 + $0x3c0] sm:$0xff] %v10687_v27  ;;  %v10689_v30 = vpop.f32.mrb[143].mxu0  ;;  %13250 = vst [vmem:[#allocation7 + $0x3d0] sm:$0xff] %v11459_v55  ;;  %v11461_v49 = vpop.f32.mrb[143].mxu1  ;;  %v734_v55 = vld [vmem:[#allocation5 + $0x11b0] sm:$0xff] }
 0x6da   :  { %13249 = vst [vmem:[#allocation7 + $0x3c8] sm:$0xff] %v10689_v30  ;;  %13251 = vst [vmem:[#allocation7 + $0x3d8] sm:$0xff] %v11461_v49  ;;  %v742_v30 = vld [vmem:[#allocation5 + $0x11f0] sm:$0xff]  ;;  %v735_v49 = vld [vmem:[#allocation5 + $0x11b8] sm:$0xff] }
 0x6db   :  { %11757 = vmatmul.mubr.bf16.gmra.mrb[248].mxu0 %v18749_v51  ;;  %12529 = vmatmul.mubr.bf16.gmra.mrb[248].mxu1 %v18749_v51  ;;  %v743_v51 = vld [vmem:[#allocation5 + $0x11f8] sm:$0xff] }
 0x6dc   :  { %11766 = vmatprep.mubr.bf16.mxu0 %v18750_v52  ;;  %12538 = vmatprep.mubr.bf16.mxu1 %v18750_v52  ;;  %v14360_v61 = vcombine.low %v735_v49, %v743_v51 }
 0x6de   :  { %v10693_v3 = vpop.f32.mrb[144].mxu0  ;;  %v11465_v45 = vpop.f32.mrb[144].mxu1 }
 0x6df   :  { %13264 = vst [vmem:[#allocation7 + $0x440] sm:$0xff] %v10693_v3  ;;  %v10695_v60 = vpop.f32.mrb[145].mxu0  ;;  %13266 = vst [vmem:[#allocation7 + $0x450] sm:$0xff] %v11465_v45  ;;  %v11467_v38 = vpop.f32.mrb[145].mxu1  ;;  %v14342_v45 = vcombine.low %v718_v34, %v726_v12  ;;  %v767_v34 = vld [vmem:[#allocation5 + $0x12b8] sm:$0xff] }
 0x6e0   :  { %13265 = vst [vmem:[#allocation7 + $0x448] sm:$0xff] %v10695_v60  ;;  %v10697_v1 = vpop.f32.mrb[146].mxu0  ;;  %13267 = vst [vmem:[#allocation7 + $0x458] sm:$0xff] %v11467_v38  ;;  %v11469_v0 = vpop.f32.mrb[146].mxu1  ;;  %v14344_v38 = vcombine.low %v719_v28, %v727_v62  ;;  %v775_v12 = vld [vmem:[#allocation5 + $0x12f8] sm:$0xff] }
 0x6e1   :  { %13280 = vst [vmem:[#allocation7 + $0x4c0] sm:$0xff] %v10697_v1  ;;  %v10699_v32 = vpop.f32.mrb[147].mxu0  ;;  %13282 = vst [vmem:[#allocation7 + $0x4d0] sm:$0xff] %v11469_v0  ;;  %v11471_v44 = vpop.f32.mrb[147].mxu1  ;;  %v14359_v1 = vcombine.high %v734_v55, %v742_v30  ;;  %v18757_v0 = vld [vmem:[#allocation21_spill] sm:$0xff] }
 0x6e2   :  { %13281 = vst [vmem:[#allocation7 + $0x4c8] sm:$0xff] %v10699_v32  ;;  %13283 = vst [vmem:[#allocation7 + $0x4d8] sm:$0xff] %v11471_v44  ;;  %v14361_v32 = vcombine.high %v735_v49, %v743_v51  ;;  %v750_v44 = vld [vmem:[#allocation5 + $0x1230] sm:$0xff] }
 0x6e3   :  { %11767 = vmatmul.mubr.bf16.gmra.mrb[252].mxu0 %v18751_v26  ;;  %12539 = vmatmul.mubr.bf16.gmra.mrb[252].mxu1 %v18751_v26  ;;  %v758_v26 = vld [vmem:[#allocation5 + $0x1270] sm:$0xff] }
 0x6e4   :  { %11809 = vmatprep.mubr.bf16.mxu0 %v18752_v37  ;;  %12581 = vmatprep.mubr.bf16.mxu1 %v18752_v37  ;;  %v18758_v37 = vld [vmem:[#allocation22_spill] sm:$0xff] }
 0x6e6   :  { %v10703_v10 = vpop.f32.mrb[148].mxu0  ;;  %v11475_v48 = vpop.f32.mrb[148].mxu1 }
 0x6e7   :  { %13296 = vst [vmem:[#allocation7 + $0x540] sm:$0xff] %v10703_v10  ;;  %v10705_v36 = vpop.f32.mrb[149].mxu0  ;;  %13298 = vst [vmem:[#allocation7 + $0x550] sm:$0xff] %v11475_v48  ;;  %v11477_v2 = vpop.f32.mrb[149].mxu1  ;;  %v751_v10 = vld [vmem:[#allocation5 + $0x1238] sm:$0xff] }
 0x6e8   :  { %13297 = vst [vmem:[#allocation7 + $0x548] sm:$0xff] %v10705_v36  ;;  %v10707_v18 = vpop.f32.mrb[150].mxu0  ;;  %13299 = vst [vmem:[#allocation7 + $0x558] sm:$0xff] %v11477_v2  ;;  %v11479_v13 = vpop.f32.mrb[150].mxu1  ;;  %v759_v48 = vld [vmem:[#allocation5 + $0x1278] sm:$0xff]  ;;  %v14358_v36 = vcombine.low %v734_v55, %v742_v30  ;;  %v14375_v2 = vcombine.high %v750_v44, %v758_v26  ;;  %v14392_v30 = vcombine.low %v767_v34, %v775_v12 }
 0x6e9   :  { %13312 = vst [vmem:[#allocation7 + $0x5c0] sm:$0xff] %v10707_v18  ;;  %v10709_v53 = vpop.f32.mrb[151].mxu0  ;;  %13314 = vst [vmem:[#allocation7 + $0x5d0] sm:$0xff] %v11479_v13  ;;  %v11481_v14 = vpop.f32.mrb[151].mxu1  ;;  %v14377_v25 = vcombine.high %v751_v10, %v759_v48  ;;  %v766_v13 = vld [vmem:[#allocation5 + $0x12b0] sm:$0xff] }
 0x6ea   :  { %13313 = vst [vmem:[#allocation7 + $0x5c8] sm:$0xff] %v10709_v53  ;;  %13315 = vst [vmem:[#allocation7 + $0x5d8] sm:$0xff] %v11481_v14  ;;  %v774_v53 = vld [vmem:[#allocation5 + $0x12f0] sm:$0xff] }
 0x6eb   :  { %11810 = vmatmul.mubr.bf16.vlgmr.msra.gmra.mrb[192].mxu0 %v18753_v29  ;;  %12582 = vmatmul.mubr.bf16.vlgmr.msra.gmra.mrb[192].mxu1 %v18753_v29 }
 0x6ec   :  { %11971 = vmatpush1.bf16.msra.mxu0 %v18754_v42  ;;  %12743 = vmatpush1.bf16.msra.mxu1 %v18755_v22  ;;  %v14376_v42 = vcombine.low %v751_v10, %v759_v48  ;;  %v18759_v22 = vld [vmem:[#allocation23_spill] sm:$0xff]  ;;  %v18761_v48 = vld [vmem:[#allocation25_spill] sm:$0xff] }
 0x6ed   :  { %11819 = vmatprep.mubr.bf16.mxu0 %v18756_v9  ;;  %12591 = vmatprep.mubr.bf16.mxu1 %v18756_v9  ;;  %v14393_v9 = vcombine.high %v767_v34, %v775_v12 }
 0x6ee   :  { %v10713_v59 = vpop.f32.mrb[152].mxu0  ;;  %11972 = vmatprep.subr.bf16.mxu0 %v14327_v33  ;;  %v11485_v8 = vpop.f32.mrb[152].mxu1  ;;  %12744 = vmatprep.subr.bf16.mxu1 %v14329_v41  ;;  %v14374_v41 = vcombine.low %v750_v44, %v758_v26 }
 0x6ef   :  { %13328 = vst [vmem:[#allocation7 + $0x640] sm:$0xff] %v10713_v59  ;;  %v10715_v27 = vpop.f32.mrb[153].mxu0  ;;  %13330 = vst [vmem:[#allocation7 + $0x650] sm:$0xff] %v11485_v8  ;;  %v11487_v54 = vpop.f32.mrb[153].mxu1  ;;  %v18760_v59 = vld [vmem:[#allocation24_spill] sm:$0xff]  ;;  %v791_v8 = vld [vmem:[#allocation5 + $0x1378] sm:$0xff] }
 0x6f0   :  { %13329 = vst [vmem:[#allocation7 + $0x648] sm:$0xff] %v10715_v27  ;;  %v10717_v4 = vpop.f32.mrb[154].mxu0  ;;  %11973 = vmatpush1.bf16.msra.mxu0 %v14326_v17  ;;  %13331 = vst [vmem:[#allocation7 + $0x658] sm:$0xff] %v11487_v54  ;;  %v11489_v52 = vpop.f32.mrb[154].mxu1  ;;  %12745 = vmatpush1.bf16.msra.mxu1 %v14328_v46  ;;  %v14391_v17 = vcombine.high %v766_v13, %v774_v53  ;;  %v782_v46 = vld [vmem:[#allocation5 + $0x1330] sm:$0xff]  ;;  %v14390_v27 = vcombine.low %v766_v13, %v774_v53 }
 0x6f1   :  { %13344 = vst [vmem:[#allocation7 + $0x6c0] sm:$0xff] %v10717_v4  ;;  %v10719_v3 = vpop.f32.mrb[155].mxu0  ;;  %11974 = vmatprep.subr.bf16.mxu0 %v14343_v47  ;;  %13346 = vst [vmem:[#allocation7 + $0x6d0] sm:$0xff] %v11489_v52  ;;  %v11491_v60 = vpop.f32.mrb[155].mxu1  ;;  %12746 = vmatprep.subr.bf16.mxu1 %v14345_v39  ;;  %v790_v47 = vld [vmem:[#allocation5 + $0x1370] sm:$0xff]  ;;  %v783_v39 = vld [vmem:[#allocation5 + $0x1338] sm:$0xff] }
 0x6f2   :  { %13345 = vst [vmem:[#allocation7 + $0x6c8] sm:$0xff] %v10719_v3  ;;  %13347 = vst [vmem:[#allocation7 + $0x6d8] sm:$0xff] %v11491_v60  ;;  %v14407_v54 = vcombine.high %v782_v46, %v790_v47  ;;  %v14409_v51 = vcombine.high %v783_v39, %v791_v8  ;;  %v798_v52 = vld [vmem:[#allocation5 + $0x13b0] sm:$0xff]  ;;  %v14406_v44 = vcombine.low %v782_v46, %v790_v47 }
 0x6f3   :  { %11820 = vmatmul.mubr.bf16.gmra.mrb[196].mxu0 %v18757_v0  ;;  %12592 = vmatmul.mubr.bf16.gmra.mrb[196].mxu1 %v18757_v0  ;;  %v806_v3 = vld [vmem:[#allocation5 + $0x13f0] sm:$0xff] }
 0x6f4   :  { %11829 = vmatprep.mubr.bf16.mxu0 %v18758_v37  ;;  %12601 = vmatprep.mubr.bf16.mxu1 %v18758_v37  ;;  %v14408_v37 = vcombine.low %v783_v39, %v791_v8  ;;  %v14423_v10 = vcombine.high %v798_v52, %v806_v3  ;;  %v18763_v8 = vld [vmem:[#allocation27_spill] sm:$0xff] }
 0x6f5   :  { %11975 = vmatpush1.bf16.msra.mxu0 %v14342_v45  ;;  %12747 = vmatpush1.bf16.msra.mxu1 %v14344_v38  ;;  %v799_v38 = vld [vmem:[#allocation5 + $0x13b8] sm:$0xff] }
 0x6f6   :  { %v10723_v57 = vpop.f32.mrb[156].mxu0  ;;  %11976 = vmatprep.subr.bf16.mxu0 %v14359_v1  ;;  %v11495_v18 = vpop.f32.mrb[156].mxu1  ;;  %12748 = vmatprep.subr.bf16.mxu1 %v14361_v32  ;;  %v807_v1 = vld [vmem:[#allocation5 + $0x13f8] sm:$0xff] }
 0x6f7   :  { %13360 = vst [vmem:[#allocation7 + $0x740] sm:$0xff] %v10723_v57  ;;  %v10725_v20 = vpop.f32.mrb[157].mxu0  ;;  %13362 = vst [vmem:[#allocation7 + $0x750] sm:$0xff] %v11495_v18  ;;  %v11497_v14 = vpop.f32.mrb[157].mxu1  ;;  %v814_v57 = vld [vmem:[#allocation5 + $0x1430] sm:$0xff]  ;;  %v815_v18 = vld [vmem:[#allocation5 + $0x1438] sm:$0xff]  ;;  %v14424_v53 = vcombine.low %v799_v38, %v807_v1 }
 0x6f8   :  { %13361 = vst [vmem:[#allocation7 + $0x748] sm:$0xff] %v10725_v20  ;;  %v10727_v33 = vpop.f32.mrb[158].mxu0  ;;  %13363 = vst [vmem:[#allocation7 + $0x758] sm:$0xff] %v11497_v14  ;;  %v11499_v28 = vpop.f32.mrb[158].mxu1  ;;  %v823_v20 = vld [vmem:[#allocation5 + $0x1478] sm:$0xff] }
 0x6f9   :  { %13376 = vst [vmem:[#allocation7 + $0x7c0] sm:$0xff] %v10727_v33  ;;  %v10729_v29 = vpop.f32.mrb[159].mxu0  ;;  %11977 = vmatpush1.bf16.msra.mxu0 %v14358_v36  ;;  %13378 = vst [vmem:[#allocation7 + $0x7d0] sm:$0xff] %v11499_v28  ;;  %v11501_v62 = vpop.f32.mrb[159].mxu1  ;;  %12749 = vmatpush1.bf16.msra.mxu1 %v14360_v61  ;;  %v14425_v36 = vcombine.high %v799_v38, %v807_v1  ;;  %v822_v61 = vld [vmem:[#allocation5 + $0x1470] sm:$0xff]  ;;  %v14441_v12 = vcombine.high %v815_v18, %v823_v20 }
 0x6fa   :  { %13377 = vst [vmem:[#allocation7 + $0x7c8] sm:$0xff] %v10729_v29  ;;  %11978 = vmatprep.subr.bf16.mxu0 %v14375_v2  ;;  %13379 = vst [vmem:[#allocation7 + $0x7d8] sm:$0xff] %v11501_v62  ;;  %12750 = vmatprep.subr.bf16.mxu1 %v14377_v25  ;;  %v18762_v2 = vld [vmem:[#allocation26_spill] sm:$0xff]  ;;  %v14422_v25 = vcombine.low %v798_v52, %v806_v3  ;;  %v14439_v14 = vcombine.high %v814_v57, %v822_v61  ;;  %v830_v28 = vld [vmem:[#allocation5 + $0x14b0] sm:$0xff] }
 0x6fb   :  { %11830 = vmatmul.mubr.bf16.gmra.mrb[200].mxu0 %v18759_v22  ;;  %12602 = vmatmul.mubr.bf16.gmra.mrb[200].mxu1 %v18759_v22  ;;  %v838_v29 = vld [vmem:[#allocation5 + $0x14f0] sm:$0xff]  ;;  %v14438_v46 = vcombine.low %v814_v57, %v822_v61 }
 0x6fc   :  { %11839 = vmatprep.mubr.bf16.mxu0 %v18760_v59  ;;  %12611 = vmatprep.mubr.bf16.mxu1 %v18760_v59  ;;  %v14440_v59 = vcombine.low %v815_v18, %v823_v20  ;;  %v14455_v39 = vcombine.high %v830_v28, %v838_v29  ;;  %v18765_v20 = vld [vmem:[#allocation29_spill] sm:$0xff] }
 0x6fd   :  { %11979 = vmatpush1.bf16.msra.mxu0 %v14374_v41  ;;  %12751 = vmatpush1.bf16.msra.mxu1 %v14376_v42  ;;  %v831_v42 = vld [vmem:[#allocation5 + $0x14b8] sm:$0xff] }
 0x6fe   :  { %v10733_v55 = vpop.f32.mrb[160].mxu0  ;;  %11980 = vmatprep.subr.bf16.mxu0 %v14391_v17  ;;  %v11505_v4 = vpop.f32.mrb[160].mxu1  ;;  %12752 = vmatprep.subr.bf16.mxu1 %v14393_v9  ;;  %v839_v17 = vld [vmem:[#allocation5 + $0x14f8] sm:$0xff] }
 0x6ff   :  { %13392 = vst [vmem:[#allocation7 + $0x840] sm:$0xff] %v10733_v55  ;;  %v10735_v49 = vpop.f32.mrb[161].mxu0  ;;  %13394 = vst [vmem:[#allocation7 + $0x850] sm:$0xff] %v11505_v4  ;;  %v11507_v45 = vpop.f32.mrb[161].mxu1  ;;  %v846_v55 = vld [vmem:[#allocation5 + $0x1530] sm:$0xff]  ;;  %v847_v4 = vld [vmem:[#allocation5 + $0x1538] sm:$0xff]  ;;  %v14456_v3 = vcombine.low %v831_v42, %v839_v17 }
 0x700   :  { %13393 = vst [vmem:[#allocation7 + $0x848] sm:$0xff] %v10735_v49  ;;  %v10737_v60 = vpop.f32.mrb[162].mxu0  ;;  %13395 = vst [vmem:[#allocation7 + $0x858] sm:$0xff] %v11507_v45  ;;  %v11509_v0 = vpop.f32.mrb[162].mxu1  ;;  %v855_v49 = vld [vmem:[#allocation5 + $0x1578] sm:$0xff] }
 0x701   :  { %13408 = vst [vmem:[#allocation7 + $0x8c0] sm:$0xff] %v10737_v60  ;;  %v10739_v32 = vpop.f32.mrb[163].mxu0  ;;  %11981 = vmatpush1.bf16.msra.mxu0 %v14390_v27  ;;  %13410 = vst [vmem:[#allocation7 + $0x8d0] sm:$0xff] %v11509_v0  ;;  %v11511_v26 = vpop.f32.mrb[163].mxu1  ;;  %12753 = vmatpush1.bf16.msra.mxu1 %v14392_v30  ;;  %v14457_v27 = vcombine.high %v831_v42, %v839_v17  ;;  %v854_v30 = vld [vmem:[#allocation5 + $0x1570] sm:$0xff]  ;;  %v14473_v1 = vcombine.high %v847_v4, %v855_v49 }
 0x702   :  { %13409 = vst [vmem:[#allocation7 + $0x8c8] sm:$0xff] %v10739_v32  ;;  %11982 = vmatprep.subr.bf16.mxu0 %v14407_v54  ;;  %13411 = vst [vmem:[#allocation7 + $0x8d8] sm:$0xff] %v11511_v26  ;;  %12754 = vmatprep.subr.bf16.mxu1 %v14409_v51  ;;  %v18764_v54 = vld [vmem:[#allocation28_spill] sm:$0xff]  ;;  %v14454_v51 = vcombine.low %v830_v28, %v838_v29  ;;  %v14471_v45 = vcombine.high %v846_v55, %v854_v30  ;;  %v862_v0 = vld [vmem:[#allocation5 + $0x15b0] sm:$0xff] }
 0x703   :  { %11840 = vmatmul.mubr.bf16.gmra.mrb[204].mxu0 %v18761_v48  ;;  %12612 = vmatmul.mubr.bf16.gmra.mrb[204].mxu1 %v18761_v48  ;;  %v870_v32 = vld [vmem:[#allocation5 + $0x15f0] sm:$0xff]  ;;  %v14470_v57 = vcombine.low %v846_v55, %v854_v30 }
 0x704   :  { %11849 = vmatprep.mubr.bf16.mxu0 %v18762_v2  ;;  %12621 = vmatprep.mubr.bf16.mxu1 %v18762_v2  ;;  %v14472_v2 = vcombine.low %v847_v4, %v855_v49  ;;  %v14487_v18 = vcombine.high %v862_v0, %v870_v32  ;;  %v18767_v49 = vld [vmem:[#allocation31_spill] sm:$0xff] }
 0x705   :  { %11983 = vmatpush1.bf16.msra.mxu0 %v14406_v44  ;;  %12755 = vmatpush1.bf16.msra.mxu1 %v14408_v37  ;;  %v863_v37 = vld [vmem:[#allocation5 + $0x15b8] sm:$0xff] }
 0x706   :  { %v10743_v13 = vpop.f32.mrb[164].mxu0  ;;  %11984 = vmatprep.subr.bf16.mxu0 %v14423_v10  ;;  %v11515_v33 = vpop.f32.mrb[164].mxu1  ;;  %12756 = vmatprep.subr.bf16.mxu1 %v14425_v36  ;;  %v871_v10 = vld [vmem:[#allocation5 + $0x15f8] sm:$0xff] }
 0x707   :  { %13424 = vst [vmem:[#allocation7 + $0x940] sm:$0xff] %v10743_v13  ;;  %v10745_v34 = vpop.f32.mrb[165].mxu0  ;;  %13426 = vst [vmem:[#allocation7 + $0x950] sm:$0xff] %v11515_v33  ;;  %v11517_v41 = vpop.f32.mrb[165].mxu1  ;;  %v878_v13 = vld [vmem:[#allocation5 + $0x1630] sm:$0xff]  ;;  %v879_v33 = vld [vmem:[#allocation5 + $0x1638] sm:$0xff]  ;;  %v14488_v29 = vcombine.low %v863_v37, %v871_v10 }
 0x708   :  { %13425 = vst [vmem:[#allocation7 + $0x948] sm:$0xff] %v10745_v34  ;;  %v10747_v62 = vpop.f32.mrb[166].mxu0  ;;  %13427 = vst [vmem:[#allocation7 + $0x958] sm:$0xff] %v11517_v41  ;;  %v11519_v22 = vpop.f32.mrb[166].mxu1  ;;  %v887_v34 = vld [vmem:[#allocation5 + $0x1678] sm:$0xff] }
 0x709   :  { %13440 = vst [vmem:[#allocation7 + $0x9c0] sm:$0xff] %v10747_v62  ;;  %v10749_v9 = vpop.f32.mrb[167].mxu0  ;;  %11985 = vmatpush1.bf16.msra.mxu0 %v14422_v25  ;;  %13442 = vst [vmem:[#allocation7 + $0x9d0] sm:$0xff] %v11519_v22  ;;  %v11521_v47 = vpop.f32.mrb[167].mxu1  ;;  %12757 = vmatpush1.bf16.msra.mxu1 %v14424_v53  ;;  %v14489_v25 = vcombine.high %v863_v37, %v871_v10  ;;  %v886_v53 = vld [vmem:[#allocation5 + $0x1670] sm:$0xff]  ;;  %v14505_v17 = vcombine.high %v879_v33, %v887_v34 }
 0x70a   :  { %13441 = vst [vmem:[#allocation7 + $0x9c8] sm:$0xff] %v10749_v9  ;;  %11986 = vmatprep.subr.bf16.mxu0 %v14439_v14  ;;  %13443 = vst [vmem:[#allocation7 + $0x9d8] sm:$0xff] %v11521_v47  ;;  %12758 = vmatprep.subr.bf16.mxu1 %v14441_v12  ;;  %v18766_v14 = vld [vmem:[#allocation30_spill] sm:$0xff]  ;;  %v14486_v12 = vcombine.low %v862_v0, %v870_v32  ;;  %v14503_v41 = vcombine.high %v878_v13, %v886_v53  ;;  %v894_v22 = vld [vmem:[#allocation5 + $0x16b0] sm:$0xff] }
 0x70b   :  { %11850 = vmatmul.mubr.bf16.gmra.mrb[208].mxu0 %v18763_v8  ;;  %12622 = vmatmul.mubr.bf16.gmra.mrb[208].mxu1 %v18763_v8  ;;  %v902_v9 = vld [vmem:[#allocation5 + $0x16f0] sm:$0xff]  ;;  %v14502_v55 = vcombine.low %v878_v13, %v886_v53 }
 0x70c   :  { %11859 = vmatprep.mubr.bf16.mxu0 %v18764_v54  ;;  %12631 = vmatprep.mubr.bf16.mxu1 %v18764_v54  ;;  %v14504_v54 = vcombine.low %v879_v33, %v887_v34  ;;  %v14519_v4 = vcombine.high %v894_v22, %v902_v9  ;;  %v18769_v34 = vld [vmem:[#allocation33_spill] sm:$0xff] }
 0x70d   :  { %11987 = vmatpush1.bf16.msra.mxu0 %v14438_v46  ;;  %12759 = vmatpush1.bf16.msra.mxu1 %v14440_v59  ;;  %v895_v59 = vld [vmem:[#allocation5 + $0x16b8] sm:$0xff] }
 0x70e   :  { %v10753_v52 = vpop.f32.mrb[168].mxu0  ;;  %11988 = vmatprep.subr.bf16.mxu0 %v14455_v39  ;;  %v11525_v60 = vpop.f32.mrb[168].mxu1  ;;  %12760 = vmatprep.subr.bf16.mxu1 %v14457_v27  ;;  %v903_v39 = vld [vmem:[#allocation5 + $0x16f8] sm:$0xff] }
 0x70f   :  { %13456 = vst [vmem:[#allocation7 + $0xa40] sm:$0xff] %v10753_v52  ;;  %v10755_v38 = vpop.f32.mrb[169].mxu0  ;;  %13458 = vst [vmem:[#allocation7 + $0xa50] sm:$0xff] %v11525_v60  ;;  %v11527_v44 = vpop.f32.mrb[169].mxu1  ;;  %v910_v52 = vld [vmem:[#allocation5 + $0x1730] sm:$0xff]  ;;  %v911_v60 = vld [vmem:[#allocation5 + $0x1738] sm:$0xff]  ;;  %v14520_v32 = vcombine.low %v895_v59, %v903_v39 }
 0x710   :  { %13457 = vst [vmem:[#allocation7 + $0xa48] sm:$0xff] %v10755_v38  ;;  %v10757_v26 = vpop.f32.mrb[170].mxu0  ;;  %13459 = vst [vmem:[#allocation7 + $0xa58] sm:$0xff] %v11527_v44  ;;  %v11529_v48 = vpop.f32.mrb[170].mxu1  ;;  %v919_v38 = vld [vmem:[#allocation5 + $0x1778] sm:$0xff] }
 0x711   :  { %13472 = vst [vmem:[#allocation7 + $0xac0] sm:$0xff] %v10757_v26  ;;  %v10759_v36 = vpop.f32.mrb[171].mxu0  ;;  %11989 = vmatpush1.bf16.msra.mxu0 %v14454_v51  ;;  %13474 = vst [vmem:[#allocation7 + $0xad0] sm:$0xff] %v11529_v48  ;;  %v11531_v61 = vpop.f32.mrb[171].mxu1  ;;  %12761 = vmatpush1.bf16.msra.mxu1 %v14456_v3  ;;  %v14521_v51 = vcombine.high %v895_v59, %v903_v39  ;;  %v918_v3 = vld [vmem:[#allocation5 + $0x1770] sm:$0xff]  ;;  %v14537_v10 = vcombine.high %v911_v60, %v919_v38 }
 0x712   :  { %13473 = vst [vmem:[#allocation7 + $0xac8] sm:$0xff] %v10759_v36  ;;  %11990 = vmatprep.subr.bf16.mxu0 %v14471_v45  ;;  %13475 = vst [vmem:[#allocation7 + $0xad8] sm:$0xff] %v11531_v61  ;;  %12762 = vmatprep.subr.bf16.mxu1 %v14473_v1  ;;  %v18768_v45 = vld [vmem:[#allocation32_spill] sm:$0xff]  ;;  %v14518_v1 = vcombine.low %v894_v22, %v902_v9  ;;  %v14535_v44 = vcombine.high %v910_v52, %v918_v3  ;;  %v926_v48 = vld [vmem:[#allocation5 + $0x17b0] sm:$0xff] }
 0x713   :  { %11860 = vmatmul.mubr.bf16.gmra.mrb[212].mxu0 %v18765_v20  ;;  %12632 = vmatmul.mubr.bf16.gmra.mrb[212].mxu1 %v18765_v20  ;;  %v934_v36 = vld [vmem:[#allocation5 + $0x17f0] sm:$0xff]  ;;  %v14534_v13 = vcombine.low %v910_v52, %v918_v3  ;;  %v14569_v9 = vcombine.high %v17864_v5, %v17866_v16 }
 0x714   :  { %11869 = vmatprep.mubr.bf16.mxu0 %v18766_v14  ;;  %12641 = vmatprep.mubr.bf16.mxu1 %v18766_v14  ;;  %v14536_v14 = vcombine.low %v911_v60, %v919_v38  ;;  %v14551_v33 = vcombine.high %v926_v48, %v934_v36  ;;  %v18773_v60 = vld [vmem:[#allocation37_spill] sm:$0xff]  ;;  %v18774_v38 = vld [vmem:[#allocation38_spill] sm:$0xff] }
 0x715   :  { %11991 = vmatpush1.bf16.msra.mxu0 %v14470_v57  ;;  %12763 = vmatpush1.bf16.msra.mxu1 %v14472_v2  ;;  %v927_v2 = vld [vmem:[#allocation5 + $0x17b8] sm:$0xff]  ;;  %v18789_v16 = vld [vmem:[#allocation53_spill] sm:$0xff] }
 0x716   :  { %v10763_v28 = vpop.f32.mrb[172].mxu0  ;;  %11992 = vmatprep.subr.bf16.mxu0 %v14487_v18  ;;  %v11535_v62 = vpop.f32.mrb[172].mxu1  ;;  %12764 = vmatprep.subr.bf16.mxu1 %v14489_v25  ;;  %v935_v18 = vld [vmem:[#allocation5 + $0x17f8] sm:$0xff] }
 0x717   :  { %13488 = vst [vmem:[#allocation7 + $0xb40] sm:$0xff] %v10763_v28  ;;  %v10765_v42 = vpop.f32.mrb[173].mxu0  ;;  %13490 = vst [vmem:[#allocation7 + $0xb50] sm:$0xff] %v11535_v62  ;;  %v11537_v46 = vpop.f32.mrb[173].mxu1  ;;  %v18770_v28 = vld [vmem:[#allocation34_spill] sm:$0xff]  ;;  %v14552_v62 = vcombine.low %v927_v2, %v935_v18 }
 0x718   :  { %13489 = vst [vmem:[#allocation7 + $0xb48] sm:$0xff] %v10765_v42  ;;  %v10767_v47 = vpop.f32.mrb[174].mxu0  ;;  %13491 = vst [vmem:[#allocation7 + $0xb58] sm:$0xff] %v11537_v46  ;;  %v11539_v8 = vpop.f32.mrb[174].mxu1  ;;  %v14567_v42 = vcombine.high %v17854_v21, %v17856_v40  ;;  %v999_v21 = vld [vmem:[#allocation5 + $0x19f8] sm:$0xff] }
 0x719   :  { %13504 = vst [vmem:[#allocation7 + $0xbc0] sm:$0xff] %v10767_v47  ;;  %v10769_v27 = vpop.f32.mrb[175].mxu0  ;;  %11993 = vmatpush1.bf16.msra.mxu0 %v14486_v12  ;;  %13506 = vst [vmem:[#allocation7 + $0xbd0] sm:$0xff] %v11539_v8  ;;  %v11541_v30 = vpop.f32.mrb[175].mxu1  ;;  %12765 = vmatpush1.bf16.msra.mxu1 %v14488_v29  ;;  %v14553_v12 = vcombine.high %v927_v2, %v935_v18  ;;  %v14550_v29 = vcombine.low %v926_v48, %v934_v36  ;;  %v18775_v36 = vld [vmem:[#allocation39_spill] sm:$0xff]  ;;  %v18778_v2 = vld [vmem:[#allocation42_spill] sm:$0xff] }
 0x71a   :  { %13505 = vst [vmem:[#allocation7 + $0xbc8] sm:$0xff] %v10769_v27  ;;  %11994 = vmatprep.subr.bf16.mxu0 %v14503_v41  ;;  %13507 = vst [vmem:[#allocation7 + $0xbd8] sm:$0xff] %v11541_v30  ;;  %12766 = vmatprep.subr.bf16.mxu1 %v14505_v17  ;;  %v18771_v27 = vld [vmem:[#allocation35_spill] sm:$0xff] }
 0x71b   :  { %11870 = vmatmul.mubr.bf16.gmra.mrb[216].mxu0 %v18767_v49  ;;  %12642 = vmatmul.mubr.bf16.gmra.mrb[216].mxu1 %v18767_v49  ;;  %v18779_v18 = vld [vmem:[#allocation43_spill] sm:$0xff] }
 0x71c   :  { %11879 = vmatprep.mubr.bf16.mxu0 %v18768_v45  ;;  %12651 = vmatprep.mubr.bf16.mxu1 %v18768_v45 }
 0x71d   :  { %11995 = vmatpush1.bf16.msra.mxu0 %v14502_v55  ;;  %12767 = vmatpush1.bf16.msra.mxu1 %v14504_v54  ;;  %v18772_v55 = vld [vmem:[#allocation36_spill] sm:$0xff] }
 0x71e   :  { %v10773_v0 = vpop.f32.mrb[176].mxu0  ;;  %11996 = vmatprep.subr.bf16.mxu0 %v14519_v4  ;;  %v11545_v26 = vpop.f32.mrb[176].mxu1  ;;  %12768 = vmatprep.subr.bf16.mxu1 %v14521_v51 }
 0x71f   :  { %13520 = vst [vmem:[#allocation7 + $0xc40] sm:$0xff] %v10773_v0  ;;  %v10775_v37 = vpop.f32.mrb[177].mxu0  ;;  %13522 = vst [vmem:[#allocation7 + $0xc50] sm:$0xff] %v11545_v26  ;;  %v11547_v57 = vpop.f32.mrb[177].mxu1 }
 0x720   :  { %13521 = vst [vmem:[#allocation7 + $0xc48] sm:$0xff] %v10775_v37  ;;  %v10777_v61 = vpop.f32.mrb[178].mxu0  ;;  %13523 = vst [vmem:[#allocation7 + $0xc58] sm:$0xff] %v11547_v57  ;;  %v11549_v20 = vpop.f32.mrb[178].mxu1  ;;  %v18776_v57 = vld [vmem:[#allocation40_spill] sm:$0xff] }
 0x721   :  { %13536 = vst [vmem:[#allocation7 + $0xcc0] sm:$0xff] %v10777_v61  ;;  %v10779_v25 = vpop.f32.mrb[179].mxu0  ;;  %11997 = vmatpush1.bf16.msra.mxu0 %v14518_v1  ;;  %13538 = vst [vmem:[#allocation7 + $0xcd0] sm:$0xff] %v11549_v20  ;;  %v11551_v53 = vpop.f32.mrb[179].mxu1  ;;  %12769 = vmatpush1.bf16.msra.mxu1 %v14520_v32  ;;  %v18777_v61 = vld [vmem:[#allocation41_spill] sm:$0xff]  ;;  %v18780_v20 = vld [vmem:[#allocation44_spill] sm:$0xff] }
 0x722   :  { %13537 = vst [vmem:[#allocation7 + $0xcc8] sm:$0xff] %v10779_v25  ;;  %11998 = vmatprep.subr.bf16.mxu0 %v14535_v44  ;;  %13539 = vst [vmem:[#allocation7 + $0xcd8] sm:$0xff] %v11551_v53  ;;  %12770 = vmatprep.subr.bf16.mxu1 %v14537_v10  ;;  %v18781_v25 = vld [vmem:[#allocation45_spill] sm:$0xff]  ;;  %v18783_v53 = vld [vmem:[#allocation47_spill] sm:$0xff] }
 0x723   :  { %11880 = vmatmul.mubr.bf16.gmra.mrb[220].mxu0 %v18769_v34  ;;  %12652 = vmatmul.mubr.bf16.gmra.mrb[220].mxu1 %v18769_v34  ;;  %v18786_v34 = vld [vmem:[#allocation50_spill] sm:$0xff] }
 0x724   :  { %11889 = vmatprep.mubr.bf16.mxu0 %v18770_v28  ;;  %12661 = vmatprep.mubr.bf16.mxu1 %v18770_v28  ;;  %v966_v28 = vld [vmem:[#allocation5 + $0x18f0] sm:$0xff] }
 0x725   :  { %11999 = vmatpush1.bf16.msra.mxu0 %v14534_v13  ;;  %12771 = vmatpush1.bf16.msra.mxu1 %v14536_v14  ;;  %v18782_v13 = vld [vmem:[#allocation46_spill] sm:$0xff]  ;;  %v18784_v14 = vld [vmem:[#allocation48_spill] sm:$0xff] }
 0x726   :  { %v10783_v41 = vpop.f32.mrb[180].mxu0  ;;  %12000 = vmatprep.subr.bf16.mxu0 %v14551_v33  ;;  %v11555_v17 = vpop.f32.mrb[180].mxu1  ;;  %12772 = vmatprep.subr.bf16.mxu1 %v14553_v12  ;;  %v18785_v33 = vld [vmem:[#allocation49_spill] sm:$0xff] }
 0x727   :  { %13552 = vst [vmem:[#allocation7 + $0xd40] sm:$0xff] %v10783_v41  ;;  %v10785_v22 = vpop.f32.mrb[181].mxu0  ;;  %13554 = vst [vmem:[#allocation7 + $0xd50] sm:$0xff] %v11555_v17  ;;  %v11557_v46 = vpop.f32.mrb[181].mxu1  ;;  %v958_v12 = vld [vmem:[#allocation5 + $0x18b0] sm:$0xff]  ;;  %v967_v41 = vld [vmem:[#allocation5 + $0x18f8] sm:$0xff] }
 0x728   :  { %13553 = vst [vmem:[#allocation7 + $0xd48] sm:$0xff] %v10785_v22  ;;  %v10787_v47 = vpop.f32.mrb[182].mxu0  ;;  %13555 = vst [vmem:[#allocation7 + $0xd58] sm:$0xff] %v11557_v46  ;;  %v11559_v59 = vpop.f32.mrb[182].mxu1  ;;  %v982_v17 = vld [vmem:[#allocation5 + $0x1970] sm:$0xff]  ;;  %v18787_v22 = vld [vmem:[#allocation51_spill] sm:$0xff] }
 0x729   :  { %13568 = vst [vmem:[#allocation7 + $0xdc0] sm:$0xff] %v10787_v47  ;;  %v10789_v39 = vpop.f32.mrb[183].mxu0  ;;  %12001 = vmatpush1.bf16.msra.mxu0 %v14550_v29  ;;  %13570 = vst [vmem:[#allocation7 + $0xdd0] sm:$0xff] %v11559_v59  ;;  %v11561_v8 = vpop.f32.mrb[183].mxu1  ;;  %12773 = vmatpush1.bf16.msra.mxu1 %v14552_v62  ;;  %v959_v29 = vld [vmem:[#allocation5 + $0x18b8] sm:$0xff]  ;;  %v14583_v62 = vcombine.high %v958_v12, %v966_v28  ;;  %v14582_v59 = vcombine.low %v958_v12, %v966_v28  ;;  %v1054_v12 = vld [vmem:[#allocation5 + $0x1bb0] sm:$0xff] }
 0x72a   :  { %13569 = vst [vmem:[#allocation7 + $0xdc8] sm:$0xff] %v10789_v39  ;;  %12163 = vmatprep.subr.bf16.mxu0 %v14567_v42  ;;  %13571 = vst [vmem:[#allocation7 + $0xdd8] sm:$0xff] %v11561_v8  ;;  %12935 = vmatprep.subr.bf16.mxu1 %v14569_v9  ;;  %v974_v42 = vld [vmem:[#allocation5 + $0x1930] sm:$0xff]  ;;  %v14585_v9 = vcombine.high %v959_v29, %v967_v41  ;;  %v975_v46 = vld [vmem:[#allocation5 + $0x1938] sm:$0xff]  ;;  %v14584_v8 = vcombine.low %v959_v29, %v967_v41 }
 0x72b   :  { %11890 = vmatmul.mubr.bf16.gmra.mrb[224].mxu0 %v18771_v27  ;;  %12662 = vmatmul.mubr.bf16.gmra.mrb[224].mxu1 %v18771_v27  ;;  %v983_v47 = vld [vmem:[#allocation5 + $0x1978] sm:$0xff]  ;;  %v18788_v39 = vld [vmem:[#allocation52_spill] sm:$0xff]  ;;  %v14599_v27 = vcombine.high %v974_v42, %v982_v17  ;;  %v14598_v40 = vcombine.low %v974_v42, %v982_v17  ;;  %v1062_v28 = vld [vmem:[#allocation5 + $0x1bf0] sm:$0xff] }
 0x72c   :  { %11899 = vmatprep.mubr.bf16.mxu0 %v18772_v55  ;;  %12671 = vmatprep.mubr.bf16.mxu1 %v18772_v55  ;;  %v14601_v55 = vcombine.high %v975_v46, %v983_v47  ;;  %v1055_v29 = vld [vmem:[#allocation5 + $0x1bb8] sm:$0xff]  ;;  %v14679_v17 = vcombine.high %v1054_v12, %v1062_v28 }
 0x72d   :  { %v1063_v41 = vld [vmem:[#allocation5 + $0x1bf8] sm:$0xff] }
 0x72e   :  { %v10793_v30 = vpop.f32.mrb[184].mxu0  ;;  %v11565_v54 = vpop.f32.mrb[184].mxu1 }
 0x72f   :  { %13584 = vst [vmem:[#allocation7 + $0xe40] sm:$0xff] %v10793_v30  ;;  %v10795_v4 = vpop.f32.mrb[185].mxu0  ;;  %13586 = vst [vmem:[#allocation7 + $0xe50] sm:$0xff] %v11565_v54  ;;  %v11567_v49 = vpop.f32.mrb[185].mxu1  ;;  %v990_v30 = vld [vmem:[#allocation5 + $0x19b0] sm:$0xff] }
 0x730   :  { %13585 = vst [vmem:[#allocation7 + $0xe48] sm:$0xff] %v10795_v4  ;;  %v10797_v51 = vpop.f32.mrb[186].mxu0  ;;  %13587 = vst [vmem:[#allocation7 + $0xe58] sm:$0xff] %v11567_v49  ;;  %v11569_v52 = vpop.f32.mrb[186].mxu1  ;;  %v998_v54 = vld [vmem:[#allocation5 + $0x19f0] sm:$0xff]  ;;  %v991_v4 = vld [vmem:[#allocation5 + $0x19b8] sm:$0xff] }
 0x731   :  { %13600 = vst [vmem:[#allocation7 + $0xec0] sm:$0xff] %v10797_v51  ;;  %v10799_v3 = vpop.f32.mrb[187].mxu0  ;;  %13602 = vst [vmem:[#allocation7 + $0xed0] sm:$0xff] %v11569_v52  ;;  %v11571_v45 = vpop.f32.mrb[187].mxu1  ;;  %v14615_v5 = vcombine.high %v990_v30, %v998_v54  ;;  %v1006_v49 = vld [vmem:[#allocation5 + $0x1a30] sm:$0xff]  ;;  %v18790_v52 = vld [vmem:[#allocation54_spill] sm:$0xff] }
 0x732   :  { %13601 = vst [vmem:[#allocation7 + $0xec8] sm:$0xff] %v10799_v3  ;;  %13603 = vst [vmem:[#allocation7 + $0xed8] sm:$0xff] %v11571_v45  ;;  %v1014_v51 = vld [vmem:[#allocation5 + $0x1a70] sm:$0xff]  ;;  %v1007_v3 = vld [vmem:[#allocation5 + $0x1a38] sm:$0xff] }
 0x733   :  { %11900 = vmatmul.mubr.bf16.gmra.mrb[228].mxu0 %v18773_v60  ;;  %12672 = vmatmul.mubr.bf16.gmra.mrb[228].mxu1 %v18773_v60  ;;  %v1015_v45 = vld [vmem:[#allocation5 + $0x1a78] sm:$0xff]  ;;  %v14614_v60 = vcombine.low %v990_v30, %v998_v54 }
 0x734   :  { %11909 = vmatprep.mubr.bf16.mxu0 %v18774_v38  ;;  %12681 = vmatprep.mubr.bf16.mxu1 %v18774_v38  ;;  %v14616_v38 = vcombine.low %v991_v4, %v999_v21 }
 0x736   :  { %v10803_v1 = vpop.f32.mrb[188].mxu0  ;;  %v11575_v0 = vpop.f32.mrb[188].mxu1 }
 0x737   :  { %13616 = vst [vmem:[#allocation7 + $0xf40] sm:$0xff] %v10803_v1  ;;  %v10805_v32 = vpop.f32.mrb[189].mxu0  ;;  %13618 = vst [vmem:[#allocation7 + $0xf50] sm:$0xff] %v11575_v0  ;;  %v11577_v44 = vpop.f32.mrb[189].mxu1  ;;  %v14631_v1 = vcombine.high %v1006_v49, %v1014_v51  ;;  %v14633_v0 = vcombine.high %v1007_v3, %v1015_v45 }
 0x738   :  { %13617 = vst [vmem:[#allocation7 + $0xf48] sm:$0xff] %v10805_v32  ;;  %v10807_v26 = vpop.f32.mrb[190].mxu0  ;;  %13619 = vst [vmem:[#allocation7 + $0xf58] sm:$0xff] %v11577_v44  ;;  %v11579_v37 = vpop.f32.mrb[190].mxu1  ;;  %v1022_v32 = vld [vmem:[#allocation5 + $0x1ab0] sm:$0xff] }
 0x739   :  { %13632 = vst [vmem:[#allocation7 + $0xfc0] sm:$0xff] %v10807_v26  ;;  %v10809_v10 = vpop.f32.mrb[191].mxu0  ;;  %13634 = vst [vmem:[#allocation7 + $0xfd0] sm:$0xff] %v11579_v37  ;;  %v11581_v48 = vpop.f32.mrb[191].mxu1  ;;  %v1030_v44 = vld [vmem:[#allocation5 + $0x1af0] sm:$0xff]  ;;  %v1023_v26 = vld [vmem:[#allocation5 + $0x1ab8] sm:$0xff] }
 0x73a   :  { %13633 = vst [vmem:[#allocation7 + $0xfc8] sm:$0xff] %v10809_v10  ;;  %13635 = vst [vmem:[#allocation7 + $0xfd8] sm:$0xff] %v11581_v48  ;;  %v1031_v37 = vld [vmem:[#allocation5 + $0x1af8] sm:$0xff]  ;;  %v14630_v10 = vcombine.low %v1006_v49, %v1014_v51  ;;  %v14632_v48 = vcombine.low %v1007_v3, %v1015_v45  ;;  %v18795_v49 = vld [vmem:[#allocation59_spill] sm:$0xff] }
 0x73b   :  { %11910 = vmatmul.mubr.bf16.gmra.mrb[232].mxu0 %v18775_v36  ;;  %12682 = vmatmul.mubr.bf16.gmra.mrb[232].mxu1 %v18775_v36  ;;  %v14647_v36 = vcombine.high %v1022_v32, %v1030_v44  ;;  %v1110_v3 = vld [vmem:[#allocation5 + $0x1d70] sm:$0xff]  ;;  %v18796_v45 = vld [vmem:[#allocation60_spill] sm:$0xff] }
 0x73c   :  { %11919 = vmatprep.mubr.bf16.mxu0 %v18776_v57  ;;  %12691 = vmatprep.mubr.bf16.mxu1 %v18776_v57  ;;  %v18791_v57 = vld [vmem:[#allocation55_spill] sm:$0xff] }
 0x743   :  { %11920 = vmatmul.mubr.bf16.gmra.mrb[236].mxu0 %v18777_v61  ;;  %12692 = vmatmul.mubr.bf16.gmra.mrb[236].mxu1 %v18777_v61  ;;  %v14649_v61 = vcombine.high %v1023_v26, %v1031_v37 }
 0x744   :  { %11929 = vmatprep.mubr.bf16.mxu0 %v18778_v2  ;;  %12701 = vmatprep.mubr.bf16.mxu1 %v18778_v2  ;;  %v1038_v2 = vld [vmem:[#allocation5 + $0x1b30] sm:$0xff] }
 0x74b   :  { %11930 = vmatmul.mubr.bf16.gmra.mrb[240].mxu0 %v18779_v18  ;;  %12702 = vmatmul.mubr.bf16.gmra.mrb[240].mxu1 %v18779_v18  ;;  %v1046_v18 = vld [vmem:[#allocation5 + $0x1b70] sm:$0xff] }
 0x74c   :  { %11939 = vmatprep.mubr.bf16.mxu0 %v18780_v20  ;;  %12711 = vmatprep.mubr.bf16.mxu1 %v18780_v20  ;;  %v18792_v20 = vld [vmem:[#allocation56_spill] sm:$0xff] }
 0x753   :  { %11940 = vmatmul.mubr.bf16.gmra.mrb[244].mxu0 %v18781_v25  ;;  %12712 = vmatmul.mubr.bf16.gmra.mrb[244].mxu1 %v18781_v25  ;;  %v1039_v25 = vld [vmem:[#allocation5 + $0x1b38] sm:$0xff] }
 0x754   :  { %11949 = vmatprep.mubr.bf16.mxu0 %v18782_v13  ;;  %12721 = vmatprep.mubr.bf16.mxu1 %v18782_v13  ;;  %v1047_v13 = vld [vmem:[#allocation5 + $0x1b78] sm:$0xff] }
 0x755   :  { %v14664_v42 = vcombine.low %v1039_v25, %v1047_v13 }
 0x75b   :  { %11950 = vmatmul.mubr.bf16.gmra.mrb[248].mxu0 %v18783_v53  ;;  %12722 = vmatmul.mubr.bf16.gmra.mrb[248].mxu1 %v18783_v53  ;;  %v14646_v53 = vcombine.low %v1022_v32, %v1030_v44 }
 0x75c   :  { %11959 = vmatprep.mubr.bf16.mxu0 %v18784_v14  ;;  %12731 = vmatprep.mubr.bf16.mxu1 %v18784_v14  ;;  %v14648_v14 = vcombine.low %v1023_v26, %v1031_v37  ;;  %v1118_v26 = vld [vmem:[#allocation5 + $0x1db0] sm:$0xff] }
 0x75d   :  { %v1126_v37 = vld [vmem:[#allocation5 + $0x1df0] sm:$0xff] }
 0x763   :  { %11960 = vmatmul.mubr.bf16.gmra.mrb[252].mxu0 %v18785_v33  ;;  %12732 = vmatmul.mubr.bf16.gmra.mrb[252].mxu1 %v18785_v33  ;;  %v14663_v33 = vcombine.high %v1038_v2, %v1046_v18 }
 0x764   :  { %12002 = vmatprep.mubr.bf16.mxu0 %v18786_v34  ;;  %12774 = vmatprep.mubr.bf16.mxu1 %v18786_v34  ;;  %v14665_v34 = vcombine.high %v1039_v25, %v1047_v13  ;;  %v1142_v25 = vld [vmem:[#allocation5 + $0x1e70] sm:$0xff]  ;;  %v18798_v13 = vld [vmem:[#allocation62_spill] sm:$0xff] }
 0x76b   :  { %12003 = vmatmul.mubr.bf16.vlgmr.msra.gmra.mrb[192].mxu0 %v18787_v22  ;;  %12775 = vmatmul.mubr.bf16.vlgmr.msra.gmra.mrb[192].mxu1 %v18787_v22  ;;  %v18793_v22 = vld [vmem:[#allocation57_spill] sm:$0xff] }
 0x76c   :  { %12164 = vmatpush1.bf16.msra.mxu0 %v14566_v23  ;;  %12936 = vmatpush1.bf16.msra.mxu1 %v14568_v6  ;;  %v14600_v23 = vcombine.low %v975_v46, %v983_v47  ;;  %v14617_v6 = vcombine.high %v991_v4, %v999_v21  ;;  %v1070_v46 = vld [vmem:[#allocation5 + $0x1c30] sm:$0xff] }
 0x76d   :  { %12012 = vmatprep.mubr.bf16.mxu0 %v18788_v39  ;;  %12784 = vmatprep.mubr.bf16.mxu1 %v18788_v39  ;;  %v1078_v47 = vld [vmem:[#allocation5 + $0x1c70] sm:$0xff]  ;;  %v1071_v39 = vld [vmem:[#allocation5 + $0x1c38] sm:$0xff] }
 0x76e   :  { %12165 = vmatprep.subr.bf16.mxu0 %v14583_v62  ;;  %12937 = vmatprep.subr.bf16.mxu1 %v14585_v9  ;;  %v14662_v62 = vcombine.low %v1038_v2, %v1046_v18  ;;  %v14681_v9 = vcombine.high %v1055_v29, %v1063_v41  ;;  %v14695_v30 = vcombine.high %v1070_v46, %v1078_v47  ;;  %v1086_v4 = vld [vmem:[#allocation5 + $0x1cb0] sm:$0xff] }
 0x76f   :  { %v1094_v21 = vld [vmem:[#allocation5 + $0x1cf0] sm:$0xff] }
 0x770   :  { %12166 = vmatpush1.bf16.msra.mxu0 %v14582_v59  ;;  %12938 = vmatpush1.bf16.msra.mxu1 %v14584_v8  ;;  %v18794_v59 = vld [vmem:[#allocation58_spill] sm:$0xff]  ;;  %v18797_v2 = vld [vmem:[#allocation61_spill] sm:$0xff] }
 0x771   :  { %12167 = vmatprep.subr.bf16.mxu0 %v14599_v27  ;;  %12939 = vmatprep.subr.bf16.mxu1 %v14601_v55  ;;  %v1079_v8 = vld [vmem:[#allocation5 + $0x1c78] sm:$0xff]  ;;  %v14678_v27 = vcombine.low %v1054_v12, %v1062_v28  ;;  %v14680_v55 = vcombine.low %v1055_v29, %v1063_v41  ;;  %v1150_v29 = vld [vmem:[#allocation5 + $0x1eb0] sm:$0xff] }
 0x772   :  { %v14697_v54 = vcombine.high %v1071_v39, %v1079_v8  ;;  %v1158_v41 = vld [vmem:[#allocation5 + $0x1ef0] sm:$0xff] }
 0x773   :  { %12013 = vmatmul.mubr.bf16.gmra.mrb[196].mxu0 %v18789_v16  ;;  %12785 = vmatmul.mubr.bf16.gmra.mrb[196].mxu1 %v18789_v16  ;;  %v14696_v16 = vcombine.low %v1071_v39, %v1079_v8  ;;  %v1174_v39 = vld [vmem:[#allocation5 + $0x1f70] sm:$0xff]  ;;  %v18800_v8 = vld [vmem:[#allocation64_spill] sm:$0xff] }
 0x774   :  { %12022 = vmatprep.mubr.bf16.mxu0 %v18790_v52  ;;  %12794 = vmatprep.mubr.bf16.mxu1 %v18790_v52  ;;  %v1102_v52 = vld [vmem:[#allocation5 + $0x1d30] sm:$0xff] }
 0x775   :  { %12168 = vmatpush1.bf16.msra.mxu0 %v14598_v40  ;;  %12940 = vmatpush1.bf16.msra.mxu1 %v14600_v23  ;;  %v1087_v40 = vld [vmem:[#allocation5 + $0x1cb8] sm:$0xff]  ;;  %v14727_v32 = vcombine.high %v1102_v52, %v1110_v3 }
 0x776   :  { %12169 = vmatprep.subr.bf16.mxu0 %v14615_v5  ;;  %12941 = vmatprep.subr.bf16.mxu1 %v14617_v6  ;;  %v1095_v23 = vld [vmem:[#allocation5 + $0x1cf8] sm:$0xff]  ;;  %v14694_v5 = vcombine.low %v1070_v46, %v1078_v47  ;;  %v14711_v6 = vcombine.high %v1086_v4, %v1094_v21  ;;  %v18799_v46 = vld [vmem:[#allocation63_spill] sm:$0xff] }
 0x777   :  { %v14713_v51 = vcombine.high %v1087_v40, %v1095_v23 }
 0x779   :  { %12170 = vmatpush1.bf16.msra.mxu0 %v14614_v60  ;;  %12942 = vmatpush1.bf16.msra.mxu1 %v14616_v38  ;;  %v1103_v60 = vld [vmem:[#allocation5 + $0x1d38] sm:$0xff] }
 0x77a   :  { %12171 = vmatprep.subr.bf16.mxu0 %v14631_v1  ;;  %12943 = vmatprep.subr.bf16.mxu1 %v14633_v0  ;;  %v1111_v38 = vld [vmem:[#allocation5 + $0x1d78] sm:$0xff]  ;;  %v14710_v1 = vcombine.low %v1086_v4, %v1094_v21  ;;  %v14712_v0 = vcombine.low %v1087_v40, %v1095_v23  ;;  %v1182_v40 = vld [vmem:[#allocation5 + $0x1fb0] sm:$0xff] }
 0x77b   :  { %12023 = vmatmul.mubr.bf16.gmra.mrb[200].mxu0 %v18791_v57  ;;  %12795 = vmatmul.mubr.bf16.gmra.mrb[200].mxu1 %v18791_v57  ;;  %v14729_v44 = vcombine.high %v1103_v60, %v1111_v38  ;;  %v14728_v57 = vcombine.low %v1103_v60, %v1111_v38  ;;  %v1190_v23 = vld [vmem:[#allocation5 + $0x1ff0] sm:$0xff] }
 0x77c   :  { %12032 = vmatprep.mubr.bf16.mxu0 %v18792_v20  ;;  %12804 = vmatprep.mubr.bf16.mxu1 %v18792_v20  ;;  %v1134_v20 = vld [vmem:[#allocation5 + $0x1e30] sm:$0xff]  ;;  %v14806_v60 = vcombine.low %v1182_v40, %v1190_v23 }
 0x77d   :  { %12172 = vmatpush1.bf16.msra.mxu0 %v14630_v10  ;;  %12944 = vmatpush1.bf16.msra.mxu1 %v14632_v48  ;;  %v1119_v10 = vld [vmem:[#allocation5 + $0x1db8] sm:$0xff]  ;;  %v14759_v12 = vcombine.high %v1134_v20, %v1142_v25 }
 0x77e   :  { %12173 = vmatprep.subr.bf16.mxu0 %v14647_v36  ;;  %12945 = vmatprep.subr.bf16.mxu1 %v14649_v61  ;;  %v1127_v48 = vld [vmem:[#allocation5 + $0x1df8] sm:$0xff]  ;;  %v14726_v36 = vcombine.low %v1102_v52, %v1110_v3  ;;  %v14743_v61 = vcombine.high %v1118_v26, %v1126_v37  ;;  %v18801_v52 = vld [vmem:[#allocation65_spill] sm:$0xff] }
 0x77f   :  { %v14745_v18 = vcombine.high %v1119_v10, %v1127_v48 }
 0x781   :  { %12174 = vmatpush1.bf16.msra.mxu0 %v14646_v53  ;;  %12946 = vmatpush1.bf16.msra.mxu1 %v14648_v14  ;;  %v1135_v53 = vld [vmem:[#allocation5 + $0x1e38] sm:$0xff] }
 0x782   :  { %12175 = vmatprep.subr.bf16.mxu0 %v14663_v33  ;;  %12947 = vmatprep.subr.bf16.mxu1 %v14665_v34  ;;  %v1143_v14 = vld [vmem:[#allocation5 + $0x1e78] sm:$0xff]  ;;  %v14742_v33 = vcombine.low %v1118_v26, %v1126_v37  ;;  %v14744_v34 = vcombine.low %v1119_v10, %v1127_v48  ;;  %v18807_v26 = vld [vmem:[#allocation71_spill] sm:$0xff]  ;;  %v18808_v37 = vld [vmem:[#allocation72_spill] sm:$0xff] }
 0x783   :  { %12033 = vmatmul.mubr.bf16.gmra.mrb[204].mxu0 %v18793_v22  ;;  %12805 = vmatmul.mubr.bf16.gmra.mrb[204].mxu1 %v18793_v22  ;;  %v14761_v28 = vcombine.high %v1135_v53, %v1143_v14  ;;  %v14760_v22 = vcombine.low %v1135_v53, %v1143_v14  ;;  %v18809_v10 = vld [vmem:[#allocation73_spill] sm:$0xff]  ;;  %v18810_v48 = vld [vmem:[#allocation74_spill] sm:$0xff]  ;;  %v18819_v53 = vld [vmem:[#allocation83_spill] sm:$0xff] }
 0x784   :  { %12042 = vmatprep.mubr.bf16.mxu0 %v18794_v59  ;;  %12814 = vmatprep.mubr.bf16.mxu1 %v18794_v59  ;;  %v1166_v59 = vld [vmem:[#allocation5 + $0x1f30] sm:$0xff]  ;;  %v18820_v14 = vld [vmem:[#allocation84_spill] sm:$0xff] }
 0x785   :  { %12176 = vmatpush1.bf16.msra.mxu0 %v14662_v62  ;;  %12948 = vmatpush1.bf16.msra.mxu1 %v14664_v42  ;;  %v1151_v62 = vld [vmem:[#allocation5 + $0x1eb8] sm:$0xff]  ;;  %v14791_v4 = vcombine.high %v1166_v59, %v1174_v39 }
 0x786   :  { %12177 = vmatprep.subr.bf16.mxu0 %v14679_v17  ;;  %12949 = vmatprep.subr.bf16.mxu1 %v14681_v9  ;;  %v1159_v42 = vld [vmem:[#allocation5 + $0x1ef8] sm:$0xff]  ;;  %v14758_v17 = vcombine.low %v1134_v20, %v1142_v25  ;;  %v14775_v9 = vcombine.high %v1150_v29, %v1158_v41  ;;  %v18816_v20 = vld [vmem:[#allocation80_spill] sm:$0xff]  ;;  %v18817_v25 = vld [vmem:[#allocation81_spill] sm:$0xff] }
 0x787   :  { %v14777_v47 = vcombine.high %v1151_v62, %v1159_v42 }
 0x789   :  { %12178 = vmatpush1.bf16.msra.mxu0 %v14678_v27  ;;  %12950 = vmatpush1.bf16.msra.mxu1 %v14680_v55  ;;  %v1167_v27 = vld [vmem:[#allocation5 + $0x1f38] sm:$0xff] }
 0x78a   :  { %12179 = vmatprep.subr.bf16.mxu0 %v14695_v30  ;;  %12951 = vmatprep.subr.bf16.mxu1 %v14697_v54  ;;  %v1175_v55 = vld [vmem:[#allocation5 + $0x1f78] sm:$0xff]  ;;  %v14774_v30 = vcombine.low %v1150_v29, %v1158_v41  ;;  %v14776_v54 = vcombine.low %v1151_v62, %v1159_v42  ;;  %v18825_v29 = vld [vmem:[#allocation89_spill] sm:$0xff]  ;;  %v18827_v62 = vld [vmem:[#allocation91_spill] sm:$0xff] }
 0x78b   :  { %12043 = vmatmul.mubr.bf16.gmra.mrb[208].mxu0 %v18795_v49  ;;  %12815 = vmatmul.mubr.bf16.gmra.mrb[208].mxu1 %v18795_v49  ;;  %v14793_v21 = vcombine.high %v1167_v27, %v1175_v55  ;;  %v14792_v49 = vcombine.low %v1167_v27, %v1175_v55  ;;  %v18826_v41 = vld [vmem:[#allocation90_spill] sm:$0xff]  ;;  %v18828_v42 = vld [vmem:[#allocation93_spill] sm:$0xff] }
 0x78c   :  { %12052 = vmatprep.mubr.bf16.mxu0 %v18796_v45  ;;  %12824 = vmatprep.mubr.bf16.mxu1 %v18796_v45  ;;  %v18802_v45 = vld [vmem:[#allocation66_spill] sm:$0xff] }
 0x78d   :  { %12180 = vmatpush1.bf16.msra.mxu0 %v14694_v5  ;;  %12952 = vmatpush1.bf16.msra.mxu1 %v14696_v16  ;;  %v1183_v5 = vld [vmem:[#allocation5 + $0x1fb8] sm:$0xff] }
 0x78e   :  { %12181 = vmatprep.subr.bf16.mxu0 %v14711_v6  ;;  %12953 = vmatprep.subr.bf16.mxu1 %v14713_v51  ;;  %v1191_v16 = vld [vmem:[#allocation5 + $0x1ff8] sm:$0xff]  ;;  %v14790_v6 = vcombine.low %v1166_v59, %v1174_v39  ;;  %v14807_v51 = vcombine.high %v1182_v40, %v1190_v23 }
 0x78f   :  { %v14809_v3 = vcombine.high %v1183_v5, %v1191_v16  ;;  %v14808_v38 = vcombine.low %v1183_v5, %v1191_v16 }
 0x791   :  { %12182 = vmatpush1.bf16.msra.mxu0 %v14710_v1  ;;  %12954 = vmatpush1.bf16.msra.mxu1 %v14712_v0  ;;  %v18803_v1 = vld [vmem:[#allocation67_spill] sm:$0xff]  ;;  %v18804_v0 = vld [vmem:[#allocation68_spill] sm:$0xff] }
 0x792   :  { %12183 = vmatprep.subr.bf16.mxu0 %v14727_v32  ;;  %12955 = vmatprep.subr.bf16.mxu1 %v14729_v44  ;;  %v18805_v32 = vld [vmem:[#allocation69_spill] sm:$0xff]  ;;  %v18806_v44 = vld [vmem:[#allocation70_spill] sm:$0xff] }
 0x793   :  { %12053 = vmatmul.mubr.bf16.gmra.mrb[212].mxu0 %v18797_v2  ;;  %12825 = vmatmul.mubr.bf16.gmra.mrb[212].mxu1 %v18797_v2  ;;  %v18814_v2 = vld [vmem:[#allocation78_spill] sm:$0xff] }
 0x794   :  { %12062 = vmatprep.mubr.bf16.mxu0 %v18798_v13  ;;  %12834 = vmatprep.mubr.bf16.mxu1 %v18798_v13  ;;  %v18818_v13 = vld [vmem:[#allocation82_spill] sm:$0xff] }
 0x795   :  { %12184 = vmatpush1.bf16.msra.mxu0 %v14726_v36  ;;  %12956 = vmatpush1.bf16.msra.mxu1 %v14728_v57  ;;  %v18811_v36 = vld [vmem:[#allocation75_spill] sm:$0xff]  ;;  %v18812_v57 = vld [vmem:[#allocation76_spill] sm:$0xff] }
 0x796   :  { %12185 = vmatprep.subr.bf16.mxu0 %v14743_v61  ;;  %12957 = vmatprep.subr.bf16.mxu1 %v14745_v18  ;;  %v18813_v61 = vld [vmem:[#allocation77_spill] sm:$0xff]  ;;  %v18815_v18 = vld [vmem:[#allocation79_spill] sm:$0xff] }
 0x799   :  { %12186 = vmatpush1.bf16.msra.mxu0 %v14742_v33  ;;  %12958 = vmatpush1.bf16.msra.mxu1 %v14744_v34  ;;  %v18821_v33 = vld [vmem:[#allocation85_spill] sm:$0xff]  ;;  %v18822_v34 = vld [vmem:[#allocation86_spill] sm:$0xff] }
 0x79a   :  { %12187 = vmatprep.subr.bf16.mxu0 %v14759_v12  ;;  %12959 = vmatprep.subr.bf16.mxu1 %v14761_v28  ;;  %v18823_v12 = vld [vmem:[#allocation87_spill] sm:$0xff]  ;;  %v18824_v28 = vld [vmem:[#allocation88_spill] sm:$0xff] }
 0x79b   :  { %12063 = vmatmul.mubr.bf16.gmra.mrb[216].mxu0 %v18799_v46  ;;  %12835 = vmatmul.mubr.bf16.gmra.mrb[216].mxu1 %v18799_v46 }
 0x79c   :  { %12072 = vmatprep.mubr.bf16.mxu0 %v18800_v8  ;;  %12844 = vmatprep.mubr.bf16.mxu1 %v18800_v8 }
 0x79d   :  { %12188 = vmatpush1.bf16.msra.mxu0 %v14758_v17  ;;  %12960 = vmatpush1.bf16.msra.mxu1 %v14760_v22 }
 0x79e   :  { %12189 = vmatprep.subr.bf16.mxu0 %v14775_v9  ;;  %12961 = vmatprep.subr.bf16.mxu1 %v14777_v47 }
 0x7a1   :  { %12190 = vmatpush1.bf16.msra.mxu0 %v14774_v30  ;;  %12962 = vmatpush1.bf16.msra.mxu1 %v14776_v54 }
 0x7a2   :  { %12191 = vmatprep.subr.bf16.mxu0 %v14791_v4  ;;  %12963 = vmatprep.subr.bf16.mxu1 %v14793_v21 }
 0x7a3   :  { %12073 = vmatmul.mubr.bf16.gmra.mrb[220].mxu0 %v18801_v52  ;;  %12845 = vmatmul.mubr.bf16.gmra.mrb[220].mxu1 %v18801_v52 }
 0x7a4   :  { %12082 = vmatprep.mubr.bf16.mxu0 %v18802_v45  ;;  %12854 = vmatprep.mubr.bf16.mxu1 %v18802_v45 }
 0x7a5   :  { %12192 = vmatpush1.bf16.msra.mxu0 %v14790_v6  ;;  %12964 = vmatpush1.bf16.msra.mxu1 %v14792_v49 }
 0x7a6   :  { %12193 = vmatprep.subr.bf16.mxu0 %v14807_v51  ;;  %12965 = vmatprep.subr.bf16.mxu1 %v14809_v3 }
 0x7a9   :  { %12194 = vmatpush1.bf16.msra.mxu0 %v14806_v60  ;;  %12966 = vmatpush1.bf16.msra.mxu1 %v14808_v38 }
 0x7ab   :  { %12083 = vmatmul.mubr.bf16.gmra.mrb[224].mxu0 %v18803_v1  ;;  %12855 = vmatmul.mubr.bf16.gmra.mrb[224].mxu1 %v18803_v1 }
 0x7ac   :  { %12092 = vmatprep.mubr.bf16.mxu0 %v18804_v0  ;;  %12864 = vmatprep.mubr.bf16.mxu1 %v18804_v0 }
 0x7b3   :  { %12093 = vmatmul.mubr.bf16.gmra.mrb[228].mxu0 %v18805_v32  ;;  %12865 = vmatmul.mubr.bf16.gmra.mrb[228].mxu1 %v18805_v32 }
 0x7b4   :  { %12102 = vmatprep.mubr.bf16.mxu0 %v18806_v44  ;;  %12874 = vmatprep.mubr.bf16.mxu1 %v18806_v44 }
 0x7bb   :  { %12103 = vmatmul.mubr.bf16.gmra.mrb[232].mxu0 %v18807_v26  ;;  %12875 = vmatmul.mubr.bf16.gmra.mrb[232].mxu1 %v18807_v26 }
 0x7bc   :  { %12112 = vmatprep.mubr.bf16.mxu0 %v18808_v37  ;;  %12884 = vmatprep.mubr.bf16.mxu1 %v18808_v37 }
 0x7c3   :  { %12113 = vmatmul.mubr.bf16.gmra.mrb[236].mxu0 %v18809_v10  ;;  %12885 = vmatmul.mubr.bf16.gmra.mrb[236].mxu1 %v18809_v10 }
 0x7c4   :  { %12122 = vmatprep.mubr.bf16.mxu0 %v18810_v48  ;;  %12894 = vmatprep.mubr.bf16.mxu1 %v18810_v48 }
 0x7cb   :  { %12123 = vmatmul.mubr.bf16.gmra.mrb[240].mxu0 %v18811_v36  ;;  %12895 = vmatmul.mubr.bf16.gmra.mrb[240].mxu1 %v18811_v36 }
 0x7cc   :  { %12132 = vmatprep.mubr.bf16.mxu0 %v18812_v57  ;;  %12904 = vmatprep.mubr.bf16.mxu1 %v18812_v57 }
 0x7d3   :  { %12133 = vmatmul.mubr.bf16.gmra.mrb[244].mxu0 %v18813_v61  ;;  %12905 = vmatmul.mubr.bf16.gmra.mrb[244].mxu1 %v18813_v61 }
 0x7d4   :  { %12142 = vmatprep.mubr.bf16.mxu0 %v18814_v2  ;;  %12914 = vmatprep.mubr.bf16.mxu1 %v18814_v2 }
 0x7db   :  { %12143 = vmatmul.mubr.bf16.gmra.mrb[248].mxu0 %v18815_v18  ;;  %12915 = vmatmul.mubr.bf16.gmra.mrb[248].mxu1 %v18815_v18 }
 0x7dc   :  { %12152 = vmatprep.mubr.bf16.mxu0 %v18816_v20  ;;  %12924 = vmatprep.mubr.bf16.mxu1 %v18816_v20 }
 0x7e3   :  { %12153 = vmatmul.mubr.bf16.gmra.mrb[252].mxu0 %v18817_v25  ;;  %12925 = vmatmul.mubr.bf16.gmra.mrb[252].mxu1 %v18817_v25 }
 0x7e4   :  { %12195 = vmatprep.mubr.bf16.mxu0 %v18818_v13  ;;  %12967 = vmatprep.mubr.bf16.mxu1 %v18818_v13 }
 0x7eb   :  { %12196 = vmatmul.mubr.bf16.vlgmr.msra.gmra.mrb[192].mxu0 %v18819_v53  ;;  %12968 = vmatmul.mubr.bf16.vlgmr.msra.gmra.mrb[192].mxu1 %v18819_v53 }
 0x7ec   :  { %12205 = vmatprep.mubr.bf16.mxu0 %v18820_v14  ;;  %12977 = vmatprep.mubr.bf16.mxu1 %v18820_v14 }
 0x7f3   :  { %12206 = vmatmul.mubr.bf16.gmra.mrb[196].mxu0 %v18821_v33  ;;  %12978 = vmatmul.mubr.bf16.gmra.mrb[196].mxu1 %v18821_v33 }
 0x7f4   :  { %12215 = vmatprep.mubr.bf16.mxu0 %v18822_v34  ;;  %12987 = vmatprep.mubr.bf16.mxu1 %v18822_v34 }
 0x7fb   :  { %12216 = vmatmul.mubr.bf16.gmra.mrb[200].mxu0 %v18823_v12  ;;  %12988 = vmatmul.mubr.bf16.gmra.mrb[200].mxu1 %v18823_v12 }
 0x7fc   :  { %12225 = vmatprep.mubr.bf16.mxu0 %v18824_v28  ;;  %12997 = vmatprep.mubr.bf16.mxu1 %v18824_v28 }
 0x803   :  { %12226 = vmatmul.mubr.bf16.gmra.mrb[204].mxu0 %v18825_v29  ;;  %12998 = vmatmul.mubr.bf16.gmra.mrb[204].mxu1 %v18825_v29 }
 0x804   :  { %12235 = vmatprep.mubr.bf16.mxu0 %v18826_v41  ;;  %13007 = vmatprep.mubr.bf16.mxu1 %v18826_v41 }
 0x80b   :  { %12236 = vmatmul.mubr.bf16.gmra.mrb[208].mxu0 %v18827_v62  ;;  %13008 = vmatmul.mubr.bf16.gmra.mrb[208].mxu1 %v18827_v62 }
 0x80c   :  { %12245 = vmatprep.mubr.bf16.mxu0 %v18731_v15  ;;  %13017 = vmatprep.mubr.bf16.mxu1 %v18731_v15 }
 0x813   :  { %12246 = vmatmul.mubr.bf16.gmra.mrb[212].mxu0 %v18828_v42  ;;  %13018 = vmatmul.mubr.bf16.gmra.mrb[212].mxu1 %v18828_v42 }
 0x814   :  { %12255 = vmatprep.mubr.bf16.mxu0 %v18632_v58  ;;  %13027 = vmatprep.mubr.bf16.mxu1 %v18632_v58  ;;  %v18837_v58 = vld [vmem:[#allocation105_spill] sm:$0xff] }
 0x81b   :  { %12256 = vmatmul.mubr.bf16.gmra.mrb[216].mxu0 %v18733_v43  ;;  %13028 = vmatmul.mubr.bf16.gmra.mrb[216].mxu1 %v18733_v43 }
 0x81c   :  { %12265 = vmatprep.mubr.bf16.mxu0 %v18634_v35  ;;  %13037 = vmatprep.mubr.bf16.mxu1 %v18634_v35 }
 0x823   :  { %12266 = vmatmul.mubr.bf16.gmra.mrb[220].mxu0 %v17005_v63  ;;  %13038 = vmatmul.mubr.bf16.gmra.mrb[220].mxu1 %v17005_v63  ;;  %v18829_v63 = vld [vmem:[#allocation97_spill] sm:$0xff] }
 0x824   :  { %12275 = vmatprep.mubr.bf16.mxu0 %v17007_v11  ;;  %13047 = vmatprep.mubr.bf16.mxu1 %v17007_v11  ;;  %v18830_v11 = vld [vmem:[#allocation98_spill] sm:$0xff] }
 0x82b   :  { %12276 = vmatmul.mubr.bf16.gmra.mrb[224].mxu0 %v17015_v50  ;;  %13048 = vmatmul.mubr.bf16.gmra.mrb[224].mxu1 %v17015_v50  ;;  %v18831_v50 = vld [vmem:[#allocation99_spill] sm:$0xff] }
 0x82c   :  { %12285 = vmatprep.mubr.bf16.mxu0 %v17019_v24  ;;  %13057 = vmatprep.mubr.bf16.mxu1 %v17019_v24  ;;  %v18832_v24 = vld [vmem:[#allocation100_spill] sm:$0xff] }
 0x833   :  { %12286 = vmatmul.mubr.bf16.gmra.mrb[228].mxu0 %v17025_v19  ;;  %13058 = vmatmul.mubr.bf16.gmra.mrb[228].mxu1 %v17025_v19  ;;  %v18833_v19 = vld [vmem:[#allocation101_spill] sm:$0xff] }
 0x834   :  { %12295 = vmatprep.mubr.bf16.mxu0 %v17027_v31  ;;  %13067 = vmatprep.mubr.bf16.mxu1 %v17027_v31  ;;  %v18834_v31 = vld [vmem:[#allocation102_spill] sm:$0xff] }
 0x83b   :  { %12296 = vmatmul.mubr.bf16.gmra.mrb[232].mxu0 %v17033_v56  ;;  %13068 = vmatmul.mubr.bf16.gmra.mrb[232].mxu1 %v17033_v56  ;;  %v18835_v56 = vld [vmem:[#allocation103_spill] sm:$0xff] }
 0x83c   :  { %12305 = vmatprep.mubr.bf16.mxu0 %v17035_v7  ;;  %13077 = vmatprep.mubr.bf16.mxu1 %v17035_v7  ;;  %v18836_v7 = vld [vmem:[#allocation104_spill] sm:$0xff] }
 0x843   :  { %12306 = vmatmul.mubr.bf16.gmra.mrb[236].mxu0 %v18829_v63  ;;  %13078 = vmatmul.mubr.bf16.gmra.mrb[236].mxu1 %v18829_v63 }
 0x844   :  { %12315 = vmatprep.mubr.bf16.mxu0 %v18830_v11  ;;  %13087 = vmatprep.mubr.bf16.mxu1 %v18830_v11 }
 0x84b   :  { %12316 = vmatmul.mubr.bf16.gmra.mrb[240].mxu0 %v18831_v50  ;;  %13088 = vmatmul.mubr.bf16.gmra.mrb[240].mxu1 %v18831_v50 }
 0x84c   :  { %12325 = vmatprep.mubr.bf16.mxu0 %v18832_v24  ;;  %13097 = vmatprep.mubr.bf16.mxu1 %v18832_v24 }
 0x853   :  { %12326 = vmatmul.mubr.bf16.gmra.mrb[244].mxu0 %v18833_v19  ;;  %13098 = vmatmul.mubr.bf16.gmra.mrb[244].mxu1 %v18833_v19 }
 0x854   :  { %12335 = vmatprep.mubr.bf16.mxu0 %v18834_v31  ;;  %13107 = vmatprep.mubr.bf16.mxu1 %v18834_v31 }
 0x85b   :  { %12336 = vmatmul.mubr.bf16.gmra.mrb[248].mxu0 %v18835_v56  ;;  %13108 = vmatmul.mubr.bf16.gmra.mrb[248].mxu1 %v18835_v56 }
 0x85c   :  { %12345 = vmatprep.mubr.bf16.mxu0 %v18836_v7  ;;  %13117 = vmatprep.mubr.bf16.mxu1 %v18836_v7 }
 0x863   :  { %12346 = vmatmul.mubr.bf16.gmra.mrb[252].mxu0 %v18837_v58  ;;  %13118 = vmatmul.mubr.bf16.gmra.mrb[252].mxu1 %v18837_v58 }
 0x8be   :  { %v12197_v35 = vpop.f32.mrb[192].mxu0  ;;  %v12969_v43 = vpop.f32.mrb[192].mxu1 }
 0x8bf   :  { %13140 = vst [vmem:[#allocation7 + $0x60] sm:$0xff] %v12197_v35  ;;  %v12199_v15 = vpop.f32.mrb[193].mxu0  ;;  %13142 = vst [vmem:[#allocation7 + $0x70] sm:$0xff] %v12969_v43  ;;  %v12971_v17 = vpop.f32.mrb[193].mxu1 }
 0x8c0   :  { %13141 = vst [vmem:[#allocation7 + $0x68] sm:$0xff] %v12199_v15  ;;  %v12201_v22 = vpop.f32.mrb[194].mxu0  ;;  %13143 = vst [vmem:[#allocation7 + $0x78] sm:$0xff] %v12971_v17  ;;  %v12973_v9 = vpop.f32.mrb[194].mxu1 }
 0x8c1   :  { %13156 = vst [vmem:[#allocation7 + $0xe0] sm:$0xff] %v12201_v22  ;;  %v12203_v46 = vpop.f32.mrb[195].mxu0  ;;  %13158 = vst [vmem:[#allocation7 + $0xf0] sm:$0xff] %v12973_v9  ;;  %v12975_v47 = vpop.f32.mrb[195].mxu1 }
 0x8c2   :  { %13157 = vst [vmem:[#allocation7 + $0xe8] sm:$0xff] %v12203_v46  ;;  %13159 = vst [vmem:[#allocation7 + $0xf8] sm:$0xff] %v12975_v47 }
 0x8c6   :  { %v12207_v59 = vpop.f32.mrb[196].mxu0  ;;  %v12979_v39 = vpop.f32.mrb[196].mxu1 }
 0x8c7   :  { %13172 = vst [vmem:[#allocation7 + $0x160] sm:$0xff] %v12207_v59  ;;  %v12209_v8 = vpop.f32.mrb[197].mxu0  ;;  %13174 = vst [vmem:[#allocation7 + $0x170] sm:$0xff] %v12979_v39  ;;  %v12981_v27 = vpop.f32.mrb[197].mxu1 }
 0x8c8   :  { %13173 = vst [vmem:[#allocation7 + $0x168] sm:$0xff] %v12209_v8  ;;  %v12211_v55 = vpop.f32.mrb[198].mxu0  ;;  %13175 = vst [vmem:[#allocation7 + $0x178] sm:$0xff] %v12981_v27  ;;  %v12983_v30 = vpop.f32.mrb[198].mxu1 }
 0x8c9   :  { %13188 = vst [vmem:[#allocation7 + $0x1e0] sm:$0xff] %v12211_v55  ;;  %v12213_v54 = vpop.f32.mrb[199].mxu0  ;;  %13190 = vst [vmem:[#allocation7 + $0x1f0] sm:$0xff] %v12983_v30  ;;  %v12985_v4 = vpop.f32.mrb[199].mxu1 }
 0x8ca   :  { %13189 = vst [vmem:[#allocation7 + $0x1e8] sm:$0xff] %v12213_v54  ;;  %13191 = vst [vmem:[#allocation7 + $0x1f8] sm:$0xff] %v12985_v4 }
 0x8ce   :  { %v12217_v21 = vpop.f32.mrb[200].mxu0  ;;  %v12989_v40 = vpop.f32.mrb[200].mxu1 }
 0x8cf   :  { %13204 = vst [vmem:[#allocation7 + $0x260] sm:$0xff] %v12217_v21  ;;  %v12219_v23 = vpop.f32.mrb[201].mxu0  ;;  %13206 = vst [vmem:[#allocation7 + $0x270] sm:$0xff] %v12989_v40  ;;  %v12991_v5 = vpop.f32.mrb[201].mxu1 }
 0x8d0   :  { %13205 = vst [vmem:[#allocation7 + $0x268] sm:$0xff] %v12219_v23  ;;  %v12221_v16 = vpop.f32.mrb[202].mxu0  ;;  %13207 = vst [vmem:[#allocation7 + $0x278] sm:$0xff] %v12991_v5  ;;  %v12993_v6 = vpop.f32.mrb[202].mxu1 }
 0x8d1   :  { %13220 = vst [vmem:[#allocation7 + $0x2e0] sm:$0xff] %v12221_v16  ;;  %v12223_v49 = vpop.f32.mrb[203].mxu0  ;;  %13222 = vst [vmem:[#allocation7 + $0x2f0] sm:$0xff] %v12993_v6  ;;  %v12995_v51 = vpop.f32.mrb[203].mxu1 }
 0x8d2   :  { %13221 = vst [vmem:[#allocation7 + $0x2e8] sm:$0xff] %v12223_v49  ;;  %13223 = vst [vmem:[#allocation7 + $0x2f8] sm:$0xff] %v12995_v51 }
 0x8d6   :  { %v12227_v52 = vpop.f32.mrb[204].mxu0  ;;  %v12999_v3 = vpop.f32.mrb[204].mxu1 }
 0x8d7   :  { %13236 = vst [vmem:[#allocation7 + $0x360] sm:$0xff] %v12227_v52  ;;  %v12229_v45 = vpop.f32.mrb[205].mxu0  ;;  %13238 = vst [vmem:[#allocation7 + $0x370] sm:$0xff] %v12999_v3  ;;  %v13001_v60 = vpop.f32.mrb[205].mxu1 }
 0x8d8   :  { %13237 = vst [vmem:[#allocation7 + $0x368] sm:$0xff] %v12229_v45  ;;  %v12231_v38 = vpop.f32.mrb[206].mxu0  ;;  %13239 = vst [vmem:[#allocation7 + $0x378] sm:$0xff] %v13001_v60  ;;  %v13003_v1 = vpop.f32.mrb[206].mxu1 }
 0x8d9   :  { %13252 = vst [vmem:[#allocation7 + $0x3e0] sm:$0xff] %v12231_v38  ;;  %v12233_v0 = vpop.f32.mrb[207].mxu0  ;;  %13254 = vst [vmem:[#allocation7 + $0x3f0] sm:$0xff] %v13003_v1  ;;  %v13005_v32 = vpop.f32.mrb[207].mxu1 }
 0x8da   :  { %13253 = vst [vmem:[#allocation7 + $0x3e8] sm:$0xff] %v12233_v0  ;;  %13255 = vst [vmem:[#allocation7 + $0x3f8] sm:$0xff] %v13005_v32 }
 0x8de   :  { %v12237_v44 = vpop.f32.mrb[208].mxu0  ;;  %v13009_v26 = vpop.f32.mrb[208].mxu1 }
 0x8df   :  { %13268 = vst [vmem:[#allocation7 + $0x460] sm:$0xff] %v12237_v44  ;;  %v12239_v37 = vpop.f32.mrb[209].mxu0  ;;  %13270 = vst [vmem:[#allocation7 + $0x470] sm:$0xff] %v13009_v26  ;;  %v13011_v10 = vpop.f32.mrb[209].mxu1 }
 0x8e0   :  { %13269 = vst [vmem:[#allocation7 + $0x468] sm:$0xff] %v12239_v37  ;;  %v12241_v48 = vpop.f32.mrb[210].mxu0  ;;  %13271 = vst [vmem:[#allocation7 + $0x478] sm:$0xff] %v13011_v10  ;;  %v13013_v36 = vpop.f32.mrb[210].mxu1 }
 0x8e1   :  { %13284 = vst [vmem:[#allocation7 + $0x4e0] sm:$0xff] %v12241_v48  ;;  %v12243_v57 = vpop.f32.mrb[211].mxu0  ;;  %13286 = vst [vmem:[#allocation7 + $0x4f0] sm:$0xff] %v13013_v36  ;;  %v13015_v61 = vpop.f32.mrb[211].mxu1 }
 0x8e2   :  { %13285 = vst [vmem:[#allocation7 + $0x4e8] sm:$0xff] %v12243_v57  ;;  %13287 = vst [vmem:[#allocation7 + $0x4f8] sm:$0xff] %v13015_v61 }
 0x8e6   :  { %v12247_v2 = vpop.f32.mrb[212].mxu0  ;;  %v13019_v18 = vpop.f32.mrb[212].mxu1 }
 0x8e7   :  { %13300 = vst [vmem:[#allocation7 + $0x560] sm:$0xff] %v12247_v2  ;;  %v12249_v20 = vpop.f32.mrb[213].mxu0  ;;  %13302 = vst [vmem:[#allocation7 + $0x570] sm:$0xff] %v13019_v18  ;;  %v13021_v25 = vpop.f32.mrb[213].mxu1 }
 0x8e8   :  { %13301 = vst [vmem:[#allocation7 + $0x568] sm:$0xff] %v12249_v20  ;;  %v12251_v13 = vpop.f32.mrb[214].mxu0  ;;  %13303 = vst [vmem:[#allocation7 + $0x578] sm:$0xff] %v13021_v25  ;;  %v13023_v53 = vpop.f32.mrb[214].mxu1 }
 0x8e9   :  { %13316 = vst [vmem:[#allocation7 + $0x5e0] sm:$0xff] %v12251_v13  ;;  %v12253_v14 = vpop.f32.mrb[215].mxu0  ;;  %13318 = vst [vmem:[#allocation7 + $0x5f0] sm:$0xff] %v13023_v53  ;;  %v13025_v33 = vpop.f32.mrb[215].mxu1 }
 0x8ea   :  { %13317 = vst [vmem:[#allocation7 + $0x5e8] sm:$0xff] %v12253_v14  ;;  %13319 = vst [vmem:[#allocation7 + $0x5f8] sm:$0xff] %v13025_v33 }
 0x8ee   :  { %v12257_v34 = vpop.f32.mrb[216].mxu0  ;;  %v13029_v12 = vpop.f32.mrb[216].mxu1 }
 0x8ef   :  { %13332 = vst [vmem:[#allocation7 + $0x660] sm:$0xff] %v12257_v34  ;;  %v12259_v28 = vpop.f32.mrb[217].mxu0  ;;  %13334 = vst [vmem:[#allocation7 + $0x670] sm:$0xff] %v13029_v12  ;;  %v13031_v29 = vpop.f32.mrb[217].mxu1 }
 0x8f0   :  { %13333 = vst [vmem:[#allocation7 + $0x668] sm:$0xff] %v12259_v28  ;;  %v12261_v41 = vpop.f32.mrb[218].mxu0  ;;  %13335 = vst [vmem:[#allocation7 + $0x678] sm:$0xff] %v13031_v29  ;;  %v13033_v62 = vpop.f32.mrb[218].mxu1 }
 0x8f1   :  { %13348 = vst [vmem:[#allocation7 + $0x6e0] sm:$0xff] %v12261_v41  ;;  %v12263_v42 = vpop.f32.mrb[219].mxu0  ;;  %13350 = vst [vmem:[#allocation7 + $0x6f0] sm:$0xff] %v13033_v62  ;;  %v13035_v63 = vpop.f32.mrb[219].mxu1 }
 0x8f2   :  { %13349 = vst [vmem:[#allocation7 + $0x6e8] sm:$0xff] %v12263_v42  ;;  %13351 = vst [vmem:[#allocation7 + $0x6f8] sm:$0xff] %v13035_v63 }
 0x8f6   :  { %v12267_v11 = vpop.f32.mrb[220].mxu0  ;;  %v13039_v50 = vpop.f32.mrb[220].mxu1 }
 0x8f7   :  { %13364 = vst [vmem:[#allocation7 + $0x760] sm:$0xff] %v12267_v11  ;;  %v12269_v24 = vpop.f32.mrb[221].mxu0  ;;  %13366 = vst [vmem:[#allocation7 + $0x770] sm:$0xff] %v13039_v50  ;;  %v13041_v19 = vpop.f32.mrb[221].mxu1 }
 0x8f8   :  { %13365 = vst [vmem:[#allocation7 + $0x768] sm:$0xff] %v12269_v24  ;;  %v12271_v31 = vpop.f32.mrb[222].mxu0  ;;  %13367 = vst [vmem:[#allocation7 + $0x778] sm:$0xff] %v13041_v19  ;;  %v13043_v56 = vpop.f32.mrb[222].mxu1 }
 0x8f9   :  { %13380 = vst [vmem:[#allocation7 + $0x7e0] sm:$0xff] %v12271_v31  ;;  %v12273_v7 = vpop.f32.mrb[223].mxu0  ;;  %13382 = vst [vmem:[#allocation7 + $0x7f0] sm:$0xff] %v13043_v56  ;;  %v13045_v58 = vpop.f32.mrb[223].mxu1 }
 0x8fa   :  { %13381 = vst [vmem:[#allocation7 + $0x7e8] sm:$0xff] %v12273_v7  ;;  %13383 = vst [vmem:[#allocation7 + $0x7f8] sm:$0xff] %v13045_v58 }
 0x8fe   :  { %v12277_v35 = vpop.f32.mrb[224].mxu0  ;;  %v13049_v43 = vpop.f32.mrb[224].mxu1 }
 0x8ff   :  { %13396 = vst [vmem:[#allocation7 + $0x860] sm:$0xff] %v12277_v35  ;;  %v12279_v15 = vpop.f32.mrb[225].mxu0  ;;  %13398 = vst [vmem:[#allocation7 + $0x870] sm:$0xff] %v13049_v43  ;;  %v13051_v17 = vpop.f32.mrb[225].mxu1 }
 0x900   :  { %13397 = vst [vmem:[#allocation7 + $0x868] sm:$0xff] %v12279_v15  ;;  %v12281_v22 = vpop.f32.mrb[226].mxu0  ;;  %13399 = vst [vmem:[#allocation7 + $0x878] sm:$0xff] %v13051_v17  ;;  %v13053_v9 = vpop.f32.mrb[226].mxu1 }
 0x901   :  { %13412 = vst [vmem:[#allocation7 + $0x8e0] sm:$0xff] %v12281_v22  ;;  %v12283_v46 = vpop.f32.mrb[227].mxu0  ;;  %13414 = vst [vmem:[#allocation7 + $0x8f0] sm:$0xff] %v13053_v9  ;;  %v13055_v47 = vpop.f32.mrb[227].mxu1 }
 0x902   :  { %13413 = vst [vmem:[#allocation7 + $0x8e8] sm:$0xff] %v12283_v46  ;;  %13415 = vst [vmem:[#allocation7 + $0x8f8] sm:$0xff] %v13055_v47 }
 0x906   :  { %v12287_v59 = vpop.f32.mrb[228].mxu0  ;;  %v13059_v39 = vpop.f32.mrb[228].mxu1 }
 0x907   :  { %13428 = vst [vmem:[#allocation7 + $0x960] sm:$0xff] %v12287_v59  ;;  %v12289_v8 = vpop.f32.mrb[229].mxu0  ;;  %13430 = vst [vmem:[#allocation7 + $0x970] sm:$0xff] %v13059_v39  ;;  %v13061_v27 = vpop.f32.mrb[229].mxu1 }
 0x908   :  { %13429 = vst [vmem:[#allocation7 + $0x968] sm:$0xff] %v12289_v8  ;;  %v12291_v55 = vpop.f32.mrb[230].mxu0  ;;  %13431 = vst [vmem:[#allocation7 + $0x978] sm:$0xff] %v13061_v27  ;;  %v13063_v30 = vpop.f32.mrb[230].mxu1 }
 0x909   :  { %13444 = vst [vmem:[#allocation7 + $0x9e0] sm:$0xff] %v12291_v55  ;;  %v12293_v54 = vpop.f32.mrb[231].mxu0  ;;  %13446 = vst [vmem:[#allocation7 + $0x9f0] sm:$0xff] %v13063_v30  ;;  %v13065_v4 = vpop.f32.mrb[231].mxu1 }
 0x90a   :  { %13445 = vst [vmem:[#allocation7 + $0x9e8] sm:$0xff] %v12293_v54  ;;  %13447 = vst [vmem:[#allocation7 + $0x9f8] sm:$0xff] %v13065_v4 }
 0x90e   :  { %v12297_v21 = vpop.f32.mrb[232].mxu0  ;;  %v13069_v40 = vpop.f32.mrb[232].mxu1 }
 0x90f   :  { %13460 = vst [vmem:[#allocation7 + $0xa60] sm:$0xff] %v12297_v21  ;;  %v12299_v23 = vpop.f32.mrb[233].mxu0  ;;  %13462 = vst [vmem:[#allocation7 + $0xa70] sm:$0xff] %v13069_v40  ;;  %v13071_v5 = vpop.f32.mrb[233].mxu1 }
 0x910   :  { %13461 = vst [vmem:[#allocation7 + $0xa68] sm:$0xff] %v12299_v23  ;;  %v12301_v16 = vpop.f32.mrb[234].mxu0  ;;  %13463 = vst [vmem:[#allocation7 + $0xa78] sm:$0xff] %v13071_v5  ;;  %v13073_v6 = vpop.f32.mrb[234].mxu1 }
 0x911   :  { %13476 = vst [vmem:[#allocation7 + $0xae0] sm:$0xff] %v12301_v16  ;;  %v12303_v49 = vpop.f32.mrb[235].mxu0  ;;  %13478 = vst [vmem:[#allocation7 + $0xaf0] sm:$0xff] %v13073_v6  ;;  %v13075_v51 = vpop.f32.mrb[235].mxu1 }
 0x912   :  { %13477 = vst [vmem:[#allocation7 + $0xae8] sm:$0xff] %v12303_v49  ;;  %13479 = vst [vmem:[#allocation7 + $0xaf8] sm:$0xff] %v13075_v51 }
 0x916   :  { %v12307_v52 = vpop.f32.mrb[236].mxu0  ;;  %v13079_v3 = vpop.f32.mrb[236].mxu1 }
 0x917   :  { %13492 = vst [vmem:[#allocation7 + $0xb60] sm:$0xff] %v12307_v52  ;;  %v12309_v45 = vpop.f32.mrb[237].mxu0  ;;  %13494 = vst [vmem:[#allocation7 + $0xb70] sm:$0xff] %v13079_v3  ;;  %v13081_v60 = vpop.f32.mrb[237].mxu1 }
 0x918   :  { %13493 = vst [vmem:[#allocation7 + $0xb68] sm:$0xff] %v12309_v45  ;;  %v12311_v38 = vpop.f32.mrb[238].mxu0  ;;  %13495 = vst [vmem:[#allocation7 + $0xb78] sm:$0xff] %v13081_v60  ;;  %v13083_v1 = vpop.f32.mrb[238].mxu1 }
 0x919   :  { %13508 = vst [vmem:[#allocation7 + $0xbe0] sm:$0xff] %v12311_v38  ;;  %v12313_v0 = vpop.f32.mrb[239].mxu0  ;;  %13510 = vst [vmem:[#allocation7 + $0xbf0] sm:$0xff] %v13083_v1  ;;  %v13085_v32 = vpop.f32.mrb[239].mxu1 }
 0x91a   :  { %13509 = vst [vmem:[#allocation7 + $0xbe8] sm:$0xff] %v12313_v0  ;;  %13511 = vst [vmem:[#allocation7 + $0xbf8] sm:$0xff] %v13085_v32 }
 0x91e   :  { %v12317_v44 = vpop.f32.mrb[240].mxu0  ;;  %v13089_v26 = vpop.f32.mrb[240].mxu1 }
 0x91f   :  { %13524 = vst [vmem:[#allocation7 + $0xc60] sm:$0xff] %v12317_v44  ;;  %v12319_v37 = vpop.f32.mrb[241].mxu0  ;;  %13526 = vst [vmem:[#allocation7 + $0xc70] sm:$0xff] %v13089_v26  ;;  %v13091_v10 = vpop.f32.mrb[241].mxu1 }
 0x920   :  { %13525 = vst [vmem:[#allocation7 + $0xc68] sm:$0xff] %v12319_v37  ;;  %v12321_v48 = vpop.f32.mrb[242].mxu0  ;;  %13527 = vst [vmem:[#allocation7 + $0xc78] sm:$0xff] %v13091_v10  ;;  %v13093_v36 = vpop.f32.mrb[242].mxu1 }
 0x921   :  { %13540 = vst [vmem:[#allocation7 + $0xce0] sm:$0xff] %v12321_v48  ;;  %v12323_v57 = vpop.f32.mrb[243].mxu0  ;;  %13542 = vst [vmem:[#allocation7 + $0xcf0] sm:$0xff] %v13093_v36  ;;  %v13095_v61 = vpop.f32.mrb[243].mxu1 }
 0x922   :  { %13541 = vst [vmem:[#allocation7 + $0xce8] sm:$0xff] %v12323_v57  ;;  %13543 = vst [vmem:[#allocation7 + $0xcf8] sm:$0xff] %v13095_v61 }
 0x926   :  { %v12327_v2 = vpop.f32.mrb[244].mxu0  ;;  %v13099_v18 = vpop.f32.mrb[244].mxu1 }
 0x927   :  { %13556 = vst [vmem:[#allocation7 + $0xd60] sm:$0xff] %v12327_v2  ;;  %v12329_v20 = vpop.f32.mrb[245].mxu0  ;;  %13558 = vst [vmem:[#allocation7 + $0xd70] sm:$0xff] %v13099_v18  ;;  %v13101_v25 = vpop.f32.mrb[245].mxu1 }
 0x928   :  { %13557 = vst [vmem:[#allocation7 + $0xd68] sm:$0xff] %v12329_v20  ;;  %v12331_v13 = vpop.f32.mrb[246].mxu0  ;;  %13559 = vst [vmem:[#allocation7 + $0xd78] sm:$0xff] %v13101_v25  ;;  %v13103_v53 = vpop.f32.mrb[246].mxu1 }
 0x929   :  { %13572 = vst [vmem:[#allocation7 + $0xde0] sm:$0xff] %v12331_v13  ;;  %v12333_v14 = vpop.f32.mrb[247].mxu0  ;;  %13574 = vst [vmem:[#allocation7 + $0xdf0] sm:$0xff] %v13103_v53  ;;  %v13105_v33 = vpop.f32.mrb[247].mxu1 }
 0x92a   :  { %13573 = vst [vmem:[#allocation7 + $0xde8] sm:$0xff] %v12333_v14  ;;  %13575 = vst [vmem:[#allocation7 + $0xdf8] sm:$0xff] %v13105_v33 }
 0x92e   :  { %v12337_v34 = vpop.f32.mrb[248].mxu0  ;;  %v13109_v12 = vpop.f32.mrb[248].mxu1 }
 0x92f   :  { %13588 = vst [vmem:[#allocation7 + $0xe60] sm:$0xff] %v12337_v34  ;;  %v12339_v28 = vpop.f32.mrb[249].mxu0  ;;  %13590 = vst [vmem:[#allocation7 + $0xe70] sm:$0xff] %v13109_v12  ;;  %v13111_v29 = vpop.f32.mrb[249].mxu1 }
 0x930   :  { %13589 = vst [vmem:[#allocation7 + $0xe68] sm:$0xff] %v12339_v28  ;;  %v12341_v41 = vpop.f32.mrb[250].mxu0  ;;  %13591 = vst [vmem:[#allocation7 + $0xe78] sm:$0xff] %v13111_v29  ;;  %v13113_v62 = vpop.f32.mrb[250].mxu1 }
 0x931   :  { %13604 = vst [vmem:[#allocation7 + $0xee0] sm:$0xff] %v12341_v41  ;;  %v12343_v42 = vpop.f32.mrb[251].mxu0  ;;  %13606 = vst [vmem:[#allocation7 + $0xef0] sm:$0xff] %v13113_v62  ;;  %v13115_v63 = vpop.f32.mrb[251].mxu1 }
 0x932   :  { %13605 = vst [vmem:[#allocation7 + $0xee8] sm:$0xff] %v12343_v42  ;;  %13607 = vst [vmem:[#allocation7 + $0xef8] sm:$0xff] %v13115_v63 }
 0x936   :  { %v12347_v11 = vpop.f32.mrb[252].mxu0  ;;  %v13119_v50 = vpop.f32.mrb[252].mxu1 }
 0x937   :  { %13620 = vst [vmem:[#allocation7 + $0xf60] sm:$0xff] %v12347_v11  ;;  %v12349_v24 = vpop.f32.mrb[253].mxu0  ;;  %13622 = vst [vmem:[#allocation7 + $0xf70] sm:$0xff] %v13119_v50  ;;  %v13121_v19 = vpop.f32.mrb[253].mxu1 }
 0x938   :  { %13621 = vst [vmem:[#allocation7 + $0xf68] sm:$0xff] %v12349_v24  ;;  %v12351_v31 = vpop.f32.mrb[254].mxu0  ;;  %13623 = vst [vmem:[#allocation7 + $0xf78] sm:$0xff] %v13121_v19  ;;  %v13123_v56 = vpop.f32.mrb[254].mxu1 }
 0x939   :  { %13636 = vst [vmem:[#allocation7 + $0xfe0] sm:$0xff] %v12351_v31  ;;  %v12353_v7 = vpop.f32.mrb[255].mxu0  ;;  %13638 = vst [vmem:[#allocation7 + $0xff0] sm:$0xff] %v13123_v56  ;;  %v13125_v58 = vpop.f32.mrb[255].mxu1 }
 0x93a   :  { %13637 = vst [vmem:[#allocation7 + $0xfe8] sm:$0xff] %v12353_v7  ;;  %13639 = vst [vmem:[#allocation7 + $0xff8] sm:$0xff] %v13125_v58 }
 0x93b   :  { %16410 = shalt.err (!%p16407_p6)
}
 0x93c   :  { %s16411_s12 = scalar_lea.hbm %s18085_s2, 65536 }
 0x93d   :  { %p16412_p7 = scmp.ne.s32.totalorder %s18085_s2, %s16411_s12  ;;  %p16415_p8 = scmp.lt.u32.totalorder %s16411_s12, %s18085_s2 }
 0x93f   :  { %p16417_p9 = pnand %p16415_p8, %p16412_p7 }
 0x941   :  { %16420 = shalt.err (!%p16417_p9)
}
 0x942   :  { %s16434_s17 = smov 2048   ;;  %s16435_s18 = smov 128  }
 0x943   :  { %13651 = dma.vmem_to_hbm [thread:$0]  %s13646_s8, 65536, %s18085_s2, [#allocation4], %s16434_s17, %s16434_s17, %s16435_s18  }
 0x944   :  { %16425 = dma.done.wait [#allocation4], 65536  }
 0x945   :  { %16426 = vsyncadd [#allocation4], 4294901760 }
 0x946   :  { %13655 = vsyncpa [#allocation3], 1 }
 0x947   :  { %13656 = vsyncpa [#allocation6], 1 }
 0x948   :  { %13657 = vsyncpa [#allocation4], 1 }

</bundles_post_ra>
